<compile_context>
chip_gen: v6e
topology: v6e:2x2x1
jax: 0.10.0
libtpu: 0.0.40
codegen_flags: <defaults>
</compile_context>

<pallas_src>
import numpy as np

import jax
import jax.numpy as jnp
from jax import lax
from jax.experimental import pallas as pl
from jax.experimental.pallas import tpu as pltpu


# ---------------------------------------------------------------------------
# Static geometry (fixed by the module: fc1 expects 9216 = 64*12*12 features,
# i.e. 28x28 single-channel images).
# ---------------------------------------------------------------------------
IMG = 28
C1, C2 = 32, 64
OH1 = IMG - 2                      # 26 (conv1 output side)
OH2 = OH1 - 2                      # 24 (conv2 output side)
POOL = OH2 // 2                    # 12 (pooled side)
FLAT = C2 * POOL * POOL            # 9216

# Flattened-spatial lengths; everything keeps the image's row stride (28), so a
# 3x3 tap (kh, kw) is a static lane offset kh*28 + kw.
TAP_OFFS = tuple(kh * IMG + kw for kh in range(3) for kw in range(3))  # 0..58
POOL_LEN = OH2 * IMG               # 672: columns fed to the 4-way pooling max
A2_LEN = POOL_LEN + 32             # 704: conv2 columns computed (need 672+29)
A1_LEN = 768                       # conv1 columns computed (need 704+58=762)
X_LEN = 832                        # padded flat image length (need 768+58=826)


# ---------------------------------------------------------------------------
# Kernel 1: conv1 + ReLU + conv2 + ReLU + 2x2 max-pool (+ implicit flatten)
# ---------------------------------------------------------------------------
def _conv_pool_kernel(x_ref, w1_ref, b1_ref, w2_ref, b2_ref, sel_ref, o_ref):
    # x_ref:   (1, 1, X_LEN)     f32   zero-padded row-major 28x28 image
    # w1_ref:  (C1, 9)           f32   conv1 weights, columns ordered (kh, kw)
    # b1_ref:  (C1, 1)           f32
    # w2_ref:  (C2, 9*C1)        bf16  conv2 weights, columns ordered (kh, kw, ci)
    # b2_ref:  (C2, 1)           f32
    # sel_ref: (POOL_LEN, 144)   bf16  0/1 matrix gathering valid pooled columns
    # o_ref:   (1, C2, 144)      bf16  pooled activations, index (c, 12*i + j)
    x = x_ref[0]                                                   # (1, X_LEN) f32

    # conv1 (C_in = 1): 9 shifted FMAs on the VPU -- no im2col.
    a1 = w1_ref[:, 0:1] * x[:, TAP_OFFS[0]:TAP_OFFS[0] + A1_LEN]   # (C1, A1_LEN)
    for t in range(1, 9):
        off = TAP_OFFS[t]
        a1 = a1 + w1_ref[:, t:t + 1] * x[:, off:off + A1_LEN]
    a1 = jnp.maximum(a1 + b1_ref[...], 0.0).astype(jnp.bfloat16)

    # conv2: build (kh, kw, ci)-stacked shifted slices of a1 in VMEM and do ONE
    # bf16 MXU matmul (K = 288).
    p2 = jnp.concatenate([a1[:, off:off + A2_LEN] for off in TAP_OFFS], axis=0)
    a2 = jnp.dot(w2_ref[...], p2, preferred_element_type=jnp.float32)   # (C2, A2_LEN) f32
    a2 = jnp.maximum(a2 + b2_ref[...], 0.0)

    # 2x2 stride-2 max pool: window columns are {q, q+1, q+28, q+29}.
    m = jnp.maximum(
        jnp.maximum(a2[:, 0:POOL_LEN], a2[:, 1:POOL_LEN + 1]),
        jnp.maximum(a2[:, IMG:POOL_LEN + IMG], a2[:, IMG + 1:POOL_LEN + IMG + 1]),
    )                                                              # (C2, 672) f32

    # Gather the 144 valid pooled columns (q = 56*i + 2*j) with a 0/1 selection
    # matmul (keeps everything as plain MXU ops; avoids strided lane slicing).
    pooled = jnp.dot(m.astype(jnp.bfloat16), sel_ref[...],
                     preferred_element_type=jnp.float32)           # (C2, 144) f32
    o_ref[0] = pooled.astype(jnp.bfloat16)


def conv_pool_block(x_flat, prep):
    B = x_flat.shape[0]
    return pl.pallas_call(
        _conv_pool_kernel,
        out_shape=jax.ShapeDtypeStruct((B, C2, POOL * POOL), jnp.bfloat16),
        grid=(B,),
        in_specs=[
            pl.BlockSpec((1, 1, X_LEN), lambda i: (i, 0, 0)),
            pl.BlockSpec((C1, 9), lambda i: (0, 0)),
            pl.BlockSpec((C1, 1), lambda i: (0, 0)),
            pl.BlockSpec((C2, 9 * C1), lambda i: (0, 0)),
            pl.BlockSpec((C2, 1), lambda i: (0, 0)),
            pl.BlockSpec((POOL_LEN, POOL * POOL), lambda i: (0, 0)),
        ],
        out_specs=pl.BlockSpec((1, C2, POOL * POOL), lambda i: (i, 0, 0)),
        compiler_params=pltpu.CompilerParams(dimension_semantics=("parallel",)),
    )(x_flat, prep["w1"], prep["b1"], prep["w2"], prep["b2"], prep["sel"])


# ---------------------------------------------------------------------------
# Kernel 2: fc1 + ReLU + fc2, fused, M = batch rows
# ---------------------------------------------------------------------------
def _fc_kernel(x_ref, w1_ref, b1_ref, w2_ref, b2_ref, o_ref):
    # x_ref: (bb, 9216) bf16; w1_ref: (9216, 128) bf16; b1_ref: (1, 128) f32
    # w2_ref: (128, 10) bf16;  b2_ref: (1, 10) f32;     o_ref: (bb, 10) f32
    h = jnp.dot(x_ref[...], w1_ref[...], preferred_element_type=jnp.float32)
    h = jnp.maximum(h + b1_ref[...], 0.0).astype(jnp.bfloat16)
    out = jnp.dot(h, w2_ref[...], preferred_element_type=jnp.float32)
    o_ref[...] = out + b2_ref[...]


def fc_block(feat, prep):
    B = feat.shape[0]
    # Keep M = whole batch per step when possible so the 9216x128 weight streams
    # through the MXU only once; tile only for large batches.
    if B <= 128:
        bb = B
    elif B % 128 == 0:
        bb = 128
    else:
        bb = B  # TODO(synk): ragged batch blocking not implemented; single block.
    return pl.pallas_call(
        _fc_kernel,
        out_shape=jax.ShapeDtypeStruct((B, 10), jnp.float32),
        grid=(B // bb,),
        in_specs=[
            pl.BlockSpec((bb, FLAT), lambda i: (i, 0)),
            pl.BlockSpec((FLAT, 128), lambda i: (0, 0)),
            pl.BlockSpec((1, 128), lambda i: (0, 0)),
            pl.BlockSpec((128, 10), lambda i: (0, 0)),
            pl.BlockSpec((1, 10), lambda i: (0, 0)),
        ],
        out_specs=pl.BlockSpec((bb, 10), lambda i: (i, 0)),
        compiler_params=pltpu.CompilerParams(dimension_semantics=("parallel",)),
    )(feat, prep["fc1w"], prep["fc1b"], prep["fc2w"], prep["fc2b"])


# ---------------------------------------------------------------------------
# Forward pass + parameter prep (PyTorch layouts -> kernel layouts, done once)
# ---------------------------------------------------------------------------
def cnn_net_forward(x_nchw, prep):
    B = x_nchw.shape[0]
    # Flatten the 28x28 image row-major and zero-pad so all 3x3 tap offsets are
    # in-bounds static lane slices inside the kernel.
    xf = x_nchw.reshape(B, 1, IMG * IMG)
    xf = jnp.pad(xf, ((0, 0), (0, 0), (0, X_LEN - IMG * IMG)))

    feat = conv_pool_block(xf, prep)          # [B, 64, 144] bf16
    # Row-major flatten == PyTorch's NCHW flatten order (c, h, w): no transpose
    # and no fc1 row permutation required.
    feat = feat.reshape(B, FLAT)

    # dropout1 / dropout2: identity (eval semantics).
    # TODO(synk): training-mode dropout RNG masking not implemented.
    return fc_block(feat, prep)


def _pool_selection_matrix():
    sel = np.zeros((POOL_LEN, POOL * POOL), np.float32)
    for i in range(POOL):
        for j in range(POOL):
            sel[2 * i * IMG + 2 * j, i * POOL + j] = 1.0
    return jnp.asarray(sel, dtype=jnp.bfloat16)


def prepare_params(p):
    """One-time (outside jit) repack of PyTorch-layout params into kernel layouts."""
    return {
        "w1": p["conv1_w"].reshape(C1, 9).astype(jnp.float32),      # (co, kh*3+kw)
        "b1": p["conv1_b"].reshape(C1, 1).astype(jnp.float32),
        # conv2 weight columns ordered (kh, kw, ci) to match the in-kernel concat
        # order of the shifted conv1 activations.
        "w2": jnp.transpose(p["conv2_w"], (0, 2, 3, 1)).reshape(C2, 9 * C1).astype(jnp.bfloat16),
        "b2": p["conv2_b"].reshape(C2, 1).astype(jnp.float32),
        "sel": _pool_selection_matrix(),
        "fc1w": p["fc1_w"].T.astype(jnp.bfloat16),                  # (9216, 128)
        "fc1b": p["fc1_b"].reshape(1, 128).astype(jnp.float32),
        "fc2w": p["fc2_w"].T.astype(jnp.bfloat16),                  # (128, 10)
        "fc2b": p["fc2_b"].reshape(1, 10).astype(jnp.float32),
    }


def init_params(key):
    """Deterministic PyTorch-shaped parameters (uniform(-1/sqrt(fan_in), +))."""
    ks = jax.random.split(key, 8)

    def u(k, shape, fan_in):
        bound = 1.0 / jnp.sqrt(jnp.float32(fan_in))
        return jax.random.uniform(k, shape, jnp.float32, -bound, bound)

    return {
        "conv1_w": u(ks[0], (32, 1, 3, 3), 1 * 3 * 3),
        "conv1_b": u(ks[1], (32,), 1 * 3 * 3),
        "conv2_w": u(ks[2], (64, 32, 3, 3), 32 * 3 * 3),
        "conv2_b": u(ks[3], (64,), 32 * 3 * 3),
        "fc1_w": u(ks[4], (128, 9216), 9216),
        "fc1_b": u(ks[5], (128,), 9216),
        "fc2_w": u(ks[6], (10, 128), 128),
        "fc2_b": u(ks[7], (10,), 128),
    }


def reference_forward(x, p):
    """Pure-JAX f32 reference mirroring the PyTorch forward (eval mode)."""
    dn = ("NCHW", "OIHW", "NCHW")
    y = lax.conv_general_dilated(x, p["conv1_w"], (1, 1), "VALID", dimension_numbers=dn)
    y = jax.nn.relu(y + p["conv1_b"][None, :, None, None])
    y = lax.conv_general_dilated(y, p["conv2_w"], (1, 1), "VALID", dimension_numbers=dn)
    y = jax.nn.relu(y + p["conv2_b"][None, :, None, None])
    y = lax.reduce_window(y, -jnp.inf, lax.max, (1, 1, 2, 2), (1, 1, 2, 2), "VALID")
    y = y.reshape(y.shape[0], -1)
    y = jax.nn.relu(y @ p["fc1_w"].T + p["fc1_b"])
    return y @ p["fc2_w"].T + p["fc2_b"]


if __name__ == "__main__":
    key = jax.random.PRNGKey(0)
    pkey, xkey = jax.random.split(key)
    params = init_params(pkey)
    prep = prepare_params(params)

    # fc1's 9216 input dim fixes the spatial size: 28x28 single-channel images.
    x = jax.random.normal(xkey, (2, 1, IMG, IMG), dtype=jnp.float32)

    fwd = jax.jit(cnn_net_forward)
    out = jax.block_until_ready(fwd(x, prep))
    assert out.shape == (2, 10) and out.dtype == jnp.float32

    ref = reference_forward(x, params)
    # bf16 matmul operands (f32 accumulation) vs an all-f32 reference: observed
    # logit error is ~1e-3 on logits of magnitude ~0.1, so 2e-2 is a safe check
    # that still catches any layout/indexing bug.
    if not bool(jnp.allclose(out, ref, atol=2e-2, rtol=2e-2)):
        raise AssertionError("Pallas output mismatch vs JAX reference")

    print("KERNEL_OK")
</pallas_src>

<mosaic_0001>
module attributes {stable_mosaic.version = 11 : i64} {
  func.func @_conv_pool_kernel(%arg0: i32, %arg1: memref<1x1x832xf32, #tpu.memory_space<vmem>>, %arg2: memref<32x9xf32, #tpu.memory_space<vmem>>, %arg3: memref<32x1xf32, #tpu.memory_space<vmem>>, %arg4: memref<64x288xbf16, #tpu.memory_space<vmem>>, %arg5: memref<64x1xf32, #tpu.memory_space<vmem>>, %arg6: memref<672x144xbf16, #tpu.memory_space<vmem>>, %arg7: memref<1x64x144xbf16, #tpu.memory_space<vmem>>) attributes {dimension_semantics = [#tpu.dimension_semantics<parallel>], iteration_bounds = array<i64: 2>, scalar_prefetch = 0 : i64, scratch_operands = 0 : i64, tpu.core_type = #tpu.core_type<tc>, window_params = [{transform_indices = @transform_0, window_bounds = array<i64: 1, 1, 832>}, {pipeline_mode = #tpu.pipeline_mode<synchronous>, transform_indices = @transform_1, window_bounds = array<i64: 32, 9>}, {pipeline_mode = #tpu.pipeline_mode<synchronous>, transform_indices = @transform_2, window_bounds = array<i64: 32, 1>}, {pipeline_mode = #tpu.pipeline_mode<synchronous>, transform_indices = @transform_3, window_bounds = array<i64: 64, 288>}, {pipeline_mode = #tpu.pipeline_mode<synchronous>, transform_indices = @transform_4, window_bounds = array<i64: 64, 1>}, {pipeline_mode = #tpu.pipeline_mode<synchronous>, transform_indices = @transform_5, window_bounds = array<i64: 672, 144>}, {transform_indices = @transform_6, window_bounds = array<i64: 1, 64, 144>}]} {
    %c0 = arith.constant 0 : index
    %c0_0 = arith.constant 0 : index
    %c0_1 = arith.constant 0 : index
    %0 = vector.load %arg1[%c0, %c0_0, %c0_1] : memref<1x1x832xf32, #tpu.memory_space<vmem>>, vector<1x1x832xf32>
    %1 = vector.shape_cast %0 : vector<1x1x832xf32> to vector<1x832xf32>
    %c0_2 = arith.constant 0 : index
    %c0_3 = arith.constant 0 : index
    %2 = vector.load %arg2[%c0_2, %c0_3] : memref<32x9xf32, #tpu.memory_space<vmem>>, vector<32x1xf32>
    %3 = vector.extract_strided_slice %1 {offsets = [0, 0], sizes = [1, 768], strides = [1, 1]} : vector<1x832xf32> to vector<1x768xf32>
    %4 = vector.broadcast %2 : vector<32x1xf32> to vector<32x768xf32>
    %5 = vector.broadcast %3 : vector<1x768xf32> to vector<32x768xf32>
    %6 = arith.mulf %4, %5 : vector<32x768xf32>
    %c0_4 = arith.constant 0 : index
    %c1 = arith.constant 1 : index
    %7 = vector.load %arg2[%c0_4, %c1] : memref<32x9xf32, #tpu.memory_space<vmem>>, vector<32x1xf32>
    %8 = vector.extract_strided_slice %1 {offsets = [0, 1], sizes = [1, 768], strides = [1, 1]} : vector<1x832xf32> to vector<1x768xf32>
    %9 = vector.broadcast %7 : vector<32x1xf32> to vector<32x768xf32>
    %10 = vector.broadcast %8 : vector<1x768xf32> to vector<32x768xf32>
    %11 = arith.mulf %9, %10 : vector<32x768xf32>
    %12 = arith.addf %6, %11 : vector<32x768xf32>
    %c0_5 = arith.constant 0 : index
    %c2 = arith.constant 2 : index
    %13 = vector.load %arg2[%c0_5, %c2] : memref<32x9xf32, #tpu.memory_space<vmem>>, vector<32x1xf32>
    %14 = vector.extract_strided_slice %1 {offsets = [0, 2], sizes = [1, 768], strides = [1, 1]} : vector<1x832xf32> to vector<1x768xf32>
    %15 = vector.broadcast %13 : vector<32x1xf32> to vector<32x768xf32>
    %16 = vector.broadcast %14 : vector<1x768xf32> to vector<32x768xf32>
    %17 = arith.mulf %15, %16 : vector<32x768xf32>
    %18 = arith.addf %12, %17 : vector<32x768xf32>
    %c0_6 = arith.constant 0 : index
    %c3 = arith.constant 3 : index
    %19 = vector.load %arg2[%c0_6, %c3] : memref<32x9xf32, #tpu.memory_space<vmem>>, vector<32x1xf32>
    %20 = vector.extract_strided_slice %1 {offsets = [0, 28], sizes = [1, 768], strides = [1, 1]} : vector<1x832xf32> to vector<1x768xf32>
    %21 = vector.broadcast %19 : vector<32x1xf32> to vector<32x768xf32>
    %22 = vector.broadcast %20 : vector<1x768xf32> to vector<32x768xf32>
    %23 = arith.mulf %21, %22 : vector<32x768xf32>
    %24 = arith.addf %18, %23 : vector<32x768xf32>
    %c0_7 = arith.constant 0 : index
    %c4 = arith.constant 4 : index
    %25 = vector.load %arg2[%c0_7, %c4] : memref<32x9xf32, #tpu.memory_space<vmem>>, vector<32x1xf32>
    %26 = vector.extract_strided_slice %1 {offsets = [0, 29], sizes = [1, 768], strides = [1, 1]} : vector<1x832xf32> to vector<1x768xf32>
    %27 = vector.broadcast %25 : vector<32x1xf32> to vector<32x768xf32>
    %28 = vector.broadcast %26 : vector<1x768xf32> to vector<32x768xf32>
    %29 = arith.mulf %27, %28 : vector<32x768xf32>
    %30 = arith.addf %24, %29 : vector<32x768xf32>
    %c0_8 = arith.constant 0 : index
    %c5 = arith.constant 5 : index
    %31 = vector.load %arg2[%c0_8, %c5] : memref<32x9xf32, #tpu.memory_space<vmem>>, vector<32x1xf32>
    %32 = vector.extract_strided_slice %1 {offsets = [0, 30], sizes = [1, 768], strides = [1, 1]} : vector<1x832xf32> to vector<1x768xf32>
    %33 = vector.broadcast %31 : vector<32x1xf32> to vector<32x768xf32>
    %34 = vector.broadcast %32 : vector<1x768xf32> to vector<32x768xf32>
    %35 = arith.mulf %33, %34 : vector<32x768xf32>
    %36 = arith.addf %30, %35 : vector<32x768xf32>
    %c0_9 = arith.constant 0 : index
    %c6 = arith.constant 6 : index
    %37 = vector.load %arg2[%c0_9, %c6] : memref<32x9xf32, #tpu.memory_space<vmem>>, vector<32x1xf32>
    %38 = vector.extract_strided_slice %1 {offsets = [0, 56], sizes = [1, 768], strides = [1, 1]} : vector<1x832xf32> to vector<1x768xf32>
    %39 = vector.broadcast %37 : vector<32x1xf32> to vector<32x768xf32>
    %40 = vector.broadcast %38 : vector<1x768xf32> to vector<32x768xf32>
    %41 = arith.mulf %39, %40 : vector<32x768xf32>
    %42 = arith.addf %36, %41 : vector<32x768xf32>
    %c0_10 = arith.constant 0 : index
    %c7 = arith.constant 7 : index
    %43 = vector.load %arg2[%c0_10, %c7] : memref<32x9xf32, #tpu.memory_space<vmem>>, vector<32x1xf32>
    %44 = vector.extract_strided_slice %1 {offsets = [0, 57], sizes = [1, 768], strides = [1, 1]} : vector<1x832xf32> to vector<1x768xf32>
    %45 = vector.broadcast %43 : vector<32x1xf32> to vector<32x768xf32>
    %46 = vector.broadcast %44 : vector<1x768xf32> to vector<32x768xf32>
    %47 = arith.mulf %45, %46 : vector<32x768xf32>
    %48 = arith.addf %42, %47 : vector<32x768xf32>
    %c0_11 = arith.constant 0 : index
    %c8 = arith.constant 8 : index
    %49 = vector.load %arg2[%c0_11, %c8] : memref<32x9xf32, #tpu.memory_space<vmem>>, vector<32x1xf32>
    %50 = vector.extract_strided_slice %1 {offsets = [0, 58], sizes = [1, 768], strides = [1, 1]} : vector<1x832xf32> to vector<1x768xf32>
    %51 = vector.broadcast %49 : vector<32x1xf32> to vector<32x768xf32>
    %52 = vector.broadcast %50 : vector<1x768xf32> to vector<32x768xf32>
    %53 = arith.mulf %51, %52 : vector<32x768xf32>
    %54 = arith.addf %48, %53 : vector<32x768xf32>
    %c0_12 = arith.constant 0 : index
    %c0_13 = arith.constant 0 : index
    %55 = vector.load %arg3[%c0_12, %c0_13] : memref<32x1xf32, #tpu.memory_space<vmem>>, vector<32x1xf32>
    %56 = vector.broadcast %55 : vector<32x1xf32> to vector<32x768xf32>
    %57 = arith.addf %54, %56 : vector<32x768xf32>
    %cst = arith.constant 0.000000e+00 : f32
    %58 = vector.broadcast %cst : f32 to vector<32x768xf32>
    %59 = arith.maximumf %57, %58 : vector<32x768xf32>
    %60 = arith.truncf %59 : vector<32x768xf32> to vector<32x768xbf16>
    %61 = vector.extract_strided_slice %60 {offsets = [0, 0], sizes = [32, 704], strides = [1, 1]} : vector<32x768xbf16> to vector<32x704xbf16>
    %62 = vector.extract_strided_slice %60 {offsets = [0, 1], sizes = [32, 704], strides = [1, 1]} : vector<32x768xbf16> to vector<32x704xbf16>
    %63 = vector.extract_strided_slice %60 {offsets = [0, 2], sizes = [32, 704], strides = [1, 1]} : vector<32x768xbf16> to vector<32x704xbf16>
    %64 = vector.extract_strided_slice %60 {offsets = [0, 28], sizes = [32, 704], strides = [1, 1]} : vector<32x768xbf16> to vector<32x704xbf16>
    %65 = vector.extract_strided_slice %60 {offsets = [0, 29], sizes = [32, 704], strides = [1, 1]} : vector<32x768xbf16> to vector<32x704xbf16>
    %66 = vector.extract_strided_slice %60 {offsets = [0, 30], sizes = [32, 704], strides = [1, 1]} : vector<32x768xbf16> to vector<32x704xbf16>
    %67 = vector.extract_strided_slice %60 {offsets = [0, 56], sizes = [32, 704], strides = [1, 1]} : vector<32x768xbf16> to vector<32x704xbf16>
    %68 = vector.extract_strided_slice %60 {offsets = [0, 57], sizes = [32, 704], strides = [1, 1]} : vector<32x768xbf16> to vector<32x704xbf16>
    %69 = vector.extract_strided_slice %60 {offsets = [0, 58], sizes = [32, 704], strides = [1, 1]} : vector<32x768xbf16> to vector<32x704xbf16>
    %70 = tpu.concatenate %61, %62, %63, %64, %65, %66, %67, %68, %69 in 0 : vector<32x704xbf16>, vector<32x704xbf16>, vector<32x704xbf16>, vector<32x704xbf16>, vector<32x704xbf16>, vector<32x704xbf16>, vector<32x704xbf16>, vector<32x704xbf16>, vector<32x704xbf16> -> vector<288x704xbf16>
    %c0_14 = arith.constant 0 : index
    %c0_15 = arith.constant 0 : index
    %71 = vector.load %arg4[%c0_14, %c0_15] : memref<64x288xbf16, #tpu.memory_space<vmem>>, vector<64x288xbf16>
    %cst_16 = arith.constant dense<0.000000e+00> : vector<64x704xf32>
    %72 = tpu.matmul %71, %70, %cst_16 {dimension_numbers = #tpu.dot_dimension_numbers<[1], [0], [0], [1], [0, 0, 1, 1], [], []>} : vector<64x288xbf16>, vector<288x704xbf16>, vector<64x704xf32> -> vector<64x704xf32>
    %c0_17 = arith.constant 0 : index
    %c0_18 = arith.constant 0 : index
    %73 = vector.load %arg5[%c0_17, %c0_18] : memref<64x1xf32, #tpu.memory_space<vmem>>, vector<64x1xf32>
    %74 = vector.broadcast %73 : vector<64x1xf32> to vector<64x704xf32>
    %75 = arith.addf %72, %74 : vector<64x704xf32>
    %cst_19 = arith.constant 0.000000e+00 : f32
    %76 = vector.broadcast %cst_19 : f32 to vector<64x704xf32>
    %77 = arith.maximumf %75, %76 : vector<64x704xf32>
    %78 = vector.extract_strided_slice %77 {offsets = [0, 0], sizes = [64, 672], strides = [1, 1]} : vector<64x704xf32> to vector<64x672xf32>
    %79 = vector.extract_strided_slice %77 {offsets = [0, 1], sizes = [64, 672], strides = [1, 1]} : vector<64x704xf32> to vector<64x672xf32>
    %80 = arith.maximumf %78, %79 : vector<64x672xf32>
    %81 = vector.extract_strided_slice %77 {offsets = [0, 28], sizes = [64, 672], strides = [1, 1]} : vector<64x704xf32> to vector<64x672xf32>
    %82 = vector.extract_strided_slice %77 {offsets = [0, 29], sizes = [64, 672], strides = [1, 1]} : vector<64x704xf32> to vector<64x672xf32>
    %83 = arith.maximumf %81, %82 : vector<64x672xf32>
    %84 = arith.maximumf %80, %83 : vector<64x672xf32>
    %85 = arith.truncf %84 : vector<64x672xf32> to vector<64x672xbf16>
    %c0_20 = arith.constant 0 : index
    %c0_21 = arith.constant 0 : index
    %86 = vector.load %arg6[%c0_20, %c0_21] : memref<672x144xbf16, #tpu.memory_space<vmem>>, vector<672x144xbf16>
    %cst_22 = arith.constant dense<0.000000e+00> : vector<64x144xf32>
    %87 = tpu.matmul %85, %86, %cst_22 {dimension_numbers = #tpu.dot_dimension_numbers<[1], [0], [0], [1], [0, 0, 1, 1], [], []>} : vector<64x672xbf16>, vector<672x144xbf16>, vector<64x144xf32> -> vector<64x144xf32>
    %88 = arith.truncf %87 : vector<64x144xf32> to vector<64x144xbf16>
    %c0_23 = arith.constant 0 : index
    %c0_24 = arith.constant 0 : index
    %c0_25 = arith.constant 0 : index
    %89 = vector.load %arg7[%c0_23, %c0_24, %c0_25] : memref<1x64x144xbf16, #tpu.memory_space<vmem>>, vector<1x64x144xbf16>
    %90 = vector.shape_cast %89 : vector<1x64x144xbf16> to vector<64x144xbf16>
    %91 = vector.shape_cast %88 : vector<64x144xbf16> to vector<1x64x144xbf16>
    tpu.vector_store %arg7[%c0_23, %c0_24, %c0_25], %91 {strides = array<i32>} : memref<1x64x144xbf16, #tpu.memory_space<vmem>>, vector<1x64x144xbf16>,
    return
  }
  func.func @transform_0(%arg0: i32) -> (i32, i32, i32) {
    %c0_i32 = arith.constant 0 : i32
    %c0_i32_0 = arith.constant 0 : i32
    %c0_i32_1 = arith.constant 0 : i32
    return %arg0, %c0_i32, %c0_i32_0 : i32, i32, i32
  }
  func.func @transform_1(%arg0: i32) -> (i32, i32) {
    %c0_i32 = arith.constant 0 : i32
    %c0_i32_0 = arith.constant 0 : i32
    %c0_i32_1 = arith.constant 0 : i32
    return %c0_i32, %c0_i32_0 : i32, i32
  }
  func.func @transform_2(%arg0: i32) -> (i32, i32) {
    %c0_i32 = arith.constant 0 : i32
    %c0_i32_0 = arith.constant 0 : i32
    %c0_i32_1 = arith.constant 0 : i32
    return %c0_i32, %c0_i32_0 : i32, i32
  }
  func.func @transform_3(%arg0: i32) -> (i32, i32) {
    %c0_i32 = arith.constant 0 : i32
    %c0_i32_0 = arith.constant 0 : i32
    %c0_i32_1 = arith.constant 0 : i32
    return %c0_i32, %c0_i32_0 : i32, i32
  }
  func.func @transform_4(%arg0: i32) -> (i32, i32) {
    %c0_i32 = arith.constant 0 : i32
    %c0_i32_0 = arith.constant 0 : i32
    %c0_i32_1 = arith.constant 0 : i32
    return %c0_i32, %c0_i32_0 : i32, i32
  }
  func.func @transform_5(%arg0: i32) -> (i32, i32) {
    %c0_i32 = arith.constant 0 : i32
    %c0_i32_0 = arith.constant 0 : i32
    %c0_i32_1 = arith.constant 0 : i32
    return %c0_i32, %c0_i32_0 : i32, i32
  }
  func.func @transform_6(%arg0: i32) -> (i32, i32, i32) {
    %c0_i32 = arith.constant 0 : i32
    %c0_i32_0 = arith.constant 0 : i32
    %c0_i32_1 = arith.constant 0 : i32
    return %arg0, %c0_i32, %c0_i32_0 : i32, i32, i32
  }
}

module attributes {stable_mosaic.version = 11 : i64} {
  func.func @_fc_kernel(%arg0: i32, %arg1: memref<2x9216xbf16, #tpu.memory_space<vmem>>, %arg2: memref<9216x128xbf16, #tpu.memory_space<vmem>>, %arg3: memref<1x128xf32, #tpu.memory_space<vmem>>, %arg4: memref<128x10xbf16, #tpu.memory_space<vmem>>, %arg5: memref<1x10xf32, #tpu.memory_space<vmem>>, %arg6: memref<2x10xf32, #tpu.memory_space<vmem>>) attributes {dimension_semantics = [#tpu.dimension_semantics<parallel>], iteration_bounds = array<i64: 1>, scalar_prefetch = 0 : i64, scratch_operands = 0 : i64, tpu.core_type = #tpu.core_type<tc>, window_params = [{transform_indices = @transform_0, window_bounds = array<i64: 2, 9216>}, {pipeline_mode = #tpu.pipeline_mode<synchronous>, transform_indices = @transform_1, window_bounds = array<i64: 9216, 128>}, {pipeline_mode = #tpu.pipeline_mode<synchronous>, transform_indices = @transform_2, window_bounds = array<i64: 1, 128>}, {pipeline_mode = #tpu.pipeline_mode<synchronous>, transform_indices = @transform_3, window_bounds = array<i64: 128, 10>}, {pipeline_mode = #tpu.pipeline_mode<synchronous>, transform_indices = @transform_4, window_bounds = array<i64: 1, 10>}, {transform_indices = @transform_5, window_bounds = array<i64: 2, 10>}]} {
    %c0 = arith.constant 0 : index
    %c0_0 = arith.constant 0 : index
    %0 = vector.load %arg1[%c0, %c0_0] : memref<2x9216xbf16, #tpu.memory_space<vmem>>, vector<2x9216xbf16>
    %c0_1 = arith.constant 0 : index
    %c0_2 = arith.constant 0 : index
    %1 = vector.load %arg2[%c0_1, %c0_2] : memref<9216x128xbf16, #tpu.memory_space<vmem>>, vector<9216x128xbf16>
    %cst = arith.constant dense<0.000000e+00> : vector<2x128xf32>
    %2 = tpu.matmul %0, %1, %cst {dimension_numbers = #tpu.dot_dimension_numbers<[1], [0], [0], [1], [0, 0, 1, 1], [], []>} : vector<2x9216xbf16>, vector<9216x128xbf16>, vector<2x128xf32> -> vector<2x128xf32>
    %c0_3 = arith.constant 0 : index
    %c0_4 = arith.constant 0 : index
    %3 = vector.load %arg3[%c0_3, %c0_4] : memref<1x128xf32, #tpu.memory_space<vmem>>, vector<1x128xf32>
    %4 = vector.broadcast %3 : vector<1x128xf32> to vector<2x128xf32>
    %5 = arith.addf %2, %4 : vector<2x128xf32>
    %cst_5 = arith.constant 0.000000e+00 : f32
    %6 = vector.broadcast %cst_5 : f32 to vector<2x128xf32>
    %7 = arith.maximumf %5, %6 : vector<2x128xf32>
    %8 = arith.truncf %7 : vector<2x128xf32> to vector<2x128xbf16>
    %c0_6 = arith.constant 0 : index
    %c0_7 = arith.constant 0 : index
    %9 = vector.load %arg4[%c0_6, %c0_7] : memref<128x10xbf16, #tpu.memory_space<vmem>>, vector<128x10xbf16>
    %cst_8 = arith.constant dense<0.000000e+00> : vector<2x10xf32>
    %10 = tpu.matmul %8, %9, %cst_8 {dimension_numbers = #tpu.dot_dimension_numbers<[1], [0], [0], [1], [0, 0, 1, 1], [], []>} : vector<2x128xbf16>, vector<128x10xbf16>, vector<2x10xf32> -> vector<2x10xf32>
    %c0_9 = arith.constant 0 : index
    %c0_10 = arith.constant 0 : index
    %11 = vector.load %arg5[%c0_9, %c0_10] : memref<1x10xf32, #tpu.memory_space<vmem>>, vector<1x10xf32>
    %12 = vector.broadcast %11 : vector<1x10xf32> to vector<2x10xf32>
    %13 = arith.addf %10, %12 : vector<2x10xf32>
    %c0_11 = arith.constant 0 : index
    %c0_12 = arith.constant 0 : index
    %14 = vector.load %arg6[%c0_11, %c0_12] : memref<2x10xf32, #tpu.memory_space<vmem>>, vector<2x10xf32>
    tpu.vector_store %arg6[%c0_11, %c0_12], %13 {strides = array<i32>} : memref<2x10xf32, #tpu.memory_space<vmem>>, vector<2x10xf32>,
    return
  }
  func.func @transform_0(%arg0: i32) -> (i32, i32) {
    %c0_i32 = arith.constant 0 : i32
    %c0_i32_0 = arith.constant 0 : i32
    return %arg0, %c0_i32 : i32, i32
  }
  func.func @transform_1(%arg0: i32) -> (i32, i32) {
    %c0_i32 = arith.constant 0 : i32
    %c0_i32_0 = arith.constant 0 : i32
    %c0_i32_1 = arith.constant 0 : i32
    return %c0_i32, %c0_i32_0 : i32, i32
  }
  func.func @transform_2(%arg0: i32) -> (i32, i32) {
    %c0_i32 = arith.constant 0 : i32
    %c0_i32_0 = arith.constant 0 : i32
    %c0_i32_1 = arith.constant 0 : i32
    return %c0_i32, %c0_i32_0 : i32, i32
  }
  func.func @transform_3(%arg0: i32) -> (i32, i32) {
    %c0_i32 = arith.constant 0 : i32
    %c0_i32_0 = arith.constant 0 : i32
    %c0_i32_1 = arith.constant 0 : i32
    return %c0_i32, %c0_i32_0 : i32, i32
  }
  func.func @transform_4(%arg0: i32) -> (i32, i32) {
    %c0_i32 = arith.constant 0 : i32
    %c0_i32_0 = arith.constant 0 : i32
    %c0_i32_1 = arith.constant 0 : i32
    return %c0_i32, %c0_i32_0 : i32, i32
  }
  func.func @transform_5(%arg0: i32) -> (i32, i32) {
    %c0_i32 = arith.constant 0 : i32
    %c0_i32_0 = arith.constant 0 : i32
    return %arg0, %c0_i32 : i32, i32
  }
}

</mosaic_0001>

<bundles_post_ra>
// kernel: cnn_net_forward.2
= control target key start
LH: loop header
LB: loop body
LE: loop exit
PB: predicated region body
PF: predicated region fallthrough
CT: control target
= control target key end

     0   :  { %11 = vsyncpa [#allocation3], 0  ;;  %s5196_s21 = smov 0   ;;  %s8996_s0 = inlined_call_operand.vmem [shape: f32[2,1,832], index: 0, kind: input, shape index: {}]   ;;  %s8997_s1 = inlined_call_operand.vmem [shape: f32[32,9], index: 1, kind: input, shape index: {}]   ;;  %s8998_s2 = inlined_call_operand.vmem [shape: f32[32,1], index: 2, kind: input, shape index: {}]   ;;  %s8999_s3 = inlined_call_operand.hbm [shape: bf16[64,288], index: 3, kind: input, shape index: {}]   ;;  %s9000_s4 = inlined_call_operand.vmem [shape: f32[64,1], index: 4, kind: input, shape index: {}]   ;;  %s9001_s5 = inlined_call_operand.vmem [shape: bf16[672,144], index: 5, kind: input, shape index: {}]   ;;  %s9002_s6 = inlined_call_operand.vmem [shape: bf16[2,64,144], index: 6, kind: output, shape index: {}]  }
   0x1 LB: > { %s5202_s22 = sadd.s32 4294967295, %s5139_s21   ;;  %p4500_p0 = scmp.ge.s32.totalorder %s5139_s21, 1  ;;  %s5139_s21 = sphi %s5196_s21, %s17_s21  }
   0x2   : > { %p179_p1 = scmp.lt.s32.totalorder %s5139_s21, 3  ;;  %s5141_s23 = smov [#allocation2]  }
   0x3   : > { %s197_s24 = sshll.u32 %s5141_s23, 4  ;;  %p4667_p3 = scmp.eq.s32.totalorder %s5202_s22, 0  ;;  %s198_s24 = int_to_ptr.vmem [resolvable:$true] %s197_s24 }
   0x4   : > { %p5206_p2 = pnand %p4500_p0, %p179_p1  ;;  %s5114_s26 = scalar_lea.vmem %s198_s24, 1536 }
   0x5   : > { %p5115_p7 = scmp.ne.s32.totalorder %s198_s24, %s5114_s26  ;;  %p5122_p10 = scmp.lt.s32.totalorder %s198_s24, %s198_s24 }
   0x6   : > { %p4663_p4 = pneg %p5206_p2  ;;  %p5123_p11 = scmp.lt.s32.totalorder %s5114_s26, %s5114_s26 }
   0x8   : > { %p4664_p5 = pnand %p4667_p3, %p4663_p4  ;;  %p5124_p12 = por %p5123_p11, %p5122_p10 }
   0xa   : > { %p5105_p6 = pneg %p4664_p5 }
   0xc   : > { %p5117_p8 = pnand %p5115_p7, %p5105_p6 }
   0xe   : > { %p5118_p9 = pneg %p5117_p8 }
  0x10   : > { %p5125_p13 = pnand %p5124_p12, %p5118_p9 }
  0x12   : > { %5128 = shalt.err (!%p5125_p13)
}
  0x13   : > { %s5142_s27 = smov 192   ;;  %s5143_s28 = smov 12  }
  0x14   : > { %4666 = dma.hbm_to_vmem [thread:$0]  (!%p4664_p5), %s8999_s3, 1536, %s198_s24, [#allocation3], %s5142_s27, %s5142_s27, %s5143_s28  }
  0x15   : > { %226 = sbr.rel (%p5206_p2) target bundleno = 1724 (0x6bc), region = 44 }
  0x1a   : > { %5134 = dma.done.wait (%p4667_p3), [#allocation3], 1536  }
  0x1b   : > { %5136 = vsyncadd (%p4667_p3), [#allocation3], 4294965760  ;;  %v5144_v0 = vmov 1   ;;  %v9003_v1 = vmov 0   ;;  %v5229_v2 = vld [vmem:[%s8997_s1] sm:$0xff]  ;;  %v5234_v3 = vld [vmem:[%s8997_s1 + $0x10] sm:$0xff]  ;;  %v291_v13 = vlaneseq }
  0x1c   : > { %4698 = vset.pattern.permute.xlu0 %v5144_v0  ;;  %4697 = vset.pattern.permute.xlu1 %v9003_v1  ;;  %v5241_v4 = vld [vmem:[%s8997_s1 + $0x18] sm:$0xff]  ;;  %v5248_v5 = vld [vmem:[%s8997_s1 + $0x8] sm:$0xff]  ;;  %v5146_v6 = vmov 2   ;;  %v5147_v7 = vmov 3   ;;  %v5148_v8 = vmov 4   ;;  %v5149_v9 = vmov 5  }
  0x1d   : > { %2672 = vmatprep.mubr.bf16.mxu1 %v9003_v1  ;;  %346 = vperm.xlu0 %4698, %v5229_v2   ;;  %v5150_v10 = vmov 6   ;;  %v5151_v11 = vmov 8   ;;  %v5152_v12 = vmov 7   ;;  %p255_p0 = scmp.lt.s32.totalorder %s5202_s22, 1  ;;  %v292_v14 = vshrl.u32 %v291_v13, 7  ;;  %s5153_s19 = smov 127  }
  0x1e   : > { %282 = vperm.xlu1 %4697, %v5234_v3   ;;  %s5154_s20 = smov 126   ;;  %s5155_s23 = smov 100   ;;  %vm478_vm0 = vcmask 1039360   ;;  %vm679_vm1 = vcmask 1031168   ;;  %vm880_vm2 = vcmask 818176   ;;  %vm1081_vm3 = vcmask 809984  }
  0x1f   : > { %s9735_s22 = smov (!%p255_p0, %s5202_s22), 1  ;;  %v297_v15 = vsub.s32 1, %v292_v14  ;;  %v293_v16 = vsub.s32 0, %v292_v14  ;;  %v305_v20 = vsub.s32 3, %v292_v14  ;;  %v301_v21 = vsub.s32 2, %v292_v14  ;;  %s5156_s24 = smov 99  }
  0x20   : > { %s4658_s15 = smul.u32 7, %s9735_s22  ;;  %v313_v24 = vsub.s32 5, %v292_v14  ;;  %v309_v25 = vsub.s32 4, %v292_v14  ;;  %v363_v31 = vsub.s32 6, %v292_v14  ;;  %s5157_s25 = smov 98   ;;  %vm1282_vm4 = vcmask 801792  }
  0x21   : > { %358 = vperm.xlu0 %4698, %v5241_v4   ;;  %s5158_s26 = smov 72   ;;  %s5159_s27 = smov 71   ;;  %vm1483_vm5 = vcmask 588800   ;;  %vm1684_vm6 = vcmask 580608   ;;  %vm1885_vm7 = vcmask 572416   ;;  %vm2554_vm8 = vcmask 261120  }
  0x22   : > { %287 = vperm.xlu1 %4697, %v5241_v4   ;;  %s258_s18 = scalar_lea.vmem %s8996_s0, %s4658_s15  ;;  %s5160_s8 = smov 70   ;;  %vm4420_vm9 = vcmask 1043456   ;;  %vm4421_vm10 = vcmask 130052  }
  0x23   : > { %v265_v17 = vld [vmem:[%s258_s18] sm:$0x7f]  ;;  %s4629_s7 = sshll.u32 %s9735_s22, 6  ;;  %vm8961_vm11 = vmor %vm4421_vm10, %vm4420_vm9 }
  0x24   : > { %v5281_v18 = vrot.slane %v265_v17, %v297_v15  ;;  %v5283_v19 = vrot.slane %v265_v17, %v293_v16  ;;  %v5289_v28 = vrot.slane %v265_v17, %v305_v20  ;;  %v5291_v29 = vrot.slane %v265_v17, %v301_v21  ;;  %s8959_s10 = scalar_lea.vmem %s9002_s6, %s4629_s7 }
  0x25   : > { %4701 = vset.pattern.permute.xlu0 %v5146_v6  ;;  %v5299_v34 = vrot.slane %v265_v17, %v313_v24  ;;  %v5301_v35 = vrot.slane %v265_v17, %v309_v25  ;;  %v5307_v39 = vrot.slane %v265_v17, %v363_v31 }
  0x26   : > { %4699 = vset.pattern.permute.xlu1 %v5144_v0  ;;  %556 = vperm.xlu0 %4701, %v5248_v5   ;;  %9252 = vst [vmem:[#allocation6_spill] sm:$0xff] %v5289_v28 }
  0x27   : > { %350 = vperm.xlu1 %4699, %v5248_v5   ;;  %9254 = vst [vmem:[#allocation8_spill] sm:$0xff] %v5299_v34 }
  0x2a   : > { %4702 = vset.pattern.permute.xlu0 %v5147_v7 }
  0x2b   : > { %354 = vperm.xlu1 %4699, %v5234_v3   ;;  %761 = vperm.xlu0 %4702, %v5234_v3  }
  0x2f   : > { %4700 = vset.pattern.permute.xlu1 %v5146_v6  ;;  %4705 = vset.pattern.permute.xlu0 %v5148_v8 }
  0x30   : > { %552 = vperm.xlu1 %4700, %v5229_v2   ;;  %966 = vperm.xlu0 %4705, %v5241_v4  }
  0x34   : > { %560 = vperm.xlu1 %4700, %v5234_v3   ;;  %958 = vperm.xlu0 %4705, %v5248_v5  }
  0x38   : > { %564 = vperm.xlu1 %4700, %v5241_v4   ;;  %4709 = vset.pattern.permute.xlu0 %v5149_v9 }
  0x39   : > { %1163 = vperm.xlu0 %4709, %v5234_v3  }
  0x3c   : > { %4703 = vset.pattern.permute.xlu1 %v5147_v7 }
  0x3d   : > { %765 = vperm.xlu1 %4703, %v5241_v4   ;;  %1155 = vperm.xlu0 %4709, %v5229_v2  }
  0x41   : > { %4704 = vset.pattern.permute.xlu1 %v5148_v8  ;;  %4714 = vset.pattern.permute.xlu0 %v5151_v11 }
  0x42   : > { %962 = vperm.xlu1 %4704, %v5234_v3  }
  0x46   : > { %4706 = vset.pattern.permute.xlu1 %v5147_v7 }
  0x47   : > { %753 = vperm.xlu1 %4706, %v5229_v2  }
  0x4b   : > { %757 = vperm.xlu1 %4706, %v5248_v5  }
  0x4f   : > { %4707 = vset.pattern.permute.xlu1 %v5149_v9 }
  0x50   : > { %1167 = vperm.xlu1 %4707, %v5241_v4  }
  0x54   : > { %4708 = vset.pattern.permute.xlu1 %v5148_v8 }
  0x55   : > { %954 = vperm.xlu1 %4708, %v5229_v2  }
  0x59   : > { %4710 = vset.pattern.permute.xlu1 %v5150_v10 }
  0x5a   : > { %1364 = vperm.xlu1 %4710, %v5234_v3  }
  0x5e   : > { %1368 = vperm.xlu1 %4710, %v5241_v4  }
  0x62   : > { %4711 = vset.pattern.permute.xlu1 %v5149_v9 }
  0x63   : > { %1159 = vperm.xlu1 %4711, %v5248_v5  }
  0x67   : > { %4712 = vset.pattern.permute.xlu1 %v5152_v12 }
  0x68   : > { %1565 = vperm.xlu1 %4712, %v5234_v3  }
  0x6c   : > { %4713 = vset.pattern.permute.xlu1 %v5150_v10 }
  0x98   : > { %v347_v22 = vpop.permute.xlu0 %346 }
  0x99   : > { %v5285_v23 = vpop.permute.xlu1 %282  ;;  %v367_v26 = vmul.f32 %v347_v22, %v5281_v18  ;;  %v366_v27 = vmul.f32 %v347_v22, %v5283_v19  ;;  %v369_v32 = vmul.f32 %v347_v22, %v5289_v28  ;;  %v368_v33 = vmul.f32 %v347_v22, %v5291_v29 }
  0x9a   : > { %9251 = vst [vmem:[#allocation5_spill] sm:$0xff] %v5285_v23  ;;  %v371_v36 = vmul.f32 %v347_v22, %v5299_v34  ;;  %v370_v37 = vmul.f32 %v347_v22, %v5301_v35  ;;  %v372_v41 = vmul.f32 %v5307_v39, %v347_v22 }
  0x9b   : > { %424 = vrot.lane.b32.xlu0 %v367_v26, %s5153_s19  ;;  %422 = vrot.lane.b32.xlu1 %v366_v27, %s5153_s19 }
  0x9c   : > { %v359_v55 = vpop.permute.xlu0 %358 }
  0x9d   : > { %v5295_v30 = vpop.permute.xlu1 %287  ;;  %v387_v56 = vmul.f32 %v359_v55, %v5283_v19  ;;  %v389_v59 = vmul.f32 %v359_v55, %v5291_v29  ;;  %v388_v60 = vmul.f32 %v359_v55, %v5281_v18  ;;  %v391_v62 = vmul.f32 %v359_v55, %v5301_v35 }
  0x9e   : > { %9253 = vst [vmem:[#allocation7_spill] sm:$0xff] %v5295_v30  ;;  %v390_v63 = vmul.f32 %v359_v55, %v5289_v28  ;;  %v393_v0 = vmul.f32 %v5307_v39, %v359_v55  ;;  %v392_v6 = vmul.f32 %v359_v55, %v5299_v34 }
  0x9f   : > { %428 = vrot.lane.b32.xlu0 %v369_v32, %s5153_s19  ;;  %426 = vrot.lane.b32.xlu1 %v368_v33, %s5153_s19 }
  0xa1   : > { %v5397_v24 = vpop.permute.xlu0 %556 }
  0xa2   : > { %v351_v38 = vpop.permute.xlu1 %350 }
  0xa3   : > { %432 = vrot.lane.b32.xlu0 %v371_v36, %s5153_s19  ;;  %430 = vrot.lane.b32.xlu1 %v370_v37, %s5153_s19  ;;  %v373_v40 = vmul.f32 %v351_v38, %v5283_v19  ;;  %v375_v42 = vmul.f32 %v351_v38, %v5291_v29  ;;  %v374_v43 = vmul.f32 %v351_v38, %v5281_v18 }
  0xa4   : > { %v377_v44 = vmul.f32 %v351_v38, %v5301_v35  ;;  %v376_v45 = vmul.f32 %v351_v38, %v5289_v28  ;;  %v379_v46 = vmul.f32 %v5307_v39, %v351_v38  ;;  %v378_v47 = vmul.f32 %v351_v38, %v5299_v34 }
  0xa6   : > { %v355_v48 = vpop.permute.xlu1 %354  ;;  %v5405_v25 = vpop.permute.xlu0 %761 }
  0xa7   : > { %436 = vrot.lane.b32.xlu0 %v373_v40, %s5153_s19  ;;  %434 = vrot.lane.b32.xlu1 %v372_v41, %s5153_s19  ;;  %v381_v49 = vmul.f32 %v355_v48, %v5281_v18  ;;  %v380_v50 = vmul.f32 %v355_v48, %v5283_v19  ;;  %v383_v51 = vmul.f32 %v355_v48, %v5289_v28 }
  0xa8   : > { %v382_v52 = vmul.f32 %v355_v48, %v5291_v29  ;;  %v385_v53 = vmul.f32 %v355_v48, %v5299_v34  ;;  %v384_v54 = vmul.f32 %v355_v48, %v5301_v35  ;;  %v386_v57 = vmul.f32 %v5307_v39, %v355_v48 }
  0xa9   : > { %v783_v40 = vmul.f32 %v5405_v25, %v5281_v18 }
  0xab   : > { %440 = vrot.lane.b32.xlu0 %v375_v42, %s5153_s19  ;;  %438 = vrot.lane.b32.xlu1 %v374_v43, %s5153_s19  ;;  %v5341_v58 = vpop.permute.xlu1 %552  ;;  %v5415_v26 = vpop.permute.xlu0 %966  ;;  %v785_v42 = vmul.f32 %v5405_v25, %v5289_v28  ;;  %v784_v43 = vmul.f32 %v5405_v25, %v5291_v29 }
  0xac   : > { %v567_v8 = vmul.f32 %v5341_v58, %v5283_v19  ;;  %v568_v9 = vmul.f32 %v5341_v58, %v5281_v18  ;;  %v569_v13 = vmul.f32 %v5341_v58, %v5291_v29  ;;  %v570_v14 = vmul.f32 %v5341_v58, %v5289_v28 }
  0xad   : > { %v571_v16 = vmul.f32 %v5341_v58, %v5301_v35  ;;  %v572_v17 = vmul.f32 %v5341_v58, %v5299_v34 }
  0xaf   : > { %444 = vrot.lane.b32.xlu0 %v377_v44, %s5153_s19  ;;  %442 = vrot.lane.b32.xlu1 %v376_v45, %s5153_s19  ;;  %v5349_v61 = vpop.permute.xlu1 %560  ;;  %v5428_v32 = vpop.permute.xlu0 %958 }
  0xb0   : > { %v584_v27 = vmul.f32 %v5349_v61, %v5289_v28  ;;  %v583_v31 = vmul.f32 %v5349_v61, %v5291_v29  ;;  %9260 = vst [vmem:[#allocation14_spill] sm:$0xff] %v5428_v32  ;;  %v581_v33 = vmul.f32 %v5349_v61, %v5283_v19 }
  0xb3   : > { %448 = vrot.lane.b32.xlu0 %v379_v46, %s5153_s19  ;;  %446 = vrot.lane.b32.xlu1 %v378_v47, %s5153_s19  ;;  %v5357_v7 = vpop.permute.xlu1 %564 }
  0xb4   : > { %v591_v36 = vmul.f32 %v5357_v7, %v5289_v28  ;;  %v5442_v38 = vpop.permute.xlu0 %1163  ;;  %v588_v41 = vmul.f32 %v5357_v7, %v5283_v19 }
  0xb5   : > { %9262 = vst [vmem:[#allocation16_spill] sm:$0xff] %v5442_v38 }
  0xb7   : > { %452 = vrot.lane.b32.xlu0 %v381_v49, %s5153_s19  ;;  %450 = vrot.lane.b32.xlu1 %v380_v50, %s5153_s19  ;;  %v782_v50 = vmul.f32 %v5405_v25, %v5283_v19 }
  0xb8   : > { %v5365_v10 = vpop.permute.xlu1 %765  ;;  %v5457_v45 = vpop.permute.xlu0 %1155 }
  0xb9   : > { %9263 = vst [vmem:[#allocation17_spill] sm:$0xff] %v5457_v45  ;;  %v791_v46 = vmul.f32 %v5365_v10, %v5291_v29  ;;  %v790_v47 = vmul.f32 %v5365_v10, %v5281_v18  ;;  %v789_v55 = vmul.f32 %v5365_v10, %v5283_v19 }
  0xbb   : > { %456 = vrot.lane.b32.xlu0 %v383_v51, %s5153_s19  ;;  %454 = vrot.lane.b32.xlu1 %v382_v52, %s5153_s19  ;;  %v792_v51 = vmul.f32 %v5365_v10, %v5289_v28 }
  0xbd   : > { %v5375_v15 = vpop.permute.xlu1 %962 }
  0xbf   : > { %460 = vrot.lane.b32.xlu0 %v385_v53, %s5153_s19  ;;  %458 = vrot.lane.b32.xlu1 %v384_v54, %s5153_s19  ;;  %v575_v54 = vmul.f32 %v5397_v24, %v5281_v18 }
  0xc2   : > { %v5383_v20 = vpop.permute.xlu1 %753 }
  0xc3   : > { %464 = vrot.lane.b32.xlu0 %v387_v56, %s5153_s19  ;;  %462 = vrot.lane.b32.xlu1 %v386_v57, %s5153_s19  ;;  %9255 = vst [vmem:[#allocation9_spill] sm:$0xff] %v5383_v20 }
  0xc6   : > { %v5389_v21 = vpop.permute.xlu1 %757 }
  0xc7   : > { %468 = vrot.lane.b32.xlu0 %v389_v59, %s5153_s19  ;;  %466 = vrot.lane.b32.xlu1 %v388_v60, %s5153_s19  ;;  %v577_v59 = vmul.f32 %v5397_v24, %v5289_v28  ;;  %v576_v60 = vmul.f32 %v5397_v24, %v5291_v29 }
  0xcb   : > { %472 = vrot.lane.b32.xlu0 %v391_v62, %s5153_s19  ;;  %470 = vrot.lane.b32.xlu1 %v390_v63, %s5153_s19  ;;  %v5395_v22 = vpop.permute.xlu1 %1167 }
  0xcc   : > { %9256 = vst [vmem:[#allocation10_spill] sm:$0xff] %v5395_v22 }
  0xcf   : > { %476 = vrot.lane.b32.xlu0 %v393_v0, %s5153_s19  ;;  %474 = vrot.lane.b32.xlu1 %v392_v6, %s5153_s19  ;;  %v985_v0 = vmul.f32 %v5375_v15, %v5291_v29  ;;  %v984_v6 = vmul.f32 %v5375_v15, %v5281_v18 }
  0xd3   : > { %623 = vrot.lane.b32.xlu0 %v567_v8, %s5154_s20  ;;  %625 = vrot.lane.b32.xlu1 %v568_v9, %s5154_s20 }
  0xd7   : > { %627 = vrot.lane.b32.xlu0 %v569_v13, %s5154_s20  ;;  %629 = vrot.lane.b32.xlu1 %v570_v14, %s5154_s20  ;;  %v991_v13 = vmul.f32 %v5415_v26, %v5281_v18  ;;  %v986_v14 = vmul.f32 %v5375_v15, %v5289_v28 }
  0xdb   : > { %631 = vrot.lane.b32.xlu0 %v571_v16, %s5154_s20  ;;  %633 = vrot.lane.b32.xlu1 %v572_v17, %s5154_s20 }
  0xdf   : > { %1766 = vperm.xlu0 %4714, %v5234_v3   ;;  %1356 = vperm.xlu1 %4713, %v5229_v2   ;;  %v5403_v3 = vpop.permute.xlu1 %954 }
  0xe0   : > { %9257 = vst [vmem:[#allocation11_spill] sm:$0xff] %v5403_v3 }
  0xe3   : > { %4715 = vset.pattern.permute.xlu0 %v5152_v12  ;;  %1360 = vperm.xlu1 %4713, %v5248_v5  }
  0xe4   : > { %1569 = vperm.xlu0 %4715, %v5241_v4  }
  0xe7   : > { %4716 = vset.pattern.permute.xlu1 %v5151_v11 }
  0xe8   : > { %1561 = vperm.xlu0 %4715, %v5248_v5   ;;  %1770 = vperm.xlu1 %4716, %v5241_v4   ;;  %v582_v4 = vmul.f32 %v5349_v61, %v5281_v18 }
  0xec   : > { %4718 = vset.pattern.permute.xlu0 %v9003_v1  ;;  %4717 = vset.pattern.permute.xlu1 %v5152_v12  ;;  %v5413_v12 = vpop.permute.xlu1 %1364 }
  0xed   : > { %272 = vperm.xlu0 %4718, %v5229_v2   ;;  %1557 = vperm.xlu1 %4717, %v5229_v2   ;;  %9258 = vst [vmem:[#allocation12_spill] sm:$0xff] %v5413_v12 }
  0xf1   : > { %277 = vperm.xlu0 %4718, %v5248_v5   ;;  %4719 = vset.pattern.permute.xlu1 %v5151_v11  ;;  %v5426_v11 = vpop.permute.xlu1 %1368 }
  0xf2   : > { %1758 = vperm.xlu1 %4719, %v5229_v2   ;;  %v590_v2 = vmul.f32 %v5357_v7, %v5291_v29  ;;  %9259 = vst [vmem:[#allocation13_spill] sm:$0xff] %v5426_v11 }
  0xf5   : > { %653 = vrot.lane.b32.xlu0 %v582_v4, %s5154_s20  ;;  %v5440_v37 = vpop.permute.xlu1 %1159  ;;  %v993_v4 = vmul.f32 %v5415_v26, %v5289_v28 }
  0xf6   : > { %1762 = vperm.xlu1 %4719, %v5248_v5   ;;  %v589_v5 = vmul.f32 %v5357_v7, %v5281_v18  ;;  %9261 = vst [vmem:[#allocation15_spill] sm:$0xff] %v5440_v37 }
  0xf9   : > { %657 = vrot.lane.b32.xlu0 %v584_v27, %s5154_s20  ;;  %v5455_v44 = vpop.permute.xlu1 %1565  ;;  %v992_v27 = vmul.f32 %v5415_v26, %v5291_v29 }
  0xfa   : > { %655 = vrot.lane.b32.xlu1 %v583_v31, %s5154_s20 }
  0xfb   : > { %4720 = vset.pattern.permute.xlu1 %v9003_v1 }
  0xfd   : > { %669 = vrot.lane.b32.xlu0 %v590_v2, %s5154_s20 }
  0xfe   : > { %667 = vrot.lane.b32.xlu1 %v589_v5, %s5154_s20  ;;  %v983_v5 = vmul.f32 %v5375_v15, %v5283_v19 }
 0x101   : > { %651 = vrot.lane.b32.xlu0 %v581_v33, %s5154_s20  ;;  %v574_v33 = vmul.f32 %v5397_v24, %v5283_v19 }
 0x102   : > { %671 = vrot.lane.b32.xlu1 %v591_v36, %s5154_s20 }
 0x105   : > { %854 = vrot.lane.b32.xlu0 %v783_v40, %s5155_s23 }
 0x106   : > { %665 = vrot.lane.b32.xlu1 %v588_v41, %s5154_s20  ;;  %v769_v41 = vmul.f32 %v5383_v20, %v5281_v18 }
 0x109   : > { %858 = vrot.lane.b32.xlu0 %v785_v42, %s5155_s23  ;;  %v990_v42 = vmul.f32 %v5415_v26, %v5283_v19 }
 0x10a   : > { %856 = vrot.lane.b32.xlu1 %v784_v43, %s5155_s23 }
 0x10d   : > { %v5465_v48 = vpop.permute.xlu0 %424  ;;  %870 = vrot.lane.b32.xlu0 %v791_v46, %s5155_s23  ;;  %v5468_v49 = vpop.permute.xlu1 %422 }
 0x10e   : > { %9264 = vst [vmem:[#allocation18_spill] sm:$0xff] %v5465_v48  ;;  %9265 = vst [vmem:[#allocation19_spill] sm:$0xff] %v5468_v49  ;;  %868 = vrot.lane.b32.xlu1 %v790_v47, %s5155_s23  ;;  %v771_v47 = vmul.f32 %v5383_v20, %v5289_v28 }
 0x111   : > { %v5475_v52 = vpop.permute.xlu0 %428  ;;  %852 = vrot.lane.b32.xlu0 %v782_v50, %s5155_s23  ;;  %v5478_v53 = vpop.permute.xlu1 %426  ;;  %v770_v50 = vmul.f32 %v5383_v20, %v5291_v29 }
 0x112   : > { %9266 = vst [vmem:[#allocation20_spill] sm:$0xff] %v5475_v52  ;;  %9267 = vst [vmem:[#allocation21_spill] sm:$0xff] %v5478_v53  ;;  %872 = vrot.lane.b32.xlu1 %v792_v51, %s5155_s23 }
 0x115   : > { %v5485_v56 = vpop.permute.xlu0 %432  ;;  %639 = vrot.lane.b32.xlu0 %v575_v54, %s5154_s20  ;;  %v5488_v57 = vpop.permute.xlu1 %430 }
 0x116   : > { %9268 = vst [vmem:[#allocation22_spill] sm:$0xff] %v5485_v56  ;;  %9269 = vst [vmem:[#allocation23_spill] sm:$0xff] %v5488_v57  ;;  %866 = vrot.lane.b32.xlu1 %v789_v55, %s5155_s23  ;;  %v777_v55 = vmul.f32 %v5389_v21, %v5291_v29  ;;  %v1394_v56 = vmul.f32 %v5426_v11, %v5291_v29 }
 0x119   : > { %643 = vrot.lane.b32.xlu0 %v577_v59, %s5154_s20  ;;  %v5496_v62 = vpop.permute.xlu0 %436  ;;  %v5498_v63 = vpop.permute.xlu1 %434  ;;  %v776_v59 = vmul.f32 %v5389_v21, %v5281_v18 }
 0x11a   : > { %9270 = vst [vmem:[#allocation24_spill] sm:$0xff] %v5496_v62  ;;  %9271 = vst [vmem:[#allocation25_spill] sm:$0xff] %v5498_v63  ;;  %641 = vrot.lane.b32.xlu1 %v576_v60, %s5154_s20 }
 0x11d   : > { %1057 = vrot.lane.b32.xlu0 %v985_v0, %s5156_s24  ;;  %v5506_v8 = vpop.permute.xlu0 %440  ;;  %v5508_v9 = vpop.permute.xlu1 %438 }
 0x11e   : > { %9272 = vst [vmem:[#allocation26_spill] sm:$0xff] %v5506_v8  ;;  %9273 = vst [vmem:[#allocation27_spill] sm:$0xff] %v5508_v9  ;;  %1055 = vrot.lane.b32.xlu1 %v984_v6, %s5156_s24  ;;  %v1185_v6 = vmul.f32 %v5442_v38, %v5281_v18 }
 0x121   : > { %1069 = vrot.lane.b32.xlu0 %v991_v13, %s5156_s24  ;;  %v5516_v16 = vpop.permute.xlu0 %444  ;;  %v5518_v17 = vpop.permute.xlu1 %442  ;;  %v778_v13 = vmul.f32 %v5389_v21, %v5289_v28 }
 0x122   : > { %9274 = vst [vmem:[#allocation28_spill] sm:$0xff] %v5516_v16  ;;  %9275 = vst [vmem:[#allocation29_spill] sm:$0xff] %v5518_v17  ;;  %1059 = vrot.lane.b32.xlu1 %v986_v14, %s5156_s24  ;;  %v1387_v16 = vmul.f32 %v5413_v12, %v5291_v29 }
 0x125   : > { %1073 = vrot.lane.b32.xlu0 %v993_v4, %s5156_s24  ;;  %v5526_v31 = vpop.permute.xlu0 %448  ;;  %v5528_v2 = vpop.permute.xlu1 %446 }
 0x126   : > { %9276 = vst [vmem:[#allocation30_spill] sm:$0xff] %v5526_v31  ;;  %9277 = vst [vmem:[#allocation31_spill] sm:$0xff] %v5528_v2  ;;  %1071 = vrot.lane.b32.xlu1 %v992_v27, %s5156_s24  ;;  %v1187_v27 = vmul.f32 %v5442_v38, %v5289_v28  ;;  %v970_v31 = vmul.f32 %v5403_v3, %v5281_v18 }
 0x129   : > { %1053 = vrot.lane.b32.xlu0 %v983_v5, %s5156_s24  ;;  %v5536_v36 = vpop.permute.xlu0 %452  ;;  %v5538_v40 = vpop.permute.xlu1 %450  ;;  %v1186_v5 = vmul.f32 %v5442_v38, %v5291_v29 }
 0x12a   : > { %637 = vrot.lane.b32.xlu1 %v574_v33, %s5154_s20 }
 0x12d   : > { %826 = vrot.lane.b32.xlu0 %v769_v41, %s5155_s23  ;;  %v5546_v43 = vpop.permute.xlu0 %456  ;;  %v5548_v46 = vpop.permute.xlu1 %454 }
 0x12e   : > { %9278 = vst [vmem:[#allocation32_spill] sm:$0xff] %v5546_v43  ;;  %1067 = vrot.lane.b32.xlu1 %v990_v42, %s5156_s24  ;;  %v1193_v42 = vmul.f32 %v5395_v22, %v5291_v29 }
 0x131   : > { %830 = vrot.lane.b32.xlu0 %v771_v47, %s5155_s23  ;;  %v5556_v51 = vpop.permute.xlu0 %460  ;;  %v5558_v54 = vpop.permute.xlu1 %458  ;;  %v1192_v47 = vmul.f32 %v5395_v22, %v5281_v18 }
 0x132   : > { %9279 = vst [vmem:[#allocation33_spill] sm:$0xff] %v5556_v51  ;;  %9280 = vst [vmem:[#allocation34_spill] sm:$0xff] %v5558_v54  ;;  %828 = vrot.lane.b32.xlu1 %v770_v50, %s5155_s23  ;;  %v768_v50 = vmul.f32 %v5383_v20, %v5283_v19  ;;  %v1385_v54 = vmul.f32 %v5413_v12, %v5283_v19 }
 0x135   : > { %842 = vrot.lane.b32.xlu0 %v777_v55, %s5155_s23  ;;  %v5566_v60 = vpop.permute.xlu0 %464  ;;  %v5568_v0 = vpop.permute.xlu1 %462 }
 0x136   : > { %9281 = vst [vmem:[#allocation35_spill] sm:$0xff] %v5568_v0  ;;  %840 = vrot.lane.b32.xlu1 %v776_v59, %s5155_s23  ;;  %v972_v0 = vmul.f32 %v5403_v3, %v5289_v28 }
 0x139   : > { %1256 = vrot.lane.b32.xlu0 %v1185_v6, %s5157_s25  ;;  %v5576_v14 = vpop.permute.xlu0 %468  ;;  %v5578_v4 = vpop.permute.xlu1 %466  ;;  %v1194_v6 = vmul.f32 %v5395_v22, %v5289_v28 }
 0x13a   : > { %844 = vrot.lane.b32.xlu1 %v778_v13, %s5155_s23  ;;  %v1184_v13 = vmul.f32 %v5442_v38, %v5283_v19 }
 0x13d   : > { %1260 = vrot.lane.b32.xlu0 %v1187_v27, %s5157_s25  ;;  %v5586_v33 = vpop.permute.xlu0 %472  ;;  %v5588_v41 = vpop.permute.xlu1 %470  ;;  %v775_v27 = vmul.f32 %v5389_v21, %v5283_v19 }
 0x13e   : > { %9282 = vst [vmem:[#allocation36_spill] sm:$0xff] %v5586_v33  ;;  %1258 = vrot.lane.b32.xlu1 %v1186_v5, %s5157_s25  ;;  %v969_v33 = vmul.f32 %v5403_v3, %v5283_v19 }
 0x141   : > { %1272 = vrot.lane.b32.xlu0 %v1193_v42, %s5157_s25  ;;  %v5599_v55 = vpop.permute.xlu0 %476  ;;  %v5601_v59 = vpop.permute.xlu1 %474 }
 0x142   : > { %1270 = vrot.lane.b32.xlu1 %v1192_v47, %s5157_s25  ;;  %9283 = vst [vmem:[#allocation37_spill] sm:$0xff] %v5599_v55  ;;  %9284 = vst [vmem:[#allocation38_spill] sm:$0xff] %v5601_v59  ;;  %v585_v47 = vmul.f32 %v5349_v61, %v5301_v35  ;;  %v1393_v59 = vmul.f32 %v5426_v11, %v5281_v18 }
 0x145   : > { %824 = vrot.lane.b32.xlu0 %v768_v50, %s5155_s23  ;;  %v5612_v5 = vpop.permute.xlu0 %623  ;;  %v5614_v42 = vpop.permute.xlu1 %625  ;;  %v1191_v50 = vmul.f32 %v5395_v22, %v5283_v19 }
 0x146   : > { %1274 = vrot.lane.b32.xlu1 %v1194_v6, %s5157_s25  ;;  %9285 = vst [vmem:[#allocation39_spill] sm:$0xff] %v5612_v5  ;;  %9286 = vst [vmem:[#allocation40_spill] sm:$0xff] %v5614_v42  ;;  %v592_v6 = vmul.f32 %v5357_v7, %v5301_v35 }
 0x149   : > { %1254 = vrot.lane.b32.xlu0 %v1184_v13, %s5157_s25  ;;  %v5625_v13 = vpop.permute.xlu0 %627  ;;  %v5627_v1 = vpop.permute.xlu1 %629 }
 0x14a   : > { %838 = vrot.lane.b32.xlu1 %v775_v27, %s5155_s23  ;;  %9287 = vst [vmem:[#allocation41_spill] sm:$0xff] %v5625_v13  ;;  %9288 = vst [vmem:[#allocation42_spill] sm:$0xff] %v5627_v1  ;;  %v586_v27 = vmul.f32 %v5349_v61, %v5299_v34 }
 0x14d   : > { %659 = vrot.lane.b32.xlu0 %v585_v47, %s5154_s20  ;;  %v593_v47 = vmul.f32 %v5357_v7, %v5299_v34  ;;  %v5640_v63 = vpop.permute.xlu1 %633 }
 0x14e   : > { %1268 = vrot.lane.b32.xlu1 %v1191_v50, %s5157_s25  ;;  %v5638_v50 = vpop.permute.xlu0 %631  ;;  %9290 = vst [vmem:[#allocation44_spill] sm:$0xff] %v5640_v63 }
 0x14f   : > { %9289 = vst [vmem:[#allocation43_spill] sm:$0xff] %v5638_v50 }
 0x151   : > { %673 = vrot.lane.b32.xlu0 %v592_v6, %s5154_s20  ;;  %v971_v6 = vmul.f32 %v5403_v3, %v5291_v29 }
 0x152   : > { %661 = vrot.lane.b32.xlu1 %v586_v27, %s5154_s20 }
 0x155   : > { %1027 = vrot.lane.b32.xlu0 %v970_v31, %s5156_s24  ;;  %v978_v31 = vmul.f32 %v5428_v32, %v5291_v29 }
 0x156   : > { %675 = vrot.lane.b32.xlu1 %v593_v47, %s5154_s20  ;;  %v977_v47 = vmul.f32 %v5428_v32, %v5281_v18 }
 0x159   : > { %1031 = vrot.lane.b32.xlu0 %v972_v0, %s5156_s24  ;;  %v1386_v0 = vmul.f32 %v5413_v12, %v5281_v18 }
 0x15a   : > { %1029 = vrot.lane.b32.xlu1 %v971_v6, %s5156_s24  ;;  %v5649_v27 = vpop.permute.xlu1 %1356  ;;  %v5651_v55 = vpop.permute.xlu0 %1766  ;;  %v979_v6 = vmul.f32 %v5428_v32, %v5289_v28 }
 0x15b   : > { %9291 = vst [vmem:[#allocation45_spill] sm:$0xff] %v5649_v27  ;;  %9292 = vst [vmem:[#allocation46_spill] sm:$0xff] %v5651_v55 }
 0x15d   : > { %1043 = vrot.lane.b32.xlu0 %v978_v31, %s5156_s24 }
 0x15e   : > { %1041 = vrot.lane.b32.xlu1 %v977_v47, %s5156_s24  ;;  %v5659_v63 = vpop.permute.xlu1 %1360  ;;  %v1388_v47 = vmul.f32 %v5413_v12, %v5289_v28 }
 0x15f   : > { %9293 = vst [vmem:[#allocation47_spill] sm:$0xff] %v5659_v63  ;;  %v5661_v50 = vpop.permute.xlu0 %1569 }
 0x160   : > { %9294 = vst [vmem:[#allocation48_spill] sm:$0xff] %v5661_v50 }
 0x161   : > { %1457 = vrot.lane.b32.xlu0 %v1386_v0, %s5158_s26 }
 0x162   : > { %1045 = vrot.lane.b32.xlu1 %v979_v6, %s5156_s24 }
 0x163   : > { %v5669_v2 = vpop.permute.xlu1 %1770  ;;  %v5671_v31 = vpop.permute.xlu0 %1561 }
 0x164   : > { %9295 = vst [vmem:[#allocation49_spill] sm:$0xff] %v5669_v2  ;;  %9296 = vst [vmem:[#allocation50_spill] sm:$0xff] %v5671_v31 }
 0x165   : > { %1461 = vrot.lane.b32.xlu0 %v1388_v47, %s5158_s26 }
 0x166   : > { %1459 = vrot.lane.b32.xlu1 %v1387_v16, %s5158_s26  ;;  %v1395_v16 = vmul.f32 %v5426_v11, %v5289_v28 }
 0x168   : > { %v5681_v0 = vpop.permute.xlu0 %272  ;;  %v5683_v6 = vpop.permute.xlu1 %1557 }
 0x169   : > { %9297 = vst [vmem:[#allocation51_spill] sm:$0xff] %v5681_v0  ;;  %9298 = vst [vmem:[#allocation52_spill] sm:$0xff] %v5683_v6  ;;  %1473 = vrot.lane.b32.xlu0 %v1394_v56, %s5158_s26 }
 0x16a   : > { %1471 = vrot.lane.b32.xlu1 %v1393_v59, %s5158_s26  ;;  %v976_v59 = vmul.f32 %v5428_v32, %v5283_v19 }
 0x16c   : > { %v5691_v47 = vpop.permute.xlu0 %277 }
 0x16d   : > { %9299 = vst [vmem:[#allocation53_spill] sm:$0xff] %v5691_v47  ;;  %1025 = vrot.lane.b32.xlu0 %v969_v33, %s5156_s24  ;;  %v5696_v51 = vpop.permute.xlu1 %1758  ;;  %v786_v33 = vmul.f32 %v5405_v25, %v5301_v35 }
 0x16e   : > { %9300 = vst [vmem:[#allocation54_spill] sm:$0xff] %v5696_v51  ;;  %1475 = vrot.lane.b32.xlu1 %v1395_v16, %s5158_s26  ;;  %v1392_v16 = vmul.f32 %v5426_v11, %v5283_v19 }
 0x170   : > { %v5701_v56 = vpop.permute.xlu0 %653 }
 0x171   : > { %1455 = vrot.lane.b32.xlu0 %v1385_v54, %s5158_s26  ;;  %v5706_v57 = vpop.permute.xlu1 %1762  ;;  %v793_v54 = vmul.f32 %v5365_v10, %v5301_v35 }
 0x172   : > { %9301 = vst [vmem:[#allocation55_spill] sm:$0xff] %v5706_v57  ;;  %1039 = vrot.lane.b32.xlu1 %v976_v59, %s5156_s24  ;;  %v787_v59 = vmul.f32 %v5405_v25, %v5299_v34 }
 0x174   : > { %v5711_v1 = vpop.permute.xlu0 %657 }
 0x175   : > { %860 = vrot.lane.b32.xlu0 %v786_v33, %s5155_s23  ;;  %v5716_v13 = vpop.permute.xlu1 %655  ;;  %v1171_v33 = vmul.f32 %v5457_v45, %v5281_v18 }
 0x176   : > { %1469 = vrot.lane.b32.xlu1 %v1392_v16, %s5158_s26  ;;  %v794_v16 = vmul.f32 %v5365_v10, %v5299_v34 }
 0x178   : > { %v5721_v5 = vpop.permute.xlu0 %669 }
 0x179   : > { %874 = vrot.lane.b32.xlu0 %v793_v54, %s5155_s23  ;;  %v5726_v42 = vpop.permute.xlu1 %667  ;;  %v1173_v54 = vmul.f32 %v5457_v45, %v5289_v28 }
 0x17a   : > { %862 = vrot.lane.b32.xlu1 %v787_v59, %s5155_s23  ;;  %v1172_v59 = vmul.f32 %v5457_v45, %v5291_v29 }
 0x17c   : > { %v5731_v17 = vpop.permute.xlu0 %651 }
 0x17d   : > { %1228 = vrot.lane.b32.xlu0 %v1171_v33, %s5157_s25  ;;  %v5736_v8 = vpop.permute.xlu1 %671  ;;  %v1179_v33 = vmul.f32 %v5440_v37, %v5291_v29 }
 0x17e   : > { %876 = vrot.lane.b32.xlu1 %v794_v16, %s5155_s23  ;;  %v1178_v16 = vmul.f32 %v5440_v37, %v5281_v18 }
 0x180   : > { %v5741_v62 = vpop.permute.xlu0 %854 }
 0x181   : > { %9302 = vst [vmem:[#allocation56_spill] sm:$0xff] %v5741_v62  ;;  %1232 = vrot.lane.b32.xlu0 %v1173_v54, %s5157_s25  ;;  %v5746_v9 = vpop.permute.xlu1 %665  ;;  %v1587_v54 = vmul.f32 %v5455_v44, %v5281_v18 }
 0x182   : > { %1230 = vrot.lane.b32.xlu1 %v1172_v59, %s5157_s25  ;;  %v1180_v59 = vmul.f32 %v5440_v37, %v5289_v28 }
 0x184   : > { %v5751_v47 = vpop.permute.xlu0 %858 }
 0x185   : > { %9303 = vst [vmem:[#allocation57_spill] sm:$0xff] %v5751_v47  ;;  %1244 = vrot.lane.b32.xlu0 %v1179_v33, %s5157_s25  ;;  %v5756_v49 = vpop.permute.xlu1 %856  ;;  %v1589_v33 = vmul.f32 %v5455_v44, %v5289_v28 }
 0x186   : > { %1242 = vrot.lane.b32.xlu1 %v1178_v16, %s5157_s25  ;;  %v1588_v16 = vmul.f32 %v5455_v44, %v5291_v29 }
 0x188   : > { %v5761_v52 = vpop.permute.xlu0 %870 }
 0x189   : > { %1658 = vrot.lane.b32.xlu0 %v1587_v54, %s5159_s27  ;;  %v5766_v48 = vpop.permute.xlu1 %868  ;;  %v1595_v54 = vmul.f32 %v5661_v50, %v5291_v29 }
 0x18a   : > { %9304 = vst [vmem:[#allocation58_spill] sm:$0xff] %v5766_v48  ;;  %1246 = vrot.lane.b32.xlu1 %v1180_v59, %s5157_s25  ;;  %v1594_v59 = vmul.f32 %v5661_v50, %v5281_v18 }
 0x18c   : > { %v5771_v53 = vpop.permute.xlu0 %852 }
 0x18d   : > { %9305 = vst [vmem:[#allocation59_spill] sm:$0xff] %v5771_v53  ;;  %1662 = vrot.lane.b32.xlu0 %v1589_v33, %s5159_s27  ;;  %v5776_v0 = vpop.permute.xlu1 %872  ;;  %v1960_v33 = vld [vmem:[%s8998_s2 + $0x10] sm:$0xff] }
 0x18e   : > { %9306 = vst [vmem:[#allocation60_spill] sm:$0xff] %v5776_v0  ;;  %1660 = vrot.lane.b32.xlu1 %v1588_v16, %s5159_s27  ;;  %v1596_v16 = vmul.f32 %v5661_v50, %v5289_v28 }
 0x190   : > { %v5781_v48 = vpop.permute.xlu0 %639 }
 0x191   : > { %9307 = vst [vmem:[#allocation61_spill] sm:$0xff] %v5781_v48  ;;  %1674 = vrot.lane.b32.xlu0 %v1595_v54, %s5159_s27  ;;  %v5786_v53 = vpop.permute.xlu1 %866  ;;  %v1177_v54 = vmul.f32 %v5440_v37, %v5283_v19 }
 0x192   : > { %9308 = vst [vmem:[#allocation62_spill] sm:$0xff] %v5786_v53  ;;  %1672 = vrot.lane.b32.xlu1 %v1594_v59, %s5159_s27  ;;  %v1961_v59 = vld [vmem:[%s8998_s2 + $0x18] sm:$0xff] }
 0x194   : > { %v5792_v47 = vpop.permute.xlu0 %643 }
 0x195   : > { %9309 = vst [vmem:[#allocation63_spill] sm:$0xff] %v5792_v47  ;;  %1974 = vperm.xlu0 %4718, %v1960_v33   ;;  %v5796_v48 = vpop.permute.xlu1 %641  ;;  %v1593_v33 = vmul.f32 %v5661_v50, %v5283_v19 }
 0x196   : > { %9310 = vst [vmem:[#allocation64_spill] sm:$0xff] %v5796_v48  ;;  %1676 = vrot.lane.b32.xlu1 %v1596_v16, %s5159_s27  ;;  %v1170_v16 = vmul.f32 %v5457_v45, %v5283_v19 }
 0x198   : > { %v5804_v53 = vpop.permute.xlu0 %1057 }
 0x199   : > { %9311 = vst [vmem:[#allocation65_spill] sm:$0xff] %v5804_v53  ;;  %1240 = vrot.lane.b32.xlu0 %v1177_v54, %s5157_s25  ;;  %v5807_v47 = vpop.permute.xlu1 %1055  ;;  %v579_v54 = vmul.f32 %v5397_v24, %v5299_v34 }
 0x19a   : > { %9312 = vst [vmem:[#allocation66_spill] sm:$0xff] %v5807_v47  ;;  %1979 = vperm.xlu1 %4720, %v1961_v59   ;;  %v1586_v59 = vmul.f32 %v5455_v44, %v5283_v19 }
 0x19c   : > { %v5811_v48 = vpop.permute.xlu0 %1069 }
 0x19d   : > { %9313 = vst [vmem:[#allocation67_spill] sm:$0xff] %v5811_v48  ;;  %1670 = vrot.lane.b32.xlu0 %v1593_v33, %s5159_s27  ;;  %v5816_v62 = vpop.permute.xlu1 %1059  ;;  %v988_v33 = vmul.f32 %v5375_v15, %v5299_v34 }
 0x19e   : > { %9314 = vst [vmem:[#allocation68_spill] sm:$0xff] %v5816_v62  ;;  %1226 = vrot.lane.b32.xlu1 %v1170_v16, %s5157_s25  ;;  %v578_v16 = vmul.f32 %v5397_v24, %v5301_v35 }
 0x1a0   : > { %v5821_v53 = vpop.permute.xlu0 %1073 }
 0x1a1   : > { %9315 = vst [vmem:[#allocation69_spill] sm:$0xff] %v5821_v53  ;;  %647 = vrot.lane.b32.xlu0 %v579_v54, %s5154_s20  ;;  %v5826_v48 = vpop.permute.xlu1 %1071  ;;  %v995_v54 = vmul.f32 %v5415_v26, %v5299_v34 }
 0x1a2   : > { %9316 = vst [vmem:[#allocation70_spill] sm:$0xff] %v5826_v48  ;;  %1656 = vrot.lane.b32.xlu1 %v1586_v59, %s5159_s27  ;;  %v987_v59 = vmul.f32 %v5375_v15, %v5301_v35 }
 0x1a4   : > { %v5831_v47 = vpop.permute.xlu0 %1053 }
 0x1a5   : > { %9317 = vst [vmem:[#allocation71_spill] sm:$0xff] %v5831_v47  ;;  %1063 = vrot.lane.b32.xlu0 %v988_v33, %s5156_s24  ;;  %v5836_v62 = vpop.permute.xlu1 %637  ;;  %v1373_v33 = vmul.f32 %v5649_v27, %v5291_v29 }
 0x1a6   : > { %9318 = vst [vmem:[#allocation72_spill] sm:$0xff] %v5836_v62  ;;  %645 = vrot.lane.b32.xlu1 %v578_v16, %s5154_s20  ;;  %v994_v16 = vmul.f32 %v5415_v26, %v5301_v35 }
 0x1a8   : > { %v5841_v48 = vpop.permute.xlu0 %826 }
 0x1a9   : > { %9319 = vst [vmem:[#allocation73_spill] sm:$0xff] %v5841_v48  ;;  %1077 = vrot.lane.b32.xlu0 %v995_v54, %s5156_s24  ;;  %v5846_v47 = vpop.permute.xlu1 %1067  ;;  %v1379_v54 = vmul.f32 %v5659_v63, %v5281_v18 }
 0x1aa   : > { %9320 = vst [vmem:[#allocation74_spill] sm:$0xff] %v5846_v47  ;;  %1061 = vrot.lane.b32.xlu1 %v987_v59, %s5156_s24  ;;  %v1372_v59 = vmul.f32 %v5649_v27, %v5281_v18 }
 0x1ac   : > { %v5851_v62 = vpop.permute.xlu0 %830 }
 0x1ad   : > { %9321 = vst [vmem:[#allocation75_spill] sm:$0xff] %v5851_v62  ;;  %1431 = vrot.lane.b32.xlu0 %v1373_v33, %s5158_s26  ;;  %v5856_v48 = vpop.permute.xlu1 %828  ;;  %v1381_v33 = vmul.f32 %v5659_v63, %v5289_v28 }
 0x1ae   : > { %9322 = vst [vmem:[#allocation76_spill] sm:$0xff] %v5856_v48  ;;  %1075 = vrot.lane.b32.xlu1 %v994_v16, %s5156_s24  ;;  %v1374_v16 = vmul.f32 %v5649_v27, %v5289_v28 }
 0x1b0   : > { %v5861_v47 = vpop.permute.xlu0 %842 }
 0x1b1   : > { %9323 = vst [vmem:[#allocation77_spill] sm:$0xff] %v5861_v47  ;;  %1443 = vrot.lane.b32.xlu0 %v1379_v54, %s5158_s26  ;;  %v5866_v62 = vpop.permute.xlu1 %840  ;;  %v1789_v54 = vmul.f32 %v5651_v55, %v5291_v29 }
 0x1b2   : > { %9324 = vst [vmem:[#allocation78_spill] sm:$0xff] %v5866_v62  ;;  %1429 = vrot.lane.b32.xlu1 %v1372_v59, %s5158_s26  ;;  %v1380_v59 = vmul.f32 %v5659_v63, %v5291_v29 }
 0x1b4   : > { %v5871_v48 = vpop.permute.xlu0 %1256 }
 0x1b5   : > { %9325 = vst [vmem:[#allocation79_spill] sm:$0xff] %v5871_v48  ;;  %1447 = vrot.lane.b32.xlu0 %v1381_v33, %s5158_s26  ;;  %v5876_v47 = vpop.permute.xlu1 %844  ;;  %v1795_v33 = vmul.f32 %v5669_v2, %v5281_v18 }
 0x1b6   : > { %9326 = vst [vmem:[#allocation80_spill] sm:$0xff] %v5876_v47  ;;  %1433 = vrot.lane.b32.xlu1 %v1374_v16, %s5158_s26  ;;  %v1788_v16 = vmul.f32 %v5651_v55, %v5281_v18 }
 0x1b8   : > { %v5881_v62 = vpop.permute.xlu0 %1260 }
 0x1b9   : > { %9327 = vst [vmem:[#allocation81_spill] sm:$0xff] %v5881_v62  ;;  %1861 = vrot.lane.b32.xlu0 %v1789_v54, %s5160_s8  ;;  %v5886_v48 = vpop.permute.xlu1 %1258  ;;  %v1797_v54 = vmul.f32 %v5669_v2, %v5289_v28 }
 0x1ba   : > { %9328 = vst [vmem:[#allocation82_spill] sm:$0xff] %v5886_v48  ;;  %1445 = vrot.lane.b32.xlu1 %v1380_v59, %s5158_s26  ;;  %v1790_v59 = vmul.f32 %v5651_v55, %v5289_v28 }
 0x1bc   : > { %v5891_v47 = vpop.permute.xlu0 %1272 }
 0x1bd   : > { %9329 = vst [vmem:[#allocation83_spill] sm:$0xff] %v5891_v47  ;;  %1873 = vrot.lane.b32.xlu0 %v1795_v33, %s5160_s8  ;;  %v5896_v62 = vpop.permute.xlu1 %1270  ;;  %v1378_v33 = vmul.f32 %v5659_v63, %v5283_v19 }
 0x1be   : > { %9330 = vst [vmem:[#allocation84_spill] sm:$0xff] %v5896_v62  ;;  %1859 = vrot.lane.b32.xlu1 %v1788_v16, %s5160_s8  ;;  %v1796_v16 = vmul.f32 %v5669_v2, %v5291_v29 }
 0x1c0   : > { %v5901_v48 = vpop.permute.xlu0 %824 }
 0x1c1   : > { %9331 = vst [vmem:[#allocation85_spill] sm:$0xff] %v5901_v48  ;;  %1877 = vrot.lane.b32.xlu0 %v1797_v54, %s5160_s8  ;;  %v5906_v47 = vpop.permute.xlu1 %1274  ;;  %v1794_v54 = vmul.f32 %v5669_v2, %v5283_v19 }
 0x1c2   : > { %9332 = vst [vmem:[#allocation86_spill] sm:$0xff] %v5906_v47  ;;  %1863 = vrot.lane.b32.xlu1 %v1790_v59, %s5160_s8  ;;  %v1371_v59 = vmul.f32 %v5649_v27, %v5283_v19 }
 0x1c4   : > { %v5911_v62 = vpop.permute.xlu0 %1254 }
 0x1c5   : > { %9333 = vst [vmem:[#allocation87_spill] sm:$0xff] %v5911_v62  ;;  %1441 = vrot.lane.b32.xlu0 %v1378_v33, %s5158_s26  ;;  %v5916_v48 = vpop.permute.xlu1 %838  ;;  %v773_v33 = vmul.f32 %v5383_v20, %v5299_v34 }
 0x1c6   : > { %9334 = vst [vmem:[#allocation88_spill] sm:$0xff] %v5916_v48  ;;  %1875 = vrot.lane.b32.xlu1 %v1796_v16, %s5160_s8  ;;  %v1787_v16 = vmul.f32 %v5651_v55, %v5283_v19 }
 0x1c8   : > { %v5921_v47 = vpop.permute.xlu0 %659 }
 0x1c9   : > { %9335 = vst [vmem:[#allocation89_spill] sm:$0xff] %v5921_v47  ;;  %1871 = vrot.lane.b32.xlu0 %v1794_v54, %s5160_s8  ;;  %v5926_v62 = vpop.permute.xlu1 %1268  ;;  %v780_v54 = vmul.f32 %v5389_v21, %v5299_v34 }
 0x1ca   : > { %9336 = vst [vmem:[#allocation90_spill] sm:$0xff] %v5926_v62  ;;  %1427 = vrot.lane.b32.xlu1 %v1371_v59, %s5158_s26  ;;  %v772_v59 = vmul.f32 %v5383_v20, %v5301_v35 }
 0x1cc   : > { %v5931_v48 = vpop.permute.xlu0 %673 }
 0x1cd   : > { %9337 = vst [vmem:[#allocation91_spill] sm:$0xff] %v5931_v48  ;;  %834 = vrot.lane.b32.xlu0 %v773_v33, %s5155_s23  ;;  %v5936_v47 = vpop.permute.xlu1 %661  ;;  %v1189_v33 = vmul.f32 %v5442_v38, %v5299_v34 }
 0x1ce   : > { %9338 = vst [vmem:[#allocation92_spill] sm:$0xff] %v5936_v47  ;;  %1857 = vrot.lane.b32.xlu1 %v1787_v16, %s5160_s8  ;;  %v779_v16 = vmul.f32 %v5389_v21, %v5301_v35 }
 0x1d0   : > { %v5941_v62 = vpop.permute.xlu0 %1027 }
 0x1d1   : > { %9339 = vst [vmem:[#allocation93_spill] sm:$0xff] %v5941_v62  ;;  %848 = vrot.lane.b32.xlu0 %v780_v54, %s5155_s23  ;;  %v5946_v48 = vpop.permute.xlu1 %675  ;;  %v1196_v54 = vmul.f32 %v5395_v22, %v5299_v34 }
 0x1d2   : > { %9340 = vst [vmem:[#allocation94_spill] sm:$0xff] %v5946_v48  ;;  %832 = vrot.lane.b32.xlu1 %v772_v59, %s5155_s23  ;;  %v1188_v59 = vmul.f32 %v5442_v38, %v5301_v35 }
 0x1d4   : > { %v5951_v47 = vpop.permute.xlu0 %1031 }
 0x1d5   : > { %9341 = vst [vmem:[#allocation95_spill] sm:$0xff] %v5951_v47  ;;  %1264 = vrot.lane.b32.xlu0 %v1189_v33, %s5157_s25  ;;  %v5956_v62 = vpop.permute.xlu1 %1029  ;;  %v1574_v33 = vmul.f32 %v5683_v6, %v5291_v29 }
 0x1d6   : > { %9342 = vst [vmem:[#allocation96_spill] sm:$0xff] %v5956_v62  ;;  %846 = vrot.lane.b32.xlu1 %v779_v16, %s5155_s23  ;;  %v1195_v16 = vmul.f32 %v5395_v22, %v5301_v35 }
 0x1d8   : > { %v5961_v48 = vpop.permute.xlu0 %1043 }
 0x1d9   : > { %9343 = vst [vmem:[#allocation97_spill] sm:$0xff] %v5961_v48  ;;  %1278 = vrot.lane.b32.xlu0 %v1196_v54, %s5157_s25  ;;  %v5966_v47 = vpop.permute.xlu1 %1041  ;;  %v1580_v54 = vmul.f32 %v5671_v31, %v5281_v18 }
 0x1da   : > { %9344 = vst [vmem:[#allocation98_spill] sm:$0xff] %v5966_v47  ;;  %1262 = vrot.lane.b32.xlu1 %v1188_v59, %s5157_s25  ;;  %v1573_v59 = vmul.f32 %v5683_v6, %v5281_v18 }
 0x1dc   : > { %v5971_v62 = vpop.permute.xlu0 %1457 }
 0x1dd   : > { %9345 = vst [vmem:[#allocation99_spill] sm:$0xff] %v5971_v62  ;;  %1632 = vrot.lane.b32.xlu0 %v1574_v33, %s5159_s27  ;;  %v5976_v48 = vpop.permute.xlu1 %1045  ;;  %v1582_v33 = vmul.f32 %v5671_v31, %v5289_v28 }
 0x1de   : > { %9346 = vst [vmem:[#allocation100_spill] sm:$0xff] %v5976_v48  ;;  %1276 = vrot.lane.b32.xlu1 %v1195_v16, %s5157_s25  ;;  %v1575_v16 = vmul.f32 %v5683_v6, %v5289_v28 }
 0x1e0   : > { %v5981_v47 = vpop.permute.xlu0 %1461 }
 0x1e1   : > { %9347 = vst [vmem:[#allocation101_spill] sm:$0xff] %v5981_v47  ;;  %1644 = vrot.lane.b32.xlu0 %v1580_v54, %s5159_s27  ;;  %v5986_v38 = vpop.permute.xlu1 %1459  ;;  %v1959_v54 = vld [vmem:[%s8998_s2 + $0x8] sm:$0xff] }
 0x1e2   : > { %9348 = vst [vmem:[#allocation102_spill] sm:$0xff] %v5986_v38  ;;  %1630 = vrot.lane.b32.xlu1 %v1573_v59, %s5159_s27  ;;  %v1581_v59 = vmul.f32 %v5671_v31, %v5291_v29 }
 0x1e4   : > { %v5991_v48 = vpop.permute.xlu0 %1473 }
 0x1e5   : > { %1648 = vrot.lane.b32.xlu0 %v1582_v33, %s5159_s27  ;;  %v5996_v20 = vpop.permute.xlu1 %1471  ;;  %v1579_v33 = vmul.f32 %v5671_v31, %v5283_v19 }
 0x1e6   : > { %9349 = vst [vmem:[#allocation103_spill] sm:$0xff] %v5996_v20  ;;  %1634 = vrot.lane.b32.xlu1 %v1575_v16, %s5159_s27  ;;  %v1958_v16 = vld [vmem:[%s8998_s2] sm:$0xff] }
 0x1e8   : > { %v6002_v22 = vpop.permute.xlu0 %1025 }
 0x1e9   : > { %9350 = vst [vmem:[#allocation104_spill] sm:$0xff] %v6002_v22  ;;  %1969 = vperm.xlu0 %4718, %v1959_v54   ;;  %v6006_v62 = vpop.permute.xlu1 %1475  ;;  %v974_v54 = vmul.f32 %v5403_v3, %v5299_v34 }
 0x1ea   : > { %9351 = vst [vmem:[#allocation105_spill] sm:$0xff] %v6006_v62  ;;  %1646 = vrot.lane.b32.xlu1 %v1581_v59, %s5159_s27  ;;  %v1572_v59 = vmul.f32 %v5683_v6, %v5283_v19 }
 0x1ec   : > { %v6014_v20 = vpop.permute.xlu0 %1455 }
 0x1ed   : > { %9352 = vst [vmem:[#allocation106_spill] sm:$0xff] %v6014_v20  ;;  %1642 = vrot.lane.b32.xlu0 %v1579_v33, %s5159_s27  ;;  %v6017_v22 = vpop.permute.xlu1 %1039  ;;  %v981_v33 = vmul.f32 %v5428_v32, %v5299_v34 }
 0x1ee   : > { %9353 = vst [vmem:[#allocation107_spill] sm:$0xff] %v6017_v22  ;;  %1964 = vperm.xlu1 %4720, %v1958_v16   ;;  %v973_v16 = vmul.f32 %v5403_v3, %v5301_v35 }
 0x1f0   : > { %v6021_v38 = vpop.permute.xlu0 %860 }
 0x1f1   : > { %9354 = vst [vmem:[#allocation108_spill] sm:$0xff] %v6021_v38  ;;  %1035 = vrot.lane.b32.xlu0 %v974_v54, %s5156_s24  ;;  %v6026_v47 = vpop.permute.xlu1 %1469  ;;  %v1390_v54 = vmul.f32 %v5413_v12, %v5299_v34 }
 0x1f2   : > { %9355 = vst [vmem:[#allocation109_spill] sm:$0xff] %v6026_v47  ;;  %1628 = vrot.lane.b32.xlu1 %v1572_v59, %s5159_s27  ;;  %v980_v59 = vmul.f32 %v5428_v32, %v5301_v35 }
 0x1f4   : > { %v6031_v20 = vpop.permute.xlu0 %874 }
 0x1f5   : > { %9356 = vst [vmem:[#allocation110_spill] sm:$0xff] %v6031_v20  ;;  %1049 = vrot.lane.b32.xlu0 %v981_v33, %s5156_s24  ;;  %v6036_v38 = vpop.permute.xlu1 %862  ;;  %v1397_v33 = vmul.f32 %v5426_v11, %v5299_v34 }
 0x1f6   : > { %9357 = vst [vmem:[#allocation111_spill] sm:$0xff] %v6036_v38  ;;  %1033 = vrot.lane.b32.xlu1 %v973_v16, %s5156_s24  ;;  %v1389_v16 = vmul.f32 %v5413_v12, %v5301_v35 }
 0x1f8   : > { %v6041_v22 = vpop.permute.xlu0 %1228 }
 0x1f9   : > { %9358 = vst [vmem:[#allocation112_spill] sm:$0xff] %v6041_v22  ;;  %1465 = vrot.lane.b32.xlu0 %v1390_v54, %s5158_s26  ;;  %v6046_v20 = vpop.permute.xlu1 %876  ;;  %v1775_v54 = vmul.f32 %v5696_v51, %v5291_v29 }
 0x1fa   : > { %9359 = vst [vmem:[#allocation113_spill] sm:$0xff] %v6046_v20  ;;  %1047 = vrot.lane.b32.xlu1 %v980_v59, %s5156_s24  ;;  %v1396_v59 = vmul.f32 %v5426_v11, %v5301_v35 }
 0x1fc   : > { %v6051_v38 = vpop.permute.xlu0 %1232 }
 0x1fd   : > { %9360 = vst [vmem:[#allocation114_spill] sm:$0xff] %v6051_v38  ;;  %1479 = vrot.lane.b32.xlu0 %v1397_v33, %s5158_s26  ;;  %v6056_v22 = vpop.permute.xlu1 %1230  ;;  %v1781_v33 = vmul.f32 %v5706_v57, %v5281_v18 }
 0x1fe   : > { %9361 = vst [vmem:[#allocation115_spill] sm:$0xff] %v6056_v22  ;;  %1463 = vrot.lane.b32.xlu1 %v1389_v16, %s5158_s26  ;;  %v1774_v16 = vmul.f32 %v5696_v51, %v5281_v18 }
 0x200   : > { %v6061_v20 = vpop.permute.xlu0 %1244 }
 0x201   : > { %9362 = vst [vmem:[#allocation116_spill] sm:$0xff] %v6061_v20  ;;  %1833 = vrot.lane.b32.xlu0 %v1775_v54, %s5160_s8  ;;  %v6066_v38 = vpop.permute.xlu1 %1242  ;;  %v1783_v54 = vmul.f32 %v5706_v57, %v5289_v28 }
 0x202   : > { %9363 = vst [vmem:[#allocation117_spill] sm:$0xff] %v6066_v38  ;;  %1477 = vrot.lane.b32.xlu1 %v1396_v59, %s5158_s26  ;;  %v1776_v59 = vmul.f32 %v5696_v51, %v5289_v28 }
 0x204   : > { %v6071_v22 = vpop.permute.xlu0 %1658 }
 0x205   : > { %1845 = vrot.lane.b32.xlu0 %v1781_v33, %s5160_s8  ;;  %v6076_v20 = vpop.permute.xlu1 %1246  ;;  %v1780_v33 = vmul.f32 %v5706_v57, %v5283_v19 }
 0x206   : > { %9364 = vst [vmem:[#allocation118_spill] sm:$0xff] %v6076_v20  ;;  %1831 = vrot.lane.b32.xlu1 %v1774_v16, %s5160_s8  ;;  %v1782_v16 = vmul.f32 %v5706_v57, %v5291_v29 }
 0x208   : > { %v6081_v38 = vpop.permute.xlu0 %1662 }
 0x209   : > { %1849 = vrot.lane.b32.xlu0 %v1783_v54, %s5160_s8  ;;  %v6086_v11 = vpop.permute.xlu1 %1660  ;;  %v1175_v54 = vmul.f32 %v5457_v45, %v5299_v34 }
 0x20a   : > { %1835 = vrot.lane.b32.xlu1 %v1776_v59, %s5160_s8  ;;  %v1773_v59 = vmul.f32 %v5696_v51, %v5283_v19 }
 0x20c   : > { %v6091_v20 = vpop.permute.xlu0 %1674 }
 0x20d   : > { %1843 = vrot.lane.b32.xlu0 %v1780_v33, %s5160_s8  ;;  %v6096_v32 = vpop.permute.xlu1 %1672  ;;  %v1182_v33 = vmul.f32 %v5440_v37, %v5299_v34 }
 0x20e   : > { %1847 = vrot.lane.b32.xlu1 %v1782_v16, %s5160_s8  ;;  %v1174_v16 = vmul.f32 %v5457_v45, %v5301_v35 }
 0x210   : > { %v6101_v28 = vpop.permute.xlu0 %1974 }
 0x211   : > { %9365 = vst [vmem:[#allocation119_spill] sm:$0xff] %v6101_v28  ;;  %1236 = vrot.lane.b32.xlu0 %v1175_v54, %s5157_s25  ;;  %v6106_v12 = vpop.permute.xlu1 %1676  ;;  %v1591_v54 = vmul.f32 %v5455_v44, %v5299_v34 }
 0x212   : > { %9366 = vst [vmem:[#allocation120_spill] sm:$0xff] %v6106_v12  ;;  %1829 = vrot.lane.b32.xlu1 %v1773_v59, %s5160_s8  ;;  %v1181_v59 = vmul.f32 %v5440_v37, %v5301_v35 }
 0x214   : > { %v6111_v3 = vpop.permute.xlu0 %1240 }
 0x215   : > { %9367 = vst [vmem:[#allocation121_spill] sm:$0xff] %v6111_v3  ;;  %1250 = vrot.lane.b32.xlu0 %v1182_v33, %s5157_s25  ;;  %v6116_v28 = vpop.permute.xlu1 %1979  ;;  %v1598_v33 = vmul.f32 %v5661_v50, %v5299_v34 }
 0x216   : > { %9368 = vst [vmem:[#allocation122_spill] sm:$0xff] %v6116_v28  ;;  %1234 = vrot.lane.b32.xlu1 %v1174_v16, %s5157_s25  ;;  %v1590_v16 = vmul.f32 %v5455_v44, %v5301_v35 }
 0x218   : > { %v6121_v47 = vpop.permute.xlu0 %1670 }
 0x219   : > { %9369 = vst [vmem:[#allocation123_spill] sm:$0xff] %v6121_v47  ;;  %1666 = vrot.lane.b32.xlu0 %v1591_v54, %s5159_s27  ;;  %v6126_v3 = vpop.permute.xlu1 %1226  ;;  %v1376_v54 = vmul.f32 %v5649_v27, %v5299_v34 }
 0x21a   : > { %9370 = vst [vmem:[#allocation124_spill] sm:$0xff] %v6126_v3  ;;  %1248 = vrot.lane.b32.xlu1 %v1181_v59, %s5157_s25  ;;  %v1597_v59 = vmul.f32 %v5661_v50, %v5301_v35  ;;  %v1785_v50 = vmul.f32 %v5706_v57, %v5299_v34 }
 0x21c   : > { %v6131_v45 = vpop.permute.xlu0 %647 }
 0x21d   : > { %9371 = vst [vmem:[#allocation125_spill] sm:$0xff] %v6131_v45  ;;  %1680 = vrot.lane.b32.xlu0 %v1598_v33, %s5159_s27  ;;  %v6136_v47 = vpop.permute.xlu1 %1656  ;;  %v1383_v33 = vmul.f32 %v5659_v63, %v5299_v34 }
 0x21e   : > { %1664 = vrot.lane.b32.xlu1 %v1590_v16, %s5159_s27  ;;  %v1375_v16 = vmul.f32 %v5649_v27, %v5301_v35 }
 0x220   : > { %v6141_v3 = vpop.permute.xlu0 %1063 }
 0x221   : > { %9372 = vst [vmem:[#allocation126_spill] sm:$0xff] %v6141_v3  ;;  %1437 = vrot.lane.b32.xlu0 %v1376_v54, %s5158_s26  ;;  %v6146_v45 = vpop.permute.xlu1 %645  ;;  %v1792_v54 = vmul.f32 %v5651_v55, %v5299_v34 }
 0x222   : > { %9373 = vst [vmem:[#allocation127_spill] sm:$0xff] %v6146_v45  ;;  %1678 = vrot.lane.b32.xlu1 %v1597_v59, %s5159_s27  ;;  %v1382_v59 = vmul.f32 %v5659_v63, %v5301_v35 }
 0x224   : > { %v6151_v37 = vpop.permute.xlu0 %1077 }
 0x225   : > { %9374 = vst [vmem:[#allocation128_spill] sm:$0xff] %v6151_v37  ;;  %1451 = vrot.lane.b32.xlu0 %v1383_v33, %s5158_s26  ;;  %v6156_v3 = vpop.permute.xlu1 %1061  ;;  %v1799_v33 = vmul.f32 %v5669_v2, %v5299_v34 }
 0x226   : > { %9375 = vst [vmem:[#allocation129_spill] sm:$0xff] %v6156_v3  ;;  %1435 = vrot.lane.b32.xlu1 %v1375_v16, %s5158_s26  ;;  %v1791_v16 = vmul.f32 %v5651_v55, %v5301_v35  ;;  %v334_v55 = vmul.f32 %v5281_v18, %v5285_v23 }
 0x228   : > { %v6161_v45 = vpop.permute.xlu0 %1431 }
 0x229   : > { %9376 = vst [vmem:[#allocation130_spill] sm:$0xff] %v6161_v45  ;;  %1867 = vrot.lane.b32.xlu0 %v1792_v54, %s5160_s8  ;;  %v6166_v37 = vpop.permute.xlu1 %1075  ;;  %v1577_v54 = vmul.f32 %v5683_v6, %v5299_v34  ;;  %v6221_v45 = vmul.f32 %v5405_v25, %v5307_v39  ;;  %v6240_v25 = vmul.f32 %v5365_v10, %v5307_v39 }
 0x22a   : > { %9377 = vst [vmem:[#allocation131_spill] sm:$0xff] %v6166_v37  ;;  %1449 = vrot.lane.b32.xlu1 %v1382_v59, %s5158_s26  ;;  %v1798_v59 = vmul.f32 %v5669_v2, %v5301_v35  ;;  %v497_v10 = vsel %vm478_vm0, %v5566_v60, %v5578_v4 }
 0x22c   : > { %v6171_v3 = vpop.permute.xlu0 %1443 }
 0x22d   : > { %9378 = vst [vmem:[#allocation132_spill] sm:$0xff] %v6171_v3  ;;  %1881 = vrot.lane.b32.xlu0 %v1799_v33, %s5160_s8  ;;  %v6176_v27 = vpop.permute.xlu1 %1429  ;;  %v1584_v33 = vmul.f32 %v5671_v31, %v5299_v34  ;;  %v339_v3 = vmul.f32 %v5283_v19, %v5295_v30 }
 0x22e   : > { %9379 = vst [vmem:[#allocation133_spill] sm:$0xff] %v6176_v27  ;;  %1865 = vrot.lane.b32.xlu1 %v1791_v16, %s5160_s8  ;;  %v333_v16 = vmul.f32 %v5283_v19, %v5285_v23 }
 0x230   : > { %v6181_v37 = vpop.permute.xlu0 %1447 }
 0x231   : > { %9380 = vst [vmem:[#allocation134_spill] sm:$0xff] %v6181_v37  ;;  %1638 = vrot.lane.b32.xlu0 %v1577_v54, %s5159_s27  ;;  %v6186_v63 = vpop.permute.xlu1 %1433  ;;  %v335_v37 = vmul.f32 %v5291_v29, %v5285_v23  ;;  %v1576_v54 = vmul.f32 %v5683_v6, %v5301_v35  ;;  %v6212_v23 = vmul.f32 %v5397_v24, %v5307_v39 }
 0x232   : > { %9381 = vst [vmem:[#allocation135_spill] sm:$0xff] %v6186_v63  ;;  %1879 = vrot.lane.b32.xlu1 %v1798_v59, %s5160_s8  ;;  %v340_v59 = vmul.f32 %v5281_v18, %v5295_v30  ;;  %v341_v63 = vmul.f32 %v5291_v29, %v5295_v30  ;;  %v6217_v6 = vmul.f32 %v5349_v61, %v5307_v39 }
 0x233   : > { %v6225_v30 = vmul.f32 %v5415_v26, %v5307_v39  ;;  %v491_v24 = vsel %vm478_vm0, %v5538_v40, %v5536_v36  ;;  %v1778_v61 = vmul.f32 %v5696_v51, %v5299_v34  ;;  %v492_v26 = vsel %vm478_vm0, %v5536_v36, %v5548_v46 }
 0x234   : > { %v6197_v2 = vpop.permute.xlu0 %1861  ;;  %v1583_v40 = vmul.f32 %v5671_v31, %v5301_v35  ;;  %v499_v31 = vsel %vm478_vm0, %v5576_v14, %v5588_v41  ;;  %v540_v60 = vadd.f32 %v492_v26, %v334_v55  ;;  %v694_v26 = vsel %vm679_vm1, %v5716_v13, %v5711_v1 }
 0x235   : > { %1652 = vrot.lane.b32.xlu0 %v1584_v33, %s5159_s27  ;;  %v6208_v27 = vpop.permute.xlu1 %1445  ;;  %v6229_v33 = vmul.f32 %v5341_v58, %v5307_v39  ;;  %v493_v58 = vsel %vm478_vm0, %v5548_v46, %v5546_v43  ;;  %v6264_v46 = vmul.f32 %v5389_v21, %v5307_v39  ;;  %v539_v43 = vadd.f32 %v491_v24, %v333_v16 }
 0x236   : > { %9382 = vst [vmem:[#allocation136_spill] sm:$0xff] %v6208_v27  ;;  %1636 = vrot.lane.b32.xlu1 %v1576_v54, %s5159_s27  ;;  %v594_v54 = vmul.f32 %v5357_v7, %v5307_v39  ;;  %v6254_v7 = vmul.f32 %v5375_v15, %v5307_v39  ;;  %v498_v15 = vsel %vm478_vm0, %v5578_v4, %v5576_v14 }
 0x237   : > { %v545_v21 = vadd.f32 %v497_v10, %v339_v3  ;;  %v693_v16 = vsel %vm679_vm1, %v5701_v56, %v5716_v13  ;;  %v700_v4 = vsel %vm679_vm1, %v5721_v5, %v5736_v8  ;;  %v1777_v14 = vmul.f32 %v5696_v51, %v5301_v35 }
 0x238   : > { %v6248_v27 = vpop.permute.xlu0 %1873  ;;  %v546_v55 = vadd.f32 %v498_v15, %v340_v59  ;;  %v699_v3 = vsel %vm679_vm1, %v5726_v42, %v5721_v5  ;;  %v901_v13 = vsel %vm880_vm2, %v5761_v52, %v5776_v0  ;;  %v741_v5 = vadd.f32 %v693_v16, %v540_v60  ;;  %v9386_v15 = vld [vmem:[#allocation57_spill] sm:$0xff]  ;;  %v9392_v0 = vld [vmem:[#allocation86_spill] sm:$0xff] }
 0x239   : > { %1839 = vrot.lane.b32.xlu0 %v1778_v61, %s5160_s8  ;;  %v6260_v36 = vpop.permute.xlu1 %1859  ;;  %v541_v61 = vadd.f32 %v493_v58, %v335_v37  ;;  %v547_v37 = vadd.f32 %v499_v31, %v341_v63  ;;  %v698_v63 = vsel %vm679_vm1, %v5746_v9, %v5726_v42  ;;  %v895_v9 = vsel %vm880_vm2, %v5756_v49, %v9386_v15  ;;  %v9387_v42 = vld [vmem:[#allocation70_spill] sm:$0xff] }
 0x23a   : > { %1650 = vrot.lane.b32.xlu1 %v1583_v40, %s5159_s27  ;;  %v692_v40 = vsel %vm679_vm1, %v5731_v17, %v5701_v56  ;;  %v1784_v17 = vmul.f32 %v5706_v57, %v5301_v35  ;;  %v747_v10 = vadd.f32 %v699_v3, %v546_v55  ;;  %v1102_v34 = vsel %vm1081_vm3, %v9387_v42, %v5821_v53  ;;  %v9390_v3 = vld [vmem:[#allocation68_spill] sm:$0xff]  ;;  %v9391_v57 = vld [vmem:[#allocation65_spill] sm:$0xff] }
 0x23b   : > { %v748_v31 = vadd.f32 %v700_v4, %v547_v37  ;;  %v742_v56 = vadd.f32 %v694_v26, %v541_v61  ;;  %v740_v60 = vadd.f32 %v692_v40, %v539_v43  ;;  %v746_v16 = vadd.f32 %v698_v63, %v545_v21  ;;  %v9388_v4 = vld [vmem:[#allocation58_spill] sm:$0xff]  ;;  %v9389_v26 = vld [vmem:[#allocation59_spill] sm:$0xff] }
 0x23c   : > { %v6281_v24 = vpop.permute.xlu0 %1877  ;;  %v900_v37 = vsel %vm880_vm2, %v9388_v4, %v5761_v52  ;;  %v1096_v53 = vsel %vm1081_vm3, %v9391_v57, %v9390_v3  ;;  %v9393_v43 = vld [vmem:[#allocation83_spill] sm:$0xff]  ;;  %v9394_v40 = vld [vmem:[#allocation62_spill] sm:$0xff] }
 0x23d   : > { %9383 = vst [vmem:[#allocation137_spill] sm:$0xff] %v6281_v24  ;;  %1853 = vrot.lane.b32.xlu0 %v1785_v50, %s5160_s8  ;;  %v6292_v58 = vpop.permute.xlu1 %1863  ;;  %v9385_v50 = vld [vmem:[#allocation56_spill] sm:$0xff]  ;;  %v949_v51 = vadd.f32 %v901_v13, %v748_v31  ;;  %v1303_v21 = vsel %vm1282_vm4, %v9393_v43, %v9392_v0  ;;  %v943_v52 = vadd.f32 %v895_v9, %v742_v56  ;;  %v9395_v63 = vld [vmem:[#allocation66_spill] sm:$0xff] }
 0x23e   : > { %9384 = vst [vmem:[#allocation138_spill] sm:$0xff] %v6292_v58  ;;  %1837 = vrot.lane.b32.xlu1 %v1777_v14, %s5160_s8  ;;  %v894_v59 = vsel %vm880_vm2, %v9385_v50, %v5756_v49  ;;  %v893_v49 = vsel %vm880_vm2, %v9389_v26, %v9385_v50  ;;  %v1095_v13 = vsel %vm1081_vm3, %v9395_v63, %v9391_v57  ;;  %v9396_v50 = vld [vmem:[#allocation81_spill] sm:$0xff] }
 0x23f   : > { %v942_v55 = vadd.f32 %v894_v59, %v741_v5  ;;  %v1150_v5 = vadd.f32 %v1102_v34, %v949_v51  ;;  %v948_v31 = vadd.f32 %v900_v37, %v747_v10  ;;  %v9397_v59 = vld [vmem:[#allocation82_spill] sm:$0xff]  ;;  %v1504_v0 = vsel %vm1483_vm5, %v5991_v48, %v6006_v62  ;;  %v9399_v37 = vld [vmem:[#allocation101_spill] sm:$0xff] }
 0x240   : > { %v6315_v14 = vpop.permute.xlu0 %1441  ;;  %v1297_v26 = vsel %vm1282_vm4, %v9397_v59, %v9396_v50  ;;  %v941_v56 = vadd.f32 %v893_v49, %v740_v60  ;;  %v1144_v9 = vadd.f32 %v1096_v53, %v943_v52  ;;  %v9400_v50 = vld [vmem:[#allocation102_spill] sm:$0xff]  ;;  %v1705_v53 = vsel %vm1684_vm6, %v6091_v20, %v6106_v12  ;;  %v9401_v60 = vld [vmem:[#allocation84_spill] sm:$0xff] }
 0x241   : > { %677 = vrot.lane.b32.xlu0 %v594_v54, %s5154_s20  ;;  %v1876_v61 = vpop.permute.xlu1 %1875  ;;  %v899_v54 = vsel %vm880_vm2, %v9394_v40, %v9388_v4  ;;  %v9398_v4 = vld [vmem:[#allocation67_spill] sm:$0xff]  ;;  %v1351_v57 = vadd.f32 %v1303_v21, %v1150_v5  ;;  %v1143_v10 = vadd.f32 %v1095_v13, %v942_v55  ;;  %v1498_v62 = vsel %vm1483_vm5, %v9400_v50, %v9399_v37  ;;  %v9467_v12 = vld [vmem:[#allocation98_spill] sm:$0xff] }
 0x242   : > { %1851 = vrot.lane.b32.xlu1 %v1784_v17, %s5160_s8  ;;  %v1101_v40 = vsel %vm1081_vm3, %v9398_v4, %v9387_v42  ;;  %v947_v51 = vadd.f32 %v899_v54, %v746_v16  ;;  %v1345_v42 = vadd.f32 %v1297_v26, %v1144_v9  ;;  %v9402_v55 = vld [vmem:[#allocation71_spill] sm:$0xff]  ;;  %v1699_v52 = vsel %vm1684_vm6, %v6086_v11, %v6081_v38  ;;  %v9406_v9 = vld [vmem:[#allocation74_spill] sm:$0xff] }
 0x243   : > { %v1552_v49 = vadd.f32 %v1504_v0, %v1351_v57  ;;  %v1149_v16 = vadd.f32 %v1101_v40, %v948_v31  ;;  %v1094_v21 = vsel %vm1081_vm3, %v9402_v55, %v9395_v63  ;;  %v1906_v54 = vsel %vm1885_vm7, %v1876_v61, %v6281_v24  ;;  %v9404_v13 = vld [vmem:[#allocation79_spill] sm:$0xff] }
 0x244   : > { %v6343_v17 = vpop.permute.xlu0 %1871  ;;  %v1546_v0 = vadd.f32 %v1498_v62, %v1345_v42  ;;  %v9405_v5 = vld [vmem:[#allocation103_spill] sm:$0xff]  ;;  %v1100_v40 = vsel %vm1081_vm3, %v9406_v9, %v9398_v4  ;;  %v1900_v62 = vsel %vm1885_vm7, %v6197_v2, %v6292_v58  ;;  %v1704_v4 = vsel %vm1684_vm6, %v6096_v32, %v6091_v20 }
 0x245   : > { %878 = vrot.lane.b32.xlu0 %v6240_v25, %s5155_s23  ;;  %v6350_v34 = vpop.permute.xlu1 %1427  ;;  %v1302_v25 = vsel %vm1282_vm4, %v9401_v60, %v9393_v43  ;;  %v1296_v43 = vsel %vm1282_vm4, %v9404_v13, %v9397_v59  ;;  %v1503_v31 = vsel %vm1483_vm5, %v9405_v5, %v5991_v48  ;;  %v1753_v26 = vadd.f32 %v1705_v53, %v1552_v49  ;;  %v9407_v55 = vld [vmem:[#allocation87_spill] sm:$0xff]  ;;  %v9409_v49 = vld [vmem:[#allocation90_spill] sm:$0xff] }
 0x246   : > { %663 = vrot.lane.b32.xlu1 %v6217_v6, %s5154_s20  ;;  %v1350_v57 = vadd.f32 %v1302_v25, %v1149_v16  ;;  %v1295_v24 = vsel %vm1282_vm4, %v9407_v55, %v9404_v13  ;;  %v9408_v48 = vld [vmem:[#allocation99_spill] sm:$0xff]  ;;  %v1747_v59 = vadd.f32 %v1699_v52, %v1546_v0  ;;  %v1142_v42 = vadd.f32 %v1094_v21, %v941_v56 }
 0x247   : > { %v1954_v53 = vadd.f32 %v1906_v54, %v1753_v26  ;;  %v1344_v25 = vadd.f32 %v1296_v43, %v1143_v10  ;;  %v1301_v16 = vsel %vm1282_vm4, %v9409_v49, %v9401_v60  ;;  %v1905_v20 = vsel %vm1885_vm7, %v6248_v27, %v1876_v61  ;;  %v9413_v43 = vld [vmem:[#allocation109_spill] sm:$0xff]  ;;  %v9465_v58 = vld [vmem:[#allocation95_spill] sm:$0xff] }
 0x248   : > { %v6371_v6 = vpop.permute.xlu0 %834  ;;  %v1551_v13 = vadd.f32 %v1503_v31, %v1350_v57  ;;  %v1948_v52 = vadd.f32 %v1900_v62, %v1747_v59  ;;  %v1148_v10 = vadd.f32 %v1100_v40, %v947_v51  ;;  %v1343_v60 = vadd.f32 %v1295_v24, %v1142_v42  ;;  %v9415_v57 = vld [vmem:[#allocation119_spill] sm:$0xff] }
 0x249   : > { %9403 = vst [vmem:[#allocation56_spill] sm:$0xff] %v6371_v6  ;;  %649 = vrot.lane.b32.xlu0 %v6212_v23, %s5154_s20  ;;  %v1858_v63 = vpop.permute.xlu1 %1857  ;;  %v1497_v23 = vsel %vm1483_vm5, %v9408_v48, %v9400_v50  ;;  %v1698_v50 = vsel %vm1684_vm6, %v6071_v22, %v6086_v11  ;;  %v1502_v11 = vsel %vm1483_vm5, %v9413_v43, %v9405_v5 }
 0x24a   : > { %864 = vrot.lane.b32.xlu1 %v6221_v45, %s5155_s23  ;;  %v9411_v45 = vld [vmem:[#allocation106_spill] sm:$0xff]  ;;  %v1545_v21 = vadd.f32 %v1497_v23, %v1344_v25  ;;  %v1752_v54 = vadd.f32 %v1704_v4, %v1551_v13  ;;  %v1697_v61 = vsel %vm1684_vm6, %v6136_v47, %v6071_v22  ;;  %v2002_v51 = vadd.f32 %v6116_v28, %v1954_v53  ;;  %v9418_v25 = vld [vmem:[#allocation9_spill] sm:$0xff] }
 0x24b   : > { %v1496_v55 = vsel %vm1483_vm5, %v9411_v45, %v9408_v48  ;;  %v1349_v24 = vadd.f32 %v1301_v16, %v1148_v10  ;;  %v1996_v62 = vadd.f32 %v9415_v57, %v1948_v52  ;;  %v1898_v22 = vsel %vm1885_vm7, %v1858_v63, %v6260_v36  ;;  %v9417_v4 = vld [vmem:[#allocation10_spill] sm:$0xff]  ;;  %v9420_v52 = vld [vmem:[#allocation16_spill] sm:$0xff] }
 0x24c   : > { %v6401_v9 = vpop.permute.xlu0 %848  ;;  %v1544_v0 = vadd.f32 %v1496_v55, %v1343_v60  ;;  %v1746_v31 = vadd.f32 %v1698_v50, %v1545_v21  ;;  %v1953_v26 = vadd.f32 %v1905_v20, %v1752_v54  ;;  %v2026_v59 = vmax.f32 %v2002_v51, 0.0  ;;  %v9421_v54 = vld [vmem:[#allocation11_spill] sm:$0xff] }
 0x24d   : > { %9410 = vst [vmem:[#allocation57_spill] sm:$0xff] %v6401_v9  ;;  %1079 = vrot.lane.b32.xlu0 %v6225_v30, %s5156_s24  ;;  %v6413_v56 = vpop.permute.xlu1 %832  ;;  %v1899_v30 = vsel %vm1885_vm7, %v6260_v36, %v6197_v2  ;;  %v1550_v47 = vadd.f32 %v1502_v11, %v1349_v24  ;;  %v1197_v53 = vmul.f32 %v9417_v4, %v5307_v39  ;;  %v2020_v16 = vmax.f32 %v1996_v62, 0.0  ;;  %v9425_v62 = vld [vmem:[#allocation17_spill] sm:$0xff] }
 0x24e   : > { %9412 = vst [vmem:[#allocation70_spill] sm:$0xff] %v6413_v56  ;;  %635 = vrot.lane.b32.xlu1 %v6229_v33, %s5154_s20  ;;  %v9414_v33 = vld [vmem:[#allocation123_spill] sm:$0xff]  ;;  %v1745_v48 = vadd.f32 %v1697_v61, %v1544_v0  ;;  %v1947_v23 = vadd.f32 %v1899_v30, %v1746_v31  ;;  %v2001_v63 = vadd.f32 %v6116_v28, %v1953_v26  ;;  %v9423_v0 = vld [vmem:[#allocation12_spill] sm:$0xff] }
 0x24f   : > { %v1703_v5 = vsel %vm1684_vm6, %v9414_v33, %v6096_v32  ;;  %v1904_v32 = vsel %vm1885_vm7, %v6343_v17, %v6248_v27  ;;  %v774_v49 = vmul.f32 %v9418_v25, %v5307_v39  ;;  %v6456_v17 = vpack.c.bf16 %v2026_v59, %v2020_v16  ;;  %v9431_v25 = vld [vmem:[#allocation15_spill] sm:$0xff] }
 0x250   : > { %v6427_v40 = vpop.permute.xlu0 %1264  ;;  %v1751_v36 = vadd.f32 %v1703_v5, %v1550_v47  ;;  %v1995_v13 = vadd.f32 %v9415_v57, %v1947_v23  ;;  %v2025_v45 = vmax.f32 %v2001_v63, 0.0  ;;  %v1190_v20 = vmul.f32 %v9420_v52, %v5307_v39  ;;  %v9434_v52 = vld [vmem:[#allocation48_spill] sm:$0xff] }
 0x251   : > { %850 = vrot.lane.b32.xlu0 %v6264_v46, %s5155_s23  ;;  %v6437_v2 = vpop.permute.xlu1 %846  ;;  %v1946_v46 = vadd.f32 %v1898_v22, %v1745_v48  ;;  %9419 = vst [vmem:[#allocation59_spill] sm:$0xff] %v6456_v17  ;;  %v975_v43 = vmul.f32 %v9421_v54, %v5307_v39  ;;  %v1391_v31 = vmul.f32 %v9423_v0, %v5307_v39  ;;  %v9427_v48 = vld [vmem:[#allocation14_spill] sm:$0xff]  ;;  %v9439_v0 = vld [vmem:[#allocation19_spill] sm:$0xff] }
 0x252   : > { %9416 = vst [vmem:[#allocation58_spill] sm:$0xff] %v6437_v2  ;;  %1065 = vrot.lane.b32.xlu1 %v6254_v7, %s5156_s24  ;;  %v1952_v27 = vadd.f32 %v1904_v32, %v1751_v36  ;;  %v2019_v60 = vmax.f32 %v1995_v13, 0.0  ;;  %v1176_v22 = vmul.f32 %v9425_v62, %v5307_v39  ;;  %v982_v23 = vmul.f32 %v9427_v48, %v5307_v39  ;;  %v9437_v54 = vld [vmem:[#allocation18_spill] sm:$0xff]  ;;  %v9440_v62 = vld [vmem:[#allocation53_spill] sm:$0xff] }
 0x253   : > { %v1994_v55 = vadd.f32 %v9415_v57, %v1946_v46  ;;  %v1592_v32 = vmul.f32 %v5455_v44, %v5307_v39  ;;  %v9432_v44 = vld [vmem:[#allocation51_spill] sm:$0xff]  ;;  %v9453_v57 = vld [vmem:[#allocation72_spill] sm:$0xff] }
 0x254   : > { %v6447_v42 = vpop.permute.xlu0 %1278  ;;  %v2000_v21 = vadd.f32 %v6116_v28, %v1952_v27  ;;  %v6471_v11 = vpack.c.bf16 %v2025_v45, %v2019_v60  ;;  %v322_v13 = vmul.f32 %v5281_v18, %v9432_v44  ;;  %v323_v27 = vmul.f32 %v5291_v29, %v9432_v44 }
 0x255   : > { %1280 = vrot.lane.b32.xlu0 %v1197_v53, %s5157_s25  ;;  %v6452_v7 = vpop.permute.xlu1 %1262  ;;  %v2018_v61 = vmax.f32 %v1994_v55, 0.0  ;;  %v9428_v53 = vld [vmem:[#allocation13_spill] sm:$0xff]  ;;  %v321_v45 = vmul.f32 %v5283_v19, %v9432_v44 }
 0x256   : > { %836 = vrot.lane.b32.xlu1 %v774_v49, %s5155_s23  ;;  %9422 = vst [vmem:[#allocation68_spill] sm:$0xff] %v6471_v11  ;;  %v2024_v24 = vmax.f32 %v2000_v21, 0.0  ;;  %v1398_v36 = vmul.f32 %v9428_v53, %v5307_v39  ;;  %v1183_v49 = vmul.f32 %v9431_v25, %v5307_v39  ;;  %v9436_v21 = vld [vmem:[#allocation21_spill] sm:$0xff]  ;;  %v9441_v25 = vld [vmem:[#allocation27_spill] sm:$0xff] }
 0x258   : > { %v6459_v50 = vpop.permute.xlu0 %1632  ;;  %v6482_v26 = vpack.c.bf16 %v2024_v24, %v2018_v61  ;;  %v9438_v61 = vld [vmem:[#allocation20_spill] sm:$0xff] }
 0x259   : > { %2399 = vrot.lane.b32.xlu0 %v6456_v17, %s5160_s8  ;;  %v6465_v10 = vpop.permute.xlu1 %1276  ;;  %v481_v24 = vsel %vm478_vm0, %v9436_v21, %v9438_v61 }
 0x25a   : > { %1266 = vrot.lane.b32.xlu1 %v1190_v20, %s5157_s25  ;;  %9424 = vst [vmem:[#allocation65_spill] sm:$0xff] %v6482_v26  ;;  %v1599_v20 = vmul.f32 %v9434_v52, %v5307_v39 }
 0x25c   : > { %v6473_v30 = vpop.permute.xlu0 %1644 }
 0x25d   : > { %1037 = vrot.lane.b32.xlu0 %v975_v43, %s5156_s24  ;;  %v6476_v51 = vpop.permute.xlu1 %1630  ;;  %v480_v43 = vsel %vm478_vm0, %v9437_v54, %v9436_v21 }
 0x25e   : > { %2397 = vrot.lane.b32.xlu1 %v6471_v11, %s5160_s8  ;;  %v528_v48 = vadd.f32 %v480_v43, %v322_v13  ;;  %v327_v13 = vmul.f32 %v5283_v19, %v9440_v62  ;;  %v9452_v19 = vld [vmem:[#allocation63_spill] sm:$0xff] }
 0x260   : > { %v6484_v33 = vpop.permute.xlu0 %1648 }
 0x261   : > { %1467 = vrot.lane.b32.xlu0 %v1391_v31, %s5158_s26  ;;  %v6487_v5 = vpop.permute.xlu1 %1634  ;;  %v479_v31 = vsel %vm478_vm0, %v9439_v0, %v9437_v54  ;;  %v9444_v54 = vld [vmem:[#allocation29_spill] sm:$0xff] }
 0x262   : > { %2395 = vrot.lane.b32.xlu1 %v6482_v26, %s5160_s8  ;;  %v527_v53 = vadd.f32 %v479_v31, %v321_v45  ;;  %v9447_v45 = vld [vmem:[#allocation39_spill] sm:$0xff]  ;;  %v9449_v31 = vld [vmem:[#allocation42_spill] sm:$0xff]  ;;  %v9451_v26 = vld [vmem:[#allocation61_spill] sm:$0xff] }
 0x264   : > { %v6493_v47 = vpop.permute.xlu0 %1969 }
 0x265   : > { %9426 = vst [vmem:[#allocation83_spill] sm:$0xff] %v6493_v47  ;;  %1238 = vrot.lane.b32.xlu0 %v1176_v22, %s5157_s25  ;;  %v6498_v59 = vpop.permute.xlu1 %1646  ;;  %v328_v22 = vmul.f32 %v5281_v18, %v9440_v62 }
 0x266   : > { %1051 = vrot.lane.b32.xlu1 %v982_v23, %s5156_s24  ;;  %v529_v23 = vadd.f32 %v481_v24, %v323_v27  ;;  %v9448_v24 = vld [vmem:[#allocation41_spill] sm:$0xff] }
 0x268   : > { %v6503_v4 = vpop.permute.xlu0 %1642 }
 0x269   : > { %1668 = vrot.lane.b32.xlu0 %v1592_v32, %s5159_s27  ;;  %v6508_v63 = vpop.permute.xlu1 %1964  ;;  %v329_v32 = vmul.f32 %v5291_v29, %v9440_v62  ;;  %v9446_v29 = vld [vmem:[#allocation40_spill] sm:$0xff] }
 0x26a   : > { %9429 = vst [vmem:[#allocation62_spill] sm:$0xff] %v6508_v63  ;;  %1481 = vrot.lane.b32.xlu1 %v1398_v36, %s5158_s26  ;;  %v680_v43 = vsel %vm679_vm1, %v9447_v45, %v9446_v29  ;;  %v681_v0 = vsel %vm679_vm1, %v9446_v29, %v9448_v24  ;;  %v686_v29 = vsel %vm679_vm1, %v9453_v57, %v9451_v26 }
 0x26b   : > { %v729_v28 = vadd.f32 %v681_v0, %v528_v48  ;;  %v9458_v48 = vld [vmem:[#allocation77_spill] sm:$0xff] }
 0x26c   : > { %v6511_v46 = vpop.permute.xlu0 %1035 }
 0x26d   : > { %9430 = vst [vmem:[#allocation66_spill] sm:$0xff] %v6511_v46  ;;  %v6515_v16 = vpop.permute.xlu1 %1628  ;;  %v9455_v46 = vld [vmem:[#allocation73_spill] sm:$0xff] }
 0x26e   : > { %1252 = vrot.lane.b32.xlu1 %v1183_v49, %s5157_s25  ;;  %v9442_v49 = vld [vmem:[#allocation24_spill] sm:$0xff] }
 0x26f   : > { %v485_v52 = vsel %vm478_vm0, %v9442_v49, %v9441_v25  ;;  %v9450_v49 = vld [vmem:[#allocation64_spill] sm:$0xff] }
 0x270   : > { %v6524_v55 = vpop.permute.xlu0 %1049  ;;  %v688_v17 = vsel %vm679_vm1, %v9450_v49, %v9452_v19 }
 0x271   : > { %9433 = vst [vmem:[#allocation82_spill] sm:$0xff] %v6524_v55  ;;  %v6528_v60 = vpop.permute.xlu1 %1033 }
 0x272   : > { %9435 = vst [vmem:[#allocation67_spill] sm:$0xff] %v6528_v60  ;;  %1682 = vrot.lane.b32.xlu1 %v1599_v20, %s5159_s27  ;;  %v9443_v20 = vld [vmem:[#allocation26_spill] sm:$0xff]  ;;  %v728_v60 = vadd.f32 %v680_v43, %v527_v53  ;;  %v9461_v53 = vld [vmem:[#allocation85_spill] sm:$0xff] }
 0x273   : > { %v486_v21 = vsel %vm478_vm0, %v9441_v25, %v9443_v20  ;;  %v487_v18 = vsel %vm478_vm0, %v9443_v20, %v9444_v54  ;;  %v682_v25 = vsel %vm679_vm1, %v9448_v24, %v9449_v31  ;;  %v687_v20 = vsel %vm679_vm1, %v9451_v26, %v9450_v49  ;;  %v9460_v26 = vld [vmem:[#allocation80_spill] sm:$0xff] }
 0x274   : > { %v6544_v36 = vpop.permute.xlu0 %1465  ;;  %v534_v11 = vadd.f32 %v486_v21, %v328_v22  ;;  %v730_v55 = vadd.f32 %v682_v25, %v529_v23  ;;  %v535_v45 = vadd.f32 %v487_v18, %v329_v32  ;;  %v533_v22 = vadd.f32 %v485_v52, %v327_v13  ;;  %v9457_v21 = vld [vmem:[#allocation75_spill] sm:$0xff]  ;;  %v9459_v23 = vld [vmem:[#allocation78_spill] sm:$0xff]  ;;  %v9462_v52 = vld [vmem:[#allocation88_spill] sm:$0xff] }
 0x275   : > { %v6557_v27 = vpop.permute.xlu1 %1047  ;;  %v888_v32 = vsel %vm880_vm2, %v9459_v23, %v9458_v48  ;;  %v889_v0 = vsel %vm880_vm2, %v9458_v48, %v9460_v26  ;;  %v887_v13 = vsel %vm880_vm2, %v9462_v52, %v9459_v23  ;;  %v9463_v25 = vld [vmem:[#allocation96_spill] sm:$0xff]  ;;  %v9466_v26 = vld [vmem:[#allocation97_spill] sm:$0xff]  ;;  %v9469_v52 = vld [vmem:[#allocation115_spill] sm:$0xff] }
 0x276   : > { %9445 = vst [vmem:[#allocation101_spill] sm:$0xff] %v6557_v27  ;;  %v9454_v27 = vld [vmem:[#allocation76_spill] sm:$0xff]  ;;  %v735_v2 = vadd.f32 %v687_v20, %v534_v11  ;;  %v736_v57 = vadd.f32 %v688_v17, %v535_v45  ;;  %v881_v11 = vsel %vm880_vm2, %v9461_v53, %v9455_v46  ;;  %v9464_v20 = vld [vmem:[#allocation93_spill] sm:$0xff]  ;;  %v1084_v17 = vsel %vm1081_vm3, %v9463_v25, %v9465_v58 }
 0x277   : > { %v882_v24 = vsel %vm880_vm2, %v9455_v46, %v9454_v27  ;;  %v883_v49 = vsel %vm880_vm2, %v9454_v27, %v9457_v21  ;;  %v734_v27 = vadd.f32 %v686_v29, %v533_v22  ;;  %v1083_v6 = vsel %vm1081_vm3, %v9464_v20, %v9463_v25  ;;  %v9468_v53 = vld [vmem:[#allocation100_spill] sm:$0xff]  ;;  %v9473_v25 = vld [vmem:[#allocation114_spill] sm:$0xff] }
 0x278   : > { %v6580_v9 = vpop.permute.xlu0 %1479  ;;  %v930_v43 = vadd.f32 %v882_v24, %v729_v28  ;;  %v931_v45 = vadd.f32 %v883_v49, %v730_v55  ;;  %v936_v48 = vadd.f32 %v888_v32, %v735_v2  ;;  %v1089_v46 = vsel %vm1081_vm3, %v9467_v12, %v9466_v26  ;;  %v9472_v49 = vld [vmem:[#allocation104_spill] sm:$0xff] }
 0x279   : > { %9456 = vst [vmem:[#allocation102_spill] sm:$0xff] %v6580_v9  ;;  %v6588_v18 = vpop.permute.xlu1 %1463  ;;  %v1090_v23 = vsel %vm1081_vm3, %v9466_v26, %v9468_v53  ;;  %v937_v28 = vadd.f32 %v889_v0, %v736_v57  ;;  %v929_v24 = vadd.f32 %v881_v11, %v728_v60  ;;  %v935_v22 = vadd.f32 %v887_v13, %v734_v27  ;;  %v9470_v9 = vld [vmem:[#allocation112_spill] sm:$0xff]  ;;  %v9474_v60 = vld [vmem:[#allocation107_spill] sm:$0xff]  ;;  %v9475_v11 = vld [vmem:[#allocation130_spill] sm:$0xff] }
 0x27a   : > { %v1284_v21 = vsel %vm1282_vm4, %v9470_v9, %v9469_v52  ;;  %v1131_v55 = vadd.f32 %v1083_v6, %v930_v43  ;;  %v1132_v2 = vadd.f32 %v1084_v17, %v931_v45  ;;  %v1082_v32 = vsel %vm1081_vm3, %v9472_v49, %v9464_v20  ;;  %v9476_v13 = vld [vmem:[#allocation133_spill] sm:$0xff]  ;;  %v9477_v43 = vld [vmem:[#allocation116_spill] sm:$0xff]  ;;  %v9479_v20 = vld [vmem:[#allocation118_spill] sm:$0xff] }
 0x27b   : > { %v1285_v26 = vsel %vm1282_vm4, %v9469_v52, %v9473_v25  ;;  %v1137_v53 = vadd.f32 %v1089_v46, %v936_v48  ;;  %v1138_v57 = vadd.f32 %v1090_v23, %v937_v28  ;;  %v1088_v0 = vsel %vm1081_vm3, %v9474_v60, %v9467_v12  ;;  %v9478_v17 = vld [vmem:[#allocation117_spill] sm:$0xff]  ;;  %v9480_v52 = vld [vmem:[#allocation135_spill] sm:$0xff] }
 0x27c   : > { %v1834_v29 = vpop.permute.xlu0 %1833  ;;  %v1485_v27 = vsel %vm1483_vm5, %v9476_v13, %v9475_v11  ;;  %v1332_v6 = vadd.f32 %v1284_v21, %v1131_v55  ;;  %v1290_v45 = vsel %vm1282_vm4, %v9478_v17, %v9477_v43  ;;  %v1291_v49 = vsel %vm1282_vm4, %v9477_v43, %v9479_v20  ;;  %v9481_v28 = vld [vmem:[#allocation121_spill] sm:$0xff]  ;;  %v9483_v43 = vld [vmem:[#allocation132_spill] sm:$0xff] }
 0x27d   : > { %v6614_v56 = vpop.permute.xlu1 %1477  ;;  %v1486_v48 = vsel %vm1483_vm5, %v9475_v11, %v9480_v52  ;;  %v1130_v23 = vadd.f32 %v1082_v32, %v929_v24  ;;  %v1333_v12 = vadd.f32 %v1285_v26, %v1132_v2  ;;  %v1289_v60 = vsel %vm1282_vm4, %v9481_v28, %v9478_v17  ;;  %v9484_v28 = vld [vmem:[#allocation134_spill] sm:$0xff] }
 0x27e   : > { %9471 = vst [vmem:[#allocation84_spill] sm:$0xff] %v6614_v56  ;;  %v1686_v21 = vsel %vm1684_vm6, %v6476_v51, %v6459_v50  ;;  %v1136_v25 = vadd.f32 %v1088_v0, %v935_v22  ;;  %v1533_v58 = vadd.f32 %v1485_v27, %v1332_v6  ;;  %v9482_v56 = vld [vmem:[#allocation136_spill] sm:$0xff]  ;;  %v1687_v24 = vsel %vm1684_vm6, %v6459_v50, %v6487_v5 }
 0x27f   : > { %v1491_v20 = vsel %vm1483_vm5, %v9483_v43, %v9482_v56  ;;  %v1338_v2 = vadd.f32 %v1290_v45, %v1137_v53  ;;  %v1339_v32 = vadd.f32 %v1291_v49, %v1138_v57  ;;  %v1534_v26 = vadd.f32 %v1486_v48, %v1333_v12  ;;  %v9485_v6 = vld [vmem:[#allocation124_spill] sm:$0xff] }
 0x280   : > { %v1846_v46 = vpop.permute.xlu0 %1845  ;;  %v1337_v17 = vadd.f32 %v1289_v60, %v1136_v25  ;;  %v1492_v52 = vsel %vm1483_vm5, %v9482_v56, %v9484_v28  ;;  %v1490_v22 = vsel %vm1483_vm5, %v6315_v14, %v9483_v43  ;;  %v1734_v0 = vadd.f32 %v1686_v21, %v1533_v58 }
 0x281   : > { %v1832_v55 = vpop.permute.xlu1 %1831  ;;  %v1283_v50 = vsel %vm1282_vm4, %v9485_v6, %v9470_v9  ;;  %v1539_v53 = vadd.f32 %v1491_v20, %v1338_v2  ;;  %v1735_v57 = vadd.f32 %v1687_v24, %v1534_v26  ;;  %v1692_v25 = vsel %vm1684_vm6, %v6473_v30, %v6498_v59 }
 0x282   : > { %v1887_v11 = vsel %vm1885_vm7, %v1832_v55, %v1834_v29  ;;  %v1693_v56 = vsel %vm1684_vm6, %v6498_v59, %v6484_v33  ;;  %v1691_v58 = vsel %vm1684_vm6, %v6503_v4, %v6473_v30  ;;  %v1540_v20 = vadd.f32 %v1492_v52, %v1339_v32 }
 0x283   : > { %v1935_v14 = vadd.f32 %v1887_v11, %v1734_v0  ;;  %v1538_v49 = vadd.f32 %v1490_v22, %v1337_v17  ;;  %v1331_v12 = vadd.f32 %v1283_v50, %v1130_v23  ;;  %v1484_v60 = vsel %vm1483_vm5, %v6350_v34, %v9476_v13 }
 0x284   : > { %v6656_v27 = vpop.permute.xlu0 %1849  ;;  %v1740_v21 = vadd.f32 %v1692_v25, %v1539_v53  ;;  %v1741_v24 = vadd.f32 %v1693_v56, %v1540_v20  ;;  %v1685_v30 = vsel %vm1684_vm6, %v6515_v16, %v6476_v51 }
 0x285   : > { %v6664_v45 = vpop.permute.xlu1 %1835  ;;  %v1739_v59 = vadd.f32 %v1691_v58, %v1538_v49  ;;  %v1532_v13 = vadd.f32 %v1484_v60, %v1331_v12  ;;  %v9487_v60 = vld [vmem:[#allocation5_spill] sm:$0xff] }
 0x286   : > { %v1888_v9 = vsel %vm1885_vm7, %v1834_v29, %v6664_v45  ;;  %v1983_v29 = vadd.f32 %v6508_v63, %v1935_v14 }
 0x287   : > { %v1936_v48 = vadd.f32 %v1888_v9, %v1735_v57  ;;  %v1733_v22 = vadd.f32 %v1685_v30, %v1532_v13 }
 0x288   : > { %v1844_v43 = vpop.permute.xlu0 %1843  ;;  %v2007_v6 = vmax.f32 %v1983_v29, 0.0  ;;  %v9490_v29 = vld [vmem:[#allocation23_spill] sm:$0xff] }
 0x289   : > { %v1892_v4 = vsel %vm1885_vm7, %v1844_v43, %v1846_v46  ;;  %v1848_v2 = vpop.permute.xlu1 %1847  ;;  %v1984_v52 = vadd.f32 %v6508_v63, %v1936_v48 }
 0x28a   : > { %v1893_v23 = vsel %vm1885_vm7, %v1846_v46, %v1848_v2  ;;  %v1894_v34 = vsel %vm1885_vm7, %v1848_v2, %v6656_v27  ;;  %v1940_v32 = vadd.f32 %v1892_v4, %v1739_v59  ;;  %v9489_v4 = vld [vmem:[#allocation45_spill] sm:$0xff] }
 0x28b   : > { %v1941_v26 = vadd.f32 %v1893_v23, %v1740_v21  ;;  %v1942_v11 = vadd.f32 %v1894_v34, %v1741_v24  ;;  %v2008_v50 = vmax.f32 %v1984_v52, 0.0  ;;  %v9488_v21 = vld [vmem:[#allocation6_spill] sm:$0xff]  ;;  %v337_v24 = vmul.f32 %v5301_v35, %v9487_v60  ;;  %v9492_v34 = vld [vmem:[#allocation32_spill] sm:$0xff] }
 0x28c   : > { %v6686_v17 = vpop.permute.xlu0 %1236  ;;  %v1988_v46 = vadd.f32 %v6493_v47, %v1940_v32  ;;  %v336_v43 = vmul.f32 %v9488_v21, %v9487_v60  ;;  %v1377_v2 = vmul.f32 %v9489_v4, %v5307_v39  ;;  %v482_v52 = vsel %vm478_vm0, %v9438_v61, %v9490_v29  ;;  %v9491_v23 = vld [vmem:[#allocation34_spill] sm:$0xff]  ;;  %v9493_v32 = vld [vmem:[#allocation7_spill] sm:$0xff]  ;;  %v9504_v60 = vld [vmem:[#allocation44_spill] sm:$0xff] }
 0x28d   : > { %v1989_v51 = vadd.f32 %v6493_v47, %v1941_v26  ;;  %v1990_v16 = vadd.f32 %v6493_v47, %v1942_v11  ;;  %v1830_v0 = vpop.permute.xlu1 %1829  ;;  %v494_v13 = vsel %vm478_vm0, %v9492_v34, %v9491_v23  ;;  %v342_v26 = vmul.f32 %v9488_v21, %v9493_v32 }
 0x28e   : > { %v1886_v53 = vsel %vm1885_vm7, %v1830_v0, %v1832_v55  ;;  %v2012_v48 = vmax.f32 %v1988_v46, 0.0  ;;  %v343_v11 = vmul.f32 %v5301_v35, %v9493_v32  ;;  %v9498_v46 = vld [vmem:[#allocation28_spill] sm:$0xff]  ;;  %v324_v4 = vmul.f32 %v9488_v21, %v9432_v44 }
 0x28f   : > { %v2013_v57 = vmax.f32 %v1989_v51, 0.0  ;;  %v2014_v25 = vmax.f32 %v1990_v16, 0.0  ;;  %v1934_v56 = vadd.f32 %v1886_v53, %v1733_v22  ;;  %v9494_v22 = vld [vmem:[#allocation33_spill] sm:$0xff]  ;;  %v9495_v16 = vld [vmem:[#allocation36_spill] sm:$0xff]  ;;  %v542_v34 = vadd.f32 %v494_v13, %v336_v43 }
 0x290   : > { %v6692_v58 = vpop.permute.xlu0 %1250  ;;  %v495_v51 = vsel %vm478_vm0, %v9491_v23, %v9494_v22  ;;  %v500_v0 = vsel %vm478_vm0, %v5588_v41, %v9495_v16  ;;  %v9512_v32 = vld [vmem:[#allocation108_spill] sm:$0xff] }
 0x291   : > { %v6694_v14 = vpack.c.bf16 %v2013_v57, %v2007_v6  ;;  %v6696_v9 = vpack.c.bf16 %v2014_v25, %v2008_v50  ;;  %v1982_v20 = vadd.f32 %v6508_v63, %v1934_v56  ;;  %v6699_v49 = vpop.permute.xlu1 %1234  ;;  %v9496_v6 = vld [vmem:[#allocation38_spill] sm:$0xff]  ;;  %v488_v57 = vsel %vm478_vm0, %v9444_v54, %v9498_v46  ;;  %v9499_v25 = vld [vmem:[#allocation31_spill] sm:$0xff] }
 0x292   : > { %v501_v61 = vsel %vm478_vm0, %v9495_v16, %v9496_v6  ;;  %v9497_v50 = vld [vmem:[#allocation22_spill] sm:$0xff]  ;;  %v489_v41 = vsel %vm478_vm0, %v9498_v46, %v9499_v25  ;;  %v9502_v54 = vld [vmem:[#allocation47_spill] sm:$0xff]  ;;  %v543_v16 = vadd.f32 %v495_v51, %v337_v24  ;;  %v548_v46 = vadd.f32 %v500_v0, %v342_v26  ;;  %v9506_v24 = vld [vmem:[#allocation92_spill] sm:$0xff] }
 0x293   : > { %v2006_v12 = vmax.f32 %v1982_v20, 0.0  ;;  %2385 = vrot.lane.b32.xlu0 %v6694_v14, %s5160_s8  ;;  %2387 = vrot.lane.b32.xlu1 %v6696_v9, %s5160_s8  ;;  %v483_v53 = vsel %vm478_vm0, %v9490_v29, %v9497_v50  ;;  %v9501_v20 = vld [vmem:[#allocation46_spill] sm:$0xff]  ;;  %v1384_v23 = vmul.f32 %v9502_v54, %v5307_v39  ;;  %v549_v25 = vadd.f32 %v501_v61, %v343_v11  ;;  %v9503_v50 = vld [vmem:[#allocation43_spill] sm:$0xff]  ;;  %v9505_v54 = vld [vmem:[#allocation89_spill] sm:$0xff] }
 0x294   : > { %v6705_v55 = vpop.permute.xlu0 %1666  ;;  %v695_v43 = vsel %vm679_vm1, %v5711_v1, %v9505_v54  ;;  %v696_v13 = vsel %vm679_vm1, %v9505_v54, %v9506_v24  ;;  %v9507_v26 = vld [vmem:[#allocation49_spill] sm:$0xff]  ;;  %v9508_v51 = vld [vmem:[#allocation50_spill] sm:$0xff]  ;;  %v530_v61 = vadd.f32 %v482_v52, %v324_v4  ;;  %v9510_v1 = vld [vmem:[#allocation91_spill] sm:$0xff] }
 0x295   : > { %9486 = vst [vmem:[#allocation71_spill] sm:$0xff] %v6705_v55  ;;  %v6711_v59 = vpack.c.bf16 %v2012_v48, %v2006_v12  ;;  %v6713_v30 = vpop.permute.xlu1 %1248  ;;  %v1793_v48 = vmul.f32 %v9501_v20, %v5307_v39  ;;  %v330_v12 = vmul.f32 %v9488_v21, %v9440_v62  ;;  %v683_v20 = vsel %vm679_vm1, %v9449_v31, %v9503_v50  ;;  %v9511_v54 = vld [vmem:[#allocation94_spill] sm:$0xff]  ;;  %v9515_v4 = vld [vmem:[#allocation60_spill] sm:$0xff] }
 0x296   : > { %v684_v21 = vsel %vm679_vm1, %v9503_v50, %v9504_v60  ;;  %v1800_v11 = vmul.f32 %v9507_v26, %v5307_v39  ;;  %v702_v24 = vsel %vm679_vm1, %v9510_v1, %v9511_v54  ;;  %v896_v26 = vsel %vm880_vm2, %v9386_v15, %v9512_v32  ;;  %v9517_v15 = vld [vmem:[#allocation129_spill] sm:$0xff] }
 0x297   : > { %2383 = vrot.lane.b32.xlu0 %v6711_v59, %s5160_s8  ;;  %1439 = vrot.lane.b32.xlu1 %v1377_v2, %s5158_s26  ;;  %v325_v2 = vmul.f32 %v5301_v35, %v9432_v44  ;;  %v331_v44 = vmul.f32 %v5301_v35, %v9440_v62  ;;  %v1585_v35 = vmul.f32 %v9508_v51, %v5307_v39  ;;  %v9513_v51 = vld [vmem:[#allocation111_spill] sm:$0xff] }
 0x298   : > { %v6748_v56 = vpop.permute.xlu0 %1680  ;;  %v536_v0 = vadd.f32 %v488_v57, %v330_v12  ;;  %v701_v62 = vsel %vm679_vm1, %v5736_v8, %v9510_v1  ;;  %v897_v52 = vsel %vm880_vm2, %v9512_v32, %v9513_v51  ;;  %v744_v57 = vadd.f32 %v696_v13, %v543_v16  ;;  %v9514_v8 = vld [vmem:[#allocation110_spill] sm:$0xff] }
 0x299   : > { %9500 = vst [vmem:[#allocation79_spill] sm:$0xff] %v6748_v56  ;;  %v6758_v29 = vpop.permute.xlu1 %1664  ;;  %v531_v50 = vadd.f32 %v483_v53, %v325_v2  ;;  %v743_v53 = vadd.f32 %v695_v43, %v542_v34  ;;  %v537_v12 = vadd.f32 %v489_v41, %v331_v44  ;;  %v902_v2 = vsel %vm880_vm2, %v9515_v4, %v9514_v8  ;;  %v9518_v32 = vld [vmem:[#allocation126_spill] sm:$0xff] }
 0x29a   : > { %v1097_v54 = vsel %vm1081_vm3, %v9390_v3, %v9517_v15  ;;  %v1098_v44 = vsel %vm1081_vm3, %v9517_v15, %v9518_v32  ;;  %v749_v34 = vadd.f32 %v701_v62, %v548_v46  ;;  %v945_v43 = vadd.f32 %v897_v52, %v744_v57  ;;  %v9520_v62 = vld [vmem:[#allocation131_spill] sm:$0xff] }
 0x29b   : > { %1453 = vrot.lane.b32.xlu0 %v1384_v23, %s5158_s26  ;;  %1869 = vrot.lane.b32.xlu1 %v1793_v48, %s5160_s8  ;;  %v9509_v23 = vld [vmem:[#allocation52_spill] sm:$0xff]  ;;  %v944_v16 = vadd.f32 %v896_v26, %v743_v53  ;;  %v732_v4 = vadd.f32 %v684_v21, %v531_v50  ;;  %v1299_v3 = vsel %vm1282_vm4, %v6452_v7, %v6427_v40  ;;  %v9524_v50 = vld [vmem:[#allocation127_spill] sm:$0xff] }
 0x29c   : > { %v6778_v31 = vpop.permute.xlu0 %1437  ;;  %v1578_v60 = vmul.f32 %v9509_v23, %v5307_v39  ;;  %v9516_v23 = vld [vmem:[#allocation113_spill] sm:$0xff]  ;;  %v1146_v22 = vadd.f32 %v1098_v44, %v945_v43 }
 0x29d   : > { %v1679_v48 = vpop.permute.xlu1 %1678  ;;  %v903_v1 = vsel %vm880_vm2, %v9514_v8, %v9516_v23  ;;  %v9519_v8 = vld [vmem:[#allocation81_spill] sm:$0xff]  ;;  %v950_v23 = vadd.f32 %v902_v2, %v749_v34  ;;  %v1145_v32 = vadd.f32 %v1097_v54, %v944_v16  ;;  %v9528_v16 = vld [vmem:[#allocation75_spill] sm:$0xff] }
 0x29e   : > { %v1298_v51 = vsel %vm1282_vm4, %v9519_v8, %v6452_v7  ;;  %v1500_v7 = vsel %vm1483_vm5, %v6588_v18, %v6544_v36  ;;  %v9525_v54 = vld [vmem:[#allocation125_spill] sm:$0xff]  ;;  %v1347_v53 = vadd.f32 %v1299_v3, %v1146_v22  ;;  %v9529_v8 = vld [vmem:[#allocation84_spill] sm:$0xff] }
 0x29f   : > { %1883 = vrot.lane.b32.xlu0 %v1800_v11, %s5160_s8  ;;  %1640 = vrot.lane.b32.xlu1 %v1578_v60, %s5159_s27  ;;  %v750_v60 = vadd.f32 %v702_v24, %v549_v25  ;;  %v731_v11 = vadd.f32 %v683_v20, %v530_v61  ;;  %v9521_v25 = vld [vmem:[#allocation69_spill] sm:$0xff]  ;;  %v9522_v20 = vld [vmem:[#allocation128_spill] sm:$0xff]  ;;  %v1499_v24 = vsel %vm1483_vm5, %v9399_v37, %v6588_v18  ;;  %v9526_v37 = vld [vmem:[#allocation86_spill] sm:$0xff] }
 0x2a0   : > { %v6812_v41 = vpop.permute.xlu0 %1451  ;;  %v1103_v46 = vsel %vm1081_vm3, %v9521_v25, %v9520_v62  ;;  %v1104_v21 = vsel %vm1081_vm3, %v9520_v62, %v9522_v20  ;;  %v690_v26 = vsel %vm679_vm1, %v9524_v50, %v9525_v54  ;;  %v1346_v52 = vadd.f32 %v1298_v51, %v1145_v32  ;;  %v9530_v3 = vld [vmem:[#allocation105_spill] sm:$0xff]  ;;  %v9531_v62 = vld [vmem:[#allocation102_spill] sm:$0xff] }
 0x2a1   : > { %v6814_v13 = vpop.permute.xlu1 %1435  ;;  %v951_v15 = vadd.f32 %v903_v1, %v750_v60  ;;  %v1304_v2 = vsel %vm1282_vm4, %v9526_v37, %v6465_v10  ;;  %v1305_v18 = vsel %vm1282_vm4, %v6465_v10, %v6447_v42  ;;  %v1701_v1 = vsel %vm1684_vm6, %v6758_v29, %v6705_v55  ;;  %v9527_v60 = vld [vmem:[#allocation70_spill] sm:$0xff] }
 0x2a2   : > { %v1151_v51 = vadd.f32 %v1103_v46, %v950_v23  ;;  %v1547_v32 = vadd.f32 %v1499_v24, %v1346_v52  ;;  %v1548_v44 = vadd.f32 %v1500_v7, %v1347_v53  ;;  %v884_v43 = vsel %vm880_vm2, %v9528_v16, %v9527_v60 }
 0x2a3   : > { %1654 = vrot.lane.b32.xlu0 %v1585_v35, %s5159_s27  ;;  %v689_v35 = vsel %vm679_vm1, %v9452_v19, %v9524_v50  ;;  %v1700_v19 = vsel %vm1684_vm6, %v6081_v38, %v6758_v29  ;;  %v1152_v22 = vadd.f32 %v1104_v21, %v951_v15  ;;  %v1505_v10 = vsel %vm1483_vm5, %v9530_v3, %v9529_v8  ;;  %v9534_v50 = vld [vmem:[#allocation138_spill] sm:$0xff] }
 0x2a4   : > { %v6835_v61 = vpop.permute.xlu0 %1867  ;;  %v737_v34 = vadd.f32 %v689_v35, %v536_v0  ;;  %v1506_v38 = vsel %vm1483_vm5, %v9529_v8, %v9531_v62  ;;  %v1352_v29 = vadd.f32 %v1304_v2, %v1151_v51  ;;  %v1748_v15 = vadd.f32 %v1700_v19, %v1547_v32  ;;  %v9533_v0 = vld [vmem:[#allocation120_spill] sm:$0xff]  ;;  %v9539_v8 = vld [vmem:[#allocation57_spill] sm:$0xff] }
 0x2a5   : > { %9523 = vst [vmem:[#allocation103_spill] sm:$0xff] %v6835_v61  ;;  %v6843_v57 = vpop.permute.xlu1 %1449  ;;  %v1353_v23 = vadd.f32 %v1305_v18, %v1152_v22  ;;  %v1749_v46 = vadd.f32 %v1701_v1, %v1548_v44  ;;  %v1706_v24 = vsel %vm1684_vm6, %v9533_v0, %v1679_v48  ;;  %v1707_v7 = vsel %vm1684_vm6, %v1679_v48, %v6748_v56  ;;  %v9535_v19 = vld [vmem:[#allocation56_spill] sm:$0xff]  ;;  %v9536_v22 = vld [vmem:[#allocation58_spill] sm:$0xff] }
 0x2a6   : > { %v1553_v53 = vadd.f32 %v1505_v10, %v1352_v29  ;;  %v738_v18 = vadd.f32 %v690_v26, %v537_v12  ;;  %v885_v1 = vsel %vm880_vm2, %v9527_v60, %v9535_v19  ;;  %v932_v51 = vadd.f32 %v884_v43, %v731_v11  ;;  %v9537_v32 = vld [vmem:[#allocation80_spill] sm:$0xff]  ;;  %v9540_v10 = vld [vmem:[#allocation67_spill] sm:$0xff]  ;;  %v9543_v60 = vld [vmem:[#allocation101_spill] sm:$0xff] }
 0x2a7   : > { %v1554_v37 = vadd.f32 %v1506_v38, %v1353_v23  ;;  %v890_v48 = vsel %vm880_vm2, %v9537_v32, %v9536_v22  ;;  %v891_v3 = vsel %vm880_vm2, %v9536_v22, %v9539_v8  ;;  %v9541_v38 = vld [vmem:[#allocation95_spill] sm:$0xff]  ;;  %v9544_v43 = vld [vmem:[#allocation100_spill] sm:$0xff] }
 0x2a8   : > { %v6866_v25 = vpop.permute.xlu0 %1881  ;;  %v1085_v29 = vsel %vm1081_vm3, %v9541_v38, %v9540_v10  ;;  %v1754_v12 = vadd.f32 %v1706_v24, %v1553_v53  ;;  %v938_v22 = vadd.f32 %v890_v48, %v737_v34  ;;  %v939_v32 = vadd.f32 %v891_v3, %v738_v18 }
 0x2a9   : > { %9532 = vst [vmem:[#allocation74_spill] sm:$0xff] %v6866_v25  ;;  %v1866_v21 = vpop.permute.xlu1 %1865  ;;  %v1755_v26 = vadd.f32 %v1707_v7, %v1554_v37  ;;  %v933_v37 = vadd.f32 %v885_v1, %v732_v4  ;;  %v1133_v38 = vadd.f32 %v1085_v29, %v932_v51  ;;  %v1287_v34 = vsel %vm1282_vm4, %v6699_v49, %v6686_v17  ;;  %v9551_v29 = vld [vmem:[#allocation118_spill] sm:$0xff] }
 0x2aa   : > { %v1901_v35 = vsel %vm1885_vm7, %v9534_v50, %v1866_v21  ;;  %v1902_v52 = vsel %vm1885_vm7, %v1866_v21, %v6835_v61  ;;  %v9545_v21 = vld [vmem:[#allocation137_spill] sm:$0xff]  ;;  %v9548_v61 = vld [vmem:[#allocation82_spill] sm:$0xff] }
 0x2ab   : > { %v1949_v16 = vadd.f32 %v1901_v35, %v1748_v15  ;;  %v1950_v2 = vadd.f32 %v1902_v52, %v1749_v46  ;;  %v9542_v15 = vld [vmem:[#allocation66_spill] sm:$0xff]  ;;  %v1091_v46 = vsel %vm1081_vm3, %v9544_v43, %v9543_v60  ;;  %v9546_v35 = vld [vmem:[#allocation119_spill] sm:$0xff]  ;;  %v1092_v43 = vsel %vm1081_vm3, %v9543_v60, %v9548_v61 }
 0x2ac   : > { %v6882_v44 = vpop.permute.xlu0 %1638  ;;  %v1086_v11 = vsel %vm1081_vm3, %v9540_v10, %v9542_v15  ;;  %v1139_v56 = vadd.f32 %v1091_v46, %v938_v22  ;;  %v1140_v3 = vadd.f32 %v1092_v43, %v939_v32  ;;  %v1488_v60 = vsel %vm1483_vm5, %v6814_v13, %v6778_v31 }
 0x2ad   : > { %9538 = vst [vmem:[#allocation87_spill] sm:$0xff] %v6882_v44  ;;  %v1880_v23 = vpop.permute.xlu1 %1879  ;;  %v1997_v52 = vadd.f32 %v9546_v35, %v1949_v16  ;;  %v1998_v24 = vadd.f32 %v9546_v35, %v1950_v2  ;;  %v1134_v16 = vadd.f32 %v1086_v11, %v933_v37  ;;  %v9550_v2 = vld [vmem:[#allocation114_spill] sm:$0xff]  ;;  %v9573_v35 = vld [vmem:[#allocation8_spill] sm:$0xff] }
 0x2ae   : > { %v1907_v0 = vsel %vm1885_vm7, %v9545_v21, %v1880_v23  ;;  %v1908_v50 = vsel %vm1885_vm7, %v1880_v23, %v6866_v25  ;;  %v9549_v21 = vld [vmem:[#allocation122_spill] sm:$0xff]  ;;  %v1286_v4 = vsel %vm1282_vm4, %v9550_v2, %v6699_v49 }
 0x2af   : > { %v1955_v7 = vadd.f32 %v1907_v0, %v1754_v12  ;;  %v1956_v53 = vadd.f32 %v1908_v50, %v1755_v26  ;;  %v2021_v18 = vmax.f32 %v1997_v52, 0.0  ;;  %v2022_v1 = vmax.f32 %v1998_v24, 0.0  ;;  %v9552_v26 = vld [vmem:[#allocation135_spill] sm:$0xff] }
 0x2b0   : > { %v6902_v10 = vpop.permute.xlu0 %1652  ;;  %v1292_v12 = vsel %vm1282_vm4, %v9551_v29, %v6713_v30  ;;  %v1487_v11 = vsel %vm1483_vm5, %v9552_v26, %v6814_v13  ;;  %v1334_v49 = vadd.f32 %v1286_v4, %v1133_v38  ;;  %v1335_v0 = vadd.f32 %v1287_v34, %v1134_v16  ;;  %v9557_v26 = vld [vmem:[#allocation55_spill] sm:$0xff] }
 0x2b1   : > { %9547 = vst [vmem:[#allocation99_spill] sm:$0xff] %v6902_v10  ;;  %v2003_v55 = vadd.f32 %v9549_v21, %v1955_v7  ;;  %v2004_v23 = vadd.f32 %v9549_v21, %v1956_v53  ;;  %v1637_v25 = vpop.permute.xlu1 %1636  ;;  %v1293_v24 = vsel %vm1282_vm4, %v6713_v30, %v6692_v58  ;;  %v1493_v7 = vsel %vm1483_vm5, %v9484_v28, %v6843_v57 }
 0x2b2   : > { %v1688_v13 = vsel %vm1684_vm6, %v6487_v5, %v1637_v25  ;;  %v1689_v53 = vsel %vm1684_vm6, %v1637_v25, %v6882_v44  ;;  %v1340_v37 = vadd.f32 %v1292_v12, %v1139_v56  ;;  %v1535_v22 = vadd.f32 %v1487_v11, %v1334_v49  ;;  %v9555_v5 = vld [vmem:[#allocation54_spill] sm:$0xff] }
 0x2b3   : > { %v2027_v51 = vmax.f32 %v2003_v55, 0.0  ;;  %v2028_v48 = vmax.f32 %v2004_v23, 0.0  ;;  %v1536_v32 = vadd.f32 %v1488_v60, %v1335_v0  ;;  %v1494_v30 = vsel %vm1483_vm5, %v6843_v57, %v6812_v41 }
 0x2b4   : > { %v6924_v46 = vpop.permute.xlu0 %1839  ;;  %v1779_v38 = vmul.f32 %v9555_v5, %v5307_v39  ;;  %v1341_v43 = vadd.f32 %v1293_v24, %v1140_v3  ;;  %v1541_v25 = vadd.f32 %v1493_v7, %v1340_v37  ;;  %v1736_v56 = vadd.f32 %v1688_v13, %v1535_v22  ;;  %v9558_v7 = vld [vmem:[#allocation68_spill] sm:$0xff]  ;;  %v9559_v5 = vld [vmem:[#allocation65_spill] sm:$0xff] }
 0x2b5   : > { %9553 = vst [vmem:[#allocation90_spill] sm:$0xff] %v6924_v46  ;;  %v6926_v50 = vpack.c.bf16 %v2027_v51, %v2021_v18  ;;  %v6928_v55 = vpack.c.bf16 %v2028_v48, %v2022_v1  ;;  %v1651_v52 = vpop.permute.xlu1 %1650  ;;  %v1737_v23 = vadd.f32 %v1689_v53, %v1536_v32  ;;  %v9556_v48 = vld [vmem:[#allocation59_spill] sm:$0xff]  ;;  %v1786_v11 = vmul.f32 %v9557_v26, %v5307_v39 }
 0x2b6   : > { %v1694_v2 = vsel %vm1684_vm6, %v6484_v33, %v1651_v52  ;;  %v1695_v4 = vsel %vm1684_vm6, %v1651_v52, %v6902_v10  ;;  %v1542_v18 = vadd.f32 %v1494_v30, %v1341_v43  ;;  %v9580_v10 = vld [vmem:[#allocation25_spill] sm:$0xff] }
 0x2b7   : > { %2168 = vrot.lane.b32.xlu0 %v6928_v55, %s5155_s23  ;;  %2166 = vrot.lane.b32.xlu1 %v6926_v50, %s5155_s23  ;;  %v1742_v33 = vadd.f32 %v1694_v2, %v1541_v25 }
 0x2b8   : > { %v6947_v28 = vpop.permute.xlu0 %1853  ;;  %v1743_v29 = vadd.f32 %v1695_v4, %v1542_v18 }
 0x2b9   : > { %9554 = vst [vmem:[#allocation106_spill] sm:$0xff] %v6947_v28  ;;  %v1838_v16 = vpop.permute.xlu1 %1837 }
 0x2ba   : > { %v1889_v34 = vsel %vm1885_vm7, %v6664_v45, %v1838_v16  ;;  %v1890_v57 = vsel %vm1885_vm7, %v1838_v16, %v6924_v46  ;;  %v9574_v46 = vld [vmem:[#allocation53_spill] sm:$0xff] }
 0x2bb   : > { %v1937_v1 = vadd.f32 %v1889_v34, %v1736_v56  ;;  %v1938_v51 = vadd.f32 %v1890_v57, %v1737_v23  ;;  %1841 = vrot.lane.b32.xlu0 %v1779_v38, %s5160_s8  ;;  %2164 = vrot.lane.b32.xlu1 %v9556_v48, %s5155_s23 }
 0x2bc   : > { %v6962_v3 = vpop.permute.xlu0 %677 }
 0x2bd   : > { %v1852_v12 = vpop.permute.xlu1 %1851  ;;  %v1985_v45 = vadd.f32 %v6508_v63, %v1937_v1  ;;  %v1986_v0 = vadd.f32 %v6508_v63, %v1938_v51  ;;  %v9571_v63 = vld [vmem:[#allocation33_spill] sm:$0xff] }
 0x2be   : > { %v1895_v60 = vsel %vm1885_vm7, %v6656_v27, %v1852_v12  ;;  %v1896_v49 = vsel %vm1885_vm7, %v1852_v12, %v6947_v28  ;;  %v332_v28 = vmul.f32 %v9573_v35, %v9574_v46 }
 0x2bf   : > { %v1943_v52 = vadd.f32 %v1895_v60, %v1742_v33  ;;  %v1944_v24 = vadd.f32 %v1896_v49, %v1743_v29  ;;  %2162 = vrot.lane.b32.xlu0 %v9558_v7, %s5155_s23  ;;  %1855 = vrot.lane.b32.xlu1 %v1786_v11, %s5160_s8  ;;  %v2009_v27 = vmax.f32 %v1985_v45, 0.0  ;;  %v2010_v22 = vmax.f32 %v1986_v0, 0.0 }
 0x2c0   : > { %v6975_v13 = vpop.permute.xlu0 %878 }
 0x2c1   : > { %v1991_v39 = vadd.f32 %v6493_v47, %v1943_v52  ;;  %v1992_v53 = vadd.f32 %v6493_v47, %v1944_v24  ;;  %v6979_v37 = vpop.permute.xlu1 %663  ;;  %v9572_v47 = vld [vmem:[#allocation7_spill] sm:$0xff] }
 0x2c2   : > { %v344_v21 = vmul.f32 %v9573_v35, %v9572_v47 }
 0x2c3   : > { %v2015_v32 = vmax.f32 %v1991_v39, 0.0  ;;  %v2016_v30 = vmax.f32 %v1992_v53, 0.0  ;;  %2160 = vrot.lane.b32.xlu1 %v9559_v5, %s5155_s23 }
 0x2c4   : > { %v6983_v38 = vpop.permute.xlu0 %649 }
 0x2c5   : > { %v6985_v43 = vpack.c.bf16 %v2015_v32, %v2009_v27  ;;  %v6987_v25 = vpack.c.bf16 %v2016_v30, %v2010_v22  ;;  %v6989_v56 = vpop.permute.xlu1 %864  ;;  %v7099_v30 = vld [vmem:[#allocation2 + $0x8] ss:$12 sps:$4 sm:$0xff]  }
 0x2c6   : > { %9563 = vst [vmem:[#allocation9_spill] sm:$0xff] %v7099_v30 }
 0x2c7   : > { %9560 = vst [vmem:[#allocation109_spill] sm:$0xff] %v6985_v43  ;;  %2154 = vrot.lane.b32.xlu0 %v6985_v43, %s5155_s23  ;;  %2156 = vrot.lane.b32.xlu1 %v6987_v25, %s5155_s23 }
 0x2c8   : > { %v6995_v23 = vpop.permute.xlu0 %1079 }
 0x2c9   : > { %v6997_v16 = vpop.permute.xlu1 %635 }
 0x2cb   : > { %2152 = vrot.lane.b32.xlu0 %v6696_v9, %s5155_s23  ;;  %2150 = vrot.lane.b32.xlu1 %v6694_v14, %s5155_s23 }
 0x2cc   : > { %v7003_v2 = vpop.permute.xlu0 %850 }
 0x2cd   : > { %v7005_v4 = vpop.permute.xlu1 %1065 }
 0x2cf   : > { %2148 = vrot.lane.b32.xlu0 %v6711_v59, %s5155_s23  ;;  %2119 = vrot.lane.b32.xlu1 %v6926_v50, %s5154_s20 }
 0x2d0   : > { %v7013_v57 = vpop.permute.xlu0 %1280 }
 0x2d1   : > { %v7011_v34 = vpop.permute.xlu1 %836 }
 0x2d3   : > { %2121 = vrot.lane.b32.xlu0 %v6928_v55, %s5154_s20  ;;  %2117 = vrot.lane.b32.xlu1 %v9556_v48, %s5154_s20 }
 0x2d4   : > { %v7025_v1 = vpop.permute.xlu0 %2399 }
 0x2d5   : > { %v7019_v18 = vpop.permute.xlu1 %1266  ;;  %9561 = vst [vmem:[#allocation123_spill] sm:$0xff] %v7025_v1 }
 0x2d7   : > { %2115 = vrot.lane.b32.xlu0 %v9558_v7, %s5154_s20  ;;  %2113 = vrot.lane.b32.xlu1 %v9559_v5, %s5154_s20 }
 0x2d8   : > { %v7050_v26 = vpop.permute.xlu0 %1037 }
 0x2d9   : > { %v2398_v51 = vpop.permute.xlu1 %2397 }
 0x2da   : > { %v2414_v33 = vsel %vm1885_vm7, %v2398_v51, %v7025_v1  ;;  %v9570_v1 = vld [vmem:[#allocation35_spill] sm:$0xff] }
 0x2db   : > { %2107 = vrot.lane.b32.xlu0 %v6985_v43, %s5154_s20  ;;  %2652 = vmatprep.subr.bf16.mxu1 %v2414_v33 }
 0x2dc   : > { %2109 = vrot.lane.b32.xlu1 %v6987_v25, %s5154_s20  ;;  %v7062_v45 = vpop.permute.xlu0 %1467 }
 0x2dd   : > { %v2396_v29 = vpop.permute.xlu1 %2395 }
 0x2de   : > { %v2413_v12 = vsel %vm1885_vm7, %v2396_v29, %v2398_v51  ;;  %v9564_v51 = vmov 0  }
 0x2df   : > { %2105 = vrot.lane.b32.xlu0 %v6696_v9, %s5154_s20  ;;  %2653 = vmatpush1.bf16.msra.mxu1 %v2413_v12 }
 0x2e0   : > { %2103 = vrot.lane.b32.xlu1 %v6694_v14, %s5154_s20  ;;  %v7070_v49 = vpop.permute.xlu0 %1238 }
 0x2e1   : > { %v7052_v11 = vpop.permute.xlu1 %1051 }
 0x2e3   : > { %2101 = vrot.lane.b32.xlu0 %v6711_v59, %s5154_s20 }
 0x2e4   : > { %2072 = vrot.lane.b32.xlu1 %v6926_v50, %s5153_s19  ;;  %v7082_v52 = vpop.permute.xlu0 %1668 }
 0x2e5   : > { %v7064_v60 = vpop.permute.xlu1 %1481 }
 0x2e7   : > { %2074 = vrot.lane.b32.xlu0 %v6928_v55, %s5153_s19 }
 0x2e8   : > { %2070 = vrot.lane.b32.xlu1 %v9556_v48, %s5153_s19 }
 0x2e9   : > { %v7072_v0 = vpop.permute.xlu1 %1252 }
 0x2eb   : > { %2068 = vrot.lane.b32.xlu0 %v9558_v7, %s5153_s19 }
 0x2ec   : > { %2066 = vrot.lane.b32.xlu1 %v9559_v5, %s5153_s19 }
 0x2ed   : > { %v7084_v24 = vpop.permute.xlu1 %1682 }
 0x2ef   : > { %2060 = vrot.lane.b32.xlu0 %v6985_v43, %s5153_s19 }
 0x2f0   : > { %2062 = vrot.lane.b32.xlu1 %v6987_v25, %s5153_s19 }
 0x2f3   : > { %2058 = vrot.lane.b32.xlu0 %v6696_v9, %s5153_s19 }
 0x2f4   : > { %2056 = vrot.lane.b32.xlu1 %v6694_v14, %s5153_s19 }
 0x2f7   : > { %2054 = vrot.lane.b32.xlu0 %v6711_v59, %s5153_s19 }
 0x2f8   : > { %2354 = vrot.lane.b32.xlu1 %v6926_v50, %s5159_s27 }
 0x2fb   : > { %2356 = vrot.lane.b32.xlu0 %v6928_v55, %s5159_s27 }
 0x2fc   : > { %2352 = vrot.lane.b32.xlu1 %v9556_v48, %s5159_s27 }
 0x2ff   : > { %2350 = vrot.lane.b32.xlu0 %v9558_v7, %s5159_s27 }
 0x300   : > { %2348 = vrot.lane.b32.xlu1 %v9559_v5, %s5159_s27 }
 0x303   : > { %2342 = vrot.lane.b32.xlu0 %v6985_v43, %s5159_s27 }
 0x304   : > { %2344 = vrot.lane.b32.xlu1 %v6987_v25, %s5159_s27 }
 0x305   : > { %v2386_v39 = vpop.permute.xlu0 %2385  ;;  %v7090_v53 = vpop.permute.xlu1 %2387 }
 0x306   : > { %9562 = vst [vmem:[#allocation10_spill] sm:$0xff] %v7090_v53  ;;  %v2409_v27 = vsel %vm1885_vm7, %v2386_v39, %v7090_v53 }
 0x307   : > { %2340 = vrot.lane.b32.xlu0 %v6696_v9, %s5159_s27  ;;  %2654 = vmatprep.subr.bf16.mxu1 %v2409_v27  ;;  %v7136_v27 = vld [vmem:[#allocation2 + $0x20] ss:$12 sps:$4 sm:$0xff]  }
 0x308   : > { %2338 = vrot.lane.b32.xlu1 %v6694_v14, %s5159_s27  ;;  %9566 = vst [vmem:[#allocation11_spill] sm:$0xff] %v7136_v27 }
 0x309   : > { %v2384_v22 = vpop.permute.xlu0 %2383  ;;  %v7120_v33 = vpop.permute.xlu1 %1439 }
 0x30a   : > { %v2408_v32 = vsel %vm1885_vm7, %v2384_v22, %v2386_v39 }
 0x30b   : > { %2336 = vrot.lane.b32.xlu0 %v6711_v59, %s5159_s27  ;;  %2655 = vmatpush1.bf16.msra.mxu1 %v2408_v32 }
 0x30c   : > { %2307 = vrot.lane.b32.xlu1 %v6926_v50, %s5158_s26 }
 0x30d   : > { %v7122_v29 = vpop.permute.xlu0 %1453  ;;  %v7128_v12 = vpop.permute.xlu1 %1869 }
 0x30e   : > { %4519 = vmatmul.mubr.msk.bf16.vlgmr.msra.gmra.mxu1 %vm2554_vm8, %v7099_v30  ;;  %9565 = vst [vmem:[#allocation16_spill] sm:$0xff] %v7128_v12  ;;  %v9569_v30 = vld [vmem:[#allocation37_spill] sm:$0xff] }
 0x30f   : > { %2309 = vrot.lane.b32.xlu0 %v6928_v55, %s5158_s26  ;;  %2682 = vmatprep.mubr.bf16.mxu1 %v9564_v51  ;;  %v502_v53 = vsel %vm478_vm0, %v9496_v6, %v9569_v30  ;;  %v9577_v6 = vld [vmem:[#allocation94_spill] sm:$0xff] }
 0x310   : > { %2305 = vrot.lane.b32.xlu1 %v9556_v48, %s5158_s26  ;;  %v703_v30 = vsel %vm679_vm1, %v9577_v6, %v6962_v3  ;;  %v9582_v6 = vld [vmem:[#allocation30_spill] sm:$0xff] }
 0x311   : > { %v7130_v39 = vpop.permute.xlu0 %1883  ;;  %v7144_v22 = vpop.permute.xlu1 %1640 }
 0x312   : > { %9567 = vst [vmem:[#allocation12_spill] sm:$0xff] %v7144_v22  ;;  %v9576_v22 = vld [vmem:[#allocation5_spill] sm:$0xff] }
 0x313   : > { %2303 = vrot.lane.b32.xlu0 %v9558_v7, %s5158_s26  ;;  %v338_v12 = vmul.f32 %v9573_v35, %v9576_v22  ;;  %v7179_v22 = vld [vmem:[#allocation2 + $0x38] ss:$12 sps:$4 sm:$0xff]  }
 0x314   : > { %2301 = vrot.lane.b32.xlu1 %v9559_v5, %s5158_s26 }
 0x315   : > { %v7146_v32 = vpop.permute.xlu0 %1654 }
 0x316   : > { %4520 = vmatmul.mubr.msk.bf16.gmra.mxu1 %vm2554_vm8, %v7136_v27  ;;  %9568 = vst [vmem:[#allocation17_spill] sm:$0xff] %v7146_v32  ;;  %v496_v27 = vsel %vm478_vm0, %v9571_v63, %v9570_v1  ;;  %v550_v63 = vadd.f32 %v502_v53, %v344_v21  ;;  %v9578_v1 = vld [vmem:[#allocation92_spill] sm:$0xff]  ;;  %v9581_v32 = vld [vmem:[#allocation22_spill] sm:$0xff] }
 0x317   : > { %2295 = vrot.lane.b32.xlu0 %v6985_v43, %s5158_s26  ;;  %2692 = vmatprep.mubr.bf16.mxu1 %v9564_v51  ;;  %v697_v47 = vsel %vm679_vm1, %v9578_v1, %v6979_v37  ;;  %v484_v3 = vsel %vm478_vm0, %v9581_v32, %v9580_v10  ;;  %v544_v53 = vadd.f32 %v496_v27, %v338_v12  ;;  %v9584_v37 = vld [vmem:[#allocation113_spill] sm:$0xff]  ;;  %v9585_v10 = vld [vmem:[#allocation111_spill] sm:$0xff] }
 0x318   : > { %2297 = vrot.lane.b32.xlu1 %v6987_v25, %s5158_s26  ;;  %v904_v1 = vsel %vm880_vm2, %v9584_v37, %v6975_v13  ;;  %v898_v32 = vsel %vm880_vm2, %v9585_v10, %v6989_v56  ;;  %v1105_v12 = vsel %vm1081_vm3, %v9522_v20, %v6995_v23  ;;  %v892_v23 = vsel %vm880_vm2, %v9539_v8, %v7003_v2  ;;  %v9588_v37 = vld [vmem:[#allocation79_spill] sm:$0xff] }
 0x319   : > { %v745_v13 = vadd.f32 %v697_v47, %v544_v53  ;;  %v1093_v2 = vsel %vm1081_vm3, %v9548_v61, %v7052_v11  ;;  %v7236_v53 = vld [vmem:[#allocation2 + $0x50] ss:$12 sps:$4 sm:$0xff]   ;;  %v1501_v61 = vsel %vm1483_vm5, %v6544_v36, %v7062_v45 }
 0x31a   : > { %v9589_v36 = vld [vmem:[#allocation71_spill] sm:$0xff] }
 0x31b   : > { %2293 = vrot.lane.b32.xlu0 %v6696_v9, %s5158_s26  ;;  %v946_v20 = vadd.f32 %v898_v32, %v745_v13 }
 0x31c   : > { %2291 = vrot.lane.b32.xlu1 %v6694_v14, %s5158_s26 }
 0x31d   : > { %v9591_v32 = vld [vmem:[#allocation17_spill] sm:$0xff] }
 0x31e   : > { %4521 = vmatmul.mubr.msk.bf16.gmra.mxu1 %vm2554_vm8, %v7179_v22 }
 0x31f   : > { %2289 = vrot.lane.b32.xlu0 %v6711_v59, %s5158_s26  ;;  %2702 = vmatprep.mubr.bf16.mxu1 %v9564_v51 }
 0x320   : > { %2260 = vrot.lane.b32.xlu1 %v6926_v50, %s5157_s25 }
 0x323   : > { %2262 = vrot.lane.b32.xlu0 %v6928_v55, %s5157_s25 }
 0x324   : > { %2258 = vrot.lane.b32.xlu1 %v9556_v48, %s5157_s25  ;;  %v9579_v48 = vld [vmem:[#allocation51_spill] sm:$0xff] }
 0x325   : > { %v326_v46 = vmul.f32 %v9573_v35, %v9579_v48  ;;  %v751_v35 = vadd.f32 %v703_v30, %v550_v63  ;;  %v9587_v30 = vld [vmem:[#allocation126_spill] sm:$0xff] }
 0x326   : > { %v1099_v63 = vsel %vm1081_vm3, %v9587_v30, %v7005_v4  ;;  %v1306_v4 = vsel %vm1282_vm4, %v6447_v42, %v7013_v57  ;;  %4522 = vmatmul.mubr.msk.bf16.gmra.mxu1 %vm2554_vm8, %v7236_v53  ;;  %v7284_v30 = vld [vmem:[#allocation2 + $0x4] ss:$12 sps:$4 sm:$0xff]  }
 0x327   : > { %2256 = vrot.lane.b32.xlu0 %v9558_v7, %s5157_s25  ;;  %v532_v56 = vadd.f32 %v484_v3, %v326_v46  ;;  %v1300_v3 = vsel %vm1282_vm4, %v6427_v40, %v7019_v18  ;;  %v1147_v8 = vadd.f32 %v1099_v63, %v946_v20  ;;  %v1507_v40 = vsel %vm1483_vm5, %v9531_v62, %v7064_v60  ;;  %v9597_v63 = vld [vmem:[#allocation87_spill] sm:$0xff]  ;;  %v9598_v20 = vld [vmem:[#allocation106_spill] sm:$0xff] }
 0x328   : > { %2254 = vrot.lane.b32.xlu1 %v9559_v5, %s5157_s25  ;;  %v1288_v62 = vsel %vm1282_vm4, %v6686_v17, %v7070_v49  ;;  %2745 = vmatprep.mubr.bf16.mxu1 %v7284_v30 }
 0x329   : > { %v7163_v44 = vpop.permute.xlu0 %2168  ;;  %v2167_v7 = vpop.permute.xlu1 %2166  ;;  %2599 = vmatprep.mubr.bf16.mxu0 %v7284_v30 }
 0x32a   : > { %9575 = vst [vmem:[#allocation14_spill] sm:$0xff] %v7163_v44  ;;  %v2181_v5 = vsel %vm880_vm2, %v2167_v7, %v7163_v44  ;;  %v9583_v44 = vld [vmem:[#allocation31_spill] sm:$0xff] }
 0x32b   : > { %2248 = vrot.lane.b32.xlu0 %v6985_v43, %s5157_s25  ;;  %2713 = vmatprep.subr.bf16.mxu1 %v2181_v5  ;;  %v490_v21 = vsel %vm478_vm0, %v9583_v44, %v9582_v6  ;;  %v691_v5 = vsel %vm679_vm1, %v9525_v54, %v6983_v38  ;;  %v952_v38 = vadd.f32 %v904_v1, %v751_v35 }
 0x32c   : > { %2250 = vrot.lane.b32.xlu1 %v6987_v25, %s5157_s25  ;;  %v538_v48 = vadd.f32 %v490_v21, %v332_v28  ;;  %v9586_v28 = vld [vmem:[#allocation44_spill] sm:$0xff]  ;;  %v1708_v1 = vsel %vm1684_vm6, %v9588_v37, %v7084_v24 }
 0x32d   : > { %v7198_v43 = vpop.permute.xlu0 %1841  ;;  %v2165_v44 = vpop.permute.xlu1 %2164  ;;  %v685_v27 = vsel %vm679_vm1, %v9586_v28, %v6997_v16  ;;  %v1153_v16 = vadd.f32 %v1105_v12, %v952_v38 }
 0x32e   : > { %v2180_v54 = vsel %vm880_vm2, %v2165_v44, %v2167_v7  ;;  %v739_v47 = vadd.f32 %v691_v5, %v538_v48  ;;  %v886_v7 = vsel %vm880_vm2, %v9535_v19, %v7011_v34  ;;  %v733_v46 = vadd.f32 %v685_v27, %v532_v56  ;;  %v9590_v5 = vld [vmem:[#allocation74_spill] sm:$0xff]  ;;  %v9595_v27 = vld [vmem:[#allocation103_spill] sm:$0xff] }
 0x32f   : > { %2246 = vrot.lane.b32.xlu0 %v6696_v9, %s5157_s25  ;;  %2714 = vmatpush1.bf16.msra.mxu1 %v2180_v54  ;;  %v1087_v19 = vsel %vm1081_vm3, %v9542_v15, %v7050_v26  ;;  %v1354_v18 = vadd.f32 %v1306_v4, %v1153_v16  ;;  %v1348_v15 = vadd.f32 %v1300_v3, %v1147_v8  ;;  %v9599_v4 = vld [vmem:[#allocation68_spill] sm:$0xff] }
 0x330   : > { %2244 = vrot.lane.b32.xlu1 %v6694_v14, %s5157_s25  ;;  %v940_v42 = vadd.f32 %v892_v23, %v739_v47  ;;  %v934_v57 = vadd.f32 %v886_v7, %v733_v46  ;;  %v1294_v26 = vsel %vm1282_vm4, %v6692_v58, %v7072_v0  ;;  %v1702_v58 = vsel %vm1684_vm6, %v9589_v36, %v7082_v52 }
 0x331   : > { %v2163_v6 = vpop.permute.xlu0 %2162  ;;  %v1856_v21 = vpop.permute.xlu1 %1855  ;;  %v1555_v45 = vadd.f32 %v1507_v40, %v1354_v18  ;;  %v1495_v0 = vsel %vm1483_vm5, %v6812_v41, %v7122_v29  ;;  %v1549_v49 = vadd.f32 %v1501_v61, %v1348_v15  ;;  %v1909_v24 = vsel %vm1885_vm7, %v9590_v5, %v7130_v39  ;;  %v9593_v29 = vld [vmem:[#allocation59_spill] sm:$0xff]  ;;  %v9594_v39 = vld [vmem:[#allocation16_spill] sm:$0xff] }
 0x332   : > { %v2179_v34 = vsel %vm880_vm2, %v2163_v6, %v2165_v44  ;;  %v1135_v11 = vadd.f32 %v1087_v19, %v934_v57  ;;  %v1141_v60 = vadd.f32 %v1093_v2, %v940_v42  ;;  %v1489_v52 = vsel %vm1483_vm5, %v6778_v31, %v7120_v33  ;;  %v9592_v44 = vld [vmem:[#allocation99_spill] sm:$0xff]  ;;  %v9596_v33 = vld [vmem:[#allocation12_spill] sm:$0xff]  ;;  %v9601_v19 = vld [vmem:[#allocation65_spill] sm:$0xff] }
 0x333   : > { %2242 = vrot.lane.b32.xlu0 %v6711_v59, %s5157_s25  ;;  %2567 = vmatprep.subr.bf16.mxu0 %v2179_v34  ;;  %v1756_v10 = vadd.f32 %v1708_v1, %v1555_v45  ;;  %v1696_v41 = vsel %vm1684_vm6, %v9592_v44, %v9591_v32  ;;  %v1750_v12 = vadd.f32 %v1702_v58, %v1549_v49  ;;  %v9602_v57 = vld [vmem:[#allocation122_spill] sm:$0xff] }
 0x334   : > { %2213 = vrot.lane.b32.xlu1 %v6926_v50, %s5156_s24  ;;  %v1342_v48 = vadd.f32 %v1294_v26, %v1141_v60  ;;  %v1336_v13 = vadd.f32 %v1288_v62, %v1135_v11  ;;  %v1903_v54 = vsel %vm1885_vm7, %v9595_v27, %v9594_v39  ;;  %v1690_v47 = vsel %vm1684_vm6, %v9597_v63, %v9596_v33  ;;  %v9604_v26 = vld [vmem:[#allocation119_spill] sm:$0xff]  ;;  %v9606_v58 = vld [vmem:[#allocation62_spill] sm:$0xff] }
 0x335   : > { %v2161_v35 = vpop.permute.xlu1 %2160  ;;  %v1957_v31 = vadd.f32 %v1909_v24, %v1756_v10  ;;  %v1897_v23 = vsel %vm1885_vm7, %v9598_v20, %v1856_v21  ;;  %v1951_v3 = vadd.f32 %v1903_v54, %v1750_v12  ;;  %v9605_v62 = vld [vmem:[#allocation83_spill] sm:$0xff] }
 0x336   : > { %v2178_v17 = vsel %vm880_vm2, %v2161_v35, %v2163_v6  ;;  %v1543_v28 = vadd.f32 %v1495_v0, %v1342_v48  ;;  %v1537_v16 = vadd.f32 %v1489_v52, %v1336_v13  ;;  %v9600_v6 = vld [vmem:[#allocation90_spill] sm:$0xff] }
 0x337   : > { %2215 = vrot.lane.b32.xlu0 %v6928_v55, %s5156_s24  ;;  %2568 = vmatpush1.bf16.msra.mxu0 %v2178_v17  ;;  %v1891_v8 = vsel %vm1885_vm7, %v9600_v6, %v7198_v43  ;;  %v2005_v40 = vadd.f32 %v9602_v57, %v1957_v31  ;;  %v9603_v43 = vld [vmem:[#allocation109_spill] sm:$0xff]  ;;  %v1999_v11 = vadd.f32 %v9604_v26, %v1951_v3 }
 0x338   : > { %2211 = vrot.lane.b32.xlu1 %v9593_v29, %s5156_s24  ;;  %v1744_v46 = vadd.f32 %v1696_v41, %v1543_v28  ;;  %v1738_v21 = vadd.f32 %v1690_v47, %v1537_v16 }
 0x339   : > { %v2155_v38 = vpop.permute.xlu0 %2154  ;;  %v7282_v56 = vpop.permute.xlu1 %2156  ;;  %v2029_v35 = vmax.f32 %v2005_v40, 0.0  ;;  %v2023_v0 = vmax.f32 %v1999_v11, 0.0 }
 0x33a   : > { %v2176_v7 = vsel %vm880_vm2, %v2155_v38, %v7282_v56  ;;  %v1945_v2 = vadd.f32 %v1897_v23, %v1744_v46  ;;  %v1939_v61 = vadd.f32 %v1891_v8, %v1738_v21 }
 0x33b   : > { %2209 = vrot.lane.b32.xlu0 %v9599_v4, %s5156_s24  ;;  %2715 = vmatprep.subr.bf16.mxu1 %v2176_v7  ;;  %v7319_v5 = vpack.c.bf16 %v2029_v35, %v2023_v0  ;;  %v2451_v0 = vld [vmem:[%s9000_s4 + $0x28] sm:$0xff] }
 0x33c   : > { %2207 = vrot.lane.b32.xlu1 %v9601_v19, %s5156_s24  ;;  %v1993_v60 = vadd.f32 %v9605_v62, %v1945_v2  ;;  %v1987_v45 = vadd.f32 %v9606_v58, %v1939_v61 }
 0x33d   : > { %v2153_v34 = vpop.permute.xlu0 %2152  ;;  %v2151_v42 = vpop.permute.xlu1 %2150 }
 0x33e   : > { %v2174_v18 = vsel %vm880_vm2, %v2151_v42, %v2153_v34  ;;  %v2175_v15 = vsel %vm880_vm2, %v2153_v34, %v2155_v38  ;;  %v2017_v17 = vmax.f32 %v1993_v60, 0.0  ;;  %v2011_v52 = vmax.f32 %v1987_v45, 0.0 }
 0x33f   : > { %2201 = vrot.lane.b32.xlu0 %v9603_v43, %s5156_s24  ;;  %2569 = vmatprep.subr.bf16.mxu0 %v2174_v18 }
 0x340   : > { %2203 = vrot.lane.b32.xlu1 %v6987_v25, %s5156_s24  ;;  %2716 = vmatpush1.bf16.msra.mxu1 %v2175_v15  ;;  %v7328_v32 = vpack.c.bf16 %v2017_v17, %v2011_v52 }
 0x341   : > { %v2149_v37 = vpop.permute.xlu0 %2148  ;;  %v2120_v1 = vpop.permute.xlu1 %2119 }
 0x342   : > { %v2173_v36 = vsel %vm880_vm2, %v2149_v37, %v2151_v42 }
 0x343   : > { %2199 = vrot.lane.b32.xlu0 %v6696_v9, %s5156_s24  ;;  %2570 = vmatpush1.bf16.msra.mxu0 %v2173_v36  ;;  %v2450_v36 = vld [vmem:[%s9000_s4 + $0x20] sm:$0xff] }
 0x344   : > { %2197 = vrot.lane.b32.xlu1 %v6694_v14, %s5156_s24 }
 0x345   : > { %v7317_v49 = vpop.permute.xlu0 %2121  ;;  %v2118_v48 = vpop.permute.xlu1 %2117 }
 0x346   : > { %v2134_v24 = vsel %vm679_vm1, %v2120_v1, %v7317_v49  ;;  %v2133_v10 = vsel %vm679_vm1, %v2118_v48, %v2120_v1 }
 0x347   : > { %2195 = vrot.lane.b32.xlu0 %v6711_v59, %s5156_s24  ;;  %2717 = vmatprep.subr.bf16.mxu1 %v2134_v24 }
 0x348   : > { %2170 = vrot.lane.b32.xlu1 %v7319_v5, %s5155_s23  ;;  %2718 = vmatpush1.bf16.msra.mxu1 %v2133_v10 }
 0x349   : > { %v2116_v44 = vpop.permute.xlu0 %2115  ;;  %v2114_v41 = vpop.permute.xlu1 %2113 }
 0x34a   : > { %v2132_v13 = vsel %vm679_vm1, %v2116_v44, %v2118_v48  ;;  %v2131_v12 = vsel %vm679_vm1, %v2114_v41, %v2116_v44  ;;  %v2452_v48 = vld [vmem:[%s9000_s4 + $0x30] sm:$0xff]  ;;  %v2453_v44 = vld [vmem:[%s9000_s4 + $0x38] sm:$0xff] }
 0x34b   : > { %2158 = vrot.lane.b32.xlu0 %v7328_v32, %s5155_s23  ;;  %2571 = vmatprep.subr.bf16.mxu0 %v2132_v13 }
 0x34c   : > { %2123 = vrot.lane.b32.xlu1 %v7319_v5, %s5154_s20  ;;  %2572 = vmatpush1.bf16.msra.mxu0 %v2131_v12 }
 0x34d   : > { %v2108_v28 = vpop.permute.xlu0 %2107 }
 0x34e   : > { %v7336_v39 = vpop.permute.xlu1 %2109 }
 0x34f   : > { %2111 = vrot.lane.b32.xlu0 %v7328_v32, %s5154_s20  ;;  %v2129_v27 = vsel %vm679_vm1, %v2108_v28, %v7336_v39 }
 0x350   : > { %2076 = vrot.lane.b32.xlu1 %v7319_v5, %s5153_s19  ;;  %2719 = vmatprep.subr.bf16.mxu1 %v2129_v27 }
 0x351   : > { %v2106_v54 = vpop.permute.xlu0 %2105 }
 0x352   : > { %v2104_v38 = vpop.permute.xlu1 %2103  ;;  %v2128_v31 = vsel %vm679_vm1, %v2106_v54, %v2108_v28 }
 0x353   : > { %2064 = vrot.lane.b32.xlu0 %v7328_v32, %s5153_s19  ;;  %v2127_v33 = vsel %vm679_vm1, %v2104_v38, %v2106_v54  ;;  %2720 = vmatpush1.bf16.msra.mxu1 %v2128_v31 }
 0x354   : > { %2401 = vrot.lane.b32.xlu1 %v6926_v50, %s5160_s8  ;;  %2573 = vmatprep.subr.bf16.mxu0 %v2127_v33 }
 0x355   : > { %v2102_v63 = vpop.permute.xlu0 %2101 }
 0x356   : > { %v2073_v47 = vpop.permute.xlu1 %2072  ;;  %v2126_v20 = vsel %vm679_vm1, %v2102_v63, %v2104_v38 }
 0x357   : > { %2403 = vrot.lane.b32.xlu0 %v6928_v55, %s5160_s8  ;;  %2574 = vmatpush1.bf16.msra.mxu0 %v2126_v20 }
 0x358   : > { %2389 = vrot.lane.b32.xlu1 %v9603_v43, %s5160_s8 }
 0x359   : > { %v7355_v23 = vpop.permute.xlu0 %2074 }
 0x35a   : > { %v2071_v7 = vpop.permute.xlu1 %2070  ;;  %v2087_v16 = vsel %vm478_vm0, %v2073_v47, %v7355_v23 }
 0x35b   : > { %2391 = vrot.lane.b32.xlu0 %v6987_v25, %s5160_s8  ;;  %2721 = vmatprep.subr.bf16.mxu1 %v2087_v16  ;;  %v2086_v46 = vsel %vm478_vm0, %v2071_v7, %v2073_v47 }
 0x35c   : > { %2358 = vrot.lane.b32.xlu1 %v7319_v5, %s5159_s27  ;;  %2722 = vmatpush1.bf16.msra.mxu1 %v2086_v46 }
 0x35d   : > { %v2069_v3 = vpop.permute.xlu0 %2068 }
 0x35e   : > { %v2067_v6 = vpop.permute.xlu1 %2066  ;;  %v2085_v8 = vsel %vm478_vm0, %v2069_v3, %v2071_v7 }
 0x35f   : > { %2346 = vrot.lane.b32.xlu0 %v7328_v32, %s5159_s27  ;;  %2575 = vmatprep.subr.bf16.mxu0 %v2085_v8  ;;  %v2084_v21 = vsel %vm478_vm0, %v2067_v6, %v2069_v3 }
 0x360   : > { %2311 = vrot.lane.b32.xlu1 %v7319_v5, %s5158_s26  ;;  %2576 = vmatpush1.bf16.msra.mxu0 %v2084_v21 }
 0x361   : > { %v2061_v2 = vpop.permute.xlu0 %2060 }
 0x362   : > { %v7370_v34 = vpop.permute.xlu1 %2062 }
 0x363   : > { %2299 = vrot.lane.b32.xlu0 %v7328_v32, %s5158_s26  ;;  %v2082_v42 = vsel %vm478_vm0, %v2061_v2, %v7370_v34 }
 0x364   : > { %2264 = vrot.lane.b32.xlu1 %v7319_v5, %s5157_s25  ;;  %2723 = vmatprep.subr.bf16.mxu1 %v2082_v42 }
 0x365   : > { %v2059_v57 = vpop.permute.xlu0 %2058 }
 0x366   : > { %v2057_v40 = vpop.permute.xlu1 %2056  ;;  %v2081_v18 = vsel %vm478_vm0, %v2059_v57, %v2061_v2 }
 0x367   : > { %2252 = vrot.lane.b32.xlu0 %v7328_v32, %s5157_s25  ;;  %v2080_v15 = vsel %vm478_vm0, %v2057_v40, %v2059_v57  ;;  %2724 = vmatpush1.bf16.msra.mxu1 %v2081_v18 }
 0x368   : > { %2217 = vrot.lane.b32.xlu1 %v7319_v5, %s5156_s24  ;;  %2577 = vmatprep.subr.bf16.mxu0 %v2080_v15 }
 0x369   : > { %2725 = vmatprep.subr.bf16.mxu1 %v6926_v50  ;;  %v2055_v61 = vpop.permute.xlu0 %2054  ;;  %v2446_v50 = vld [vmem:[%s9000_s4] sm:$0xff] }
 0x36a   : > { %v2355_v26 = vpop.permute.xlu1 %2354  ;;  %v2079_v11 = vsel %vm478_vm0, %v2055_v61, %v2057_v40 }
 0x36b   : > { %2405 = vrot.lane.b32.xlu0 %v7319_v5, %s5160_s8  ;;  %2578 = vmatpush1.bf16.msra.mxu0 %v2079_v11 }
 0x36c   : > { %2205 = vrot.lane.b32.xlu1 %v7328_v32, %s5156_s24  ;;  %2726 = vmatpush1.bf16.msra.mxu1 %v9593_v29  ;;  %v2447_v29 = vld [vmem:[%s9000_s4 + $0x8] sm:$0xff] }
 0x36d   : > { %2579 = vmatprep.subr.bf16.mxu0 %v9599_v4  ;;  %2727 = vmatprep.subr.bf16.mxu1 %v9603_v43  ;;  %v7393_v62 = vpop.permute.xlu0 %2356  ;;  %v2448_v43 = vld [vmem:[%s9000_s4 + $0x10] sm:$0xff] }
 0x36e   : > { %v2353_v60 = vpop.permute.xlu1 %2352  ;;  %v2369_v37 = vsel %vm1684_vm6, %v2355_v26, %v7393_v62 }
 0x36f   : > { %2393 = vrot.lane.b32.xlu0 %v7328_v32, %s5160_s8  ;;  %2580 = vmatpush1.bf16.msra.mxu0 %v9601_v19 }
 0x370   : > { %2456 = vperm.xlu1 %4720, %v2446_v50   ;;  %2728 = vmatpush1.bf16.msra.mxu1 %v6696_v9  ;;  %v2368_v9 = vsel %vm1684_vm6, %v2353_v60, %v2355_v26 }
 0x371   : > { %2581 = vmatprep.subr.bf16.mxu0 %v6694_v14  ;;  %2729 = vmatprep.subr.bf16.mxu1 %v2369_v37  ;;  %v2351_v4 = vpop.permute.xlu0 %2350  ;;  %v2449_v14 = vld [vmem:[%s9000_s4 + $0x18] sm:$0xff] }
 0x372   : > { %v2349_v1 = vpop.permute.xlu1 %2348  ;;  %v2367_v35 = vsel %vm1684_vm6, %v2351_v4, %v2353_v60 }
 0x373   : > { %2461 = vperm.xlu0 %4718, %v2447_v29   ;;  %2582 = vmatpush1.bf16.msra.mxu0 %v6711_v59  ;;  %v2366_v45 = vsel %vm1684_vm6, %v2349_v1, %v2351_v4 }
 0x374   : > { %2466 = vperm.xlu1 %4720, %v2448_v43   ;;  %2730 = vmatpush2.bf16.msra.mxu1 %v2368_v9 }
 0x375   : > { %2583 = vmatprep.subr.bf16.mxu0 %v2367_v35  ;;  %v2343_v19 = vpop.permute.xlu0 %2342 }
 0x376   : > { %v7420_v58 = vpop.permute.xlu1 %2344 }
 0x377   : > { %2471 = vperm.xlu0 %4718, %v2449_v14   ;;  %2584 = vmatpush2.bf16.msra.mxu0 %v2366_v45  ;;  %v2364_v59 = vsel %vm1684_vm6, %v2343_v19, %v7420_v58 }
 0x378   : > { %2476 = vperm.xlu1 %4720, %v2450_v36   ;;  %2731 = vmatprep.subr.bf16.mxu1 %v2364_v59 }
 0x379   : > { %v2341_v17 = vpop.permute.xlu0 %2340 }
 0x37a   : > { %v2339_v24 = vpop.permute.xlu1 %2338  ;;  %v2363_v10 = vsel %vm1684_vm6, %v2341_v17, %v2343_v19 }
 0x37b   : > { %2481 = vperm.xlu0 %4718, %v2451_v0   ;;  %v2362_v52 = vsel %vm1684_vm6, %v2339_v24, %v2341_v17  ;;  %2732 = vmatpush2.bf16.msra.mxu1 %v2363_v10 }
 0x37c   : > { %2486 = vperm.xlu1 %4720, %v2452_v48   ;;  %2585 = vmatprep.subr.bf16.mxu0 %v2362_v52 }
 0x37d   : > { %v2337_v41 = vpop.permute.xlu0 %2336 }
 0x37e   : > { %v2308_v13 = vpop.permute.xlu1 %2307  ;;  %v2361_v12 = vsel %vm1684_vm6, %v2337_v41, %v2339_v24 }
 0x37f   : > { %2491 = vperm.xlu0 %4718, %v2453_v44   ;;  %2586 = vmatpush2.bf16.msra.mxu0 %v2361_v12 }
 0x381   : > { %v7437_v28 = vpop.permute.xlu0 %2309 }
 0x382   : > { %v2306_v27 = vpop.permute.xlu1 %2305  ;;  %v2322_v54 = vsel %vm1483_vm5, %v2308_v13, %v7437_v28 }
 0x383   : > { %2733 = vmatprep.subr.bf16.mxu1 %v2322_v54  ;;  %v2321_v38 = vsel %vm1483_vm5, %v2306_v27, %v2308_v13  ;;  %v7477_v54 = vld [vmem:[#allocation2] ss:$12 sps:$4 sm:$0xff]  }
 0x384   : > { %2734 = vmatpush2.bf16.msra.mxu1 %v2321_v38 }
 0x385   : > { %v2304_v31 = vpop.permute.xlu0 %2303 }
 0x386   : > { %v2302_v33 = vpop.permute.xlu1 %2301  ;;  %v2320_v63 = vsel %vm1483_vm5, %v2304_v31, %v2306_v27 }
 0x387   : > { %2587 = vmatprep.subr.bf16.mxu0 %v2320_v63  ;;  %v2319_v47 = vsel %vm1483_vm5, %v2302_v33, %v2304_v31  ;;  %v7480_v31 = vld [vmem:[#allocation2 + $0x1c] ss:$12 sps:$4 sm:$0xff]  }
 0x388   : > { %2588 = vmatpush2.bf16.msra.mxu0 %v2319_v47 }
 0x389   : > { %v2296_v20 = vpop.permute.xlu0 %2295 }
 0x38a   : > { %v7444_v7 = vpop.permute.xlu1 %2297 }
 0x38b   : > { %v2317_v16 = vsel %vm1483_vm5, %v2296_v20, %v7444_v7 }
 0x38c   : > { %2735 = vmatprep.subr.bf16.mxu1 %v2317_v16 }
 0x38d   : > { %v2294_v46 = vpop.permute.xlu0 %2293 }
 0x38e   : > { %v2292_v3 = vpop.permute.xlu1 %2291  ;;  %v2316_v6 = vsel %vm1483_vm5, %v2294_v46, %v2296_v20  ;;  %v9607_v20 = vld [vmem:[#allocation14_spill] sm:$0xff] }
 0x38f   : > { %v2315_v8 = vsel %vm1483_vm5, %v2292_v3, %v2294_v46  ;;  %2736 = vmatpush2.bf16.msra.mxu1 %v2316_v6 }
 0x390   : > { %2589 = vmatprep.subr.bf16.mxu0 %v2315_v8  ;;  %v7490_v8 = vld [vmem:[#allocation2 + $0x18] ss:$12 sps:$4 sm:$0xff]  }
 0x391   : > { %v2290_v21 = vpop.permute.xlu0 %2289 }
 0x392   : > { %v2261_v2 = vpop.permute.xlu1 %2260  ;;  %v2314_v42 = vsel %vm1483_vm5, %v2290_v21, %v2292_v3  ;;  %v7493_v21 = vld [vmem:[#allocation2 + $0x34] ss:$12 sps:$4 sm:$0xff]  }
 0x393   : > { %2590 = vmatpush2.bf16.msra.mxu0 %v2314_v42 }
 0x395   : > { %v7451_v57 = vpop.permute.xlu0 %2262 }
 0x396   : > { %v2259_v40 = vpop.permute.xlu1 %2258  ;;  %v2275_v18 = vsel %vm1282_vm4, %v2261_v2, %v7451_v57 }
 0x397   : > { %v2274_v15 = vsel %vm1282_vm4, %v2259_v40, %v2261_v2  ;;  %2737 = vmatprep.subr.bf16.mxu1 %v2275_v18 }
 0x398   : > { %2738 = vmatpush2.bf16.msra.mxu1 %v2274_v15  ;;  %v7500_v15 = vld [vmem:[#allocation2 + $0x30] ss:$12 sps:$4 sm:$0xff]  }
 0x399   : > { %v2257_v61 = vpop.permute.xlu0 %2256 }
 0x39a   : > { %v2255_v26 = vpop.permute.xlu1 %2254  ;;  %v2273_v11 = vsel %vm1282_vm4, %v2257_v61, %v2259_v40 }
 0x39b   : > { %2591 = vmatprep.subr.bf16.mxu0 %v2273_v11  ;;  %v2272_v50 = vsel %vm1282_vm4, %v2255_v26, %v2257_v61  ;;  %v7505_v26 = vld [vmem:[#allocation2 + $0x4c] ss:$12 sps:$4 sm:$0xff]  }
 0x39c   : > { %2592 = vmatpush2.bf16.msra.mxu0 %v2272_v50 }
 0x39d   : > { %v2249_v60 = vpop.permute.xlu0 %2248 }
 0x39e   : > { %v7458_v37 = vpop.permute.xlu1 %2250 }
 0x39f   : > { %v2270_v29 = vsel %vm1282_vm4, %v2249_v60, %v7458_v37 }
 0x3a0   : > { %2739 = vmatprep.subr.bf16.mxu1 %v2270_v29 }
 0x3a1   : > { %v2247_v4 = vpop.permute.xlu0 %2246 }
 0x3a2   : > { %v2269_v43 = vsel %vm1282_vm4, %v2247_v4, %v2249_v60  ;;  %v2245_v1 = vpop.permute.xlu1 %2244  ;;  %v9608_v60 = vld [vmem:[#allocation123_spill] sm:$0xff] }
 0x3a3   : > { %v2268_v35 = vsel %vm1282_vm4, %v2245_v1, %v2247_v4  ;;  %2740 = vmatpush2.bf16.msra.mxu1 %v2269_v43 }
 0x3a4   : > { %2593 = vmatprep.subr.bf16.mxu0 %v2268_v35  ;;  %v9609_v35 = vld [vmem:[#allocation10_spill] sm:$0xff] }
 0x3a5   : > { %v2243_v9 = vpop.permute.xlu0 %2242 }
 0x3a6   : > { %v2214_v14 = vpop.permute.xlu1 %2213  ;;  %v2267_v19 = vsel %vm1282_vm4, %v2243_v9, %v2245_v1  ;;  %v7516_v1 = vld [vmem:[#allocation2 + $0x48] ss:$12 sps:$4 sm:$0xff]  }
 0x3a7   : > { %2594 = vmatpush2.bf16.msra.mxu0 %v2267_v19 }
 0x3a9   : > { %v7465_v36 = vpop.permute.xlu0 %2215 }
 0x3aa   : > { %v2212_v45 = vpop.permute.xlu1 %2211  ;;  %v2228_v59 = vsel %vm1081_vm3, %v2214_v14, %v7465_v36 }
 0x3ab   : > { %v2227_v0 = vsel %vm1081_vm3, %v2212_v45, %v2214_v14  ;;  %2741 = vmatprep.subr.bf16.mxu1 %v2228_v59  ;;  %v9610_v59 = vld [vmem:[#allocation9_spill] sm:$0xff] }
 0x3ac   : > { %2742 = vmatpush2.bf16.msra.mxu1 %v2227_v0 }
 0x3ad   : > { %v2210_v17 = vpop.permute.xlu0 %2209 }
 0x3ae   : > { %v2208_v48 = vpop.permute.xlu1 %2207  ;;  %v2226_v24 = vsel %vm1081_vm3, %v2210_v17, %v2212_v45 }
 0x3af   : > { %2595 = vmatprep.subr.bf16.mxu0 %v2226_v24  ;;  %v2225_v10 = vsel %vm1081_vm3, %v2208_v48, %v2210_v17  ;;  %v9611_v48 = vld [vmem:[#allocation11_spill] sm:$0xff] }
 0x3b0   : > { %2596 = vmatpush2.bf16.msra.mxu0 %v2225_v10 }
 0x3b1   : > { %v2202_v52 = vpop.permute.xlu0 %2201 }
 0x3b2   : > { %v7472_v44 = vpop.permute.xlu1 %2203 }
 0x3b3   : > { %v2223_v41 = vsel %vm1081_vm3, %v2202_v52, %v7472_v44 }
 0x3b4   : > { %2743 = vmatprep.subr.bf16.mxu1 %v2223_v41 }
 0x3b5   : > { %v2200_v13 = vpop.permute.xlu0 %2199 }
 0x3b6   : > { %v2222_v12 = vsel %vm1081_vm3, %v2200_v13, %v2202_v52  ;;  %v2198_v27 = vpop.permute.xlu1 %2197 }
 0x3b7   : > { %v2221_v38 = vsel %vm1081_vm3, %v2198_v27, %v2200_v13  ;;  %2744 = vmatpush2.bf16.msra.mxu1 %v2222_v12 }
 0x3b8   : > { %2597 = vmatprep.subr.bf16.mxu0 %v2221_v38 }
 0x3b9   : > { %v2196_v33 = vpop.permute.xlu0 %2195 }
 0x3ba   : > { %v2171_v63 = vpop.permute.xlu1 %2170  ;;  %2746 = vmatmul.mubr.bf16.vlgmr.msra.gmra.mxu1 %v7477_v54  ;;  %v2220_v47 = vsel %vm1081_vm3, %v2196_v33, %v2198_v27 }
 0x3bb   : > { %v2182_v16 = vsel %vm880_vm2, %v9607_v20, %v2171_v63  ;;  %2859 = vmatprep.subr.bf16.mxu1 %v2171_v63  ;;  %2598 = vmatpush2.bf16.msra.mxu0 %v2220_v47 }
 0x3bc   : > { %2860 = vmatpush1.bf16.msra.mxu1 %v2182_v16  ;;  %2755 = vmatprep.mubr.bf16.mxu1 %v7480_v31 }
 0x3bd   : > { %v2159_v46 = vpop.permute.xlu0 %2158 }
 0x3be   : > { %v2177_v3 = vsel %vm880_vm2, %v7282_v56, %v2159_v46  ;;  %v2124_v6 = vpop.permute.xlu1 %2123  ;;  %2600 = vmatmul.mubr.bf16.vlgmr.msra.gmra.mxu0 %v7477_v54  ;;  %2861 = vmatprep.subr.bf16.mxu1 %v2159_v46 }
 0x3bf   : > { %2609 = vmatprep.mubr.bf16.mxu0 %v7480_v31  ;;  %v2135_v40 = vsel %vm679_vm1, %v7317_v49, %v2124_v6 }
 0x3c0   : > { %2862 = vmatpush1.bf16.msra.mxu1 %v2177_v3 }
 0x3c1   : > { %2863 = vmatprep.subr.bf16.mxu1 %v2124_v6  ;;  %v2112_v2 = vpop.permute.xlu0 %2111 }
 0x3c2   : > { %v2077_v42 = vpop.permute.xlu1 %2076  ;;  %2756 = vmatmul.mubr.bf16.gmra.mxu1 %v7490_v8  ;;  %v2130_v61 = vsel %vm679_vm1, %v7336_v39, %v2112_v2 }
 0x3c3   : > { %2765 = vmatprep.mubr.bf16.mxu1 %v7493_v21  ;;  %v2088_v50 = vsel %vm478_vm0, %v7355_v23, %v2077_v42 }
 0x3c4   : > { %2864 = vmatpush1.bf16.msra.mxu1 %v2135_v40 }
 0x3c5   : > { %2865 = vmatprep.subr.bf16.mxu1 %v2112_v2  ;;  %v2065_v56 = vpop.permute.xlu0 %2064 }
 0x3c6   : > { %v2402_v18 = vpop.permute.xlu1 %2401  ;;  %2610 = vmatmul.mubr.bf16.gmra.mxu0 %v7490_v8  ;;  %v2083_v23 = vsel %vm478_vm0, %v7370_v34, %v2065_v56 }
 0x3c7   : > { %2619 = vmatprep.mubr.bf16.mxu0 %v7493_v21  ;;  %v2415_v29 = vsel %vm1885_vm7, %v9608_v60, %v2402_v18 }
 0x3c8   : > { %2866 = vmatpush1.bf16.msra.mxu1 %v2130_v61 }
 0x3c9   : > { %2867 = vmatprep.subr.bf16.mxu1 %v2077_v42  ;;  %v2404_v49 = vpop.permute.xlu0 %2403 }
 0x3ca   : > { %2766 = vmatmul.mubr.bf16.gmra.mxu1 %v7500_v15  ;;  %v2416_v11 = vsel %vm1885_vm7, %v2402_v18, %v2404_v49  ;;  %v2390_v39 = vpop.permute.xlu1 %2389 }
 0x3cb   : > { %2798 = vmatprep.subr.bf16.mxu0 %v2416_v11  ;;  %2775 = vmatprep.mubr.bf16.mxu1 %v7505_v26  ;;  %v2410_v9 = vsel %vm1885_vm7, %v9609_v35, %v2390_v39 }
 0x3cc   : > { %2868 = vmatpush1.bf16.msra.mxu1 %v2088_v50  ;;  %2799 = vmatpush1.bf16.msra.mxu0 %v2415_v29 }
 0x3cd   : > { %2869 = vmatprep.subr.bf16.mxu1 %v2065_v56  ;;  %v2392_v4 = vpop.permute.xlu0 %2391 }
 0x3ce   : > { %2620 = vmatmul.mubr.bf16.gmra.mxu0 %v7500_v15  ;;  %v2411_v43 = vsel %vm1885_vm7, %v2390_v39, %v2392_v4  ;;  %v2359_v19 = vpop.permute.xlu1 %2358 }
 0x3cf   : > { %2800 = vmatprep.subr.bf16.mxu0 %v2411_v43  ;;  %2629 = vmatprep.mubr.bf16.mxu0 %v7505_v26 }
 0x3d0   : > { %2870 = vmatpush1.bf16.msra.mxu1 %v2083_v23  ;;  %2801 = vmatpush1.bf16.msra.mxu0 %v2410_v9 }
 0x3d1   : > { %2871 = vmatprep.subr.bf16.mxu1 %v7319_v5  ;;  %v2347_v14 = vpop.permute.xlu0 %2346  ;;  %v2370_v5 = vsel %vm1684_vm6, %v7393_v62, %v2359_v19 }
 0x3d2   : > { %2776 = vmatmul.mubr.bf16.gmra.mxu1 %v7516_v1 }
 0x3d3   : > { %2891 = vmatprep.mubr.bf16.mxu1 %v7284_v30 }
 0x3d4   : > { %2872 = vmatpush1.bf16.msra.mxu1 %v6928_v55 }
 0x3d5   : > { %2873 = vmatprep.subr.bf16.mxu1 %v7328_v32  ;;  %v2300_v34 = vpop.permute.xlu0 %2299  ;;  %v2365_v32 = vsel %vm1684_vm6, %v7420_v58, %v2347_v14 }
 0x3d6   : > { %2630 = vmatmul.mubr.bf16.gmra.mxu0 %v7516_v1  ;;  %v2318_v58 = vsel %vm1483_vm5, %v7444_v7, %v2300_v34 }
 0x3d7   : > { %2818 = vmatprep.mubr.bf16.mxu0 %v9564_v51 }
 0x3d8   : > { %2874 = vmatpush1.bf16.msra.mxu1 %v6987_v25  ;;  %v2312_v25 = vpop.permute.xlu1 %2311 }
 0x3d9   : > { %2875 = vmatprep.subr.bf16.mxu1 %v2359_v19  ;;  %v2253_v45 = vpop.permute.xlu0 %2252  ;;  %v2323_v17 = vsel %vm1483_vm5, %v7437_v28, %v2312_v25 }
 0x3da   : > { %v2271_v52 = vsel %vm1282_vm4, %v7458_v37, %v2253_v45  ;;  %v2674_v37 = vpop.f32.mrf.mxu1 }
 0x3dc   : > { %2876 = vmatpush2.bf16.msra.mxu1 %v2370_v5  ;;  %v2265_v24 = vpop.permute.xlu1 %2264 }
 0x3dd   : > { %2877 = vmatprep.subr.bf16.mxu1 %v2347_v14  ;;  %v2406_v30 = vpop.permute.xlu0 %2405  ;;  %v2276_v10 = vsel %vm1282_vm4, %v7451_v57, %v2265_v24 }
 0x3de   : > { %v2417_v55 = vsel %vm1885_vm7, %v2404_v49, %v2406_v30  ;;  %4523 = vmatmul.mubr.msk.bf16.vlgmr.msra.gmra.mxu0 %vm2554_vm8, %v9610_v59  ;;  %2944 = vmatprep.subr.bf16.mxu0 %v2406_v30 }
 0x3df   : > { %2945 = vmatpush1.bf16.msra.mxu0 %v2417_v55  ;;  %2828 = vmatprep.mubr.bf16.mxu0 %v9564_v51 }
 0x3e0   : > { %2878 = vmatpush2.bf16.msra.mxu1 %v2365_v32  ;;  %v2218_v28 = vpop.permute.xlu1 %2217 }
 0x3e1   : > { %2879 = vmatprep.subr.bf16.mxu1 %v2312_v25  ;;  %v2394_v0 = vpop.permute.xlu0 %2393  ;;  %v2229_v7 = vsel %vm1081_vm3, %v7465_v36, %v2218_v28  ;;  %v2676_v36 = vpop.f32.mrf.mxu1 }
 0x3e2   : > { %v2412_v62 = vsel %vm1885_vm7, %v2392_v4, %v2394_v0  ;;  %2946 = vmatprep.subr.bf16.mxu0 %v2394_v0 }
 0x3e3   : > { %2947 = vmatpush1.bf16.msra.mxu0 %v2412_v62 }
 0x3e4   : > { %2880 = vmatpush2.bf16.msra.mxu1 %v2323_v17  ;;  %v2206_v41 = vpop.permute.xlu1 %2205 }
 0x3e5   : > { %2881 = vmatprep.subr.bf16.mxu1 %v2300_v34  ;;  %v2224_v57 = vsel %vm1081_vm3, %v7472_v44, %v2206_v41  ;;  %v2678_v44 = vpop.f32.mrf.mxu1 }
 0x3e6   : > { %4524 = vmatmul.mubr.msk.bf16.gmra.mxu0 %vm2554_vm8, %v9611_v48 }
 0x3e7   : > { %2838 = vmatprep.mubr.bf16.mxu0 %v9564_v51  ;;  %v2680_v13 = vpop.f32.mrf.mxu1 }
 0x3e8   : > { %2882 = vmatpush2.bf16.msra.mxu1 %v2318_v58 }
 0x3e9   : > { %2883 = vmatprep.subr.bf16.mxu1 %v2265_v24  ;;  %v7579_v12 = vpop.f32.mrf.mxu1 }
 0x3eb   : > { %v7581_v27 = vpop.f32.mrf.mxu1  ;;  %v7617_v4 = vpop.permute.xlu1 %2456 }
 0x3ec   : > { %2884 = vmatpush2.bf16.msra.mxu1 %v2276_v10 }
 0x3ed   : > { %2885 = vmatprep.subr.bf16.mxu1 %v2253_v45 }
 0x3ee   : > { %4525 = vmatmul.mubr.msk.bf16.gmra.mxu0 %vm2554_vm8, %v7179_v22 }
 0x3ef   : > { %2848 = vmatprep.mubr.bf16.mxu0 %v9564_v51 }
 0x3f0   : > { %2886 = vmatpush2.bf16.msra.mxu1 %v2271_v52 }
 0x3f1   : > { %2887 = vmatprep.subr.bf16.mxu1 %v2218_v28 }
 0x3f4   : > { %2888 = vmatpush2.bf16.msra.mxu1 %v2229_v7 }
 0x3f5   : > { %2889 = vmatprep.subr.bf16.mxu1 %v2206_v41 }
 0x3f6   : > { %4526 = vmatmul.mubr.msk.bf16.gmra.mxu0 %vm2554_vm8, %v7236_v53 }
 0x3f7   : > { %2964 = vmatprep.mubr.bf16.mxu0 %v9564_v51 }
 0x3f8   : > { %2890 = vmatpush2.bf16.msra.mxu1 %v2224_v57 }
 0x3fb   : > { %2892 = vmatmul.mubr.bf16.vlgmr.msra.gmra.mxu1 %v7477_v54  ;;  %v7583_v54 = vpop.f32.mrf.mxu1 }
 0x3fc   : > { %2901 = vmatprep.mubr.bf16.mxu1 %v7480_v31 }
 0x3fd   : > { %v7585_v38 = vpop.f32.mrf.mxu1 }
 0x3fe   : > { %4527 = vmatmul.mubr.msk.bf16.vlgmr.msra.gmra.mxu0 %vm2554_vm8, %v9610_v59 }
 0x3ff   : > { %2974 = vmatprep.mubr.bf16.mxu0 %v9564_v51 }
 0x403   : > { %2902 = vmatmul.mubr.bf16.gmra.mxu1 %v7490_v8 }
 0x404   : > { %2911 = vmatprep.mubr.bf16.mxu1 %v7493_v21 }
 0x406   : > { %4528 = vmatmul.mubr.msk.bf16.gmra.mxu0 %vm2554_vm8, %v9611_v48  ;;  %v7642_v48 = vpop.permute.xlu1 %2466 }
 0x407   : > { %2984 = vmatprep.mubr.bf16.mxu0 %v9564_v51 }
 0x40b   : > { %2912 = vmatmul.mubr.bf16.gmra.mxu1 %v7500_v15 }
 0x40c   : > { %2921 = vmatprep.mubr.bf16.mxu1 %v7505_v26 }
 0x40e   : > { %4529 = vmatmul.mubr.msk.bf16.gmra.mxu0 %vm2554_vm8, %v7179_v22  ;;  %v7587_v22 = vpop.f32.mrf.mxu1 }
 0x40f   : > { %2994 = vmatprep.mubr.bf16.mxu0 %v9564_v51 }
 0x410   : > { %v7589_v51 = vpop.f32.mrf.mxu1 }
 0x412   : > { %v7591_v31 = vpop.f32.mrf.mxu1 }
 0x413   : > { %2922 = vmatmul.mubr.bf16.gmra.mxu1 %v7516_v1  ;;  %v7621_v1 = vpop.permute.xlu0 %2461 }
 0x414   : > { %v7593_v33 = vpop.f32.mrf.mxu1 }
 0x416   : > { %4530 = vmatmul.mubr.msk.bf16.gmra.mxu0 %vm2554_vm8, %v7236_v53  ;;  %v7595_v53 = vpop.f32.mrf.mxu1 }
 0x417   : > { %v7652_v7 = vpop.permute.xlu0 %2471 }
 0x418   : > { %v7597_v63 = vpop.f32.mrf.mxu1 }
 0x41a   : > { %v7599_v47 = vpop.f32.mrf.mxu1 }
 0x41c   : > { %v7601_v20 = vpop.f32.mrf.mxu1 }
 0x47a   : > { %v2747_v16 = vpop.f32.mrf.mxu1 }
 0x47b   : > { %v2748_v19 = vadd.f32 %v2747_v16, %v7617_v4 }
 0x47c   : > { %v2749_v6 = vpop.f32.mrf.mxu1 }
 0x47d   : > { %v2750_v25 = vadd.f32 %v2749_v6, %v7617_v4 }
 0x47e   : > { %v2601_v46 = vpop.f32.mrf.mxu0  ;;  %v2751_v2 = vpop.f32.mrf.mxu1 }
 0x47f   : > { %v2602_v55 = vadd.f32 %v2601_v46, %v7617_v4  ;;  %v2752_v62 = vadd.f32 %v2751_v2, %v7621_v1 }
 0x480   : > { %v2603_v3 = vpop.f32.mrf.mxu0  ;;  %v2753_v56 = vpop.f32.mrf.mxu1 }
 0x481   : > { %v2604_v23 = vadd.f32 %v2603_v3, %v7617_v4  ;;  %v7654_v41 = vadd.f32 %v2674_v37, %v2602_v55  ;;  %v2754_v57 = vadd.f32 %v2753_v56, %v7621_v1 }
 0x482   : > { %v2605_v8 = vpop.f32.mrf.mxu0  ;;  %v2757_v61 = vpop.f32.mrf.mxu1 }
 0x483   : > { %v7630_v45 = vadd.f32 %v2676_v36, %v2604_v23  ;;  %v2606_v5 = vadd.f32 %v2605_v8, %v7621_v1 }
 0x484   : > { %v2607_v21 = vpop.f32.mrf.mxu0  ;;  %v2759_v11 = vpop.f32.mrf.mxu1 }
 0x485   : > { %v2608_v9 = vadd.f32 %v2607_v21, %v7621_v1  ;;  %v9179_v58 = vmax.f32 %v7630_v45, 0.0  ;;  %v7645_v24 = vadd.f32 %v2678_v44, %v2606_v5  ;;  %v2758_v21 = vadd.f32 %v2757_v61, %v7642_v48 }
 0x486   : > { %v7603_v42 = vpop.f32.mrf.mxu0  ;;  %v2761_v29 = vpop.f32.mrf.mxu1  ;;  %v2760_v23 = vadd.f32 %v2759_v11, %v7642_v48 }
 0x487   : > { %v7636_v59 = vadd.f32 %v2680_v13, %v2608_v9  ;;  %v9177_v8 = vmax.f32 %v7645_v24, 0.0 }
 0x488   : > { %v2613_v40 = vpop.f32.mrf.mxu0  ;;  %v2763_v35 = vpop.f32.mrf.mxu1 }
 0x489   : > { %v9175_v36 = vmax.f32 %v7636_v59, 0.0  ;;  %v2614_v13 = vadd.f32 %v2613_v40, %v7642_v48 }
 0x48a   : > { %v7605_v18 = vpop.f32.mrf.mxu0  ;;  %v7633_v30 = vpop.f32.mrf.mxu1 }
 0x48b   : > { %v7681_v9 = vadd.f32 %v7581_v27, %v2614_v13  ;;  %v2764_v13 = vadd.f32 %v2763_v35, %v7652_v7 }
 0x48c   : > { %v2617_v15 = vpop.f32.mrf.mxu0  ;;  %v7647_v10 = vpop.f32.mrf.mxu1 }
 0x48d   : > { %v2618_v44 = vadd.f32 %v2617_v15, %v7652_v7  ;;  %v9176_v15 = vmax.f32 %v7654_v41, 0.0 }
 0x48e   : > { %v7607_v26 = vpop.f32.mrf.mxu0  ;;  %v7669_v2 = vpop.f32.mrf.mxu1 }
 0x48f   : > { %v7684_v61 = vadd.f32 %v7585_v38, %v2618_v44  ;;  %v4736_v27 = vpack.i.bf16 %v9177_v8, %v9176_v15 }
 0x490   : > { %v7609_v49 = vpop.f32.mrf.mxu0  ;;  %v7696_v11 = vpop.f32.mrf.mxu1 }
 0x491   : > { %v9169_v44 = vmax.f32 %v7684_v61, 0.0 }
 0x492   : > { %v7611_v50 = vpop.f32.mrf.mxu0 }
 0x494   : > { %v7613_v60 = vpop.f32.mrf.mxu0 }
 0x496   : > { %v7615_v39 = vpop.f32.mrf.mxu0 }
 0x498   : > { %v7619_v43 = vpop.f32.mrf.mxu0 }
 0x49a   : > { %v7625_v14 = vpop.f32.mrf.mxu0 }
 0x49c   : > { %v7627_v34 = vpop.f32.mrf.mxu0 }
 0x49e   : > { %v2820_v32 = vpop.f32.mrf.mxu0 }
 0x49f   : > { %v7639_v0 = vadd.f32 %v2820_v32, %v2748_v19 }
 0x4a0   : > { %v2822_v17 = vpop.f32.mrf.mxu0 }
 0x4a1   : > { %v9178_v28 = vmax.f32 %v7639_v0, 0.0  ;;  %v7650_v52 = vadd.f32 %v2822_v17, %v2750_v25  ;;  %v2762_v25 = vadd.f32 %v2761_v29, %v7652_v7 }
 0x4a2   : > { %v2824_v16 = vpop.f32.mrf.mxu0 }
 0x4a3   : > { %9612 = vst [vmem:[#allocation13_spill] sm:$0xff] %v7650_v52  ;;  %v4721_v46 = vpack.i.bf16 %v9178_v28, %v9179_v58  ;;  %v9166_v3 = vmax.f32 %v7650_v52, 0.0  ;;  %v7665_v6 = vadd.f32 %v2824_v16, %v2752_v62  ;;  %v9170_v16 = vmax.f32 %v7681_v9, 0.0  ;;  %v7758_v58 = vpop.permute.xlu1 %2476 }
 0x4a4   : > { %v2826_v37 = vpop.f32.mrf.mxu0 }
 0x4a5   : > { %v4726_v40 = vpack.i.bf16 %v9175_v36, %v9166_v3  ;;  %v7675_v56 = vadd.f32 %v2826_v37, %v2754_v57  ;;  %4722 = vrot.lane.b32.xlu1 %v4721_v46, %s5153_s19  ;;  %v9174_v5 = vmax.f32 %v7665_v6, 0.0 }
 0x4a6   : > { %v2830_v19 = vpop.f32.mrf.mxu0 }
 0x4a7   : > { %9613 = vst [vmem:[#allocation15_spill] sm:$0xff] %v7675_v56  ;;  %v9168_v55 = vmax.f32 %v7675_v56, 0.0  ;;  %v7688_v32 = vadd.f32 %v2830_v19, %v2758_v21  ;;  %4727 = vrot.lane.b32.xlu0 %v4726_v40, %s5153_s19  ;;  %v7713_v40 = vpop.f32.mrf.mxu1 }
 0x4a8   : > { %v2832_v62 = vpop.f32.mrf.mxu0 }
 0x4a9   : > { %v4731_v38 = vpack.i.bf16 %v9168_v55, %v9174_v5  ;;  %v9171_v17 = vmax.f32 %v7688_v32, 0.0  ;;  %v7703_v57 = vadd.f32 %v2832_v62, %v2760_v23 }
 0x4aa   : > { %v2834_v29 = vpop.f32.mrf.mxu0 }
 0x4ab   : > { %9614 = vst [vmem:[#allocation48_spill] sm:$0xff] %v7703_v57  ;;  %v9167_v46 = vmax.f32 %v7703_v57, 0.0  ;;  %v7709_v37 = vadd.f32 %v2834_v29, %v2762_v25  ;;  %4732 = vrot.lane.b32.xlu1 %v4731_v38, %s5153_s19  ;;  %4737 = vrot.lane.b32.xlu0 %v4736_v27, %s5153_s19  ;;  %v4741_v35 = vpack.i.bf16 %v9171_v17, %v9170_v16  ;;  %v7729_v29 = vpop.f32.mrf.mxu1 }
 0x4ac   : > { %v2836_v21 = vpop.f32.mrf.mxu0 }
 0x4ad   : > { %9615 = vst [vmem:[#allocation21_spill] sm:$0xff] %v7709_v37  ;;  %v4746_v23 = vpack.i.bf16 %v9169_v44, %v9167_v46  ;;  %v7723_v19 = vadd.f32 %v2836_v21, %v2764_v13  ;;  %v9173_v62 = vmax.f32 %v7709_v37, 0.0  ;;  %v7738_v21 = vpop.f32.mrf.mxu1 }
 0x4ae   : > { %v2840_v25 = vpop.f32.mrf.mxu0 }
 0x4af   : > { %9616 = vst [vmem:[#allocation18_spill] sm:$0xff] %v7723_v19  ;;  %v9172_v27 = vmax.f32 %v7723_v19, 0.0  ;;  %4747 = vrot.lane.b32.xlu0 %v4746_v23, %s5153_s19  ;;  %4742 = vrot.lane.b32.xlu1 %v4741_v35, %s5153_s19  ;;  %v7744_v35 = vpop.f32.mrf.mxu1  ;;  %v7760_v19 = vpop.permute.xlu0 %2481 }
 0x4b0   : > { %v2842_v38 = vpop.f32.mrf.mxu0 }
 0x4b1   : > { %v4751_v3 = vpack.i.bf16 %v9172_v27, %v9173_v62  ;;  %v2612_v27 = vadd.f32 %v7603_v42, %v7642_v48 }
 0x4b2   : > { %v7735_v46 = vpop.f32.mrf.mxu0 }
 0x4b3   : > { %4752 = vrot.lane.b32.xlu1 %v4751_v3, %s5153_s19  ;;  %v2616_v3 = vadd.f32 %v7605_v18, %v7652_v7  ;;  %v7763_v52 = vadd.f32 %v7579_v12, %v2612_v27  ;;  %v2628_v12 = vadd.f32 %v7613_v60, %v7760_v19 }
 0x4b4   : > { %v2846_v13 = vpop.f32.mrf.mxu0 }
 0x4b5   : > { %v7766_v42 = vadd.f32 %v7583_v54, %v2616_v3 }
 0x4b6   : > { %v7740_v55 = vpop.f32.mrf.mxu0 }
 0x4b7   : > { %v9188_v60 = vmax.f32 %v7766_v42, 0.0 }
 0x4b8   : > { %v7742_v23 = vpop.f32.mrf.mxu0 }
 0x4ba   : > { %v7746_v44 = vpop.f32.mrf.mxu0 }
 0x4bb   : > { %v2893_v16 = vpop.f32.mrf.mxu1 }
 0x4bc   : > { %v7748_v17 = vpop.f32.mrf.mxu0  ;;  %v2894_v62 = vadd.f32 %v2893_v16, %v7617_v4 }
 0x4bd   : > { %v2895_v5 = vpop.f32.mrf.mxu1 }
 0x4be   : > { %v2966_v36 = vpop.f32.mrf.mxu0  ;;  %v2896_v15 = vadd.f32 %v2895_v5, %v7617_v4  ;;  %v2768_v4 = vadd.f32 %v7633_v30, %v7758_v58  ;;  %v2624_v5 = vadd.f32 %v7609_v49, %v7758_v58  ;;  %v2626_v30 = vadd.f32 %v7611_v50, %v7760_v19 }
 0x4bf   : > { %v2897_v8 = vpop.f32.mrf.mxu1  ;;  %v7756_v28 = vadd.f32 %v2966_v36, %v2894_v62  ;;  %v2770_v36 = vadd.f32 %v7647_v10, %v7758_v58 }
 0x4c0   : > { %v2968_v57 = vpop.f32.mrf.mxu0  ;;  %v2898_v18 = vadd.f32 %v2897_v8, %v7621_v1  ;;  %v7786_v10 = vadd.f32 %v2840_v25, %v2768_v4  ;;  %v7800_v50 = vadd.f32 %v7589_v51, %v2624_v5  ;;  %v2774_v25 = vadd.f32 %v7696_v11, %v7760_v19 }
 0x4c1   : > { %v2899_v16 = vpop.f32.mrf.mxu1  ;;  %v7769_v56 = vadd.f32 %v2968_v57, %v2896_v15  ;;  %v9186_v54 = vmax.f32 %v7756_v28, 0.0  ;;  %v7788_v3 = vadd.f32 %v2842_v38, %v2770_v36  ;;  %v7805_v38 = vadd.f32 %v7593_v33, %v2628_v12 }
 0x4c2   : > { %v2970_v62 = vpop.f32.mrf.mxu0  ;;  %v2900_v8 = vadd.f32 %v2899_v16, %v7621_v1  ;;  %v9187_v36 = vmax.f32 %v7763_v52, 0.0  ;;  %v9193_v51 = vmax.f32 %v7786_v10, 0.0  ;;  %v7816_v5 = vadd.f32 %v2846_v13, %v2774_v25 }
 0x4c3   : > { %9617 = vst [vmem:[#allocation20_spill] sm:$0xff] %v7769_v56  ;;  %v9185_v15 = vmax.f32 %v7769_v56, 0.0  ;;  %v2903_v57 = vpop.f32.mrf.mxu1  ;;  %v7782_v27 = vadd.f32 %v2970_v62, %v2898_v18  ;;  %v2622_v18 = vadd.f32 %v7607_v26, %v7758_v58  ;;  %v7812_v26 = vadd.f32 %v7591_v31, %v2626_v30 }
 0x4c4   : > { %v2972_v49 = vpop.f32.mrf.mxu0  ;;  %v4766_v12 = vpack.i.bf16 %v9188_v60, %v9187_v36  ;;  %v9192_v13 = vmax.f32 %v7800_v50, 0.0  ;;  %v9194_v25 = vmax.f32 %v7805_v38, 0.0 }
 0x4c5   : > { %v4756_v1 = vpack.i.bf16 %v9185_v15, %v9186_v54  ;;  %v2905_v16 = vpop.f32.mrf.mxu1  ;;  %v7795_v37 = vadd.f32 %v2972_v49, %v2900_v8  ;;  %v9190_v62 = vmax.f32 %v7782_v27, 0.0  ;;  %v2772_v15 = vadd.f32 %v7669_v2, %v7760_v19 }
 0x4c6   : > { %v2976_v4 = vpop.f32.mrf.mxu0  ;;  %v2906_v36 = vadd.f32 %v2905_v16, %v7642_v48  ;;  %v9195_v16 = vmax.f32 %v7816_v5, 0.0 }
 0x4c7   : > { %v9189_v8 = vmax.f32 %v7795_v37, 0.0  ;;  %v2907_v49 = vpop.f32.mrf.mxu1  ;;  %4757 = vrot.lane.b32.xlu0 %v4756_v1, %s5153_s19  ;;  %v7829_v1 = vadd.f32 %v7587_v22, %v2622_v18  ;;  %v7834_v11 = vadd.f32 %v7735_v46, %v2772_v15  ;;  %v4771_v18 = vpack.i.bf16 %v9193_v51, %v9192_v13  ;;  %v7860_v13 = vpop.permute.xlu0 %2491 }
 0x4c8   : > { %v2978_v33 = vpop.f32.mrf.mxu0  ;;  %v9618_v46 = vmax.f32 %v7788_v3, 0.0 }
 0x4c9   : > { %v4761_v31 = vpack.i.bf16 %v9189_v8, %v9190_v62  ;;  %v2909_v30 = vpop.f32.mrf.mxu1  ;;  %v7852_v8 = vpop.permute.xlu1 %2486  ;;  %v7856_v62 = vadd.f32 %v2978_v33, %v2906_v36  ;;  %v9197_v51 = vmax.f32 %v7829_v1, 0.0  ;;  %v9196_v36 = vmax.f32 %v7834_v11, 0.0 }
 0x4ca   : > { %v2980_v54 = vpop.f32.mrf.mxu0  ;;  %v2910_v2 = vadd.f32 %v2909_v30, %v7652_v7  ;;  %v4776_v15 = vpack.i.bf16 %v9194_v25, %v9618_v46  ;;  %v2778_v46 = vadd.f32 %v7713_v40, %v7852_v8  ;;  %v2780_v25 = vadd.f32 %v7729_v29, %v7852_v8 }
 0x4cb   : > { %v7838_v60 = vpop.f32.mrf.mxu1  ;;  %4762 = vrot.lane.b32.xlu1 %v4761_v31, %s5153_s19  ;;  %4767 = vrot.lane.b32.xlu0 %v4766_v12, %s5153_s19  ;;  %v2904_v31 = vadd.f32 %v2903_v57, %v7642_v48  ;;  %v2908_v12 = vadd.f32 %v2907_v49, %v7652_v7  ;;  %v2634_v48 = vadd.f32 %v7619_v43, %v7852_v8  ;;  %v9619_v40 = vmax.f32 %v7812_v26, 0.0 }
 0x4cc   : > { %v2982_v30 = vpop.f32.mrf.mxu0  ;;  %v2638_v7 = vadd.f32 %v7627_v34, %v7860_v13  ;;  %v2636_v29 = vadd.f32 %v7625_v14, %v7860_v13  ;;  %v7885_v34 = vadd.f32 %v7740_v55, %v2778_v46  ;;  %v2632_v14 = vadd.f32 %v7615_v39, %v7852_v8 }
 0x4cd   : > { %v2915_v22 = vpop.f32.mrf.mxu1  ;;  %v7858_v56 = vadd.f32 %v2982_v30, %v2910_v2  ;;  %v7872_v49 = vadd.f32 %v2976_v4, %v2904_v31  ;;  %v7874_v33 = vadd.f32 %v2980_v54, %v2908_v12  ;;  %v4786_v43 = vpack.i.bf16 %v9619_v40, %v9197_v51 }
 0x4ce   : > { %v2986_v57 = vpop.f32.mrf.mxu0  ;;  %v4781_v54 = vpack.i.bf16 %v9195_v16, %v9196_v36  ;;  %v2784_v55 = vadd.f32 %v7744_v35, %v7860_v13  ;;  %v7901_v46 = vadd.f32 %v7597_v63, %v2634_v48  ;;  %v7904_v40 = vadd.f32 %v7601_v20, %v2638_v7 }
 0x4cf   : > { %v2917_v2 = vpop.f32.mrf.mxu1  ;;  %4777 = vrot.lane.b32.xlu0 %v4776_v15, %s5153_s19  ;;  %4772 = vrot.lane.b32.xlu1 %v4771_v18, %s5153_s19  ;;  %v7892_v15 = vadd.f32 %v7742_v23, %v2780_v25  ;;  %v9198_v18 = vmax.f32 %v7856_v62, 0.0  ;;  %v9200_v30 = vmax.f32 %v7858_v56, 0.0  ;;  %v9199_v23 = vmax.f32 %v7872_v49, 0.0 }
 0x4d0   : > { %v2988_v4 = vpop.f32.mrf.mxu0  ;;  %v9201_v25 = vmax.f32 %v7874_v33, 0.0  ;;  %v2782_v39 = vadd.f32 %v7738_v21, %v7860_v13  ;;  %v7913_v35 = vadd.f32 %v7599_v47, %v2636_v29  ;;  %v7916_v63 = vadd.f32 %v7748_v17, %v2784_v55 }
 0x4d1   : > { %v2919_v31 = vpop.f32.mrf.mxu1  ;;  %v9203_v48 = vmax.f32 %v7885_v34, 0.0  ;;  %v9204_v7 = vmax.f32 %v7892_v15, 0.0  ;;  %v2916_v29 = vadd.f32 %v2915_v22, %v7758_v58  ;;  %v9202_v36 = vmax.f32 %v7901_v46, 0.0 }
 0x4d2   : > { %v2990_v12 = vpop.f32.mrf.mxu0  ;;  %v4796_v21 = vpack.i.bf16 %v9200_v30, %v9201_v25  ;;  %v7932_v17 = vadd.f32 %v7746_v44, %v2782_v39  ;;  %v9216_v51 = vmax.f32 %v7904_v40, 0.0  ;;  %v2914_v44 = vadd.f32 %v7838_v60, %v7758_v58 }
 0x4d3   : > { %v2923_v16 = vpop.f32.mrf.mxu1  ;;  %4782 = vrot.lane.b32.xlu1 %v4781_v54, %s5153_s19  ;;  %4787 = vrot.lane.b32.xlu0 %v4786_v43, %s5153_s19  ;;  %v4791_v54 = vpack.i.bf16 %v9198_v18, %v9199_v23  ;;  %v7929_v43 = vadd.f32 %v7595_v53, %v2632_v14  ;;  %v2920_v18 = vadd.f32 %v2919_v31, %v7760_v19  ;;  %v9214_v53 = vmax.f32 %v7913_v35, 0.0 }
 0x4d4   : > { %v2992_v20 = vpop.f32.mrf.mxu0  ;;  %v7944_v22 = vadd.f32 %v2988_v4, %v2916_v29  ;;  %v4801_v31 = vpack.i.bf16 %v9203_v48, %v9202_v36  ;;  %v9215_v60 = vmax.f32 %v7932_v17, 0.0  ;;  %v7959_v4 = vadd.f32 %v2986_v57, %v2914_v44 }
 0x4d5   : > { %v2925_v47 = vpop.f32.mrf.mxu1  ;;  %v7955_v30 = vadd.f32 %v2992_v20, %v2920_v18  ;;  %v9213_v58 = vmax.f32 %v7929_v43, 0.0  ;;  %v9620_v57 = vmax.f32 %v7916_v63, 0.0 }
 0x4d6   : > { %v2996_v55 = vpop.f32.mrf.mxu0  ;;  %v2926_v36 = vadd.f32 %v2925_v47, %v7852_v8  ;;  %v9207_v18 = vmax.f32 %v7944_v22, 0.0 }
 0x4d7   : > { %v2927_v23 = vpop.f32.mrf.mxu1  ;;  %4792 = vrot.lane.b32.xlu1 %v4791_v54, %s5153_s19  ;;  %4797 = vrot.lane.b32.xlu0 %v4796_v21, %s5153_s19  ;;  %v4806_v54 = vpack.i.bf16 %v9216_v51, %v9204_v7  ;;  %v2918_v21 = vadd.f32 %v2917_v2, %v7760_v19  ;;  %v4816_v19 = vpack.i.bf16 %v9214_v53, %v9213_v58  ;;  %v9625_v51 = vmax.f32 %v7654_v41, 0.0 }
 0x4d8   : > { %v2998_v39 = vpop.f32.mrf.mxu0  ;;  %v4811_v2 = vpack.i.bf16 %v9620_v57, %v9215_v60  ;;  %v2928_v47 = vadd.f32 %v2927_v23, %v7860_v13 }
 0x4d9   : > { %v2929_v25 = vpop.f32.mrf.mxu1  ;;  %v7961_v14 = vadd.f32 %v2990_v12, %v2918_v21  ;;  %v2924_v12 = vadd.f32 %v2923_v16, %v7852_v8  ;;  %v7979_v44 = vadd.f32 %v2998_v39, %v2926_v36  ;;  %v4977_v8 = vld [vmem:[%s9001_s5 + $0x70] ss:$8 sps:$4 sm:$0xff]  }
 0x4da   : > { %v3000_v29 = vpop.f32.mrf.mxu0  ;;  %v2930_v48 = vadd.f32 %v2929_v25, %v7860_v13  ;;  %v9208_v25 = vmax.f32 %v7955_v30, 0.0  ;;  %v4979_v13 = vld [vmem:[%s9001_s5 + $0x74] ss:$8 sps:$4 sm:$0xff]  }
 0x4db   : > { %4807 = vrot.lane.b32.xlu0 %v4806_v54, %s5153_s19  ;;  %4802 = vrot.lane.b32.xlu1 %v4801_v31, %s5153_s19  ;;  %v9212_v54 = vmax.f32 %v7959_v4, 0.0  ;;  %v9211_v21 = vmax.f32 %v7961_v14, 0.0  ;;  %v7985_v7 = vadd.f32 %v2996_v55, %v2924_v12  ;;  %v7987_v57 = vadd.f32 %v3000_v29, %v2928_v47  ;;  %v4980_v29 = vld [vmem:[%s9001_s5 + $0x60] ss:$8 sps:$4 sm:$0xff]   ;;  %v4985_v47 = vld [vmem:[%s9001_s5 + $0x54] ss:$8 sps:$4 sm:$0xff]  }
 0x4dc   : > { %v3002_v20 = vpop.f32.mrf.mxu0  ;;  %v9205_v23 = vmax.f32 %v7979_v44, 0.0  ;;  %4153 = vmatprep.subr.bf16.mxu0 %v4979_v13  ;;  %v4988_v13 = vld [vmem:[%s9001_s5 + $0x44] ss:$8 sps:$4 sm:$0xff]  }
 0x4dd   : > { %v7981_v31 = vadd.f32 %v3002_v20, %v2930_v48  ;;  %v4821_v16 = vpack.i.bf16 %v9207_v18, %v9212_v54  ;;  %v4826_v36 = vpack.i.bf16 %v9208_v25, %v9211_v21  ;;  %v9210_v55 = vmax.f32 %v7985_v7, 0.0  ;;  %4154 = vmatpush1.bf16.msra.mxu0 %v4977_v8  ;;  %v4983_v20 = vld [vmem:[%s9001_s5 + $0x50] ss:$8 sps:$4 sm:$0xff]   ;;  %v4986_v8 = vld [vmem:[%s9001_s5 + $0x40] ss:$8 sps:$4 sm:$0xff]  }
 0x4de   : > { %v9209_v39 = vmax.f32 %v7987_v57, 0.0 }
 0x4df   : > { %4812 = vrot.lane.b32.xlu1 %v4811_v2, %s5153_s19  ;;  %4817 = vrot.lane.b32.xlu0 %v4816_v19, %s5153_s19  ;;  %v9206_v48 = vmax.f32 %v7981_v31, 0.0  ;;  %v4982_v19 = vld [vmem:[%s9001_s5 + $0x64] ss:$8 sps:$4 sm:$0xff]   ;;  %v4831_v2 = vpack.i.bf16 %v9205_v23, %v9210_v55 }
 0x4e0   : > { %4155 = vmatprep.subr.bf16.mxu0 %v4982_v19  ;;  %v5007_v19 = vld [vmem:[%s9001_s5 + $0x170] ss:$8 sps:$4 sm:$0xff]  }
 0x4e1   : > { %v4836_v12 = vpack.i.bf16 %v9206_v48, %v9209_v39  ;;  %4156 = vmatpush1.bf16.msra.mxu0 %v4980_v29  ;;  %v4994_v29 = vld [vmem:[%s9001_s5 + $0x24] ss:$8 sps:$4 sm:$0xff]   ;;  %v9621_v48 = vmax.f32 %v7630_v45, 0.0 }
 0x4e2   : > { %4157 = vmatprep.subr.bf16.mxu0 %v4985_v47  ;;  %v4997_v47 = vld [vmem:[%s9001_s5 + $0x14] ss:$8 sps:$4 sm:$0xff]  }
 0x4e3   : > { %4822 = vrot.lane.b32.xlu1 %v4821_v16, %s5153_s19  ;;  %4827 = vrot.lane.b32.xlu0 %v4826_v36, %s5153_s19  ;;  %v4991_v16 = vld [vmem:[%s9001_s5 + $0x34] ss:$8 sps:$4 sm:$0xff]   ;;  %v4989_v36 = vld [vmem:[%s9001_s5 + $0x30] ss:$8 sps:$4 sm:$0xff]  }
 0x4e5   : > { %4158 = vmatpush1.bf16.msra.mxu0 %v4983_v20  ;;  %v4992_v20 = vld [vmem:[%s9001_s5 + $0x20] ss:$8 sps:$4 sm:$0xff]  }
 0x4e6   : > { %4159 = vmatprep.subr.bf16.mxu0 %v4988_v13  ;;  %v5021_v13 = vld [vmem:[%s9001_s5 + $0x154] ss:$8 sps:$4 sm:$0xff]  }
 0x4e7   : > { %4832 = vrot.lane.b32.xlu1 %v4831_v2, %s5153_s19  ;;  %4837 = vrot.lane.b32.xlu0 %v4836_v12, %s5153_s19  ;;  %v5009_v2 = vld [vmem:[%s9001_s5 + $0x174] ss:$8 sps:$4 sm:$0xff]   ;;  %v5015_v12 = vld [vmem:[%s9001_s5 + $0x164] ss:$8 sps:$4 sm:$0xff]  }
 0x4e8   : > { %4226 = vmatprep.subr.bf16.mxu1 %v5009_v2  ;;  %v4998_v2 = vld [vmem:[%s9001_s5] ss:$8 sps:$4 sm:$0xff]  }
 0x4e9   : > { %4160 = vmatpush1.bf16.msra.mxu0 %v4986_v8  ;;  %4227 = vmatpush1.bf16.msra.mxu1 %v5007_v19  ;;  %v5013_v8 = vld [vmem:[%s9001_s5 + $0x160] ss:$8 sps:$4 sm:$0xff]   ;;  %v5027_v19 = vld [vmem:[%s9001_s5 + $0x144] ss:$8 sps:$4 sm:$0xff]  }
 0x4ea   : > { %4161 = vmatprep.subr.bf16.mxu0 %v4991_v16  ;;  %4228 = vmatprep.subr.bf16.mxu1 %v5015_v12  ;;  %v4995_v16 = vld [vmem:[%s9001_s5 + $0x10] ss:$8 sps:$4 sm:$0xff]   ;;  %v5003_v12 = vld [vmem:[%s9001_s5 + $0xf4] ss:$8 sps:$4 sm:$0xff]  }
 0x4ed   : > { %4162 = vmatpush1.bf16.msra.mxu0 %v4989_v36  ;;  %v5000_v36 = vld [vmem:[%s9001_s5 + $0x4] ss:$8 sps:$4 sm:$0xff]   ;;  %4229 = vmatpush1.bf16.msra.mxu1 %v5013_v8 }
 0x4ee   : > { %4163 = vmatprep.subr.bf16.mxu0 %v4994_v29  ;;  %v5019_v29 = vld [vmem:[%s9001_s5 + $0x150] ss:$8 sps:$4 sm:$0xff]   ;;  %4230 = vmatprep.subr.bf16.mxu1 %v5021_v13  ;;  %v5006_v8 = vld [vmem:[%s9001_s5 + $0xe4] ss:$8 sps:$4 sm:$0xff]   ;;  %v5004_v13 = vld [vmem:[%s9001_s5 + $0xe0] ss:$8 sps:$4 sm:$0xff]  }
 0x4f1   : > { %4164 = vmatpush1.bf16.msra.mxu0 %v4992_v20  ;;  %4231 = vmatpush1.bf16.msra.mxu1 %v5019_v29  ;;  %v5025_v20 = vld [vmem:[%s9001_s5 + $0x140] ss:$8 sps:$4 sm:$0xff]   ;;  %v5018_v29 = vld [vmem:[%s9001_s5 + $0xc4] ss:$8 sps:$4 sm:$0xff]  }
 0x4f2   : > { %4165 = vmatprep.subr.bf16.mxu0 %v4997_v47  ;;  %4232 = vmatprep.subr.bf16.mxu1 %v5027_v19  ;;  %v5001_v47 = vld [vmem:[%s9001_s5 + $0xf0] ss:$8 sps:$4 sm:$0xff]   ;;  %v5016_v19 = vld [vmem:[%s9001_s5 + $0xc0] ss:$8 sps:$4 sm:$0xff]  }
 0x4f5   : > { %4166 = vmatpush1.bf16.msra.mxu0 %v4995_v16  ;;  %4233 = vmatpush1.bf16.msra.mxu1 %v5025_v20  ;;  %v5012_v16 = vld [vmem:[%s9001_s5 + $0xd4] ss:$8 sps:$4 sm:$0xff]   ;;  %v5028_v20 = vld [vmem:[%s9001_s5 + $0xa0] ss:$8 sps:$4 sm:$0xff]  }
 0x4f6   : > { %4167 = vmatprep.subr.bf16.mxu0 %v5000_v36  ;;  %v5010_v36 = vld [vmem:[%s9001_s5 + $0xd0] ss:$8 sps:$4 sm:$0xff]  }
 0x4f9   : > { %4168 = vmatpush1.bf16.msra.mxu0 %v4998_v2  ;;  %v5024_v2 = vld [vmem:[%s9001_s5 + $0xb4] ss:$8 sps:$4 sm:$0xff]  }
 0x4fa   : > { %4169 = vmatprep.subr.bf16.mxu0 %v5003_v12  ;;  %v5022_v12 = vld [vmem:[%s9001_s5 + $0xb0] ss:$8 sps:$4 sm:$0xff]  }
 0x4fd   : > { %4170 = vmatpush2.bf16.msra.mxu0 %v5001_v47  ;;  %v5030_v47 = vld [vmem:[%s9001_s5 + $0xa4] ss:$8 sps:$4 sm:$0xff]  }
 0x4fe   : > { %4171 = vmatprep.subr.bf16.mxu0 %v5006_v8  ;;  %v5031_v8 = vld [vmem:[%s9001_s5 + $0x130] ss:$8 sps:$4 sm:$0xff]  }
 0x501   : > { %4172 = vmatpush2.bf16.msra.mxu0 %v5004_v13 }
 0x502   : > { %4173 = vmatprep.subr.bf16.mxu0 %v5012_v16  ;;  %v5033_v16 = vld [vmem:[%s9001_s5 + $0x134] ss:$8 sps:$4 sm:$0xff]  }
 0x503   : > { %4234 = vmatprep.subr.bf16.mxu1 %v5033_v16 }
 0x504   : > { %4235 = vmatpush1.bf16.msra.mxu1 %v5031_v8  ;;  %v5036_v8 = vld [vmem:[%s9001_s5 + $0x94] ss:$8 sps:$4 sm:$0xff]  }
 0x505   : > { %4174 = vmatpush2.bf16.msra.mxu0 %v5010_v36 }
 0x506   : > { %4175 = vmatprep.subr.bf16.mxu0 %v5018_v29 }
 0x509   : > { %4176 = vmatpush2.bf16.msra.mxu0 %v5016_v19 }
 0x50a   : > { %4177 = vmatprep.subr.bf16.mxu0 %v5024_v2 }
 0x50d   : > { %4178 = vmatpush2.bf16.msra.mxu0 %v5022_v12 }
 0x50e   : > { %4179 = vmatprep.subr.bf16.mxu0 %v5030_v47  ;;  %v9622_v47 = vmax.f32 %v7639_v0, 0.0  ;;  %v5037_v0 = vld [vmem:[%s9001_s5 + $0x120] ss:$8 sps:$4 sm:$0xff]  }
 0x511   : > { %4180 = vmatpush2.bf16.msra.mxu0 %v5028_v20 }
 0x512   : > { %4181 = vmatprep.subr.bf16.mxu0 %v5036_v8  ;;  %v9624_v8 = vmax.f32 %v7645_v24, 0.0 }
 0x517   : > { %v4723_v13 = vpop.permute.xlu1 %4722 }
 0x518   : > { %v4725_v36 = vunpack.i.h.bf16 %v4723_v13  ;;  %v4724_v29 = vunpack.i.l.bf16 %v4723_v13 }
 0x519   : > { %v8129_v19 = vpop.permute.xlu0 %4727 }
 0x51a   : > { %v3198_v2 = vsel %vm478_vm0, %v4724_v29, %v4725_v36  ;;  %v9217_v12 = vunpack.i.l.bf16 %v8129_v19  ;;  %v4730_v13 = vunpack.i.h.bf16 %v8129_v19 }
 0x51b   : > { %v8138_v18 = vmax.f32 %v9621_v48, %v3198_v2  ;;  %v5034_v48 = vld [vmem:[%s9001_s5 + $0x90] ss:$8 sps:$4 sm:$0xff]  }
 0x51c   : > { %v3199_v23 = vsel %vm478_vm0, %v4725_v36, %v9217_v12  ;;  %4182 = vmatpush2.bf16.msra.mxu0 %v5034_v48  ;;  %v9629_v48 = vmax.f32 %v7688_v32, 0.0 }
 0x51d   : > { %v8143_v25 = vmax.f32 %v9622_v47, %v3199_v23  ;;  %v4738_v20 = vpop.permute.xlu0 %4737  ;;  %v8145_v16 = vpop.permute.xlu1 %4732  ;;  %v5039_v23 = vld [vmem:[%s9001_s5 + $0x124] ss:$8 sps:$4 sm:$0xff]  }
 0x51e   : > { %v4740_v39 = vunpack.i.h.bf16 %v4738_v20  ;;  %v4739_v55 = vunpack.i.l.bf16 %v4738_v20  ;;  %v9221_v36 = vunpack.i.h.bf16 %v8145_v16  ;;  %v4734_v45 = vunpack.i.l.bf16 %v8145_v16  ;;  %v5042_v47 = vld [vmem:[%s9001_s5 + $0x84] ss:$8 sps:$4 sm:$0xff]   ;;  %v5045_v20 = vld [vmem:[%s9001_s5 + $0x114] ss:$8 sps:$4 sm:$0xff]   ;;  %4236 = vmatprep.subr.bf16.mxu1 %v5039_v23 }
 0x51f   : > { %9623 = vst [vmem:[#allocation19_spill] sm:$0xff] %v8143_v25  ;;  %v4841_v2 = vpack.i.bf16 %v8143_v25, %v8138_v18  ;;  %v9626_v25 = vmax.f32 %v7636_v59, 0.0  ;;  %4237 = vmatpush1.bf16.msra.mxu1 %v5037_v0  ;;  %v5040_v59 = vld [vmem:[%s9001_s5 + $0x80] ss:$8 sps:$4 sm:$0xff]   ;;  %4183 = vmatprep.subr.bf16.mxu0 %v5042_v47  ;;  %v9631_v23 = vmax.f32 %v7681_v9, 0.0 }
 0x520   : > { %v3202_v21 = vsel %vm478_vm0, %v4740_v39, %v4730_v13  ;;  %v3197_v54 = vsel %vm478_vm0, %v4739_v55, %v4724_v29  ;;  %v3203_v58 = vsel %vm478_vm0, %v4730_v13, %v4734_v45  ;;  %v3204_v53 = vsel %vm478_vm0, %v4734_v45, %v9221_v36  ;;  %4238 = vmatprep.subr.bf16.mxu1 %v5045_v20  ;;  %v5046_v9 = vld [vmem:[%s9001_s5 + $0x100] ss:$8 sps:$4 sm:$0xff]  }
 0x521   : > { %v8177_v60 = vmax.f32 %v9624_v8, %v3202_v21  ;;  %v8181_v12 = vmax.f32 %v9625_v51, %v3197_v54  ;;  %v8185_v39 = vmax.f32 %v9626_v25, %v3203_v58  ;;  %v9627_v55 = vmax.f32 %v7665_v6, 0.0  ;;  %v8191_v13 = vpop.permute.xlu0 %4747  ;;  %v8193_v45 = vpop.permute.xlu1 %4742  ;;  %4842 = vrot.lane.b32.xlu1 %v4841_v2, %s5155_s23  ;;  %v5043_v6 = vld [vmem:[%s9001_s5 + $0x110] ss:$8 sps:$4 sm:$0xff]   ;;  %v5048_v25 = vld [vmem:[%s9001_s5 + $0x104] ss:$8 sps:$4 sm:$0xff]   ;;  %4184 = vmatpush2.bf16.msra.mxu0 %v5040_v59 }
 0x522   : > { %v9219_v24 = vunpack.i.l.bf16 %v8191_v13  ;;  %v4745_v41 = vunpack.i.h.bf16 %v8193_v45  ;;  %v9222_v51 = vunpack.i.l.bf16 %v8193_v45  ;;  %v4750_v20 = vunpack.i.h.bf16 %v8191_v13 }
 0x523   : > { %v8189_v29 = vmax.f32 %v9627_v55, %v3204_v53  ;;  %v4851_v58 = vpack.i.bf16 %v8177_v60, %v8181_v12  ;;  %4239 = vmatpush1.bf16.msra.mxu1 %v5043_v6  ;;  %v9632_v59 = vmax.f32 %v7684_v61, 0.0 }
 0x524   : > { %v3209_v54 = vsel %vm478_vm0, %v4745_v41, %v9219_v24  ;;  %v3208_v21 = vsel %vm478_vm0, %v9222_v51, %v4745_v41  ;;  %4240 = vmatprep.subr.bf16.mxu1 %v5048_v25  ;;  %v5051_v41 = vld [vmem:[%s9001_s5 + $0x1f4] ss:$8 sps:$4 sm:$0xff]   ;;  %v5049_v25 = vld [vmem:[%s9001_s5 + $0x1f0] ss:$8 sps:$4 sm:$0xff]  }
 0x525   : > { %9628 = vst [vmem:[#allocation27_spill] sm:$0xff] %v8189_v29  ;;  %v4846_v53 = vpack.i.bf16 %v8189_v29, %v8185_v39  ;;  %v8220_v0 = vmax.f32 %v9629_v48, %v3209_v54  ;;  %v8224_v2 = vmax.f32 %v9631_v23, %v3208_v21  ;;  %v8226_v47 = vpop.permute.xlu1 %4752  ;;  %4852 = vrot.lane.b32.xlu1 %v4851_v58, %s5155_s23  ;;  %v9633_v54 = vld [vmem:[#allocation21_spill] sm:$0xff]  ;;  %v8260_v23 = vld [vmem:[%s9001_s5 + $0x274] ss:$8 sps:$4 sm:$0xff]   ;;  %v9639_v29 = vmax.f32 %v7766_v42, 0.0 }
 0x526   : > { %v9220_v8 = vunpack.i.h.bf16 %v8226_v47  ;;  %v4754_v55 = vunpack.i.l.bf16 %v8226_v47  ;;  %v9634_v21 = vmax.f32 %v9633_v54, 0.0  ;;  %4299 = vmatprep.subr.bf16.mxu0 %v8260_v23 }
 0x527   : > { %9630 = vst [vmem:[#allocation24_spill] sm:$0xff] %v8220_v0  ;;  %4847 = vrot.lane.b32.xlu0 %v4846_v53, %s5155_s23  ;;  %v4856_v32 = vpack.i.bf16 %v8220_v0, %v8224_v2  ;;  %4241 = vmatpush1.bf16.msra.mxu1 %v5046_v9  ;;  %v5052_v9 = vld [vmem:[%s9001_s5 + $0x1e0] ss:$8 sps:$4 sm:$0xff]  }
 0x528   : > { %v3213_v53 = vsel %vm478_vm0, %v4750_v20, %v4754_v55  ;;  %v3214_v58 = vsel %vm478_vm0, %v4754_v55, %v9220_v8  ;;  %4242 = vmatprep.subr.bf16.mxu1 %v5051_v41  ;;  %v5054_v55 = vld [vmem:[%s9001_s5 + $0x1e4] ss:$8 sps:$4 sm:$0xff]   ;;  %v5055_v41 = vld [vmem:[%s9001_s5 + $0x1d0] ss:$8 sps:$4 sm:$0xff]   ;;  %v9636_v8 = vunpack.i.l.bf16 %v8129_v19 }
 0x529   : > { %v8247_v6 = vmax.f32 %v9632_v59, %v3213_v53  ;;  %v8251_v48 = vmax.f32 %v9634_v21, %v3214_v58  ;;  %v5060_v53 = vld [vmem:[%s9001_s5 + $0x1c4] ss:$8 sps:$4 sm:$0xff]   ;;  %v5058_v58 = vld [vmem:[%s9001_s5 + $0x1c0] ss:$8 sps:$4 sm:$0xff]   ;;  %v5063_v59 = vld [vmem:[%s9001_s5 + $0x1b4] ss:$8 sps:$4 sm:$0xff]  }
 0x52a   : > { %v5061_v21 = vld [vmem:[%s9001_s5 + $0x1b0] ss:$8 sps:$4 sm:$0xff]  }
 0x52b   : > { %9635 = vst [vmem:[#allocation26_spill] sm:$0xff] %v8251_v48  ;;  %4857 = vrot.lane.b32.xlu0 %v4856_v32, %s5155_s23  ;;  %v4866_v61 = vpack.i.bf16 %v8251_v48, %v8247_v6  ;;  %4243 = vmatpush2.bf16.msra.mxu1 %v5049_v25  ;;  %v5057_v32 = vld [vmem:[%s9001_s5 + $0x1d4] ss:$8 sps:$4 sm:$0xff]  }
 0x52c   : > { %4244 = vmatprep.subr.bf16.mxu1 %v5054_v55  ;;  %v5069_v55 = vld [vmem:[%s9001_s5 + $0x1a4] ss:$8 sps:$4 sm:$0xff]  }
 0x52d   : > { %4867 = vrot.lane.b32.xlu1 %v4866_v61, %s5155_s23 }
 0x52f   : > { %4245 = vmatpush2.bf16.msra.mxu1 %v5052_v9 }
 0x530   : > { %4246 = vmatprep.subr.bf16.mxu1 %v5057_v32 }
 0x533   : > { %4247 = vmatpush2.bf16.msra.mxu1 %v5055_v41 }
 0x534   : > { %4248 = vmatprep.subr.bf16.mxu1 %v5060_v53 }
 0x537   : > { %4249 = vmatpush2.bf16.msra.mxu1 %v5058_v58  ;;  %v9637_v58 = vunpack.i.l.bf16 %v8193_v45 }
 0x538   : > { %4250 = vmatprep.subr.bf16.mxu1 %v5063_v59  ;;  %v5067_v59 = vld [vmem:[%s9001_s5 + $0x1a0] ss:$8 sps:$4 sm:$0xff]  }
 0x539   : > { %v8287_v54 = vpop.permute.xlu0 %4757 }
 0x53a   : > { %v4759_v25 = vunpack.i.l.bf16 %v8287_v54  ;;  %v9226_v61 = vunpack.i.h.bf16 %v8287_v54 }
 0x53b   : > { %4251 = vmatpush2.bf16.msra.mxu1 %v5061_v21  ;;  %v9638_v21 = vunpack.i.h.bf16 %v8145_v16 }
 0x53c   : > { %v3200_v36 = vsel %vm478_vm0, %v9636_v8, %v4759_v25  ;;  %4252 = vmatprep.subr.bf16.mxu1 %v5069_v55  ;;  %v3201_v51 = vsel %vm478_vm0, %v4759_v25, %v9226_v61  ;;  %v9640_v8 = vmax.f32 %v7763_v52, 0.0 }
 0x53d   : > { %v4768_v9 = vpop.permute.xlu0 %4767  ;;  %v8297_v32 = vpop.permute.xlu1 %4762 }
 0x53e   : > { %v4770_v41 = vunpack.i.h.bf16 %v4768_v9  ;;  %v4769_v53 = vunpack.i.l.bf16 %v4768_v9  ;;  %v4764_v24 = vunpack.i.l.bf16 %v8297_v32  ;;  %v9641_v25 = vunpack.i.h.bf16 %v8297_v32 }
 0x53f   : > { %4253 = vmatpush2.bf16.msra.mxu1 %v5067_v59 }
 0x540   : > { %v3212_v9 = vsel %vm478_vm0, %v4770_v41, %v4750_v20  ;;  %v3207_v0 = vsel %vm478_vm0, %v4769_v53, %v9637_v58  ;;  %v3205_v48 = vsel %vm478_vm0, %v9638_v21, %v4764_v24  ;;  %v3206_v20 = vsel %vm478_vm0, %v4764_v24, %v9641_v25  ;;  %v9642_v41 = vld [vmem:[#allocation15_spill] sm:$0xff]  ;;  %v9644_v58 = vld [vmem:[#allocation13_spill] sm:$0xff] }
 0x541   : > { %v8319_v19 = vmax.f32 %v9639_v29, %v3212_v9  ;;  %v8323_v55 = vmax.f32 %v9640_v8, %v3207_v0  ;;  %v9643_v45 = vmax.f32 %v9642_v41, 0.0  ;;  %v8332_v53 = vpop.permute.xlu0 %4777  ;;  %v4773_v16 = vpop.permute.xlu1 %4772  ;;  %v9645_v21 = vmax.f32 %v9644_v58, 0.0  ;;  %v5073_v24 = vld [vmem:[%s9001_s5 + $0x190] ss:$8 sps:$4 sm:$0xff]  }
 0x542   : > { %v9646_v29 = vmax.f32 %v7782_v27, 0.0  ;;  %v9227_v0 = vunpack.i.l.bf16 %v8332_v53  ;;  %v9648_v9 = vmax.f32 %v7756_v28, 0.0  ;;  %v4774_v25 = vunpack.i.l.bf16 %v4773_v16 }
 0x543   : > { %v8330_v61 = vmax.f32 %v9643_v45, %v3205_v48  ;;  %v8336_v42 = vmax.f32 %v9645_v21, %v3200_v36  ;;  %v5075_v48 = vld [vmem:[%s9001_s5 + $0x194] ss:$8 sps:$4 sm:$0xff]   ;;  %v4775_v36 = vunpack.i.h.bf16 %v4773_v16  ;;  %v4861_v27 = vpack.i.bf16 %v8319_v19, %v8323_v55  ;;  %v5081_v16 = vld [vmem:[%s9001_s5 + $0x184] ss:$8 sps:$4 sm:$0xff]  }
 0x544   : > { %v8340_v52 = vmax.f32 %v9646_v29, %v3206_v20  ;;  %v8351_v8 = vmax.f32 %v9648_v9, %v3201_v51  ;;  %4254 = vmatprep.subr.bf16.mxu1 %v5075_v48  ;;  %v4780_v20 = vunpack.i.h.bf16 %v8332_v53  ;;  %v9650_v58 = vmax.f32 %v7786_v10, 0.0 }
 0x545   : > { %v3219_v41 = vsel %vm478_vm0, %v4775_v36, %v9227_v0  ;;  %v3218_v45 = vsel %vm478_vm0, %v4774_v25, %v4775_v36  ;;  %v4788_v28 = vpop.permute.xlu0 %4787  ;;  %v8362_v51 = vpop.permute.xlu1 %4782  ;;  %4862 = vrot.lane.b32.xlu0 %v4861_v27, %s5155_s23  ;;  %v9652_v29 = vmax.f32 %v7800_v50, 0.0  ;;  %4255 = vmatpush2.bf16.msra.mxu1 %v5073_v24  ;;  %v5079_v36 = vld [vmem:[%s9001_s5 + $0x180] ss:$8 sps:$4 sm:$0xff]   ;;  %v9653_v24 = vmax.f32 %v7812_v26, 0.0 }
 0x546   : > { %9647 = vst [vmem:[#allocation29_spill] sm:$0xff] %v8340_v52  ;;  %9649 = vst [vmem:[#allocation40_spill] sm:$0xff] %v8351_v8  ;;  %v4876_v59 = vpack.i.bf16 %v8340_v52, %v8330_v61  ;;  %v8370_v21 = vmax.f32 %v9650_v58, %v3219_v41  ;;  %v4790_v9 = vunpack.i.h.bf16 %v4788_v28  ;;  %v4789_v0 = vunpack.i.l.bf16 %v4788_v28  ;;  %4256 = vmatprep.subr.bf16.mxu1 %v5081_v16 }
 0x547   : > { %v8374_v48 = vmax.f32 %v9652_v29, %v3218_v45  ;;  %v9230_v27 = vunpack.i.h.bf16 %v8362_v51  ;;  %v4784_v52 = vunpack.i.l.bf16 %v8362_v51  ;;  %v4871_v10 = vpack.i.bf16 %v8351_v8, %v8336_v42 }
 0x548   : > { %9651 = vst [vmem:[#allocation39_spill] sm:$0xff] %v8370_v21  ;;  %4877 = vrot.lane.b32.xlu1 %v4876_v59, %s5155_s23  ;;  %v3222_v50 = vsel %vm478_vm0, %v4790_v9, %v4780_v20  ;;  %v3217_v41 = vsel %vm478_vm0, %v4789_v0, %v4774_v25  ;;  %v9654_v28 = vmax.f32 %v7829_v1, 0.0  ;;  %v9656_v26 = vmax.f32 %v7805_v38, 0.0 }
 0x549   : > { %v4881_v59 = vpack.i.bf16 %v8370_v21, %v8374_v48  ;;  %v8390_v45 = vmax.f32 %v9653_v24, %v3222_v50  ;;  %v3223_v29 = vsel %vm478_vm0, %v4780_v20, %v4784_v52  ;;  %v3224_v16 = vsel %vm478_vm0, %v4784_v52, %v9230_v27  ;;  %v8400_v9 = vpop.permute.xlu0 %4797  ;;  %v8402_v0 = vpop.permute.xlu1 %4792  ;;  %4872 = vrot.lane.b32.xlu0 %v4871_v10, %s5155_s23  ;;  %v9668_v21 = vld [vmem:[#allocation48_spill] sm:$0xff] }
 0x54a   : > { %v8394_v58 = vmax.f32 %v9654_v28, %v3217_v41  ;;  %v8407_v25 = vmax.f32 %v9656_v26, %v3223_v29  ;;  %v9657_v1 = vmax.f32 %v7834_v11, 0.0  ;;  %v9229_v20 = vunpack.i.h.bf16 %v8400_v9  ;;  %4257 = vmatpush2.bf16.msra.mxu1 %v5079_v36  ;;  %v9660_v28 = vld [vmem:[#allocation18_spill] sm:$0xff] }
 0x54b   : > { %v4799_v41 = vunpack.i.l.bf16 %v8400_v9  ;;  %4638 = vmatprep.subr.bf16.mxu1 %v8260_v23  ;;  %v9659_v38 = vunpack.i.h.bf16 %v8226_v47  ;;  %v9661_v29 = vmax.f32 %v9660_v28, 0.0  ;;  %v9663_v36 = vmax.f32 %v7874_v33, 0.0 }
 0x54c   : > { %9655 = vst [vmem:[#allocation41_spill] sm:$0xff] %v8394_v58  ;;  %v8411_v50 = vmax.f32 %v9657_v1, %v3224_v16  ;;  %4882 = vrot.lane.b32.xlu1 %v4881_v59, %s5155_s23  ;;  %v4891_v52 = vpack.i.bf16 %v8390_v45, %v8394_v58  ;;  %v9234_v23 = vunpack.i.h.bf16 %v8402_v0  ;;  %v4794_v47 = vunpack.i.l.bf16 %v8402_v0 }
 0x54d   : > { %v3215_v10 = vsel %vm478_vm0, %v9659_v38, %v4799_v41  ;;  %v3216_v11 = vsel %vm478_vm0, %v4799_v41, %v9229_v20  ;;  %v4808_v26 = vpop.permute.xlu0 %4807  ;;  %v4803_v1 = vpop.permute.xlu1 %4802  ;;  %v9665_v33 = vunpack.i.l.bf16 %v8191_v13  ;;  %v9670_v58 = vmax.f32 %v7872_v49, 0.0 }
 0x54e   : > { %9658 = vst [vmem:[#allocation42_spill] sm:$0xff] %v8411_v50  ;;  %v4886_v24 = vpack.i.bf16 %v8411_v50, %v8407_v25  ;;  %v8429_v59 = vmax.f32 %v9661_v29, %v3215_v10  ;;  %v8433_v16 = vmax.f32 %v9663_v36, %v3216_v11  ;;  %v4809_v38 = vunpack.i.l.bf16 %v4808_v26 }
 0x54f   : > { %v4805_v41 = vunpack.i.h.bf16 %v4803_v1  ;;  %v4804_v20 = vunpack.i.l.bf16 %v4803_v1  ;;  %v3210_v11 = vsel %vm478_vm0, %v9665_v33, %v4794_v47  ;;  %v3211_v28 = vsel %vm478_vm0, %v4794_v47, %v9234_v23 }
 0x550   : > { %9662 = vst [vmem:[#allocation64_spill] sm:$0xff] %v8429_v59  ;;  %9664 = vst [vmem:[#allocation61_spill] sm:$0xff] %v8433_v16  ;;  %4887 = vrot.lane.b32.xlu0 %v4886_v24, %s5155_s23  ;;  %4892 = vrot.lane.b32.xlu1 %v4891_v52, %s5155_s23  ;;  %v4906_v10 = vpack.i.bf16 %v8433_v16, %v8429_v59  ;;  %v9666_v52 = vmax.f32 %v7885_v34, 0.0  ;;  %v9667_v16 = vmax.f32 %v7901_v46, 0.0  ;;  %v4810_v50 = vunpack.i.h.bf16 %v4808_v26 }
 0x551   : > { %v3229_v29 = vsel %vm478_vm0, %v4805_v41, %v4809_v38  ;;  %v3228_v36 = vsel %vm478_vm0, %v4804_v20, %v4805_v41  ;;  %v4818_v24 = vpop.permute.xlu0 %4817  ;;  %v4813_v27 = vpop.permute.xlu1 %4812  ;;  %v9669_v59 = vmax.f32 %v9668_v21, 0.0  ;;  %v8464_v34 = vmax.f32 %v9670_v58, %v3211_v28 }
 0x552   : > { %v8451_v1 = vmax.f32 %v9666_v52, %v3229_v29  ;;  %v8455_v8 = vmax.f32 %v9667_v16, %v3228_v36  ;;  %v4820_v13 = vunpack.i.h.bf16 %v4818_v24  ;;  %v4819_v33 = vunpack.i.l.bf16 %v4818_v24 }
 0x553   : > { %v4815_v47 = vunpack.i.h.bf16 %v4813_v27  ;;  %v4814_v23 = vunpack.i.l.bf16 %v4813_v27  ;;  %v8460_v41 = vmax.f32 %v9669_v59, %v3210_v11  ;;  %v9671_v21 = vmax.f32 %v7904_v40, 0.0 }
 0x554   : > { %4907 = vrot.lane.b32.xlu1 %v4906_v10, %s5155_s23  ;;  %v4896_v46 = vpack.i.bf16 %v8451_v1, %v8455_v8  ;;  %v3232_v16 = vsel %vm478_vm0, %v4820_v13, %v4810_v50  ;;  %v3227_v29 = vsel %vm478_vm0, %v4819_v33, %v4804_v20  ;;  %v9672_v49 = vmax.f32 %v7932_v17, 0.0 }
 0x555   : > { %v3233_v10 = vsel %vm478_vm0, %v4810_v50, %v4814_v23  ;;  %v3234_v26 = vsel %vm478_vm0, %v4814_v23, %v4815_v47  ;;  %v4828_v27 = vpop.permute.xlu0 %4827  ;;  %v4823_v36 = vpop.permute.xlu1 %4822  ;;  %v9673_v50 = vmax.f32 %v7913_v35, 0.0  ;;  %v9674_v23 = vmax.f32 %v7929_v43, 0.0 }
 0x556   : > { %v8474_v59 = vmax.f32 %v9671_v21, %v3233_v10  ;;  %v8478_v58 = vmax.f32 %v9672_v49, %v3234_v26  ;;  %v4830_v11 = vunpack.i.h.bf16 %v4828_v27  ;;  %v4829_v28 = vunpack.i.l.bf16 %v4828_v27  ;;  %4897 = vrot.lane.b32.xlu0 %v4896_v46, %s5155_s23 }
 0x557   : > { %v4825_v24 = vunpack.i.h.bf16 %v4823_v36  ;;  %v4824_v20 = vunpack.i.l.bf16 %v4823_v36  ;;  %v8483_v52 = vmax.f32 %v9673_v50, %v3232_v16  ;;  %v8487_v13 = vmax.f32 %v9674_v23, %v3227_v29 }
 0x558   : > { %v4901_v40 = vpack.i.bf16 %v8464_v34, %v8460_v41  ;;  %v4911_v17 = vpack.i.bf16 %v8478_v58, %v8474_v59  ;;  %v9675_v33 = vunpack.i.h.bf16 %v8362_v51  ;;  %v3226_v10 = vsel %vm478_vm0, %v4829_v28, %v4830_v11 }
 0x559   : > { %v9676_v35 = vunpack.i.l.bf16 %v8332_v53  ;;  %v4838_v26 = vpop.permute.xlu0 %4837  ;;  %v4833_v43 = vpop.permute.xlu1 %4832  ;;  %v3221_v29 = vsel %vm478_vm0, %v4824_v20, %v4825_v24  ;;  %v9677_v27 = vmax.f32 %v7788_v3, 0.0  ;;  %v9678_v51 = vmax.f32 %v7959_v4, 0.0 }
 0x55a   : > { %v3225_v46 = vsel %vm478_vm0, %v9675_v33, %v4829_v28  ;;  %v4840_v21 = vunpack.i.h.bf16 %v4838_v26  ;;  %4902 = vrot.lane.b32.xlu0 %v4901_v40, %s5155_s23  ;;  %4912 = vrot.lane.b32.xlu1 %v4911_v17, %s5155_s23  ;;  %v4839_v53 = vunpack.i.l.bf16 %v4838_v26  ;;  %v4835_v28 = vunpack.i.h.bf16 %v4833_v43 }
 0x55b   : > { %v3220_v16 = vsel %vm478_vm0, %v9676_v35, %v4824_v20  ;;  %v8509_v49 = vmax.f32 %v9678_v51, %v3221_v29  ;;  %v4834_v50 = vunpack.i.l.bf16 %v4833_v43  ;;  %v9680_v23 = vmax.f32 %v7816_v5, 0.0 }
 0x55c   : > { %v8503_v36 = vmax.f32 %v9677_v27, %v3220_v16  ;;  %v9681_v3 = vmax.f32 %v7961_v14, 0.0  ;;  %v4916_v40 = vpack.i.bf16 %v8483_v52, %v8487_v13  ;;  %v9683_v4 = vunpack.i.h.bf16 %v8297_v32 }
 0x55d   : > { %9679 = vst [vmem:[#allocation63_spill] sm:$0xff] %v8509_v49  ;;  %v8513_v33 = vmax.f32 %v9680_v23, %v3225_v46  ;;  %v3230_v17 = vsel %vm478_vm0, %v4809_v38, %v4834_v50  ;;  %v9684_v35 = vmax.f32 %v7795_v37, 0.0  ;;  %v3231_v26 = vsel %vm478_vm0, %v4834_v50, %v4835_v28  ;;  %v9686_v38 = vld [vmem:[#allocation20_spill] sm:$0xff] }
 0x55e   : > { %v8517_v20 = vmax.f32 %v9681_v3, %v3226_v10  ;;  %4917 = vrot.lane.b32.xlu0 %v4916_v40, %s5155_s23  ;;  %v4921_v5 = vpack.i.bf16 %v8509_v49, %v8503_v36  ;;  %v3235_v14 = vsel %vm478_vm0, %v4815_v47, %v4839_v53  ;;  %v3236_v46 = vsel %vm478_vm0, %v4839_v53, %v4840_v21 }
 0x55f   : > { %v8526_v16 = vmax.f32 %v9684_v35, %v9683_v4  ;;  %v9685_v10 = vunpack.i.h.bf16 %v8287_v54  ;;  %v9687_v43 = vmax.f32 %v9686_v38, 0.0  ;;  %v9688_v37 = vmax.f32 %v7892_v15, 0.0 }
 0x560   : > { %9682 = vst [vmem:[#allocation72_spill] sm:$0xff] %v8517_v20  ;;  %v9689_v27 = vmax.f32 %v7985_v7, 0.0  ;;  %4922 = vrot.lane.b32.xlu1 %v4921_v5, %s5155_s23  ;;  %v4926_v47 = vpack.i.bf16 %v8517_v20, %v8513_v33  ;;  %v9691_v53 = vmax.f32 %v7916_v63, 0.0  ;;  %v9692_v15 = vmax.f32 %v7987_v57, 0.0 }
 0x561   : > { %v8538_v32 = vmax.f32 %v9687_v43, %v9685_v10  ;;  %v8542_v29 = vmax.f32 %v9688_v37, %v3230_v17  ;;  %v9694_v7 = vunpack.i.h.bf16 %v8400_v9  ;;  %v9695_v3 = vmax.f32 %v7858_v56, 0.0 }
 0x562   : > { %v8546_v51 = vmax.f32 %v9689_v27, %v3231_v26  ;;  %v8555_v50 = vmax.f32 %v9691_v53, %v3235_v14  ;;  %v8559_v23 = vmax.f32 %v9692_v15, %v3236_v46  ;;  %4927 = vrot.lane.b32.xlu0 %v4926_v47, %s5155_s23  ;;  %v9696_v17 = vunpack.i.h.bf16 %v8402_v0 }
 0x563   : > { %v4931_v54 = vpack.i.bf16 %v8526_v16, %v8538_v32  ;;  %v8566_v40 = vmax.f32 %v9695_v3, %v9694_v7  ;;  %v9697_v4 = vmax.f32 %v7856_v62, 0.0  ;;  %v9698_v57 = vmax.f32 %v7955_v30, 0.0 }
 0x564   : > { %9690 = vst [vmem:[#allocation76_spill] sm:$0xff] %v8546_v51  ;;  %9693 = vst [vmem:[#allocation73_spill] sm:$0xff] %v8559_v23  ;;  %v4936_v63 = vpack.i.bf16 %v8546_v51, %v8542_v29  ;;  %v9700_v9 = vmax.f32 %v7944_v22, 0.0  ;;  %v4941_v62 = vpack.i.bf16 %v8559_v23, %v8555_v50  ;;  %v9702_v5 = vmax.f32 %v7981_v31, 0.0 }
 0x565   : > { %v8572_v35 = vmax.f32 %v9697_v4, %v9696_v17  ;;  %4932 = vrot.lane.b32.xlu1 %v4931_v54, %s5155_s23  ;;  %v8579_v26 = vmax.f32 %v9698_v57, %v4830_v11  ;;  %v9703_v30 = vmax.f32 %v7979_v44, 0.0 }
 0x566   : > { %v8583_v56 = vmax.f32 %v9700_v9, %v4825_v24  ;;  %4937 = vrot.lane.b32.xlu0 %v4936_v63, %s5155_s23  ;;  %v8592_v14 = vmax.f32 %v9702_v5, %v4840_v21 }
 0x567   : > { %9699 = vst [vmem:[#allocation77_spill] sm:$0xff] %v8579_v26  ;;  %v4946_v0 = vpack.i.bf16 %v8566_v40, %v8572_v35  ;;  %v8596_v11 = vmax.f32 %v9703_v30, %v4835_v28  ;;  %v8651_v30 = vld [vmem:[%s9001_s5 + $0x260] ss:$8 sps:$4 sm:$0xff]  }
 0x568   : > { %9701 = vst [vmem:[#allocation78_spill] sm:$0xff] %v8583_v56  ;;  %v4951_v22 = vpack.i.bf16 %v8579_v26, %v8583_v56 }
 0x569   : > { %4942 = vrot.lane.b32.xlu1 %v4941_v62, %s5155_s23  ;;  %v4956_v24 = vpack.i.bf16 %v8592_v14, %v8596_v11 }
 0x56a   : > { %4947 = vrot.lane.b32.xlu0 %v4946_v0, %s5155_s23  ;;  %v8633_v0 = vld [vmem:[%s9001_s5 + $0x270] ss:$8 sps:$4 sm:$0xff]  }
 0x56d   : > { %4952 = vrot.lane.b32.xlu1 %v4951_v22, %s5155_s23 }
 0x56e   : > { %4957 = vrot.lane.b32.xlu0 %v4956_v24, %s5155_s23  ;;  %v8660_v24 = vld [vmem:[%s9001_s5 + $0x254] ss:$8 sps:$4 sm:$0xff]  }
 0x593   : > { %v8606_v31 = vpop.permute.xlu1 %4842 }
 0x594   : > { %v9240_v44 = vunpack.i.h.bf16 %v8606_v31  ;;  %v4844_v21 = vunpack.i.l.bf16 %v8606_v31 }
 0x596   : > { %v3478_v28 = vsel %vm880_vm2, %v4844_v21, %v9240_v44 }
 0x597   : > { %v4853_v10 = vpop.permute.xlu1 %4852  ;;  %v3566_v17 = vmax.f32 %v8138_v18, %v3478_v28 }
 0x598   : > { %v4855_v37 = vunpack.i.h.bf16 %v4853_v10  ;;  %v4854_v27 = vunpack.i.l.bf16 %v4853_v10 }
 0x599   : > { %v8613_v46 = vpop.permute.xlu0 %4847 }
 0x59a   : > { %v4850_v38 = vunpack.i.h.bf16 %v8613_v46  ;;  %v4849_v43 = vunpack.i.l.bf16 %v8613_v46  ;;  %v3477_v53 = vsel %vm880_vm2, %v4854_v27, %v4844_v21  ;;  %v8692_v27 = vld [vmem:[%s9001_s5 + $0x230] ss:$8 sps:$4 sm:$0xff]   ;;  %v9706_v46 = vunpack.i.h.bf16 %v8606_v31 }
 0x59b   : > { %v3565_v7 = vmax.f32 %v8181_v12, %v3477_v53  ;;  %v8710_v53 = vld [vmem:[%s9001_s5 + $0x214] ss:$8 sps:$4 sm:$0xff]  }
 0x59c   : > { %v3483_v47 = vsel %vm880_vm2, %v4849_v43, %v4850_v38  ;;  %v3482_v54 = vsel %vm880_vm2, %v4855_v37, %v4849_v43  ;;  %v8668_v43 = vld [vmem:[%s9001_s5 + $0x250] ss:$8 sps:$4 sm:$0xff]   ;;  %v8674_v37 = vld [vmem:[%s9001_s5 + $0x244] ss:$8 sps:$4 sm:$0xff]  }
 0x59d   : > { %v3571_v15 = vmax.f32 %v8177_v60, %v3482_v54  ;;  %v8624_v3 = vpop.permute.xlu0 %4857  ;;  %v3572_v4 = vmax.f32 %v8185_v39, %v3483_v47  ;;  %v8638_v60 = vld [vmem:[%s9001_s5 + $0x264] ss:$8 sps:$4 sm:$0xff]   ;;  %v8704_v54 = vld [vmem:[%s9001_s5 + $0x220] ss:$8 sps:$4 sm:$0xff]  }
 0x59e   : > { %v9238_v63 = vunpack.i.h.bf16 %v8624_v3  ;;  %v4859_v57 = vunpack.i.l.bf16 %v8624_v3  ;;  %v8698_v47 = vld [vmem:[%s9001_s5 + $0x224] ss:$8 sps:$4 sm:$0xff]  }
 0x59f   : > { %v3613_v9 = vpack.c.bf16 %v3571_v15, %v3565_v7  ;;  %v3614_v62 = vpack.c.bf16 %v3572_v4, %v3566_v17  ;;  %v8640_v18 = vpop.permute.xlu1 %4867  ;;  %v8716_v15 = vld [vmem:[%s9001_s5 + $0x210] ss:$8 sps:$4 sm:$0xff]   ;;  %v8722_v7 = vld [vmem:[%s9001_s5 + $0x204] ss:$8 sps:$4 sm:$0xff]  }
 0x5a0   : > { %v3488_v12 = vsel %vm880_vm2, %v4859_v57, %v9238_v63  ;;  %v9239_v39 = vunpack.i.h.bf16 %v8640_v18  ;;  %v4869_v5 = vunpack.i.l.bf16 %v8640_v18 }
 0x5a1   : > { %4185 = vmatprep.mubr.bf16.mxu0 %v3614_v62  ;;  %v3578_v21 = vmax.f32 %v8224_v2, %v3488_v12  ;;  %v8680_v2 = vld [vmem:[%s9001_s5 + $0x240] ss:$8 sps:$4 sm:$0xff]  }
 0x5a2   : > { %4186 = vmatmul.mubr.bf16.vlgmr.msra.gmra.mxu0 %v3613_v9  ;;  %v3493_v22 = vsel %vm880_vm2, %v4869_v5, %v9239_v39 }
 0x5a3   : > { %4300 = vmatpush1.bf16.msra.mxu0 %v8633_v0  ;;  %v3584_v28 = vmax.f32 %v8247_v6, %v3493_v22  ;;  %v8686_v6 = vld [vmem:[%s9001_s5 + $0x234] ss:$8 sps:$4 sm:$0xff]  }
 0x5a4   : > { %4301 = vmatprep.subr.bf16.mxu0 %v8638_v60 }
 0x5a5   : > { %v3620_v10 = vpack.c.bf16 %v3584_v28, %v3578_v21  ;;  %v8732_v21 = vld [vmem:[%s9001_s5 + $0x200] ss:$8 sps:$4 sm:$0xff]  }
 0x5a7   : > { %4302 = vmatpush1.bf16.msra.mxu0 %v8651_v30  ;;  %4195 = vmatprep.mubr.bf16.mxu0 %v3620_v10 }
 0x5a8   : > { %4303 = vmatprep.subr.bf16.mxu0 %v8660_v24 }
 0x5ab   : > { %4304 = vmatpush1.bf16.msra.mxu0 %v8668_v43 }
 0x5ac   : > { %4305 = vmatprep.subr.bf16.mxu0 %v8674_v37 }
 0x5af   : > { %4306 = vmatpush1.bf16.msra.mxu0 %v8680_v2 }
 0x5b0   : > { %4307 = vmatprep.subr.bf16.mxu0 %v8686_v6 }
 0x5b3   : > { %4308 = vmatpush1.bf16.msra.mxu0 %v8692_v27 }
 0x5b4   : > { %4309 = vmatprep.subr.bf16.mxu0 %v8698_v47 }
 0x5b7   : > { %4310 = vmatpush1.bf16.msra.mxu0 %v8704_v54  ;;  %v4863_v17 = vpop.permute.xlu0 %4862 }
 0x5b8   : > { %4311 = vmatprep.subr.bf16.mxu0 %v8710_v53  ;;  %v4865_v4 = vunpack.i.h.bf16 %v4863_v17  ;;  %v4864_v9 = vunpack.i.l.bf16 %v4863_v17  ;;  %v8740_v17 = vld [vmem:[%s9001_s5 + $0x294] ss:$8 sps:$4 sm:$0xff]  }
 0x5b9   : > { %9704 = vst [vmem:[#allocation85_spill] sm:$0xff] %v8740_v17 }
 0x5ba   : > { %v8724_v62 = vpop.permute.xlu1 %4877  ;;  %v3487_v28 = vsel %vm880_vm2, %v4864_v9, %v4859_v57  ;;  %v3492_v10 = vsel %vm880_vm2, %v4865_v4, %v4869_v5 }
 0x5bb   : > { %v4879_v22 = vunpack.i.l.bf16 %v8724_v62  ;;  %4312 = vmatpush1.bf16.msra.mxu0 %v8716_v15  ;;  %v8742_v63 = vpop.permute.xlu0 %4872  ;;  %v3577_v39 = vmax.f32 %v8323_v55, %v3487_v28  ;;  %v3583_v44 = vmax.f32 %v8319_v19, %v3492_v10  ;;  %v9705_v9 = vunpack.i.h.bf16 %v8724_v62  ;;  %v8762_v19 = vld [vmem:[%s9001_s5 + $0x290] ss:$8 sps:$4 sm:$0xff]  }
 0x5bc   : > { %4313 = vmatprep.subr.bf16.mxu0 %v8722_v7  ;;  %v9245_v57 = vunpack.i.h.bf16 %v8742_v63  ;;  %v4874_v5 = vunpack.i.l.bf16 %v8742_v63 }
 0x5bd   : > { %v3484_v12 = vsel %vm880_vm2, %v4850_v38, %v4879_v22  ;;  %v3485_v20 = vsel %vm880_vm2, %v4879_v22, %v9705_v9  ;;  %v3619_v28 = vpack.c.bf16 %v3583_v44, %v3577_v39  ;;  %v8774_v44 = vld [vmem:[%s9001_s5 + $0x284] ss:$8 sps:$4 sm:$0xff]   ;;  %v9707_v39 = vld [vmem:[#allocation27_spill] sm:$0xff] }
 0x5be   : > { %v8751_v4 = vpop.permute.xlu1 %4882  ;;  %v3479_v38 = vsel %vm880_vm2, %v9706_v46, %v4874_v5  ;;  %v3480_v22 = vsel %vm880_vm2, %v4874_v5, %v9245_v57  ;;  %v3573_v10 = vmax.f32 %v9707_v39, %v3484_v12  ;;  %v9708_v9 = vld [vmem:[#allocation19_spill] sm:$0xff]  ;;  %v3574_v57 = vmax.f32 %v8330_v61, %v3485_v20 }
 0x5bf   : > { %v4884_v55 = vunpack.i.l.bf16 %v8751_v4  ;;  %4314 = vmatpush1.bf16.msra.mxu0 %v8732_v21  ;;  %v3567_v49 = vmax.f32 %v9708_v9, %v3479_v38  ;;  %v3568_v31 = vmax.f32 %v8336_v42, %v3480_v22  ;;  %v9709_v46 = vunpack.i.h.bf16 %v8751_v4  ;;  %v8791_v42 = vld [vmem:[%s9001_s5 + $0x280] ss:$8 sps:$4 sm:$0xff]  }
 0x5c0   : > { %4327 = vmatprep.subr.bf16.mxu0 %v8740_v17  ;;  %4196 = vmatmul.mubr.bf16.gmra.mxu0 %v3619_v28 }
 0x5c1   : > { %v3498_v23 = vsel %vm880_vm2, %v4884_v55, %v9709_v46  ;;  %v3615_v17 = vpack.c.bf16 %v3573_v10, %v3567_v49  ;;  %v3616_v38 = vpack.c.bf16 %v3574_v57, %v3568_v31  ;;  %v9710_v57 = vld [vmem:[#allocation41_spill] sm:$0xff] }
 0x5c2   : > { %v8782_v51 = vpop.permute.xlu0 %4887  ;;  %v4893_v5 = vpop.permute.xlu1 %4892  ;;  %v3590_v39 = vmax.f32 %v8374_v48, %v3498_v23 }
 0x5c3   : > { %v4890_v56 = vunpack.i.h.bf16 %v8782_v51  ;;  %v4889_v26 = vunpack.i.l.bf16 %v8782_v51  ;;  %v4895_v12 = vunpack.i.h.bf16 %v4893_v5  ;;  %4328 = vmatpush2.bf16.msra.mxu0 %v8762_v19  ;;  %v4894_v28 = vunpack.i.l.bf16 %v4893_v5  ;;  %4258 = vmatprep.mubr.bf16.mxu1 %v3616_v38  ;;  %v9718_v51 = vld [vmem:[#allocation42_spill] sm:$0xff] }
 0x5c4   : > { %4329 = vmatprep.subr.bf16.mxu0 %v8774_v44  ;;  %4259 = vmatmul.mubr.bf16.vlgmr.msra.gmra.mxu1 %v3615_v17 }
 0x5c5   : > { %v3503_v61 = vsel %vm880_vm2, %v4889_v26, %v4890_v56  ;;  %v3502_v49 = vsel %vm880_vm2, %v4895_v12, %v4889_v26  ;;  %v3497_v20 = vsel %vm880_vm2, %v4894_v28, %v4884_v55  ;;  %4648 = vmatpush1.bf16.msra.mxu1 %v8633_v0  ;;  %v9711_v0 = vunpack.i.h.bf16 %v8640_v18  ;;  %v9712_v18 = vld [vmem:[#allocation64_spill] sm:$0xff] }
 0x5c6   : > { %v8799_v22 = vpop.permute.xlu1 %4907  ;;  %v3596_v10 = vmax.f32 %v8407_v25, %v3503_v61  ;;  %v3595_v9 = vmax.f32 %v8390_v45, %v3502_v49  ;;  %v3589_v31 = vmax.f32 %v9710_v57, %v3497_v20  ;;  %4639 = vmatprep.subr.bf16.mxu1 %v8638_v60  ;;  %v9713_v20 = vunpack.i.h.bf16 %v8624_v3  ;;  %v9714_v57 = vld [vmem:[#allocation26_spill] sm:$0xff] }
 0x5c7   : > { %4330 = vmatpush2.bf16.msra.mxu0 %v8791_v42  ;;  %v9249_v26 = vunpack.i.h.bf16 %v8799_v22  ;;  %v4909_v55 = vunpack.i.l.bf16 %v8799_v22 }
 0x5c8   : > { %v3626_v46 = vpack.c.bf16 %v3596_v10, %v3590_v39  ;;  %v3625_v5 = vpack.c.bf16 %v3595_v9, %v3589_v31  ;;  %v8810_v48 = vpop.permute.xlu0 %4897 }
 0x5c9   : > { %v4900_v45 = vunpack.i.h.bf16 %v8810_v48  ;;  %v4899_v25 = vunpack.i.l.bf16 %v8810_v48  ;;  %4649 = vmatpush1.bf16.msra.mxu1 %v8651_v30  ;;  %v3495_v23 = vsel %vm880_vm2, %v4909_v55, %v9249_v26  ;;  %v3494_v60 = vsel %vm880_vm2, %v9711_v0, %v4909_v55 }
 0x5ca   : > { %4205 = vmatprep.mubr.bf16.mxu0 %v3626_v46  ;;  %4640 = vmatprep.subr.bf16.mxu1 %v8660_v24  ;;  %v3586_v49 = vmax.f32 %v9712_v18, %v3495_v23  ;;  %v3585_v31 = vmax.f32 %v9714_v57, %v3494_v60 }
 0x5cb   : > { %4206 = vmatmul.mubr.bf16.gmra.mxu0 %v3625_v5  ;;  %v3508_v17 = vsel %vm880_vm2, %v4899_v25, %v4900_v45  ;;  %v9715_v5 = vld [vmem:[#allocation24_spill] sm:$0xff] }
 0x5cc   : > { %v8825_v12 = vpop.permute.xlu0 %4902  ;;  %v8827_v28 = vpop.permute.xlu1 %4912 }
 0x5cd   : > { %v4905_v30 = vunpack.i.h.bf16 %v8825_v12  ;;  %v4904_v38 = vunpack.i.l.bf16 %v8825_v12  ;;  %v4915_v61 = vunpack.i.h.bf16 %v8827_v28  ;;  %v4914_v24 = vunpack.i.l.bf16 %v8827_v28  ;;  %4650 = vmatpush1.bf16.msra.mxu1 %v8668_v43 }
 0x5ce   : > { %4641 = vmatprep.subr.bf16.mxu1 %v8674_v37  ;;  %v3602_v43 = vmax.f32 %v8455_v8, %v3508_v17 }
 0x5cf   : > { %v3489_v39 = vsel %vm880_vm2, %v9713_v20, %v4904_v38  ;;  %v3490_v10 = vsel %vm880_vm2, %v4904_v38, %v4905_v30  ;;  %v3513_v9 = vsel %vm880_vm2, %v4914_v24, %v4915_v61 }
 0x5d0   : > { %v4918_v46 = vpop.permute.xlu0 %4917  ;;  %v3608_v55 = vmax.f32 %v8474_v59, %v3513_v9  ;;  %v3580_v3 = vmax.f32 %v8460_v41, %v3490_v10  ;;  %v3579_v23 = vmax.f32 %v9715_v5, %v3489_v39  ;;  %v9719_v5 = vunpack.i.h.bf16 %v8742_v63 }
 0x5d1   : > { %v4920_v0 = vunpack.i.h.bf16 %v4918_v46  ;;  %v4919_v18 = vunpack.i.l.bf16 %v4918_v46  ;;  %4651 = vmatpush1.bf16.msra.mxu1 %v8680_v2 }
 0x5d2   : > { %v8850_v38 = vpop.permute.xlu1 %4922  ;;  %v3632_v20 = vpack.c.bf16 %v3608_v55, %v3602_v43  ;;  %v3622_v26 = vpack.c.bf16 %v3586_v49, %v3580_v3  ;;  %v3621_v37 = vpack.c.bf16 %v3585_v31, %v3579_v23  ;;  %4642 = vmatprep.subr.bf16.mxu1 %v8686_v6  ;;  %v9716_v49 = vunpack.i.h.bf16 %v8751_v4  ;;  %v9717_v43 = vld [vmem:[#allocation39_spill] sm:$0xff] }
 0x5d3   : > { %v3507_v60 = vsel %vm880_vm2, %v4919_v18, %v4899_v25  ;;  %v3512_v57 = vsel %vm880_vm2, %v4920_v0, %v4914_v24  ;;  %v4925_v8 = vunpack.i.h.bf16 %v8850_v38  ;;  %v4924_v59 = vunpack.i.l.bf16 %v8850_v38 }
 0x5d4   : > { %v8858_v41 = vpop.permute.xlu0 %4927  ;;  %4215 = vmatprep.mubr.bf16.mxu0 %v3632_v20  ;;  %4268 = vmatprep.mubr.bf16.mxu1 %v3622_v26  ;;  %v3601_v17 = vmax.f32 %v8487_v13, %v3507_v60  ;;  %v3607_v2 = vmax.f32 %v8483_v52, %v3512_v57  ;;  %v9720_v0 = vunpack.i.h.bf16 %v8724_v62  ;;  %v9721_v20 = vld [vmem:[#allocation40_spill] sm:$0xff] }
 0x5d5   : > { %v3499_v25 = vsel %vm880_vm2, %v9716_v49, %v4924_v59  ;;  %v3500_v24 = vsel %vm880_vm2, %v4924_v59, %v4925_v8  ;;  %v4930_v39 = vunpack.i.h.bf16 %v8858_v41  ;;  %v4929_v6 = vunpack.i.l.bf16 %v8858_v41  ;;  %4269 = vmatmul.mubr.bf16.gmra.mxu1 %v3621_v37  ;;  %v9722_v37 = vld [vmem:[#allocation29_spill] sm:$0xff] }
 0x5d6   : > { %4652 = vmatpush1.bf16.msra.mxu1 %v8692_v27  ;;  %v3631_v26 = vpack.c.bf16 %v3607_v2, %v3601_v17  ;;  %v3592_v46 = vmax.f32 %v8503_v36, %v3500_v24  ;;  %v3591_v55 = vmax.f32 %v9717_v43, %v3499_v25 }
 0x5d7   : > { %v4933_v10 = vpop.permute.xlu1 %4932  ;;  %v3504_v52 = vsel %vm880_vm2, %v4890_v56, %v4929_v6  ;;  %v3505_v13 = vsel %vm880_vm2, %v4929_v6, %v4930_v39  ;;  %4643 = vmatprep.subr.bf16.mxu1 %v8698_v47 }
 0x5d8   : > { %v4935_v4 = vunpack.i.h.bf16 %v4933_v10  ;;  %v4934_v9 = vunpack.i.l.bf16 %v4933_v10  ;;  %v8878_v31 = vpop.permute.xlu0 %4937  ;;  %4216 = vmatmul.mubr.bf16.gmra.mxu0 %v3631_v26  ;;  %v3598_v27 = vmax.f32 %v8513_v33, %v3505_v13  ;;  %v3597_v3 = vmax.f32 %v9718_v51, %v3504_v52 }
 0x5d9   : > { %v4940_v60 = vunpack.i.h.bf16 %v8878_v31  ;;  %v4939_v57 = vunpack.i.l.bf16 %v8878_v31 }
 0x5da   : > { %v3576_v56 = vmax.f32 %v8526_v16, %v4935_v4  ;;  %v3481_v23 = vsel %vm880_vm2, %v9719_v5, %v4934_v9  ;;  %v3486_v47 = vsel %vm880_vm2, %v9720_v0, %v4935_v4  ;;  %v3570_v18 = vmax.f32 %v8538_v32, %v4934_v9  ;;  %4653 = vmatpush1.bf16.msra.mxu1 %v8704_v54  ;;  %v9727_v5 = vld [vmem:[#allocation61_spill] sm:$0xff] }
 0x5db   : > { %v3569_v36 = vmax.f32 %v9721_v20, %v3481_v23  ;;  %v3575_v33 = vmax.f32 %v9722_v37, %v3486_v47  ;;  %v4943_v59 = vpop.permute.xlu1 %4942  ;;  %v3628_v2 = vpack.c.bf16 %v3598_v27, %v3592_v46  ;;  %4644 = vmatprep.subr.bf16.mxu1 %v8710_v53  ;;  %v3509_v32 = vsel %vm880_vm2, %v4900_v45, %v4939_v57  ;;  %v9724_v27 = vld [vmem:[#allocation77_spill] sm:$0xff]  ;;  %v9728_v47 = vld [vmem:[#allocation76_spill] sm:$0xff] }
 0x5dc   : > { %v3618_v16 = vpack.c.bf16 %v3576_v56, %v3570_v18  ;;  %v4945_v63 = vunpack.i.h.bf16 %v4943_v59  ;;  %v4944_v17 = vunpack.i.l.bf16 %v4943_v59  ;;  %v3510_v62 = vsel %vm880_vm2, %v4939_v57, %v4940_v60  ;;  %v4948_v49 = vpop.permute.xlu0 %4947  ;;  %v9729_v20 = vld [vmem:[#allocation73_spill] sm:$0xff] }
 0x5dd   : > { %v3627_v25 = vpack.c.bf16 %v3597_v3, %v3591_v55  ;;  %v4950_v6 = vunpack.i.h.bf16 %v4948_v49  ;;  %v4949_v10 = vunpack.i.l.bf16 %v4948_v49  ;;  %4278 = vmatprep.mubr.bf16.mxu1 %v3628_v2  ;;  %v3617_v53 = vpack.c.bf16 %v3575_v33, %v3569_v36  ;;  %v9725_v55 = vld [vmem:[#allocation78_spill] sm:$0xff]  ;;  %v9726_v3 = vld [vmem:[#allocation85_spill] sm:$0xff] }
 0x5de   : > { %v3514_v24 = vsel %vm880_vm2, %v4915_v61, %v4944_v17  ;;  %v3515_v54 = vsel %vm880_vm2, %v4944_v17, %v4945_v63  ;;  %4615 = vmatprep.mubr.msk.bf16.mxu0 %vm2554_vm8, %v3618_v16  ;;  %v3604_v48 = vmax.f32 %v8542_v29, %v3510_v62  ;;  %4654 = vmatpush1.bf16.msra.mxu1 %v8716_v15  ;;  %v9723_v15 = vunpack.i.h.bf16 %v8799_v22 }
 0x5df   : > { %v4953_v26 = vpop.permute.xlu1 %4952  ;;  %4279 = vmatmul.mubr.bf16.gmra.mxu1 %v3627_v25  ;;  %v3610_v45 = vmax.f32 %v8555_v50, %v3515_v54  ;;  %v3588_v52 = vmax.f32 %v8566_v40, %v4950_v6  ;;  %v3582_v28 = vmax.f32 %v8572_v35, %v4949_v10  ;;  %v3603_v61 = vmax.f32 %v8451_v1, %v3509_v32 }
 0x5e0   : > { %v3609_v13 = vmax.f32 %v8478_v58, %v3514_v24  ;;  %v3491_v4 = vsel %vm880_vm2, %v4905_v30, %v4949_v10  ;;  %v4955_v9 = vunpack.i.h.bf16 %v4953_v26  ;;  %v4954_v31 = vunpack.i.l.bf16 %v4953_v26  ;;  %v4958_v46 = vpop.permute.xlu0 %4957  ;;  %4332 = vmatmul.mubr.bf16.vlgmr.msra.gmra.mxu0 %v3617_v53  ;;  %4645 = vmatprep.subr.bf16.mxu1 %v8722_v7 }
 0x5e1   : > { %v3634_v29 = vpack.c.bf16 %v3610_v45, %v3604_v48  ;;  %v3624_v50 = vpack.c.bf16 %v3588_v52, %v3582_v28  ;;  %v4960_v40 = vunpack.i.h.bf16 %v4958_v46  ;;  %v4959_v35 = vunpack.i.l.bf16 %v4958_v46 }
 0x5e2   : > { %v3496_v1 = vsel %vm880_vm2, %v9723_v15, %v4950_v6  ;;  %4655 = vmatpush1.bf16.msra.mxu1 %v8732_v21  ;;  %v3581_v30 = vmax.f32 %v8464_v34, %v3491_v4  ;;  %v3600_v43 = vmax.f32 %v9724_v27, %v4955_v9  ;;  %v3594_v7 = vmax.f32 %v9725_v55, %v4954_v31 }
 0x5e3   : > { %4288 = vmatprep.mubr.bf16.mxu1 %v3634_v29  ;;  %v3612_v58 = vmax.f32 %v8592_v14, %v4960_v40  ;;  %v3606_v12 = vmax.f32 %v8596_v11, %v4959_v35  ;;  %4616 = vmatprep.mubr.msk.bf16.mxu0 %vm2554_vm8, %v3624_v50  ;;  %v3633_v51 = vpack.c.bf16 %v3609_v13, %v3603_v61 }
 0x5e4   : > { %4646 = vmatprep.subr.bf16.mxu1 %v9726_v3  ;;  %v3511_v22 = vsel %vm880_vm2, %v4940_v60, %v4959_v35  ;;  %v3516_v56 = vsel %vm880_vm2, %v4945_v63, %v4960_v40  ;;  %v3587_v11 = vmax.f32 %v9727_v5, %v3496_v1  ;;  %v3506_v34 = vsel %vm880_vm2, %v4930_v39, %v4955_v9  ;;  %v9731_v39 = vld [vmem:[#allocation72_spill] sm:$0xff] }
 0x5e5   : > { %v3636_v14 = vpack.c.bf16 %v3612_v58, %v3606_v12  ;;  %v3501_v23 = vsel %vm880_vm2, %v4925_v8, %v4954_v31  ;;  %v3630_v0 = vpack.c.bf16 %v3600_v43, %v3594_v7  ;;  %v3605_v18 = vmax.f32 %v9728_v47, %v3511_v22 }
 0x5e6   : > { %4656 = vmatpush2.bf16.msra.mxu1 %v8762_v19  ;;  %v3623_v21 = vpack.c.bf16 %v3587_v11, %v3581_v30  ;;  %v3611_v36 = vmax.f32 %v9729_v20, %v3516_v56  ;;  %v9730_v19 = vld [vmem:[#allocation63_spill] sm:$0xff]  ;;  %v3599_v37 = vmax.f32 %v9731_v39, %v3506_v34 }
 0x5e7   : > { %4289 = vmatmul.mubr.bf16.gmra.mxu1 %v3633_v51  ;;  %4647 = vmatprep.subr.bf16.mxu1 %v8774_v44  ;;  %v3593_v41 = vmax.f32 %v9730_v19, %v3501_v23 }
 0x5e8   : > { %4618 = vmatprep.mubr.msk.bf16.mxu1 %vm2554_vm8, %v3636_v14  ;;  %4342 = vmatmul.mubr.bf16.gmra.mxu0 %v3623_v21  ;;  %v3635_v33 = vpack.c.bf16 %v3611_v36, %v3605_v18 }
 0x5e9   : > { %4617 = vmatprep.mubr.msk.bf16.mxu0 %vm2554_vm8, %v3630_v0  ;;  %v3629_v38 = vpack.c.bf16 %v3599_v37, %v3593_v41 }
 0x5ea   : > { %4657 = vmatpush2.bf16.msra.mxu1 %v8791_v42 }
 0x5ef   : > { %4362 = vmatmul.mubr.bf16.vlgmr.msra.gmra.mxu1 %v3635_v33 }
 0x5f0   : > { %4352 = vmatmul.mubr.bf16.gmra.mxu0 %v3629_v38 }
 0x662   : > { %v4187_v8 = vpop.f32.mrf.mxu0 }
 0x664   : > { %v4189_v60 = vpop.f32.mrf.mxu0 }
 0x666   : > { %v4191_v57 = vpop.f32.mrf.mxu0 }
 0x668   : > { %v4193_v59 = vpop.f32.mrf.mxu0 }
 0x680   : > { %v4197_v16 = vpop.f32.mrf.mxu0 }
 0x682   : > { %v4199_v63 = vpop.f32.mrf.mxu0 }
 0x684   : > { %v4201_v44 = vpop.f32.mrf.mxu0  ;;  %v4260_v2 = vpop.f32.mrf.mxu1 }
 0x685   : > { %v4261_v9 = vadd.f32 %v4260_v2, %v4187_v8 }
 0x686   : > { %v4203_v17 = vpop.f32.mrf.mxu0  ;;  %v4262_v42 = vpop.f32.mrf.mxu1 }
 0x687   : > { %v4263_v31 = vadd.f32 %v4262_v42, %v4189_v60 }
 0x688   : > { %v4264_v49 = vpop.f32.mrf.mxu1 }
 0x689   : > { %v4265_v58 = vadd.f32 %v4264_v49, %v4191_v57 }
 0x68a   : > { %v4266_v24 = vpop.f32.mrf.mxu1 }
 0x68b   : > { %v8947_v32 = vpop.f32.mrf.mxu0  ;;  %v4267_v12 = vadd.f32 %v4266_v24, %v4193_v59 }
 0x68d   : > { %v8949_v62 = vpop.f32.mrf.mxu0 }
 0x68f   : > { %v8951_v25 = vpop.f32.mrf.mxu0 }
 0x691   : > { %v8953_v6 = vpop.f32.mrf.mxu0 }
 0x695   : > { %v4270_v54 = vpop.f32.mrf.mxu1 }
 0x696   : > { %v4271_v56 = vadd.f32 %v4270_v54, %v4197_v16 }
 0x697   : > { %v4272_v10 = vpop.f32.mrf.mxu1 }
 0x698   : > { %v4217_v53 = vpop.f32.mrf.mxu0  ;;  %v4273_v14 = vadd.f32 %v4272_v10, %v4199_v63 }
 0x699   : > { %v4274_v26 = vpop.f32.mrf.mxu1 }
 0x69a   : > { %v4219_v48 = vpop.f32.mrf.mxu0  ;;  %v4275_v47 = vadd.f32 %v4274_v26, %v4201_v44 }
 0x69b   : > { %v4276_v45 = vpop.f32.mrf.mxu1 }
 0x69c   : > { %v4221_v52 = vpop.f32.mrf.mxu0  ;;  %v4277_v18 = vadd.f32 %v4276_v45, %v4203_v17 }
 0x69e   : > { %v4223_v61 = vpop.f32.mrf.mxu0 }
 0x69f   : > { %v4280_v28 = vpop.f32.mrf.mxu1 }
 0x6a0   : > { %v4333_v4 = vpop.f32.mrf.mxu0  ;;  %v4281_v59 = vadd.f32 %v4280_v28, %v8947_v32 }
 0x6a1   : > { %v4282_v13 = vpop.f32.mrf.mxu1  ;;  %v4334_v50 = vadd.f32 %v4333_v4, %v4261_v9 }
 0x6a2   : > { %v4335_v29 = vpop.f32.mrf.mxu0  ;;  %v4283_v16 = vadd.f32 %v4282_v13, %v8949_v62 }
 0x6a3   : > { %v4284_v46 = vpop.f32.mrf.mxu1  ;;  %v4336_v40 = vadd.f32 %v4335_v29, %v4263_v31 }
 0x6a4   : > { %v4337_v1 = vpop.f32.mrf.mxu0  ;;  %v4285_v26 = vadd.f32 %v4284_v46, %v8951_v25 }
 0x6a5   : > { %v4286_v15 = vpop.f32.mrf.mxu1  ;;  %v4630_v30 = vpack.c.bf16 %v4336_v40, %v4334_v50  ;;  %v4338_v55 = vadd.f32 %v4337_v1, %v4265_v58 }
 0x6a6   : > { %v4339_v43 = vpop.f32.mrf.mxu0 }
 0x6a7   : > { %v4290_v27 = vpop.f32.mrf.mxu1  ;;  %4423 = vst.msk [vmem:[%s8959_s10] sm:$0xff] %vm8961_vm11, %v4630_v30  ;;  %v4340_v7 = vadd.f32 %v4339_v43, %v4267_v12 }
 0x6a8   : > { %v4343_v22 = vpop.f32.mrf.mxu0  ;;  %v4291_v19 = vadd.f32 %v4290_v27, %v4217_v53 }
 0x6a9   : > { %v4292_v51 = vpop.f32.mrf.mxu1  ;;  %v4631_v3 = vpack.c.bf16 %v4340_v7, %v4338_v55  ;;  %v4344_v34 = vadd.f32 %v4343_v22, %v4271_v56 }
 0x6aa   : > { %v4345_v11 = vpop.f32.mrf.mxu0  ;;  %v4293_v41 = vadd.f32 %v4292_v51, %v4219_v48  ;;  %v4287_v48 = vadd.f32 %v4286_v15, %v8953_v6 }
 0x6ab   : > { %v4294_v5 = vpop.f32.mrf.mxu1  ;;  %4424 = vst.msk [vmem:[%s8959_s10 + $0x8] sm:$0xff] %vm8961_vm11, %v4631_v3  ;;  %v4346_v21 = vadd.f32 %v4345_v11, %v4273_v14 }
 0x6ac   : > { %v4347_v0 = vpop.f32.mrf.mxu0  ;;  %v4295_v17 = vadd.f32 %v4294_v5, %v4221_v52 }
 0x6ad   : > { %v4296_v23 = vpop.f32.mrf.mxu1  ;;  %v4632_v20 = vpack.c.bf16 %v4346_v21, %v4344_v34  ;;  %v4348_v37 = vadd.f32 %v4347_v0, %v4275_v47 }
 0x6ae   : > { %v4349_v39 = vpop.f32.mrf.mxu0  ;;  %v4297_v2 = vadd.f32 %v4296_v23, %v4223_v61 }
 0x6af   : > { %v4363_v36 = vpop.f32.mrf.mxu1  ;;  %4425 = vst.msk [vmem:[%s8959_s10 + $0x10] sm:$0xff] %vm8961_vm11, %v4632_v20  ;;  %v4350_v33 = vadd.f32 %v4349_v39, %v4277_v18 }
 0x6b0   : > { %v4364_v8 = vadd.f32 %v4363_v36, %v4291_v19  ;;  %v4353_v57 = vpop.f32.mrf.mxu0 }
 0x6b1   : > { %v4365_v38 = vpop.f32.mrf.mxu1  ;;  %v4633_v63 = vpack.c.bf16 %v4350_v33, %v4348_v37  ;;  %v4354_v24 = vadd.f32 %v4353_v57, %v4281_v59 }
 0x6b2   : > { %v4366_v60 = vadd.f32 %v4365_v38, %v4293_v41  ;;  %v4355_v49 = vpop.f32.mrf.mxu0 }
 0x6b3   : > { %v4367_v44 = vpop.f32.mrf.mxu1  ;;  %4426 = vst.msk [vmem:[%s8959_s10 + $0x18] sm:$0xff] %vm8961_vm11, %v4633_v63  ;;  %v4356_v54 = vadd.f32 %v4355_v49, %v4283_v16 }
 0x6b4   : > { %v4636_v42 = vpack.c.bf16 %v4366_v60, %v4364_v8  ;;  %v4368_v32 = vadd.f32 %v4367_v44, %v4295_v17  ;;  %v4357_v53 = vpop.f32.mrf.mxu0 }
 0x6b5   : > { %v4369_v10 = vpop.f32.mrf.mxu1  ;;  %v4634_v45 = vpack.c.bf16 %v4356_v54, %v4354_v24  ;;  %v4358_v61 = vadd.f32 %v4357_v53, %v4285_v26 }
 0x6b6   : > { %4429 = vst.msk [vmem:[%s8959_s10 + $0x30] sm:$0xff] %vm8961_vm11, %v4636_v42  ;;  %v4370_v62 = vadd.f32 %v4369_v10, %v4297_v2  ;;  %v4359_v28 = vpop.f32.mrf.mxu0 }
 0x6b7   : > { %4427 = vst.msk [vmem:[%s8959_s10 + $0x20] sm:$0xff] %vm8961_vm11, %v4634_v45  ;;  %v4360_v13 = vadd.f32 %v4359_v28, %v4287_v48 }
 0x6b8   : > { %v4637_v52 = vpack.c.bf16 %v4370_v62, %v4368_v32 }
 0x6b9   : > { %v4635_v4 = vpack.c.bf16 %v4360_v13, %v4358_v61 }
 0x6ba   : > { %4430 = vst.msk [vmem:[%s8959_s10 + $0x38] sm:$0xff] %vm8961_vm11, %v4637_v52 }
 0x6bb   : > { %4428 = vst.msk [vmem:[%s8959_s10 + $0x28] sm:$0xff] %vm8961_vm11, %v4635_v4 }
 0x6bc PF: > { %s17_s21 = sadd.s32 1, %s5139_s21  }
 0x6bd   : > { %p14_p1 = scmp.ge.s32.totalorder %s17_s21, 4  }
 0x6bf   :  { %16 = sbr.rel (!%p14_p1) target bundleno = 1 (0x1), region = 79 }
 0x6c4   :  { %4452 = vsyncpa [#allocation3], 1 }
 0x6c5   :  { %4454 = vsyncpa [#allocation3 + $0x1], 1 }

// kernel: cnn_net_forward.3
= control target key start
LH: loop header
LB: loop body
LE: loop exit
PB: predicated region body
PF: predicated region fallthrough
CT: control target
= control target key end

     0   :  { %10 = vsyncpa [#allocation3], 0  ;;  %s9104_s0 = inlined_call_operand.vmem [shape: bf16[2,9216], index: 0, kind: input, shape index: {}]   ;;  %s9105_s1 = inlined_call_operand.hbm [shape: bf16[9216,128], index: 1, kind: input, shape index: {}]   ;;  %s9106_s2 = inlined_call_operand.hbm [shape: f32[1,128], index: 2, kind: input, shape index: {}]   ;;  %s9107_s3 = inlined_call_operand.vmem [shape: bf16[128,10], index: 3, kind: input, shape index: {}]   ;;  %s9108_s4 = inlined_call_operand.hbm [shape: f32[1,10], index: 4, kind: input, shape index: {}]   ;;  %s9109_s5 = inlined_call_operand.hbm [shape: f32[2,10], index: 5, kind: output, shape index: {}]  }
   0x1   :  { %11 = vsyncpa [#allocation6], 0 }
   0x2   :  { %12 = vsyncpa [#allocation4], 0  ;;  %s8871_s18 = smov [#allocation5]   ;;  %s8872_s20 = smov [#allocation2]  }
   0x3   :  { %s33_s19 = sshll.u32 %s8871_s18, 4  ;;  %s20_s21 = sshll.u32 %s8872_s20, 4  ;;  %s34_s19 = int_to_ptr.vmem [resolvable:$true] %s33_s19  ;;  %s21_s21 = int_to_ptr.vmem [resolvable:$true] %s20_s21 }
   0x4   :  { %s8793_s22 = scalar_lea.vmem %s34_s19, 16  ;;  %s8797_s23 = scalar_lea.vmem %s34_s19, 32 }
   0x5   :  { %p8794_p0 = scmp.ne.s32.totalorder %s34_s19, %s8793_s22  ;;  %p8798_p1 = scmp.lt.s32.totalorder %s34_s19, %s34_s19 }
   0x6   :  { %p8799_p2 = scmp.lt.s32.totalorder %s8797_s23, %s8793_s22 }
   0x8   :  { %p8800_p3 = por %p8799_p2, %p8798_p1 }
   0xa   :  { %p8801_p4 = pnand %p8800_p3, %p8794_p0 }
   0xc   :  { %8804 = shalt.err (!%p8801_p4)
}
   0xd   :  { %36 = dma.hbm_to_vmem [thread:$0]  %s9106_s2, 16, %s34_s19, [#allocation6]  }
   0xe   :  { %s8813_s26 = scalar_lea.vmem %s21_s21, 73728  ;;  %p8818_p6 = scmp.lt.s32.totalorder %s21_s21, %s21_s21 }
   0xf   :  { %p8814_p5 = scmp.ne.s32.totalorder %s21_s21, %s8813_s26  ;;  %p8819_p7 = scmp.lt.s32.totalorder %s8813_s26, %s8813_s26 }
  0x11   :  { %p8820_p8 = por %p8819_p7, %p8818_p6 }
  0x13   :  { %p8821_p9 = pnand %p8820_p8, %p8814_p5 }
  0x15   :  { %8824 = shalt.err (!%p8821_p9)
}
  0x16   :  { %s8873_s27 = smov 64   ;;  %s8874_s28 = smov 4  }
  0x17   :  { %26 = dma.hbm_to_vmem [thread:$0]  %s9105_s1, 73728, %s21_s21, [#allocation3], %s8873_s27, %s8873_s27, %s8874_s28  }
  0x18   :  { %s8875_s6 = smov [#allocation7]  }
  0x19   :  { %s45_s7 = sshll.u32 %s8875_s6, 4  ;;  %s46_s7 = int_to_ptr.vmem [resolvable:$true] %s45_s7 }
  0x1a   :  { %s8833_s8 = scalar_lea.vmem %s46_s7, 16  ;;  %s8837_s9 = scalar_lea.vmem %s46_s7, 32 }
  0x1b   :  { %p8834_p10 = scmp.ne.s32.totalorder %s46_s7, %s8833_s8  ;;  %p8838_p11 = scmp.lt.s32.totalorder %s46_s7, %s46_s7 }
  0x1c   :  { %p8839_p12 = scmp.lt.s32.totalorder %s8837_s9, %s8833_s8 }
  0x1e   :  { %p8840_p13 = por %p8839_p12, %p8838_p11 }
  0x20   :  { %p8841_p0 = pnand %p8840_p13, %p8834_p10 }
  0x22   :  { %8844 = shalt.err (!%p8841_p0)
}
  0x23   :  { %48 = dma.hbm_to_vmem [thread:$0]  %s9108_s4, 16, %s46_s7, [#allocation6]  }
  0x24   :  { %8865 = dma.done.wait [#allocation3], 73728  }
  0x25   :  { %8866 = vsyncadd [#allocation3], 4294893568 }
  0x26   :  { %8867 = dma.done.wait [#allocation6], 32  }
  0x27   :  { %8868 = vsyncadd [#allocation6], 4294967264  ;;  %v8192_v0 = vld [vmem:[#allocation2 + $0x78] sm:$0xff]   ;;  %v8196_v4 = vld [vmem:[#allocation2 + $0x70] sm:$0xff]   ;;  %v8876_v22 = vmov 1966171168   ;;  %v1240_v24 = vlaneseq }
  0x28   :  { %v8193_v1 = vld [vmem:[#allocation2 + $0xf8] sm:$0xff]   ;;  %7362 = vmatprep.subr.bf16.mxu0 %v8192_v0  ;;  %v8197_v5 = vld [vmem:[#allocation2 + $0xf0] sm:$0xff]   ;;  %v8200_v8 = vld [vmem:[#allocation2 + $0x68] sm:$0xff]   ;;  %v1238_v23 = vunpack.c.l.s4 %v8876_v22  ;;  %vm8878_vm0 = vmmov 0   ;;  %vm6758_vm1 = vcmask 74752  }
  0x29   :  { %v8194_v2 = vld [vmem:[#allocation2 + $0x38] sm:$0xff]   ;;  %7384 = vmatprep.subr.bf16.mxu1 %v8193_v1  ;;  %v8198_v6 = vld [vmem:[#allocation2 + $0x30] sm:$0xff]   ;;  %v8201_v9 = vld [vmem:[#allocation2 + $0xe8] sm:$0xff]   ;;  %v1241_v30 = vshrl.u32 %v1240_v24, 7 }
  0x2a   :  { %v8195_v3 = vld [vmem:[#allocation2 + $0xb8] sm:$0xff]   ;;  %7363 = vmatpush3.bf16.msra.mxu0 %v8194_v2  ;;  %v8199_v7 = vld [vmem:[#allocation2 + $0xb0] sm:$0xff]   ;;  %v8202_v10 = vld [vmem:[#allocation2 + $0x28] sm:$0xff]   ;;  %v1239_v29 = vunpack.c.0.s8 %v1238_v23 }
  0x2b   :  { %7385 = vmatpush3.bf16.msra.mxu1 %v8195_v3  ;;  %7364 = vmatprep.subr.bf16.mxu0 %v8196_v4  ;;  %v8203_v11 = vld [vmem:[#allocation2 + $0xa8] sm:$0xff]   ;;  %v8204_v12 = vld [vmem:[#allocation2 + $0x60] sm:$0xff]   ;;  %v8208_v16 = vld [vmem:[#allocation2 + $0x58] sm:$0xff]  }
  0x2c   :  { %7386 = vmatprep.subr.bf16.mxu1 %v8197_v5  ;;  %v8205_v13 = vld [vmem:[#allocation2 + $0xe0] sm:$0xff]   ;;  %v8209_v17 = vld [vmem:[#allocation2 + $0xd8] sm:$0xff]   ;;  %v8212_v20 = vld [vmem:[#allocation2 + $0x50] sm:$0xff]   ;;  %v8919_v35 = vsub.s32 %v1239_v29, %v1241_v30 }
  0x2d   :  { %v8206_v14 = vld [vmem:[#allocation2 + $0x20] sm:$0xff]   ;;  %v8210_v18 = vld [vmem:[#allocation2 + $0x18] sm:$0xff]   ;;  %v8213_v21 = vld [vmem:[#allocation2 + $0xd0] sm:$0xff]  }
  0x2e   :  { %7365 = vmatpush3.bf16.msra.mxu0 %v8198_v6  ;;  %v8207_v15 = vld [vmem:[#allocation2 + $0xa0] sm:$0xff]   ;;  %v8211_v19 = vld [vmem:[#allocation2 + $0x98] sm:$0xff]   ;;  %v8214_v25 = vld [vmem:[#allocation2 + $0x10] sm:$0xff]  }
  0x2f   :  { %7387 = vmatpush3.bf16.msra.mxu1 %v8199_v7  ;;  %7366 = vmatprep.subr.bf16.mxu0 %v8200_v8  ;;  %v8215_v26 = vld [vmem:[#allocation2 + $0x90] sm:$0xff]   ;;  %v8216_v27 = vld [vmem:[#allocation2 + $0x48] sm:$0xff]   ;;  %v8220_v33 = vld [vmem:[#allocation2 + $0x40] sm:$0xff]  }
  0x30   :  { %7388 = vmatprep.subr.bf16.mxu1 %v8201_v9  ;;  %v8217_v28 = vld [vmem:[#allocation2 + $0xc8] sm:$0xff]   ;;  %v8221_v34 = vld [vmem:[#allocation2 + $0xc0] sm:$0xff]   ;;  %v8225_v41 = vld [vmem:[#allocation2 + $0x178] sm:$0xff]  }
  0x31   :  { %v8218_v31 = vld [vmem:[#allocation2 + $0x8] sm:$0xff]   ;;  %v8222_v36 = vld [vmem:[#allocation2] sm:$0xff]   ;;  %v8226_v42 = vld [vmem:[#allocation2 + $0x1f8] sm:$0xff]  }
  0x32   :  { %7367 = vmatpush3.bf16.msra.mxu0 %v8202_v10  ;;  %v8219_v32 = vld [vmem:[#allocation2 + $0x88] sm:$0xff]   ;;  %v8223_v37 = vld [vmem:[#allocation2 + $0x80] sm:$0xff]   ;;  %v8227_v46 = vld [vmem:[#allocation2 + $0x138] sm:$0xff]  }
  0x33   :  { %7389 = vmatpush3.bf16.msra.mxu1 %v8203_v11  ;;  %7368 = vmatprep.subr.bf16.mxu0 %v8204_v12  ;;  %v59_v38 = vld [vmem:[%s9104_s0] sm:$0xff]  ;;  %v8228_v48 = vld [vmem:[#allocation2 + $0x1b8] sm:$0xff]   ;;  %v8229_v51 = vld [vmem:[#allocation2 + $0x170] sm:$0xff]  }
  0x34   :  { %7390 = vmatprep.subr.bf16.mxu1 %v8205_v13  ;;  %v1236_v39 = vcombine.high %v59_v38, %v59_v38  ;;  %v1243_v40 = vrot.slane %v59_v38, %v8919_v35  ;;  %v8230_v53 = vld [vmem:[#allocation2 + $0x1f0] sm:$0xff]   ;;  %v8233_v58 = vld [vmem:[#allocation2 + $0x168] sm:$0xff]   ;;  %v8237_v62 = vld [vmem:[#allocation2 + $0x160] sm:$0xff]  }
  0x35   :  { %v8231_v55 = vld [vmem:[#allocation2 + $0x130] sm:$0xff]   ;;  %v8234_v59 = vld [vmem:[#allocation2 + $0x1e8] sm:$0xff]   ;;  %v8238_v63 = vld [vmem:[#allocation2 + $0x1e0] sm:$0xff]  }
  0x36   :  { %7369 = vmatpush3.bf16.msra.mxu0 %v8206_v14  ;;  %v1251_v43 = vcombine.high %v1243_v40, %v1243_v40  ;;  %v1259_v44 = vrot.slane %v1243_v40, %v8919_v35  ;;  %v8927_v45 = vrot.slane %v1236_v39, %v8919_v35  ;;  %v8232_v56 = vld [vmem:[#allocation2 + $0x1b0] sm:$0xff]   ;;  %v8235_v60 = vld [vmem:[#allocation2 + $0x128] sm:$0xff]   ;;  %v8239_v0 = vld [vmem:[#allocation2 + $0x120] sm:$0xff]  }
  0x37   :  { %7391 = vmatpush3.bf16.msra.mxu1 %v8207_v15  ;;  %7370 = vmatprep.subr.bf16.mxu0 %v8208_v16  ;;  %v8236_v61 = vld [vmem:[#allocation2 + $0x1a8] sm:$0xff]   ;;  %v8240_v1 = vld [vmem:[#allocation2 + $0x1a0] sm:$0xff]   ;;  %v8241_v2 = vld [vmem:[#allocation2 + $0x158] sm:$0xff]  }
  0x38   :  { %7392 = vmatprep.subr.bf16.mxu1 %v8209_v17  ;;  %v1273_v47 = vrot.slane %v1251_v43, %v8919_v35  ;;  %v1252_v49 = vcombine.high %v8927_v45, %v8927_v45  ;;  %v1281_v50 = vcombine.high %v1259_v44, %v1259_v44  ;;  %v8242_v3 = vld [vmem:[#allocation2 + $0x1d8] sm:$0xff]   ;;  %v8245_v6 = vld [vmem:[#allocation2 + $0x150] sm:$0xff]   ;;  %v8249_v10 = vld [vmem:[#allocation2 + $0x148] sm:$0xff]  }
  0x39   :  { %v8243_v4 = vld [vmem:[#allocation2 + $0x118] sm:$0xff]   ;;  %v8246_v7 = vld [vmem:[#allocation2 + $0x1d0] sm:$0xff]   ;;  %v8250_v11 = vld [vmem:[#allocation2 + $0x1c8] sm:$0xff]  }
  0x3a   :  { %7371 = vmatpush3.bf16.msra.mxu0 %v8210_v18  ;;  %5237 = vmatprep.mubr.bf16.mxu0 %v1273_v47  ;;  %v1283_v52 = vcombine.high %v1273_v47, %v1273_v47  ;;  %v1280_v54 = vrot.slane %v1252_v49, %v8919_v35  ;;  %v8244_v5 = vld [vmem:[#allocation2 + $0x198] sm:$0xff]   ;;  %v8247_v8 = vld [vmem:[#allocation2 + $0x110] sm:$0xff]   ;;  %v8251_v12 = vld [vmem:[#allocation2 + $0x108] sm:$0xff]   ;;  %v1266_v18 = vrot.slane %v8927_v45, %v8919_v35 }
  0x3b   :  { %7393 = vmatpush3.bf16.msra.mxu1 %v8211_v19  ;;  %7372 = vmatprep.subr.bf16.mxu0 %v8212_v20  ;;  %v8248_v9 = vld [vmem:[#allocation2 + $0x190] sm:$0xff]   ;;  %v8252_v13 = vld [vmem:[#allocation2 + $0x188] sm:$0xff]   ;;  %v8253_v14 = vld [vmem:[#allocation2 + $0x140] sm:$0xff]  }
  0x3c   :  { %7394 = vmatprep.subr.bf16.mxu1 %v8213_v21  ;;  %5277 = vmatprep.mubr.bf16.mxu1 %v1283_v52  ;;  %v1284_v57 = vcombine.high %v1280_v54, %v1280_v54  ;;  %v8254_v15 = vld [vmem:[#allocation2 + $0x1c0] sm:$0xff]   ;;  %v8257_v19 = vld [vmem:[#allocation2 + $0x278] sm:$0xff]   ;;  %v1282_v23 = vcombine.high %v1266_v18, %v1266_v18  ;;  %v8261_v24 = vld [vmem:[#allocation2 + $0x270] sm:$0xff]  }
  0x3d   :  { %v8255_v16 = vld [vmem:[#allocation2 + $0x100] sm:$0xff]   ;;  %v8258_v20 = vld [vmem:[#allocation2 + $0x2f8] sm:$0xff]   ;;  %v8266_v29 = vld [vmem:[#allocation2 + $0x2e8] sm:$0xff]  }
  0x3e   :  { %7373 = vmatpush3.bf16.msra.mxu0 %v8214_v25  ;;  %v8256_v17 = vld [vmem:[#allocation2 + $0x180] sm:$0xff]   ;;  %v8259_v21 = vld [vmem:[#allocation2 + $0x238] sm:$0xff]   ;;  %v8262_v25 = vld [vmem:[#allocation2 + $0x2f0] sm:$0xff]  }
  0x3f   :  { %7395 = vmatpush3.bf16.msra.mxu1 %v8215_v26  ;;  %7374 = vmatprep.subr.bf16.mxu0 %v8216_v27  ;;  %v8260_v22 = vld [vmem:[#allocation2 + $0x2b8] sm:$0xff]   ;;  %v8263_v26 = vld [vmem:[#allocation2 + $0x230] sm:$0xff]   ;;  %v8267_v30 = vld [vmem:[#allocation2 + $0x228] sm:$0xff]  }
  0x40   :  { %7396 = vmatprep.subr.bf16.mxu1 %v8217_v28  ;;  %v8264_v27 = vld [vmem:[#allocation2 + $0x2b0] sm:$0xff]   ;;  %v8265_v28 = vld [vmem:[#allocation2 + $0x268] sm:$0xff]   ;;  %v8274_v38 = vld [vmem:[#allocation2 + $0x2d8] sm:$0xff]  }
  0x41   :  { %v8275_v39 = vld [vmem:[#allocation2 + $0x218] sm:$0xff]   ;;  %v8279_v43 = vld [vmem:[#allocation2 + $0x210] sm:$0xff]   ;;  %v8281_v45 = vld [vmem:[#allocation2 + $0x248] sm:$0xff]  }
  0x42   :  { %7375 = vmatpush3.bf16.msra.mxu0 %v8218_v31  ;;  %v8268_v31 = vld [vmem:[#allocation2 + $0x2a8] sm:$0xff]   ;;  %v8276_v40 = vld [vmem:[#allocation2 + $0x298] sm:$0xff]   ;;  %v8285_v49 = vld [vmem:[#allocation2 + $0x240] sm:$0xff]  }
  0x43   :  { %7397 = vmatpush3.bf16.msra.mxu1 %v8219_v32  ;;  %7376 = vmatprep.subr.bf16.mxu0 %v8220_v33  ;;  %v8269_v32 = vld [vmem:[#allocation2 + $0x260] sm:$0xff]   ;;  %v8283_v47 = vld [vmem:[#allocation2 + $0x208] sm:$0xff]  }
  0x44   :  { %7398 = vmatprep.subr.bf16.mxu1 %v8221_v34  ;;  %v8270_v33 = vld [vmem:[#allocation2 + $0x2e0] sm:$0xff]   ;;  %v60_v52 = vld [vmem:[%s9104_s0 + $0x8] sm:$0xff] }
  0x45   :  { %v8271_v34 = vld [vmem:[#allocation2 + $0x220] sm:$0xff]  }
  0x46   :  { %7377 = vmatpush3.bf16.msra.mxu0 %v8222_v36  ;;  %v8272_v36 = vld [vmem:[#allocation2 + $0x2a0] sm:$0xff]  }
  0x47   :  { %7399 = vmatpush3.bf16.msra.mxu1 %v8223_v37  ;;  %7406 = vmatprep.subr.bf16.mxu0 %v8225_v41  ;;  %v8273_v37 = vld [vmem:[#allocation2 + $0x258] sm:$0xff]   ;;  %v8277_v41 = vld [vmem:[#allocation2 + $0x250] sm:$0xff]  }
  0x48   :  { %7428 = vmatprep.subr.bf16.mxu1 %v8226_v42  ;;  %v8278_v42 = vld [vmem:[#allocation2 + $0x2d0] sm:$0xff]  }
  0x49   :  { %5238 = vmatmul.mubr.bf16.vlgmr.msra.gmra.mxu0 %v1259_v44  ;;  %v8280_v44 = vld [vmem:[#allocation2 + $0x290] sm:$0xff]  }
  0x4a   :  { %7407 = vmatpush3.bf16.msra.mxu0 %v8227_v46  ;;  %5278 = vmatmul.mubr.bf16.vlgmr.msra.gmra.mxu1 %v1281_v50  ;;  %v8282_v46 = vld [vmem:[#allocation2 + $0x2c8] sm:$0xff]   ;;  %v8286_v50 = vld [vmem:[#allocation2 + $0x2c0] sm:$0xff]  }
  0x4b   :  { %7408 = vmatprep.subr.bf16.mxu0 %v8229_v51  ;;  %7429 = vmatpush3.bf16.msra.mxu1 %v8228_v48  ;;  %v8284_v48 = vld [vmem:[#allocation2 + $0x288] sm:$0xff]   ;;  %v8287_v51 = vld [vmem:[#allocation2 + $0x200] sm:$0xff]  }
  0x4c   :  { %5317 = vmatprep.mubr.bf16.mxu0 %v1280_v54  ;;  %7430 = vmatprep.subr.bf16.mxu1 %v8230_v53  ;;  %v8288_v53 = vld [vmem:[#allocation2 + $0x280] sm:$0xff]   ;;  %v1292_v54 = vrot.slane %v60_v52, %v8919_v35 }
  0x4d   :  { %5357 = vmatprep.mubr.bf16.mxu1 %v1284_v57 }
  0x4e   :  { %7409 = vmatpush3.bf16.msra.mxu0 %v8231_v55  ;;  %v1285_v55 = vcombine.high %v60_v52, %v60_v52  ;;  %v1300_v57 = vcombine.high %v1292_v54, %v1292_v54  ;;  %v8338_v52 = vld [vmem:[#allocation2 + $0x458] sm:$0xff]  }
  0x4f   :  { %7410 = vmatprep.subr.bf16.mxu0 %v8233_v58  ;;  %7431 = vmatpush3.bf16.msra.mxu1 %v8232_v56  ;;  %v8289_v56 = vld [vmem:[#allocation2 + $0x378] sm:$0xff]   ;;  %v1308_v58 = vrot.slane %v1292_v54, %v8919_v35 }
  0x50   :  { %7432 = vmatprep.subr.bf16.mxu1 %v8234_v59  ;;  %v8290_v59 = vld [vmem:[#allocation2 + $0x3f8] sm:$0xff]  }
  0x51   :  { %v8340_v54 = vld [vmem:[#allocation2 + $0x418] sm:$0xff]  }
  0x52   :  { %7411 = vmatpush3.bf16.msra.mxu0 %v8235_v60  ;;  %v8941_v60 = vrot.slane %v1285_v55, %v8919_v35  ;;  %v8341_v55 = vld [vmem:[#allocation2 + $0x498] sm:$0xff]  }
  0x53   :  { %7412 = vmatprep.subr.bf16.mxu0 %v8237_v62  ;;  %7433 = vmatpush3.bf16.msra.mxu1 %v8236_v61  ;;  %v8291_v61 = vld [vmem:[#allocation2 + $0x338] sm:$0xff]   ;;  %v1322_v62 = vrot.slane %v1300_v57, %v8919_v35  ;;  %v8343_v57 = vld [vmem:[#allocation2 + $0x4d0] sm:$0xff]  }
  0x54   :  { %7434 = vmatprep.subr.bf16.mxu1 %v8238_v63  ;;  %v8292_v63 = vld [vmem:[#allocation2 + $0x3b8] sm:$0xff]  }
  0x56   :  { %7413 = vmatpush3.bf16.msra.mxu0 %v8239_v0  ;;  %v1301_v0 = vcombine.high %v8941_v60, %v8941_v60 }
  0x57   :  { %7414 = vmatprep.subr.bf16.mxu0 %v8241_v2  ;;  %7435 = vmatpush3.bf16.msra.mxu1 %v8240_v1  ;;  %v1330_v1 = vcombine.high %v1308_v58, %v1308_v58  ;;  %v8293_v2 = vld [vmem:[#allocation2 + $0x370] sm:$0xff]  }
  0x58   :  { %7436 = vmatprep.subr.bf16.mxu1 %v8242_v3  ;;  %v1332_v3 = vcombine.high %v1322_v62, %v1322_v62 }
  0x5a   :  { %7415 = vmatpush3.bf16.msra.mxu0 %v8243_v4  ;;  %v8294_v4 = vld [vmem:[#allocation2 + $0x3f0] sm:$0xff]  }
  0x5b   :  { %7416 = vmatprep.subr.bf16.mxu0 %v8245_v6  ;;  %7437 = vmatpush3.bf16.msra.mxu1 %v8244_v5  ;;  %v1329_v5 = vrot.slane %v1301_v0, %v8919_v35  ;;  %v8295_v6 = vld [vmem:[#allocation2 + $0x330] sm:$0xff]   ;;  %v8350_v0 = vld [vmem:[#allocation2 + $0x440] sm:$0xff]  }
  0x5c   :  { %7438 = vmatprep.subr.bf16.mxu1 %v8246_v7  ;;  %v8296_v7 = vld [vmem:[#allocation2 + $0x3b0] sm:$0xff]  }
  0x5e   :  { %7417 = vmatpush3.bf16.msra.mxu0 %v8247_v8  ;;  %v1333_v8 = vcombine.high %v1329_v5, %v1329_v5 }
  0x5f   :  { %7418 = vmatprep.subr.bf16.mxu0 %v8249_v10  ;;  %7439 = vmatpush3.bf16.msra.mxu1 %v8248_v9  ;;  %v8297_v9 = vld [vmem:[#allocation2 + $0x368] sm:$0xff]  }
  0x60   :  { %7440 = vmatprep.subr.bf16.mxu1 %v8250_v11  ;;  %v8298_v10 = vld [vmem:[#allocation2 + $0x3e8] sm:$0xff]  }
  0x61   :  { %v8299_v11 = vld [vmem:[#allocation2 + $0x328] sm:$0xff]  }
  0x62   :  { %7419 = vmatpush3.bf16.msra.mxu0 %v8251_v12  ;;  %v8300_v12 = vld [vmem:[#allocation2 + $0x3a8] sm:$0xff]  }
  0x63   :  { %7420 = vmatprep.subr.bf16.mxu0 %v8253_v14  ;;  %7441 = vmatpush3.bf16.msra.mxu1 %v8252_v13  ;;  %v8301_v13 = vld [vmem:[#allocation2 + $0x360] sm:$0xff]  }
  0x64   :  { %7442 = vmatprep.subr.bf16.mxu1 %v8254_v15  ;;  %v8302_v14 = vld [vmem:[#allocation2 + $0x3e0] sm:$0xff]  }
  0x65   :  { %v8303_v15 = vld [vmem:[#allocation2 + $0x320] sm:$0xff]  }
  0x66   :  { %7421 = vmatpush3.bf16.msra.mxu0 %v8255_v16  ;;  %v8304_v16 = vld [vmem:[#allocation2 + $0x3a0] sm:$0xff]  }
  0x67   :  { %7450 = vmatprep.subr.bf16.mxu0 %v8257_v19  ;;  %7443 = vmatpush3.bf16.msra.mxu1 %v8256_v17  ;;  %v8305_v17 = vld [vmem:[#allocation2 + $0x358] sm:$0xff]  }
  0x68   :  { %7472 = vmatprep.subr.bf16.mxu1 %v8258_v20  ;;  %v8307_v19 = vld [vmem:[#allocation2 + $0x318] sm:$0xff]  }
  0x69   :  { %5318 = vmatmul.mubr.bf16.vlgmr.msra.gmra.mxu0 %v1266_v18  ;;  %v8306_v18 = vld [vmem:[#allocation2 + $0x3d8] sm:$0xff]  }
  0x6a   :  { %7451 = vmatpush3.bf16.msra.mxu0 %v8259_v21  ;;  %5358 = vmatmul.mubr.bf16.vlgmr.msra.gmra.mxu1 %v1282_v23  ;;  %v8308_v20 = vld [vmem:[#allocation2 + $0x398] sm:$0xff]   ;;  %v8309_v21 = vld [vmem:[#allocation2 + $0x350] sm:$0xff]  }
  0x6b   :  { %7452 = vmatprep.subr.bf16.mxu0 %v8261_v24  ;;  %7473 = vmatpush3.bf16.msra.mxu1 %v8260_v22  ;;  %v8310_v22 = vld [vmem:[#allocation2 + $0x3d0] sm:$0xff]  }
  0x6c   :  { %7474 = vmatprep.subr.bf16.mxu1 %v8262_v25  ;;  %5397 = vmatprep.mubr.bf16.mxu0 %v1322_v62  ;;  %v8311_v23 = vld [vmem:[#allocation2 + $0x310] sm:$0xff]   ;;  %v8313_v25 = vld [vmem:[#allocation2 + $0x348] sm:$0xff]  }
  0x6d   :  { %5437 = vmatprep.mubr.bf16.mxu1 %v1332_v3  ;;  %v8312_v24 = vld [vmem:[#allocation2 + $0x390] sm:$0xff]   ;;  %v8348_v62 = vld [vmem:[#allocation2 + $0x408] sm:$0xff]  }
  0x6e   :  { %7453 = vmatpush3.bf16.msra.mxu0 %v8263_v26  ;;  %v8314_v26 = vld [vmem:[#allocation2 + $0x3c8] sm:$0xff]   ;;  %v61_v3 = vld [vmem:[%s9104_s0 + $0x10] sm:$0xff] }
  0x6f   :  { %7454 = vmatprep.subr.bf16.mxu0 %v8265_v28  ;;  %7475 = vmatpush3.bf16.msra.mxu1 %v8264_v27  ;;  %v8315_v27 = vld [vmem:[#allocation2 + $0x308] sm:$0xff]  }
  0x70   :  { %7476 = vmatprep.subr.bf16.mxu1 %v8266_v29  ;;  %v8316_v28 = vld [vmem:[#allocation2 + $0x388] sm:$0xff]   ;;  %v8317_v29 = vld [vmem:[#allocation2 + $0x340] sm:$0xff]  }
  0x72   :  { %7455 = vmatpush3.bf16.msra.mxu0 %v8267_v30  ;;  %v8318_v30 = vld [vmem:[#allocation2 + $0x3c0] sm:$0xff]  }
  0x73   :  { %7456 = vmatprep.subr.bf16.mxu0 %v8269_v32  ;;  %7477 = vmatpush3.bf16.msra.mxu1 %v8268_v31  ;;  %v8319_v31 = vld [vmem:[#allocation2 + $0x300] sm:$0xff]  }
  0x74   :  { %7478 = vmatprep.subr.bf16.mxu1 %v8270_v33  ;;  %v8320_v32 = vld [vmem:[#allocation2 + $0x380] sm:$0xff]   ;;  %v1315_v33 = vrot.slane %v8941_v60, %v8919_v35  ;;  %v8346_v60 = vld [vmem:[#allocation2 + $0x448] sm:$0xff]  }
  0x76   :  { %7457 = vmatpush3.bf16.msra.mxu0 %v8271_v34  ;;  %v8322_v34 = vld [vmem:[#allocation2 + $0x478] sm:$0xff]  }
  0x77   :  { %7458 = vmatprep.subr.bf16.mxu0 %v8273_v37  ;;  %7479 = vmatpush3.bf16.msra.mxu1 %v8272_v36  ;;  %v8323_v36 = vld [vmem:[#allocation2 + $0x4f8] sm:$0xff]  }
  0x78   :  { %7480 = vmatprep.subr.bf16.mxu1 %v8274_v38  ;;  %v8324_v37 = vld [vmem:[#allocation2 + $0x438] sm:$0xff]  }
  0x79   :  { %v8325_v38 = vld [vmem:[#allocation2 + $0x4b8] sm:$0xff]  }
  0x7a   :  { %7459 = vmatpush3.bf16.msra.mxu0 %v8275_v39  ;;  %v1331_v39 = vcombine.high %v1315_v33, %v1315_v33 }
  0x7b   :  { %7460 = vmatprep.subr.bf16.mxu0 %v8277_v41  ;;  %7481 = vmatpush3.bf16.msra.mxu1 %v8276_v40  ;;  %v8326_v40 = vld [vmem:[#allocation2 + $0x470] sm:$0xff]  }
  0x7c   :  { %7482 = vmatprep.subr.bf16.mxu1 %v8278_v42  ;;  %v8327_v41 = vld [vmem:[#allocation2 + $0x4f0] sm:$0xff]  }
  0x7d   :  { %v8328_v42 = vld [vmem:[#allocation2 + $0x430] sm:$0xff]  }
  0x7e   :  { %7461 = vmatpush3.bf16.msra.mxu0 %v8279_v43  ;;  %v8329_v43 = vld [vmem:[#allocation2 + $0x4b0] sm:$0xff]  }
  0x7f   :  { %7462 = vmatprep.subr.bf16.mxu0 %v8281_v45  ;;  %7483 = vmatpush3.bf16.msra.mxu1 %v8280_v44  ;;  %v8330_v44 = vld [vmem:[#allocation2 + $0x468] sm:$0xff]  }
  0x80   :  { %7484 = vmatprep.subr.bf16.mxu1 %v8282_v46  ;;  %v8331_v45 = vld [vmem:[#allocation2 + $0x4e8] sm:$0xff]  }
  0x81   :  { %v8332_v46 = vld [vmem:[#allocation2 + $0x428] sm:$0xff]  }
  0x82   :  { %7463 = vmatpush3.bf16.msra.mxu0 %v8283_v47  ;;  %v8333_v47 = vld [vmem:[#allocation2 + $0x4a8] sm:$0xff]  }
  0x83   :  { %7464 = vmatprep.subr.bf16.mxu0 %v8285_v49  ;;  %7485 = vmatpush3.bf16.msra.mxu1 %v8284_v48  ;;  %v8334_v48 = vld [vmem:[#allocation2 + $0x460] sm:$0xff]  }
  0x84   :  { %7486 = vmatprep.subr.bf16.mxu1 %v8286_v50  ;;  %v8335_v49 = vld [vmem:[#allocation2 + $0x4e0] sm:$0xff]  }
  0x85   :  { %v8336_v50 = vld [vmem:[#allocation2 + $0x420] sm:$0xff]  }
  0x86   :  { %7465 = vmatpush3.bf16.msra.mxu0 %v8287_v51  ;;  %v8337_v51 = vld [vmem:[#allocation2 + $0x4a0] sm:$0xff]  }
  0x87   :  { %7494 = vmatprep.subr.bf16.mxu0 %v8289_v56  ;;  %7487 = vmatpush3.bf16.msra.mxu1 %v8288_v53  ;;  %v8339_v53 = vld [vmem:[#allocation2 + $0x4d8] sm:$0xff]   ;;  %v8342_v56 = vld [vmem:[#allocation2 + $0x450] sm:$0xff]  }
  0x88   :  { %7516 = vmatprep.subr.bf16.mxu1 %v8290_v59  ;;  %v8345_v59 = vld [vmem:[#allocation2 + $0x490] sm:$0xff]  }
  0x89   :  { %5398 = vmatmul.mubr.bf16.vlgmr.msra.gmra.mxu0 %v1308_v58  ;;  %v8344_v58 = vld [vmem:[#allocation2 + $0x410] sm:$0xff]  }
  0x8a   :  { %7495 = vmatpush3.bf16.msra.mxu0 %v8291_v61  ;;  %5438 = vmatmul.mubr.bf16.vlgmr.msra.gmra.mxu1 %v1330_v1  ;;  %v8347_v61 = vld [vmem:[#allocation2 + $0x4c8] sm:$0xff]   ;;  %v8351_v1 = vld [vmem:[#allocation2 + $0x4c0] sm:$0xff]  }
  0x8b   :  { %7496 = vmatprep.subr.bf16.mxu0 %v8293_v2  ;;  %7517 = vmatpush3.bf16.msra.mxu1 %v8292_v63  ;;  %v8349_v63 = vld [vmem:[#allocation2 + $0x488] sm:$0xff]   ;;  %v8352_v2 = vld [vmem:[#allocation2 + $0x400] sm:$0xff]  }
  0x8c   :  { %5477 = vmatprep.mubr.bf16.mxu0 %v1329_v5  ;;  %7518 = vmatprep.subr.bf16.mxu1 %v8294_v4  ;;  %v8353_v4 = vld [vmem:[#allocation2 + $0x480] sm:$0xff]   ;;  %v1341_v5 = vrot.slane %v61_v3, %v8919_v35 }
  0x8d   :  { %5517 = vmatprep.mubr.bf16.mxu1 %v1333_v8 }
  0x8e   :  { %7497 = vmatpush3.bf16.msra.mxu0 %v8295_v6  ;;  %v1334_v6 = vcombine.high %v61_v3, %v61_v3  ;;  %v1349_v8 = vcombine.high %v1341_v5, %v1341_v5  ;;  %v8403_v3 = vld [vmem:[#allocation2 + $0x658] sm:$0xff]  }
  0x8f   :  { %7498 = vmatprep.subr.bf16.mxu0 %v8297_v9  ;;  %7519 = vmatpush3.bf16.msra.mxu1 %v8296_v7  ;;  %v8354_v7 = vld [vmem:[#allocation2 + $0x578] sm:$0xff]   ;;  %v1357_v9 = vrot.slane %v1341_v5, %v8919_v35 }
  0x90   :  { %7520 = vmatprep.subr.bf16.mxu1 %v8298_v10  ;;  %v8355_v10 = vld [vmem:[#allocation2 + $0x5f8] sm:$0xff]  }
  0x91   :  { %v8405_v5 = vld [vmem:[#allocation2 + $0x618] sm:$0xff]  }
  0x92   :  { %7499 = vmatpush3.bf16.msra.mxu0 %v8299_v11  ;;  %v8955_v11 = vrot.slane %v1334_v6, %v8919_v35  ;;  %v8406_v6 = vld [vmem:[#allocation2 + $0x698] sm:$0xff]  }
  0x93   :  { %7500 = vmatprep.subr.bf16.mxu0 %v8301_v13  ;;  %7521 = vmatpush3.bf16.msra.mxu1 %v8300_v12  ;;  %v8356_v12 = vld [vmem:[#allocation2 + $0x538] sm:$0xff]   ;;  %v1371_v13 = vrot.slane %v1349_v8, %v8919_v35  ;;  %v8408_v8 = vld [vmem:[#allocation2 + $0x6d0] sm:$0xff]  }
  0x94   :  { %7522 = vmatprep.subr.bf16.mxu1 %v8302_v14  ;;  %v8357_v14 = vld [vmem:[#allocation2 + $0x5b8] sm:$0xff]  }
  0x96   :  { %7501 = vmatpush3.bf16.msra.mxu0 %v8303_v15  ;;  %v1350_v15 = vcombine.high %v8955_v11, %v8955_v11 }
  0x97   :  { %7502 = vmatprep.subr.bf16.mxu0 %v8305_v17  ;;  %7523 = vmatpush3.bf16.msra.mxu1 %v8304_v16  ;;  %v1379_v16 = vcombine.high %v1357_v9, %v1357_v9  ;;  %v8358_v17 = vld [vmem:[#allocation2 + $0x570] sm:$0xff]  }
  0x98   :  { %7524 = vmatprep.subr.bf16.mxu1 %v8306_v18  ;;  %v1381_v18 = vcombine.high %v1371_v13, %v1371_v13 }
  0x9a   :  { %7503 = vmatpush3.bf16.msra.mxu0 %v8307_v19  ;;  %v8359_v19 = vld [vmem:[#allocation2 + $0x5f0] sm:$0xff]  }
  0x9b   :  { %7504 = vmatprep.subr.bf16.mxu0 %v8309_v21  ;;  %7525 = vmatpush3.bf16.msra.mxu1 %v8308_v20  ;;  %v1378_v20 = vrot.slane %v1350_v15, %v8919_v35  ;;  %v8360_v21 = vld [vmem:[#allocation2 + $0x530] sm:$0xff]   ;;  %v8415_v15 = vld [vmem:[#allocation2 + $0x640] sm:$0xff]  }
  0x9c   :  { %7526 = vmatprep.subr.bf16.mxu1 %v8310_v22  ;;  %v8361_v22 = vld [vmem:[#allocation2 + $0x5b0] sm:$0xff]  }
  0x9e   :  { %7505 = vmatpush3.bf16.msra.mxu0 %v8311_v23  ;;  %v1382_v23 = vcombine.high %v1378_v20, %v1378_v20 }
  0x9f   :  { %7506 = vmatprep.subr.bf16.mxu0 %v8313_v25  ;;  %7527 = vmatpush3.bf16.msra.mxu1 %v8312_v24  ;;  %v8362_v24 = vld [vmem:[#allocation2 + $0x568] sm:$0xff]  }
  0xa0   :  { %7528 = vmatprep.subr.bf16.mxu1 %v8314_v26  ;;  %v8363_v25 = vld [vmem:[#allocation2 + $0x5e8] sm:$0xff]  }
  0xa1   :  { %v8364_v26 = vld [vmem:[#allocation2 + $0x528] sm:$0xff]  }
  0xa2   :  { %7507 = vmatpush3.bf16.msra.mxu0 %v8315_v27  ;;  %v8365_v27 = vld [vmem:[#allocation2 + $0x5a8] sm:$0xff]  }
  0xa3   :  { %7508 = vmatprep.subr.bf16.mxu0 %v8317_v29  ;;  %7529 = vmatpush3.bf16.msra.mxu1 %v8316_v28  ;;  %v8366_v28 = vld [vmem:[#allocation2 + $0x560] sm:$0xff]  }
  0xa4   :  { %7530 = vmatprep.subr.bf16.mxu1 %v8318_v30  ;;  %v8367_v29 = vld [vmem:[#allocation2 + $0x5e0] sm:$0xff]  }
  0xa5   :  { %v8368_v30 = vld [vmem:[#allocation2 + $0x520] sm:$0xff]  }
  0xa6   :  { %7509 = vmatpush3.bf16.msra.mxu0 %v8319_v31  ;;  %v8369_v31 = vld [vmem:[#allocation2 + $0x5a0] sm:$0xff]  }
  0xa7   :  { %7538 = vmatprep.subr.bf16.mxu0 %v8322_v34  ;;  %7531 = vmatpush3.bf16.msra.mxu1 %v8320_v32  ;;  %v8370_v32 = vld [vmem:[#allocation2 + $0x558] sm:$0xff]  }
  0xa8   :  { %7560 = vmatprep.subr.bf16.mxu1 %v8323_v36  ;;  %v8372_v34 = vld [vmem:[#allocation2 + $0x518] sm:$0xff]  }
  0xa9   :  { %5478 = vmatmul.mubr.bf16.vlgmr.msra.gmra.mxu0 %v1315_v33  ;;  %v8371_v33 = vld [vmem:[#allocation2 + $0x5d8] sm:$0xff]  }
  0xaa   :  { %7539 = vmatpush3.bf16.msra.mxu0 %v8324_v37  ;;  %5518 = vmatmul.mubr.bf16.vlgmr.msra.gmra.mxu1 %v1331_v39  ;;  %v8373_v36 = vld [vmem:[#allocation2 + $0x598] sm:$0xff]   ;;  %v8374_v37 = vld [vmem:[#allocation2 + $0x550] sm:$0xff]  }
  0xab   :  { %7540 = vmatprep.subr.bf16.mxu0 %v8326_v40  ;;  %7561 = vmatpush3.bf16.msra.mxu1 %v8325_v38  ;;  %v8375_v38 = vld [vmem:[#allocation2 + $0x5d0] sm:$0xff]  }
  0xac   :  { %7562 = vmatprep.subr.bf16.mxu1 %v8327_v41  ;;  %5557 = vmatprep.mubr.bf16.mxu0 %v1371_v13  ;;  %v8376_v39 = vld [vmem:[#allocation2 + $0x510] sm:$0xff]   ;;  %v8378_v41 = vld [vmem:[#allocation2 + $0x548] sm:$0xff]  }
  0xad   :  { %5597 = vmatprep.mubr.bf16.mxu1 %v1381_v18  ;;  %v8377_v40 = vld [vmem:[#allocation2 + $0x590] sm:$0xff]   ;;  %v8413_v13 = vld [vmem:[#allocation2 + $0x608] sm:$0xff]   ;;  %v62_v18 = vld [vmem:[%s9104_s0 + $0x18] sm:$0xff] }
  0xae   :  { %7541 = vmatpush3.bf16.msra.mxu0 %v8328_v42  ;;  %v8379_v42 = vld [vmem:[#allocation2 + $0x5c8] sm:$0xff]  }
  0xaf   :  { %7542 = vmatprep.subr.bf16.mxu0 %v8330_v44  ;;  %7563 = vmatpush3.bf16.msra.mxu1 %v8329_v43  ;;  %v8380_v43 = vld [vmem:[#allocation2 + $0x508] sm:$0xff]  }
  0xb0   :  { %7564 = vmatprep.subr.bf16.mxu1 %v8331_v45  ;;  %v8381_v44 = vld [vmem:[#allocation2 + $0x588] sm:$0xff]   ;;  %v8382_v45 = vld [vmem:[#allocation2 + $0x540] sm:$0xff]  }
  0xb2   :  { %7543 = vmatpush3.bf16.msra.mxu0 %v8332_v46  ;;  %v8383_v46 = vld [vmem:[#allocation2 + $0x5c0] sm:$0xff]  }
  0xb3   :  { %7544 = vmatprep.subr.bf16.mxu0 %v8334_v48  ;;  %7565 = vmatpush3.bf16.msra.mxu1 %v8333_v47  ;;  %v8384_v47 = vld [vmem:[#allocation2 + $0x500] sm:$0xff]  }
  0xb4   :  { %7566 = vmatprep.subr.bf16.mxu1 %v8335_v49  ;;  %v8385_v48 = vld [vmem:[#allocation2 + $0x580] sm:$0xff]   ;;  %v1364_v49 = vrot.slane %v8955_v11, %v8919_v35  ;;  %v8411_v11 = vld [vmem:[#allocation2 + $0x648] sm:$0xff]  }
  0xb6   :  { %7545 = vmatpush3.bf16.msra.mxu0 %v8336_v50  ;;  %v8387_v50 = vld [vmem:[#allocation2 + $0x678] sm:$0xff]  }
  0xb7   :  { %7546 = vmatprep.subr.bf16.mxu0 %v8338_v52  ;;  %7567 = vmatpush3.bf16.msra.mxu1 %v8337_v51  ;;  %v8388_v51 = vld [vmem:[#allocation2 + $0x6f8] sm:$0xff]  }
  0xb8   :  { %7568 = vmatprep.subr.bf16.mxu1 %v8339_v53  ;;  %v8389_v52 = vld [vmem:[#allocation2 + $0x638] sm:$0xff]  }
  0xb9   :  { %v8390_v53 = vld [vmem:[#allocation2 + $0x6b8] sm:$0xff]  }
  0xba   :  { %7547 = vmatpush3.bf16.msra.mxu0 %v8340_v54  ;;  %v1380_v54 = vcombine.high %v1364_v49, %v1364_v49 }
  0xbb   :  { %7548 = vmatprep.subr.bf16.mxu0 %v8342_v56  ;;  %7569 = vmatpush3.bf16.msra.mxu1 %v8341_v55  ;;  %v8391_v55 = vld [vmem:[#allocation2 + $0x670] sm:$0xff]  }
  0xbc   :  { %7570 = vmatprep.subr.bf16.mxu1 %v8343_v57  ;;  %v8392_v56 = vld [vmem:[#allocation2 + $0x6f0] sm:$0xff]  }
  0xbd   :  { %v8393_v57 = vld [vmem:[#allocation2 + $0x630] sm:$0xff]  }
  0xbe   :  { %7549 = vmatpush3.bf16.msra.mxu0 %v8344_v58  ;;  %v8394_v58 = vld [vmem:[#allocation2 + $0x6b0] sm:$0xff]  }
  0xbf   :  { %7550 = vmatprep.subr.bf16.mxu0 %v8346_v60  ;;  %7571 = vmatpush3.bf16.msra.mxu1 %v8345_v59  ;;  %v8395_v59 = vld [vmem:[#allocation2 + $0x668] sm:$0xff]  }
  0xc0   :  { %7572 = vmatprep.subr.bf16.mxu1 %v8347_v61  ;;  %v8396_v60 = vld [vmem:[#allocation2 + $0x6e8] sm:$0xff]  }
  0xc1   :  { %v8397_v61 = vld [vmem:[#allocation2 + $0x628] sm:$0xff]  }
  0xc2   :  { %7551 = vmatpush3.bf16.msra.mxu0 %v8348_v62  ;;  %v8398_v62 = vld [vmem:[#allocation2 + $0x6a8] sm:$0xff]  }
  0xc3   :  { %7552 = vmatprep.subr.bf16.mxu0 %v8350_v0  ;;  %7573 = vmatpush3.bf16.msra.mxu1 %v8349_v63  ;;  %v8399_v63 = vld [vmem:[#allocation2 + $0x660] sm:$0xff]  }
  0xc4   :  { %7574 = vmatprep.subr.bf16.mxu1 %v8351_v1  ;;  %v8400_v0 = vld [vmem:[#allocation2 + $0x6e0] sm:$0xff]  }
  0xc5   :  { %v8401_v1 = vld [vmem:[#allocation2 + $0x620] sm:$0xff]  }
  0xc6   :  { %7553 = vmatpush3.bf16.msra.mxu0 %v8352_v2  ;;  %v8402_v2 = vld [vmem:[#allocation2 + $0x6a0] sm:$0xff]  }
  0xc7   :  { %7582 = vmatprep.subr.bf16.mxu0 %v8354_v7  ;;  %7575 = vmatpush3.bf16.msra.mxu1 %v8353_v4  ;;  %v8404_v4 = vld [vmem:[#allocation2 + $0x6d8] sm:$0xff]   ;;  %v8407_v7 = vld [vmem:[#allocation2 + $0x650] sm:$0xff]  }
  0xc8   :  { %7604 = vmatprep.subr.bf16.mxu1 %v8355_v10  ;;  %v8410_v10 = vld [vmem:[#allocation2 + $0x690] sm:$0xff]  }
  0xc9   :  { %5558 = vmatmul.mubr.bf16.vlgmr.msra.gmra.mxu0 %v1357_v9  ;;  %v8409_v9 = vld [vmem:[#allocation2 + $0x610] sm:$0xff]  }
  0xca   :  { %7583 = vmatpush3.bf16.msra.mxu0 %v8356_v12  ;;  %5598 = vmatmul.mubr.bf16.vlgmr.msra.gmra.mxu1 %v1379_v16  ;;  %v8412_v12 = vld [vmem:[#allocation2 + $0x6c8] sm:$0xff]   ;;  %v8416_v16 = vld [vmem:[#allocation2 + $0x6c0] sm:$0xff]  }
  0xcb   :  { %7584 = vmatprep.subr.bf16.mxu0 %v8358_v17  ;;  %7605 = vmatpush3.bf16.msra.mxu1 %v8357_v14  ;;  %v8414_v14 = vld [vmem:[#allocation2 + $0x688] sm:$0xff]   ;;  %v8417_v17 = vld [vmem:[#allocation2 + $0x600] sm:$0xff]  }
  0xcc   :  { %5637 = vmatprep.mubr.bf16.mxu0 %v1378_v20  ;;  %7606 = vmatprep.subr.bf16.mxu1 %v8359_v19  ;;  %v1390_v19 = vrot.slane %v62_v18, %v8919_v35  ;;  %v8419_v20 = vld [vmem:[#allocation2 + $0x778] sm:$0xff]  }
  0xcd   :  { %5677 = vmatprep.mubr.bf16.mxu1 %v1382_v23 }
  0xce   :  { %7585 = vmatpush3.bf16.msra.mxu0 %v8360_v21  ;;  %v1383_v21 = vcombine.high %v62_v18, %v62_v18  ;;  %v1398_v23 = vcombine.high %v1390_v19, %v1390_v19 }
  0xcf   :  { %7586 = vmatprep.subr.bf16.mxu0 %v8362_v24  ;;  %7607 = vmatpush3.bf16.msra.mxu1 %v8361_v22  ;;  %v8418_v22 = vld [vmem:[#allocation2 + $0x680] sm:$0xff]   ;;  %v1406_v24 = vrot.slane %v1390_v19, %v8919_v35  ;;  %v8456_v19 = vld [vmem:[#allocation2 + $0x870] sm:$0xff]  }
  0xd0   :  { %7608 = vmatprep.subr.bf16.mxu1 %v8363_v25  ;;  %v8420_v25 = vld [vmem:[#allocation2 + $0x7f8] sm:$0xff]  }
  0xd2   :  { %7587 = vmatpush3.bf16.msra.mxu0 %v8364_v26  ;;  %v8969_v26 = vrot.slane %v1383_v21, %v8919_v35  ;;  %v8457_v21 = vld [vmem:[#allocation2 + $0x8f0] sm:$0xff]  }
  0xd3   :  { %7588 = vmatprep.subr.bf16.mxu0 %v8366_v28  ;;  %7609 = vmatpush3.bf16.msra.mxu1 %v8365_v27  ;;  %v8421_v27 = vld [vmem:[#allocation2 + $0x738] sm:$0xff]   ;;  %v1420_v28 = vrot.slane %v1398_v23, %v8919_v35 }
  0xd4   :  { %7610 = vmatprep.subr.bf16.mxu1 %v8367_v29  ;;  %v8422_v29 = vld [vmem:[#allocation2 + $0x7b8] sm:$0xff]  }
  0xd6   :  { %7589 = vmatpush3.bf16.msra.mxu0 %v8368_v30  ;;  %v1399_v30 = vcombine.high %v8969_v26, %v8969_v26 }
  0xd7   :  { %7590 = vmatprep.subr.bf16.mxu0 %v8370_v32  ;;  %7611 = vmatpush3.bf16.msra.mxu1 %v8369_v31  ;;  %v1428_v31 = vcombine.high %v1406_v24, %v1406_v24  ;;  %v8423_v32 = vld [vmem:[#allocation2 + $0x770] sm:$0xff]  }
  0xd8   :  { %7612 = vmatprep.subr.bf16.mxu1 %v8371_v33  ;;  %v1430_v33 = vcombine.high %v1420_v28, %v1420_v28 }
  0xda   :  { %7591 = vmatpush3.bf16.msra.mxu0 %v8372_v34 }
  0xdb   :  { %7592 = vmatprep.subr.bf16.mxu0 %v8374_v37  ;;  %7613 = vmatpush3.bf16.msra.mxu1 %v8373_v36  ;;  %v6776_v36 = vld [vmem:[#allocation5] ss:$0 sm:$0xff]  ;;  %v8424_v37 = vld [vmem:[#allocation2 + $0x7f0] sm:$0xff]  }
  0xdc   :  { %7614 = vmatprep.subr.bf16.mxu1 %v8375_v38  ;;  %v1427_v38 = vrot.slane %v1399_v30, %v8919_v35  ;;  %v8461_v30 = vld [vmem:[#allocation2 + $0x8e8] sm:$0xff]  }
  0xde   :  { %7593 = vmatpush3.bf16.msra.mxu0 %v8376_v39  ;;  %v8425_v39 = vld [vmem:[#allocation2 + $0x730] sm:$0xff]  }
  0xdf   :  { %7594 = vmatprep.subr.bf16.mxu0 %v8378_v41  ;;  %7615 = vmatpush3.bf16.msra.mxu1 %v8377_v40 }
  0xe0   :  { %7616 = vmatprep.subr.bf16.mxu1 %v8379_v42  ;;  %v8426_v42 = vld [vmem:[#allocation2 + $0x7b0] sm:$0xff]  }
  0xe2   :  { %7595 = vmatpush3.bf16.msra.mxu0 %v8380_v43  ;;  %v1431_v43 = vcombine.high %v1427_v38, %v1427_v38 }
  0xe3   :  { %7596 = vmatprep.subr.bf16.mxu0 %v8382_v45  ;;  %7617 = vmatpush3.bf16.msra.mxu1 %v8381_v44  ;;  %v8427_v45 = vld [vmem:[#allocation2 + $0x768] sm:$0xff]  }
  0xe4   :  { %7618 = vmatprep.subr.bf16.mxu1 %v8383_v46 }
  0xe6   :  { %7597 = vmatpush3.bf16.msra.mxu0 %v8384_v47 }
  0xe7   :  { %7626 = vmatprep.subr.bf16.mxu0 %v8387_v50  ;;  %7619 = vmatpush3.bf16.msra.mxu1 %v8385_v48  ;;  %v8428_v48 = vld [vmem:[#allocation2 + $0x7e8] sm:$0xff]  }
  0xe8   :  { %7648 = vmatprep.subr.bf16.mxu1 %v8388_v51  ;;  %v8429_v51 = vld [vmem:[#allocation2 + $0x728] sm:$0xff]  }
  0xe9   :  { %5638 = vmatmul.mubr.bf16.vlgmr.msra.gmra.mxu0 %v1364_v49 }
  0xea   :  { %7627 = vmatpush3.bf16.msra.mxu0 %v8389_v52  ;;  %5678 = vmatmul.mubr.bf16.vlgmr.msra.gmra.mxu1 %v1380_v54  ;;  %v8430_v54 = vld [vmem:[#allocation2 + $0x7a8] sm:$0xff]  }
  0xeb   :  { %7628 = vmatprep.subr.bf16.mxu0 %v8391_v55  ;;  %7649 = vmatpush3.bf16.msra.mxu1 %v8390_v53 }
  0xec   :  { %7650 = vmatprep.subr.bf16.mxu1 %v8392_v56  ;;  %5717 = vmatprep.mubr.bf16.mxu0 %v1420_v28  ;;  %v8431_v56 = vld [vmem:[#allocation2 + $0x760] sm:$0xff]  }
  0xed   :  { %5757 = vmatprep.mubr.bf16.mxu1 %v1430_v33  ;;  %v8462_v33 = vld [vmem:[#allocation2 + $0x828] sm:$0xff]  }
  0xee   :  { %7629 = vmatpush3.bf16.msra.mxu0 %v8393_v57 }
  0xef   :  { %7630 = vmatprep.subr.bf16.mxu0 %v8395_v59  ;;  %7651 = vmatpush3.bf16.msra.mxu1 %v8394_v58  ;;  %v8432_v58 = vld [vmem:[#allocation2 + $0x7e0] sm:$0xff]  }
  0xf0   :  { %7652 = vmatprep.subr.bf16.mxu1 %v8396_v60  ;;  %v8433_v59 = vld [vmem:[#allocation2 + $0x720] sm:$0xff]  }
  0xf1   :  { %v8434_v60 = vld [vmem:[#allocation2 + $0x7a0] sm:$0xff]  }
  0xf2   :  { %7631 = vmatpush3.bf16.msra.mxu0 %v8397_v61  ;;  %v8435_v61 = vld [vmem:[#allocation2 + $0x758] sm:$0xff]  }
  0xf3   :  { %7632 = vmatprep.subr.bf16.mxu0 %v8399_v63  ;;  %7653 = vmatpush3.bf16.msra.mxu1 %v8398_v62  ;;  %v8436_v62 = vld [vmem:[#allocation2 + $0x7d8] sm:$0xff]  }
  0xf4   :  { %7654 = vmatprep.subr.bf16.mxu1 %v8400_v0  ;;  %v8437_v63 = vld [vmem:[#allocation2 + $0x718] sm:$0xff]  }
  0xf5   :  { %v8438_v0 = vld [vmem:[#allocation2 + $0x798] sm:$0xff]  }
  0xf6   :  { %7633 = vmatpush3.bf16.msra.mxu0 %v8401_v1  ;;  %v8439_v1 = vld [vmem:[#allocation2 + $0x750] sm:$0xff]  }
  0xf7   :  { %7634 = vmatprep.subr.bf16.mxu0 %v8403_v3  ;;  %7655 = vmatpush3.bf16.msra.mxu1 %v8402_v2  ;;  %v8440_v2 = vld [vmem:[#allocation2 + $0x7d0] sm:$0xff]  }
  0xf8   :  { %7656 = vmatprep.subr.bf16.mxu1 %v8404_v4  ;;  %v8441_v3 = vld [vmem:[#allocation2 + $0x710] sm:$0xff]  }
  0xf9   :  { %v8442_v4 = vld [vmem:[#allocation2 + $0x790] sm:$0xff]  }
  0xfa   :  { %7635 = vmatpush3.bf16.msra.mxu0 %v8405_v5  ;;  %v8443_v5 = vld [vmem:[#allocation2 + $0x748] sm:$0xff]  }
  0xfb   :  { %7636 = vmatprep.subr.bf16.mxu0 %v8407_v7  ;;  %7657 = vmatpush3.bf16.msra.mxu1 %v8406_v6  ;;  %v8444_v6 = vld [vmem:[#allocation2 + $0x7c8] sm:$0xff]  }
  0xfc   :  { %7658 = vmatprep.subr.bf16.mxu1 %v8408_v8  ;;  %v8445_v7 = vld [vmem:[#allocation2 + $0x708] sm:$0xff]  }
  0xfd   :  { %v8446_v8 = vld [vmem:[#allocation2 + $0x788] sm:$0xff]  }
  0xfe   :  { %7637 = vmatpush3.bf16.msra.mxu0 %v8409_v9  ;;  %v8447_v9 = vld [vmem:[#allocation2 + $0x740] sm:$0xff]  }
  0xff   :  { %7638 = vmatprep.subr.bf16.mxu0 %v8411_v11  ;;  %7659 = vmatpush3.bf16.msra.mxu1 %v8410_v10  ;;  %v8448_v10 = vld [vmem:[#allocation2 + $0x7c0] sm:$0xff]  }
 0x100   :  { %7660 = vmatprep.subr.bf16.mxu1 %v8412_v12  ;;  %v8449_v11 = vld [vmem:[#allocation2 + $0x700] sm:$0xff]  }
 0x101   :  { %v8450_v12 = vld [vmem:[#allocation2 + $0x780] sm:$0xff]  }
 0x102   :  { %7639 = vmatpush3.bf16.msra.mxu0 %v8413_v13  ;;  %v1413_v13 = vrot.slane %v8969_v26, %v8919_v35 }
 0x103   :  { %7640 = vmatprep.subr.bf16.mxu0 %v8415_v15  ;;  %7661 = vmatpush3.bf16.msra.mxu1 %v8414_v14  ;;  %v8452_v14 = vld [vmem:[#allocation2 + $0x878] sm:$0xff]  }
 0x104   :  { %7662 = vmatprep.subr.bf16.mxu1 %v8416_v16  ;;  %v8453_v15 = vld [vmem:[#allocation2 + $0x8f8] sm:$0xff]   ;;  %v1429_v18 = vcombine.high %v1413_v13, %v1413_v13 }
 0x105   :  { %v8454_v16 = vld [vmem:[#allocation2 + $0x838] sm:$0xff]  }
 0x106   :  { %7641 = vmatpush3.bf16.msra.mxu0 %v8417_v17  ;;  %v8455_v17 = vld [vmem:[#allocation2 + $0x8b8] sm:$0xff]  }
 0x107   :  { %7670 = vmatprep.subr.bf16.mxu0 %v8419_v20  ;;  %7663 = vmatpush3.bf16.msra.mxu1 %v8418_v22  ;;  %v8458_v22 = vld [vmem:[#allocation2 + $0x830] sm:$0xff]  }
 0x108   :  { %7692 = vmatprep.subr.bf16.mxu1 %v8420_v25  ;;  %v8459_v25 = vld [vmem:[#allocation2 + $0x8b0] sm:$0xff]  }
 0x109   :  { %v7378_v34 = vpop.f32.mrf.mxu0  ;;  %5718 = vmatmul.mubr.bf16.vlgmr.msra.gmra.mxu0 %v1406_v24 }
 0x10a   :  { %v7400_v40 = vpop.f32.mrf.mxu1  ;;  %7671 = vmatpush3.bf16.msra.mxu0 %v8421_v27  ;;  %5758 = vmatmul.mubr.bf16.vlgmr.msra.gmra.mxu1 %v1428_v31  ;;  %v8460_v27 = vld [vmem:[#allocation2 + $0x868] sm:$0xff]  }
 0x10b   :  { %v7379_v41 = vpop.f32.mrf.mxu0  ;;  %7672 = vmatprep.subr.bf16.mxu0 %v8423_v32  ;;  %7693 = vmatpush3.bf16.msra.mxu1 %v8422_v29 }
 0x10c   :  { %v7380_v44 = vadd.f32 %v7379_v41, %v7378_v34  ;;  %v7401_v46 = vpop.f32.mrf.mxu1  ;;  %5797 = vmatprep.mubr.bf16.mxu0 %v1427_v38  ;;  %7694 = vmatprep.subr.bf16.mxu1 %v8424_v37  ;;  %v8463_v37 = vld [vmem:[#allocation2 + $0x8a8] sm:$0xff]   ;;  %v8465_v41 = vld [vmem:[#allocation2 + $0x8e0] sm:$0xff]  }
 0x10d   :  { %v7381_v47 = vpop.f32.mrf.mxu0  ;;  %v7402_v50 = vadd.f32 %v7401_v46, %v7400_v40  ;;  %5837 = vmatprep.mubr.bf16.mxu1 %v1431_v43  ;;  %v8467_v43 = vld [vmem:[#allocation2 + $0x8a0] sm:$0xff]   ;;  %v8470_v46 = vld [vmem:[#allocation2 + $0x818] sm:$0xff]  }
 0x10e   :  { %v5240_v49 = vadd.f32 %v7380_v44, %v6776_v36  ;;  %v7403_v52 = vpop.f32.mrf.mxu1  ;;  %7673 = vmatpush3.bf16.msra.mxu0 %v8425_v39  ;;  %v8464_v39 = vld [vmem:[#allocation2 + $0x860] sm:$0xff]   ;;  %v8468_v44 = vld [vmem:[#allocation2 + $0x858] sm:$0xff]  }
 0x10f   :  { %v7382_v53 = vpop.f32.mrf.mxu0  ;;  %7674 = vmatprep.subr.bf16.mxu0 %v8427_v45  ;;  %7695 = vmatpush3.bf16.msra.mxu1 %v8426_v42  ;;  %v8466_v42 = vld [vmem:[#allocation2 + $0x820] sm:$0xff]   ;;  %v8469_v45 = vld [vmem:[#allocation2 + $0x8d8] sm:$0xff]   ;;  %v8476_v52 = vld [vmem:[#allocation2 + $0x848] sm:$0xff]  }
 0x110   :  { %v8975_v55 = vadd.f32 %v7402_v50, %v5240_v49  ;;  %v7404_v57 = vpop.f32.mrf.mxu1  ;;  %7696 = vmatprep.subr.bf16.mxu1 %v8428_v48  ;;  %v8471_v47 = vld [vmem:[#allocation2 + $0x898] sm:$0xff]   ;;  %v8472_v48 = vld [vmem:[#allocation2 + $0x850] sm:$0xff]   ;;  %v8477_v53 = vld [vmem:[#allocation2 + $0x8c8] sm:$0xff]  }
 0x111   :  { %v8473_v49 = vld [vmem:[#allocation2 + $0x8d0] sm:$0xff]   ;;  %v8481_v57 = vld [vmem:[#allocation2 + $0x8c0] sm:$0xff]  }
 0x112   :  { %7675 = vmatpush3.bf16.msra.mxu0 %v8429_v51  ;;  %v8474_v50 = vld [vmem:[#allocation2 + $0x810] sm:$0xff]  }
 0x113   :  { %7676 = vmatprep.subr.bf16.mxu0 %v8431_v56  ;;  %7697 = vmatpush3.bf16.msra.mxu1 %v8430_v54  ;;  %v8475_v51 = vld [vmem:[#allocation2 + $0x890] sm:$0xff]   ;;  %v8478_v54 = vld [vmem:[#allocation2 + $0x808] sm:$0xff]   ;;  %v8480_v56 = vld [vmem:[#allocation2 + $0x840] sm:$0xff]  }
 0x114   :  { %7698 = vmatprep.subr.bf16.mxu1 %v8432_v58  ;;  %v8482_v58 = vld [vmem:[#allocation2 + $0x800] sm:$0xff]  }
 0x116   :  { %7677 = vmatpush3.bf16.msra.mxu0 %v8433_v59  ;;  %v63_v59 = vld [vmem:[%s9104_s0 + $0x20] sm:$0xff] }
 0x117   :  { %7678 = vmatprep.subr.bf16.mxu0 %v8435_v61  ;;  %7699 = vmatpush3.bf16.msra.mxu1 %v8434_v60  ;;  %v8483_v60 = vld [vmem:[#allocation2 + $0x880] sm:$0xff]   ;;  %v1439_v61 = vrot.slane %v63_v59, %v8919_v35 }
 0x118   :  { %7700 = vmatprep.subr.bf16.mxu1 %v8436_v62  ;;  %v1432_v62 = vcombine.high %v63_v59, %v63_v59  ;;  %v8521_v59 = vld [vmem:[#allocation2 + $0xa70] sm:$0xff]  }
 0x11a   :  { %7679 = vmatpush3.bf16.msra.mxu0 %v8437_v63  ;;  %v8484_v63 = vld [vmem:[#allocation2 + $0x978] sm:$0xff]  }
 0x11b   :  { %7680 = vmatprep.subr.bf16.mxu0 %v8439_v1  ;;  %7701 = vmatpush3.bf16.msra.mxu1 %v8438_v0  ;;  %v1447_v0 = vcombine.high %v1439_v61, %v1439_v61  ;;  %v1455_v1 = vrot.slane %v1439_v61, %v8919_v35  ;;  %v8522_v61 = vld [vmem:[#allocation2 + $0xaf0] sm:$0xff]  }
 0x11c   :  { %7702 = vmatprep.subr.bf16.mxu1 %v8440_v2  ;;  %v8485_v2 = vld [vmem:[#allocation2 + $0x9f8] sm:$0xff]  }
 0x11e   :  { %7681 = vmatpush3.bf16.msra.mxu0 %v8441_v3  ;;  %v8988_v3 = vrot.slane %v1432_v62, %v8919_v35  ;;  %v8523_v62 = vld [vmem:[#allocation2 + $0xa30] sm:$0xff]  }
 0x11f   :  { %7682 = vmatprep.subr.bf16.mxu0 %v8443_v5  ;;  %7703 = vmatpush3.bf16.msra.mxu1 %v8442_v4  ;;  %v8486_v4 = vld [vmem:[#allocation2 + $0x938] sm:$0xff]   ;;  %v1469_v5 = vrot.slane %v1447_v0, %v8919_v35 }
 0x120   :  { %7704 = vmatprep.subr.bf16.mxu1 %v8444_v6  ;;  %v8487_v6 = vld [vmem:[#allocation2 + $0x9b8] sm:$0xff]  }
 0x122   :  { %7683 = vmatpush3.bf16.msra.mxu0 %v8445_v7  ;;  %v1448_v7 = vcombine.high %v8988_v3, %v8988_v3 }
 0x123   :  { %7684 = vmatprep.subr.bf16.mxu0 %v8447_v9  ;;  %7705 = vmatpush3.bf16.msra.mxu1 %v8446_v8  ;;  %v1477_v8 = vcombine.high %v1455_v1, %v1455_v1  ;;  %v8488_v9 = vld [vmem:[#allocation2 + $0x970] sm:$0xff]  }
 0x124   :  { %7706 = vmatprep.subr.bf16.mxu1 %v8448_v10  ;;  %v1479_v10 = vcombine.high %v1469_v5, %v1469_v5 }
 0x126   :  { %7685 = vmatpush3.bf16.msra.mxu0 %v8449_v11 }
 0x127   :  { %7714 = vmatprep.subr.bf16.mxu0 %v8452_v14  ;;  %7707 = vmatpush3.bf16.msra.mxu1 %v8450_v12  ;;  %v8489_v12 = vld [vmem:[#allocation2 + $0x9f0] sm:$0xff]  }
 0x128   :  { %7736 = vmatprep.subr.bf16.mxu1 %v8453_v15  ;;  %v8490_v14 = vld [vmem:[#allocation2 + $0x930] sm:$0xff]  }
 0x129   :  { %v7422_v20 = vpop.f32.mrf.mxu0  ;;  %5798 = vmatmul.mubr.bf16.vlgmr.msra.gmra.mxu0 %v1413_v13  ;;  %v1476_v13 = vrot.slane %v1448_v7, %v8919_v35 }
 0x12a   :  { %v7444_v23 = vpop.f32.mrf.mxu1  ;;  %7715 = vmatpush3.bf16.msra.mxu0 %v8454_v16  ;;  %5838 = vmatmul.mubr.bf16.vlgmr.msra.gmra.mxu1 %v1429_v18 }
 0x12b   :  { %v7423_v24 = vpop.f32.mrf.mxu0  ;;  %7716 = vmatprep.subr.bf16.mxu0 %v8456_v19  ;;  %7737 = vmatpush3.bf16.msra.mxu1 %v8455_v17  ;;  %v8491_v17 = vld [vmem:[#allocation2 + $0x9b0] sm:$0xff]   ;;  %v1480_v18 = vcombine.high %v1476_v13, %v1476_v13 }
 0x12c   :  { %v7424_v26 = vadd.f32 %v7423_v24, %v7422_v20  ;;  %v7445_v28 = vpop.f32.mrf.mxu1  ;;  %7738 = vmatprep.subr.bf16.mxu1 %v8457_v21  ;;  %5877 = vmatprep.mubr.bf16.mxu0 %v1469_v5  ;;  %v8492_v20 = vld [vmem:[#allocation2 + $0x968] sm:$0xff]  }
 0x12d   :  { %v7425_v29 = vpop.f32.mrf.mxu0  ;;  %v7446_v32 = vadd.f32 %v7445_v28, %v7444_v23  ;;  %5917 = vmatprep.mubr.bf16.mxu1 %v1479_v10  ;;  %v8493_v23 = vld [vmem:[#allocation2 + $0x9e8] sm:$0xff]  }
 0x12e   :  { %v5320_v31 = vadd.f32 %v7424_v26, %v8975_v55  ;;  %v7447_v34 = vpop.f32.mrf.mxu1  ;;  %7717 = vmatpush3.bf16.msra.mxu0 %v8458_v22  ;;  %v8479_v55 = vld [vmem:[#allocation2 + $0x888] sm:$0xff]  }
 0x12f   :  { %v7426_v36 = vpop.f32.mrf.mxu0  ;;  %7718 = vmatprep.subr.bf16.mxu0 %v8460_v27  ;;  %7739 = vmatpush3.bf16.msra.mxu1 %v8459_v25  ;;  %v8494_v26 = vld [vmem:[#allocation2 + $0x928] sm:$0xff]   ;;  %v8498_v34 = vld [vmem:[#allocation2 + $0x920] sm:$0xff]  }
 0x130   :  { %v8980_v38 = vadd.f32 %v7446_v32, %v5320_v31  ;;  %v7448_v40 = vpop.f32.mrf.mxu1  ;;  %7740 = vmatprep.subr.bf16.mxu1 %v8461_v30  ;;  %v8495_v29 = vld [vmem:[#allocation2 + $0x9a8] sm:$0xff]   ;;  %v8496_v31 = vld [vmem:[#allocation2 + $0x960] sm:$0xff]  }
 0x131   :  { %v8499_v36 = vld [vmem:[#allocation2 + $0x9a0] sm:$0xff]   ;;  %v8503_v40 = vld [vmem:[#allocation2 + $0x998] sm:$0xff]  }
 0x132   :  { %7719 = vmatpush3.bf16.msra.mxu0 %v8462_v33  ;;  %v8497_v33 = vld [vmem:[#allocation2 + $0x9e0] sm:$0xff]  }
 0x133   :  { %7720 = vmatprep.subr.bf16.mxu0 %v8464_v39  ;;  %7741 = vmatpush3.bf16.msra.mxu1 %v8463_v37  ;;  %v8500_v37 = vld [vmem:[#allocation2 + $0x958] sm:$0xff]  }
 0x134   :  { %7742 = vmatprep.subr.bf16.mxu1 %v8465_v41  ;;  %v8502_v39 = vld [vmem:[#allocation2 + $0x918] sm:$0xff]   ;;  %v8504_v41 = vld [vmem:[#allocation2 + $0x950] sm:$0xff]  }
 0x136   :  { %7721 = vmatpush3.bf16.msra.mxu0 %v8466_v42  ;;  %v8505_v42 = vld [vmem:[#allocation2 + $0x9d0] sm:$0xff]  }
 0x137   :  { %7722 = vmatprep.subr.bf16.mxu0 %v8468_v44  ;;  %7743 = vmatpush3.bf16.msra.mxu1 %v8467_v43  ;;  %v8506_v43 = vld [vmem:[#allocation2 + $0x910] sm:$0xff]  }
 0x138   :  { %7744 = vmatprep.subr.bf16.mxu1 %v8469_v45  ;;  %v8507_v44 = vld [vmem:[#allocation2 + $0x990] sm:$0xff]   ;;  %v8508_v45 = vld [vmem:[#allocation2 + $0x948] sm:$0xff]  }
 0x13a   :  { %7723 = vmatpush3.bf16.msra.mxu0 %v8470_v46  ;;  %v8509_v46 = vld [vmem:[#allocation2 + $0x9c8] sm:$0xff]  }
 0x13b   :  { %7724 = vmatprep.subr.bf16.mxu0 %v8472_v48  ;;  %7745 = vmatpush3.bf16.msra.mxu1 %v8471_v47  ;;  %v8510_v47 = vld [vmem:[#allocation2 + $0x908] sm:$0xff]  }
 0x13c   :  { %7746 = vmatprep.subr.bf16.mxu1 %v8473_v49  ;;  %v8511_v48 = vld [vmem:[#allocation2 + $0x988] sm:$0xff]   ;;  %v8512_v49 = vld [vmem:[#allocation2 + $0x940] sm:$0xff]  }
 0x13e   :  { %7725 = vmatpush3.bf16.msra.mxu0 %v8474_v50  ;;  %v8513_v50 = vld [vmem:[#allocation2 + $0x9c0] sm:$0xff]  }
 0x13f   :  { %7726 = vmatprep.subr.bf16.mxu0 %v8476_v52  ;;  %7747 = vmatpush3.bf16.msra.mxu1 %v8475_v51  ;;  %v8514_v51 = vld [vmem:[#allocation2 + $0x900] sm:$0xff]  }
 0x140   :  { %7748 = vmatprep.subr.bf16.mxu1 %v8477_v53  ;;  %v8515_v52 = vld [vmem:[#allocation2 + $0x980] sm:$0xff]   ;;  %v1462_v53 = vrot.slane %v8988_v3, %v8919_v35  ;;  %v8525_v3 = vld [vmem:[#allocation2 + $0xa68] sm:$0xff]  }
 0x142   :  { %7727 = vmatpush3.bf16.msra.mxu0 %v8478_v54  ;;  %v8517_v54 = vld [vmem:[#allocation2 + $0xa78] sm:$0xff]  }
 0x143   :  { %7728 = vmatprep.subr.bf16.mxu0 %v8480_v56  ;;  %7749 = vmatpush3.bf16.msra.mxu1 %v8479_v55  ;;  %v8518_v55 = vld [vmem:[#allocation2 + $0xaf8] sm:$0xff]  }
 0x144   :  { %7750 = vmatprep.subr.bf16.mxu1 %v8481_v57  ;;  %v8519_v56 = vld [vmem:[#allocation2 + $0xa38] sm:$0xff]  }
 0x145   :  { %v8520_v57 = vld [vmem:[#allocation2 + $0xab8] sm:$0xff]  }
 0x146   :  { %7729 = vmatpush3.bf16.msra.mxu0 %v8482_v58  ;;  %v1478_v58 = vcombine.high %v1462_v53, %v1462_v53 }
 0x147   :  { %7758 = vmatprep.subr.bf16.mxu0 %v8484_v63  ;;  %7751 = vmatpush3.bf16.msra.mxu1 %v8483_v60 }
 0x148   :  { %7780 = vmatprep.subr.bf16.mxu1 %v8485_v2 }
 0x149   :  { %v7466_v11 = vpop.f32.mrf.mxu0  ;;  %5878 = vmatmul.mubr.bf16.vlgmr.msra.gmra.mxu0 %v1455_v1  ;;  %v8524_v1 = vld [vmem:[#allocation2 + $0xab0] sm:$0xff]  }
 0x14a   :  { %v7488_v15 = vpop.f32.mrf.mxu1  ;;  %7759 = vmatpush3.bf16.msra.mxu0 %v8486_v4  ;;  %5918 = vmatmul.mubr.bf16.vlgmr.msra.gmra.mxu1 %v1477_v8 }
 0x14b   :  { %v7467_v16 = vpop.f32.mrf.mxu0  ;;  %7760 = vmatprep.subr.bf16.mxu0 %v8488_v9  ;;  %7781 = vmatpush3.bf16.msra.mxu1 %v8487_v6  ;;  %v8526_v6 = vld [vmem:[#allocation2 + $0xae8] sm:$0xff]  }
 0x14c   :  { %v7468_v19 = vadd.f32 %v7467_v16, %v7466_v11  ;;  %v7489_v21 = vpop.f32.mrf.mxu1  ;;  %5957 = vmatprep.mubr.bf16.mxu0 %v1476_v13  ;;  %7782 = vmatprep.subr.bf16.mxu1 %v8489_v12  ;;  %v8527_v9 = vld [vmem:[#allocation2 + $0xa28] sm:$0xff]   ;;  %v8530_v16 = vld [vmem:[#allocation2 + $0xae0] sm:$0xff]  }
 0x14d   :  { %v7469_v22 = vpop.f32.mrf.mxu0  ;;  %v7490_v25 = vadd.f32 %v7489_v21, %v7488_v15  ;;  %5997 = vmatprep.mubr.bf16.mxu1 %v1480_v18  ;;  %v8528_v12 = vld [vmem:[#allocation2 + $0xaa8] sm:$0xff]   ;;  %v8532_v18 = vld [vmem:[#allocation2 + $0xaa0] sm:$0xff]   ;;  %v8535_v21 = vld [vmem:[#allocation2 + $0xa18] sm:$0xff]  }
 0x14e   :  { %v5400_v24 = vadd.f32 %v7468_v19, %v8980_v38  ;;  %v7491_v27 = vpop.f32.mrf.mxu1  ;;  %7761 = vmatpush3.bf16.msra.mxu0 %v8490_v14  ;;  %v8501_v38 = vld [vmem:[#allocation2 + $0x9d8] sm:$0xff]   ;;  %v8529_v14 = vld [vmem:[#allocation2 + $0xa60] sm:$0xff]  }
 0x14f   :  { %v7470_v28 = vpop.f32.mrf.mxu0  ;;  %7762 = vmatprep.subr.bf16.mxu0 %v8492_v20  ;;  %7783 = vmatpush3.bf16.msra.mxu1 %v8491_v17  ;;  %v8531_v17 = vld [vmem:[#allocation2 + $0xa20] sm:$0xff]   ;;  %v8533_v19 = vld [vmem:[#allocation2 + $0xa58] sm:$0xff]   ;;  %v8541_v27 = vld [vmem:[#allocation2 + $0xa48] sm:$0xff]  }
 0x150   :  { %v8995_v30 = vadd.f32 %v7490_v25, %v5400_v24  ;;  %v7492_v32 = vpop.f32.mrf.mxu1  ;;  %7784 = vmatprep.subr.bf16.mxu1 %v8493_v23  ;;  %v8534_v20 = vld [vmem:[#allocation2 + $0xad8] sm:$0xff]   ;;  %v8537_v23 = vld [vmem:[#allocation2 + $0xa50] sm:$0xff]   ;;  %v8542_v28 = vld [vmem:[#allocation2 + $0xac8] sm:$0xff]  }
 0x151   :  { %v8536_v22 = vld [vmem:[#allocation2 + $0xa98] sm:$0xff]   ;;  %v8538_v24 = vld [vmem:[#allocation2 + $0xad0] sm:$0xff]   ;;  %v8546_v32 = vld [vmem:[#allocation2 + $0xac0] sm:$0xff]  }
 0x152   :  { %7763 = vmatpush3.bf16.msra.mxu0 %v8494_v26  ;;  %v8539_v25 = vld [vmem:[#allocation2 + $0xa10] sm:$0xff]  }
 0x153   :  { %7764 = vmatprep.subr.bf16.mxu0 %v8496_v31  ;;  %7785 = vmatpush3.bf16.msra.mxu1 %v8495_v29  ;;  %v8540_v26 = vld [vmem:[#allocation2 + $0xa90] sm:$0xff]   ;;  %v8543_v29 = vld [vmem:[#allocation2 + $0xa08] sm:$0xff]   ;;  %v8545_v31 = vld [vmem:[#allocation2 + $0xa40] sm:$0xff]  }
 0x154   :  { %7786 = vmatprep.subr.bf16.mxu1 %v8497_v33  ;;  %v8547_v33 = vld [vmem:[#allocation2 + $0xa00] sm:$0xff]  }
 0x156   :  { %7765 = vmatpush3.bf16.msra.mxu0 %v8498_v34  ;;  %v64_v34 = vld [vmem:[%s9104_s0 + $0x28] sm:$0xff] }
 0x157   :  { %7766 = vmatprep.subr.bf16.mxu0 %v8500_v37  ;;  %7787 = vmatpush3.bf16.msra.mxu1 %v8499_v36  ;;  %v1488_v36 = vrot.slane %v64_v34, %v8919_v35  ;;  %v8549_v37 = vld [vmem:[#allocation2 + $0xb78] sm:$0xff]  }
 0x158   :  { %7788 = vmatprep.subr.bf16.mxu1 %v8501_v38  ;;  %v1481_v38 = vcombine.high %v64_v34, %v64_v34 }
 0x15a   :  { %7767 = vmatpush3.bf16.msra.mxu0 %v8502_v39  ;;  %v8548_v39 = vld [vmem:[#allocation2 + $0xa80] sm:$0xff]  }
 0x15b   :  { %7768 = vmatprep.subr.bf16.mxu0 %v8504_v41  ;;  %7789 = vmatpush3.bf16.msra.mxu1 %v8503_v40  ;;  %v1496_v40 = vcombine.high %v1488_v36, %v1488_v36  ;;  %v1504_v41 = vrot.slane %v1488_v36, %v8919_v35  ;;  %v8586_v36 = vld [vmem:[#allocation2 + $0xc70] sm:$0xff]  }
 0x15c   :  { %7790 = vmatprep.subr.bf16.mxu1 %v8505_v42  ;;  %v8550_v42 = vld [vmem:[#allocation2 + $0xbf8] sm:$0xff]  }
 0x15e   :  { %7769 = vmatpush3.bf16.msra.mxu0 %v8506_v43  ;;  %v9008_v43 = vrot.slane %v1481_v38, %v8919_v35 }
 0x15f   :  { %7770 = vmatprep.subr.bf16.mxu0 %v8508_v45  ;;  %7791 = vmatpush3.bf16.msra.mxu1 %v8507_v44  ;;  %v8551_v44 = vld [vmem:[#allocation2 + $0xb38] sm:$0xff]   ;;  %v1518_v45 = vrot.slane %v1496_v40, %v8919_v35  ;;  %v8588_v40 = vld [vmem:[#allocation2 + $0xc30] sm:$0xff]  }
 0x160   :  { %7792 = vmatprep.subr.bf16.mxu1 %v8509_v46  ;;  %v8552_v46 = vld [vmem:[#allocation2 + $0xbb8] sm:$0xff]  }
 0x162   :  { %7771 = vmatpush3.bf16.msra.mxu0 %v8510_v47  ;;  %v1497_v47 = vcombine.high %v9008_v43, %v9008_v43 }
 0x163   :  { %7772 = vmatprep.subr.bf16.mxu0 %v8512_v49  ;;  %7793 = vmatpush3.bf16.msra.mxu1 %v8511_v48  ;;  %v1526_v49 = vcombine.high %v1504_v41, %v1504_v41 }
 0x164   :  { %7794 = vmatprep.subr.bf16.mxu1 %v8513_v50  ;;  %v8553_v50 = vld [vmem:[#allocation2 + $0xb70] sm:$0xff]  }
 0x166   :  { %7773 = vmatpush3.bf16.msra.mxu0 %v8514_v51  ;;  %v1528_v51 = vcombine.high %v1518_v45, %v1518_v45 }
 0x167   :  { %7802 = vmatprep.subr.bf16.mxu0 %v8517_v54  ;;  %7795 = vmatpush3.bf16.msra.mxu1 %v8515_v52  ;;  %v8554_v52 = vld [vmem:[#allocation2 + $0xbf0] sm:$0xff]  }
 0x168   :  { %7824 = vmatprep.subr.bf16.mxu1 %v8518_v55 }
 0x169   :  { %v7510_v60 = vpop.f32.mrf.mxu0  ;;  %5958 = vmatmul.mubr.bf16.vlgmr.msra.gmra.mxu0 %v1462_v53  ;;  %v1525_v53 = vrot.slane %v1497_v47, %v8919_v35 }
 0x16a   :  { %v7532_v63 = vpop.f32.mrf.mxu1  ;;  %7803 = vmatpush3.bf16.msra.mxu0 %v8519_v56  ;;  %5998 = vmatmul.mubr.bf16.vlgmr.msra.gmra.mxu1 %v1478_v58  ;;  %v8555_v56 = vld [vmem:[#allocation2 + $0xb30] sm:$0xff]  }
 0x16b   :  { %v7511_v0 = vpop.f32.mrf.mxu0  ;;  %7804 = vmatprep.subr.bf16.mxu0 %v8521_v59  ;;  %7825 = vmatpush3.bf16.msra.mxu1 %v8520_v57  ;;  %v8556_v58 = vld [vmem:[#allocation2 + $0xbb0] sm:$0xff]   ;;  %v1529_v59 = vcombine.high %v1525_v53, %v1525_v53 }
 0x16c   :  { %v7512_v2 = vadd.f32 %v7511_v0, %v7510_v60  ;;  %v7533_v4 = vpop.f32.mrf.mxu1  ;;  %7826 = vmatprep.subr.bf16.mxu1 %v8522_v61  ;;  %6037 = vmatprep.mubr.bf16.mxu0 %v1518_v45  ;;  %v8590_v45 = vld [vmem:[#allocation2 + $0xc68] sm:$0xff]  }
 0x16d   :  { %v7513_v5 = vpop.f32.mrf.mxu0  ;;  %v7534_v8 = vadd.f32 %v7533_v4, %v7532_v63  ;;  %6077 = vmatprep.mubr.bf16.mxu1 %v1528_v51  ;;  %v8559_v4 = vld [vmem:[#allocation2 + $0xb28] sm:$0xff]  }
 0x16e   :  { %v5480_v7 = vadd.f32 %v7512_v2, %v8995_v30  ;;  %v7535_v10 = vpop.f32.mrf.mxu1  ;;  %7805 = vmatpush3.bf16.msra.mxu0 %v8523_v62  ;;  %v8544_v30 = vld [vmem:[#allocation2 + $0xa88] sm:$0xff]  }
 0x16f   :  { %v7514_v11 = vpop.f32.mrf.mxu0  ;;  %7806 = vmatprep.subr.bf16.mxu0 %v8525_v3  ;;  %7827 = vmatpush3.bf16.msra.mxu1 %v8524_v1  ;;  %v8557_v62 = vld [vmem:[#allocation2 + $0xb68] sm:$0xff]   ;;  %v8563_v10 = vld [vmem:[#allocation2 + $0xb20] sm:$0xff]  }
 0x170   :  { %v9000_v13 = vadd.f32 %v7534_v8, %v5480_v7  ;;  %v7536_v15 = vpop.f32.mrf.mxu1  ;;  %7828 = vmatprep.subr.bf16.mxu1 %v8526_v6  ;;  %v8558_v1 = vld [vmem:[#allocation2 + $0xbe8] sm:$0xff]   ;;  %v8561_v8 = vld [vmem:[#allocation2 + $0xb60] sm:$0xff]  }
 0x171   :  { %v8560_v6 = vld [vmem:[#allocation2 + $0xba8] sm:$0xff]   ;;  %v8564_v11 = vld [vmem:[#allocation2 + $0xba0] sm:$0xff]   ;;  %v8568_v15 = vld [vmem:[#allocation2 + $0xb98] sm:$0xff]  }
 0x172   :  { %7807 = vmatpush3.bf16.msra.mxu0 %v8527_v9  ;;  %v8562_v9 = vld [vmem:[#allocation2 + $0xbe0] sm:$0xff]   ;;  %v8592_v51 = vld [vmem:[#allocation2 + $0xc28] sm:$0xff]  }
 0x173   :  { %7808 = vmatprep.subr.bf16.mxu0 %v8529_v14  ;;  %7829 = vmatpush3.bf16.msra.mxu1 %v8528_v12  ;;  %v8565_v12 = vld [vmem:[#allocation2 + $0xb58] sm:$0xff]  }
 0x174   :  { %7830 = vmatprep.subr.bf16.mxu1 %v8530_v16  ;;  %v8567_v14 = vld [vmem:[#allocation2 + $0xb18] sm:$0xff]   ;;  %v8569_v16 = vld [vmem:[#allocation2 + $0xb50] sm:$0xff]  }
 0x176   :  { %7809 = vmatpush3.bf16.msra.mxu0 %v8531_v17  ;;  %v8570_v17 = vld [vmem:[#allocation2 + $0xbd0] sm:$0xff]  }
 0x177   :  { %7810 = vmatprep.subr.bf16.mxu0 %v8533_v19  ;;  %7831 = vmatpush3.bf16.msra.mxu1 %v8532_v18  ;;  %v8571_v18 = vld [vmem:[#allocation2 + $0xb10] sm:$0xff]  }
 0x178   :  { %7832 = vmatprep.subr.bf16.mxu1 %v8534_v20  ;;  %v8572_v19 = vld [vmem:[#allocation2 + $0xb90] sm:$0xff]   ;;  %v8573_v20 = vld [vmem:[#allocation2 + $0xb48] sm:$0xff]  }
 0x17a   :  { %7811 = vmatpush3.bf16.msra.mxu0 %v8535_v21  ;;  %v8574_v21 = vld [vmem:[#allocation2 + $0xbc8] sm:$0xff]  }
 0x17b   :  { %7812 = vmatprep.subr.bf16.mxu0 %v8537_v23  ;;  %7833 = vmatpush3.bf16.msra.mxu1 %v8536_v22  ;;  %v8575_v22 = vld [vmem:[#allocation2 + $0xb08] sm:$0xff]  }
 0x17c   :  { %7834 = vmatprep.subr.bf16.mxu1 %v8538_v24  ;;  %v8576_v23 = vld [vmem:[#allocation2 + $0xb88] sm:$0xff]   ;;  %v8577_v24 = vld [vmem:[#allocation2 + $0xb40] sm:$0xff]  }
 0x17e   :  { %7813 = vmatpush3.bf16.msra.mxu0 %v8539_v25  ;;  %v8578_v25 = vld [vmem:[#allocation2 + $0xbc0] sm:$0xff]  }
 0x17f   :  { %7814 = vmatprep.subr.bf16.mxu0 %v8541_v27  ;;  %7835 = vmatpush3.bf16.msra.mxu1 %v8540_v26  ;;  %v8579_v26 = vld [vmem:[#allocation2 + $0xb00] sm:$0xff]  }
 0x180   :  { %7836 = vmatprep.subr.bf16.mxu1 %v8542_v28  ;;  %v8580_v27 = vld [vmem:[#allocation2 + $0xb80] sm:$0xff]   ;;  %v1511_v28 = vrot.slane %v9008_v43, %v8919_v35 }
 0x182   :  { %7815 = vmatpush3.bf16.msra.mxu0 %v8543_v29  ;;  %v8582_v29 = vld [vmem:[#allocation2 + $0xc78] sm:$0xff]   ;;  %v1527_v34 = vcombine.high %v1511_v28, %v1511_v28 }
 0x183   :  { %7816 = vmatprep.subr.bf16.mxu0 %v8545_v31  ;;  %7837 = vmatpush3.bf16.msra.mxu1 %v8544_v30  ;;  %v8583_v30 = vld [vmem:[#allocation2 + $0xcf8] sm:$0xff]  }
 0x184   :  { %7838 = vmatprep.subr.bf16.mxu1 %v8546_v32  ;;  %v8584_v31 = vld [vmem:[#allocation2 + $0xc38] sm:$0xff]  }
 0x185   :  { %v8585_v32 = vld [vmem:[#allocation2 + $0xcb8] sm:$0xff]  }
 0x186   :  { %7817 = vmatpush3.bf16.msra.mxu0 %v8547_v33 }
 0x187   :  { %7846 = vmatprep.subr.bf16.mxu0 %v8549_v37  ;;  %7839 = vmatpush3.bf16.msra.mxu1 %v8548_v39  ;;  %v8587_v37 = vld [vmem:[#allocation2 + $0xcf0] sm:$0xff]  }
 0x188   :  { %7868 = vmatprep.subr.bf16.mxu1 %v8550_v42  ;;  %v8589_v42 = vld [vmem:[#allocation2 + $0xcb0] sm:$0xff]  }
 0x189   :  { %v7554_v48 = vpop.f32.mrf.mxu0  ;;  %6038 = vmatmul.mubr.bf16.vlgmr.msra.gmra.mxu0 %v1504_v41 }
 0x18a   :  { %v7576_v54 = vpop.f32.mrf.mxu1  ;;  %7847 = vmatpush3.bf16.msra.mxu0 %v8551_v44  ;;  %6078 = vmatmul.mubr.bf16.vlgmr.msra.gmra.mxu1 %v1526_v49 }
 0x18b   :  { %v7555_v55 = vpop.f32.mrf.mxu0  ;;  %7848 = vmatprep.subr.bf16.mxu0 %v8553_v50  ;;  %7869 = vmatpush3.bf16.msra.mxu1 %v8552_v46 }
 0x18c   :  { %v7556_v57 = vadd.f32 %v7555_v55, %v7554_v48  ;;  %v7577_v60 = vpop.f32.mrf.mxu1  ;;  %6117 = vmatprep.mubr.bf16.mxu0 %v1525_v53  ;;  %7870 = vmatprep.subr.bf16.mxu1 %v8554_v52  ;;  %v8591_v48 = vld [vmem:[#allocation2 + $0xce8] sm:$0xff]   ;;  %v8594_v55 = vld [vmem:[#allocation2 + $0xc60] sm:$0xff]  }
 0x18d   :  { %v7557_v61 = vpop.f32.mrf.mxu0  ;;  %v7578_v0 = vadd.f32 %v7577_v60, %v7576_v54  ;;  %6157 = vmatprep.mubr.bf16.mxu1 %v1529_v59  ;;  %v8593_v53 = vld [vmem:[#allocation2 + $0xca8] sm:$0xff]   ;;  %v8598_v59 = vld [vmem:[#allocation2 + $0xc58] sm:$0xff]  }
 0x18e   :  { %v5560_v63 = vadd.f32 %v7556_v57, %v9000_v13  ;;  %v7579_v2 = vpop.f32.mrf.mxu1  ;;  %7849 = vmatpush3.bf16.msra.mxu0 %v8555_v56  ;;  %v8566_v13 = vld [vmem:[#allocation2 + $0xbd8] sm:$0xff]   ;;  %v8595_v56 = vld [vmem:[#allocation2 + $0xce0] sm:$0xff]  }
 0x18f   :  { %v7558_v3 = vpop.f32.mrf.mxu0  ;;  %7850 = vmatprep.subr.bf16.mxu0 %v8557_v62  ;;  %7871 = vmatpush3.bf16.msra.mxu1 %v8556_v58  ;;  %v8596_v57 = vld [vmem:[#allocation2 + $0xc20] sm:$0xff]   ;;  %v8599_v60 = vld [vmem:[#allocation2 + $0xcd8] sm:$0xff]   ;;  %v8605_v2 = vld [vmem:[#allocation2 + $0xc90] sm:$0xff]  }
 0x190   :  { %v9015_v5 = vadd.f32 %v7578_v0, %v5560_v63  ;;  %v7580_v7 = vpop.f32.mrf.mxu1  ;;  %7872 = vmatprep.subr.bf16.mxu1 %v8558_v1  ;;  %v8597_v58 = vld [vmem:[#allocation2 + $0xca0] sm:$0xff]   ;;  %v8600_v61 = vld [vmem:[#allocation2 + $0xc18] sm:$0xff]   ;;  %v8602_v63 = vld [vmem:[#allocation2 + $0xc50] sm:$0xff]  }
 0x191   :  { %v8601_v62 = vld [vmem:[#allocation2 + $0xc98] sm:$0xff]   ;;  %v8603_v0 = vld [vmem:[#allocation2 + $0xcd0] sm:$0xff]   ;;  %v8606_v3 = vld [vmem:[#allocation2 + $0xc48] sm:$0xff]  }
 0x192   :  { %7851 = vmatpush3.bf16.msra.mxu0 %v8559_v4  ;;  %v8604_v1 = vld [vmem:[#allocation2 + $0xc10] sm:$0xff]   ;;  %v8607_v4 = vld [vmem:[#allocation2 + $0xcc8] sm:$0xff]   ;;  %v8610_v7 = vld [vmem:[#allocation2 + $0xc40] sm:$0xff]  }
 0x193   :  { %7852 = vmatprep.subr.bf16.mxu0 %v8561_v8  ;;  %7873 = vmatpush3.bf16.msra.mxu1 %v8560_v6  ;;  %v8609_v6 = vld [vmem:[#allocation2 + $0xc88] sm:$0xff]   ;;  %v8611_v8 = vld [vmem:[#allocation2 + $0xcc0] sm:$0xff]  }
 0x194   :  { %7874 = vmatprep.subr.bf16.mxu1 %v8562_v9  ;;  %v8612_v9 = vld [vmem:[#allocation2 + $0xc00] sm:$0xff]  }
 0x196   :  { %7853 = vmatpush3.bf16.msra.mxu0 %v8563_v10  ;;  %v65_v10 = vld [vmem:[%s9104_s0 + $0x30] sm:$0xff] }
 0x197   :  { %7854 = vmatprep.subr.bf16.mxu0 %v8565_v12  ;;  %7875 = vmatpush3.bf16.msra.mxu1 %v8564_v11  ;;  %v8613_v11 = vld [vmem:[#allocation2 + $0xc80] sm:$0xff]   ;;  %v1537_v12 = vrot.slane %v65_v10, %v8919_v35 }
 0x198   :  { %7876 = vmatprep.subr.bf16.mxu1 %v8566_v13  ;;  %v1530_v13 = vcombine.high %v65_v10, %v65_v10  ;;  %v8651_v10 = vld [vmem:[#allocation2 + $0xe70] sm:$0xff]  }
 0x19a   :  { %7855 = vmatpush3.bf16.msra.mxu0 %v8567_v14  ;;  %v8614_v14 = vld [vmem:[#allocation2 + $0xd78] sm:$0xff]  }
 0x19b   :  { %7856 = vmatprep.subr.bf16.mxu0 %v8569_v16  ;;  %7877 = vmatpush3.bf16.msra.mxu1 %v8568_v15  ;;  %v1545_v15 = vcombine.high %v1537_v12, %v1537_v12  ;;  %v1553_v16 = vrot.slane %v1537_v12, %v8919_v35  ;;  %v8652_v12 = vld [vmem:[#allocation2 + $0xef0] sm:$0xff]  }
 0x19c   :  { %7878 = vmatprep.subr.bf16.mxu1 %v8570_v17  ;;  %v8615_v17 = vld [vmem:[#allocation2 + $0xdf8] sm:$0xff]  }
 0x19e   :  { %7857 = vmatpush3.bf16.msra.mxu0 %v8571_v18  ;;  %v9028_v18 = vrot.slane %v1530_v13, %v8919_v35  ;;  %v8653_v13 = vld [vmem:[#allocation2 + $0xe30] sm:$0xff]  }
 0x19f   :  { %7858 = vmatprep.subr.bf16.mxu0 %v8573_v20  ;;  %7879 = vmatpush3.bf16.msra.mxu1 %v8572_v19  ;;  %v8616_v19 = vld [vmem:[#allocation2 + $0xd38] sm:$0xff]   ;;  %v1567_v20 = vrot.slane %v1545_v15, %v8919_v35 }
 0x1a0   :  { %7880 = vmatprep.subr.bf16.mxu1 %v8574_v21  ;;  %v8617_v21 = vld [vmem:[#allocation2 + $0xdb8] sm:$0xff]  }
 0x1a2   :  { %7859 = vmatpush3.bf16.msra.mxu0 %v8575_v22  ;;  %v1546_v22 = vcombine.high %v9028_v18, %v9028_v18 }
 0x1a3   :  { %7860 = vmatprep.subr.bf16.mxu0 %v8577_v24  ;;  %7881 = vmatpush3.bf16.msra.mxu1 %v8576_v23  ;;  %v1575_v23 = vcombine.high %v1553_v16, %v1553_v16  ;;  %v8618_v24 = vld [vmem:[#allocation2 + $0xd70] sm:$0xff]  }
 0x1a4   :  { %7882 = vmatprep.subr.bf16.mxu1 %v8578_v25  ;;  %v1577_v25 = vcombine.high %v1567_v20, %v1567_v20 }
 0x1a6   :  { %7861 = vmatpush3.bf16.msra.mxu0 %v8579_v26 }
 0x1a7   :  { %7890 = vmatprep.subr.bf16.mxu0 %v8582_v29  ;;  %7883 = vmatpush3.bf16.msra.mxu1 %v8580_v27  ;;  %v8619_v27 = vld [vmem:[#allocation2 + $0xdf0] sm:$0xff]  }
 0x1a8   :  { %7912 = vmatprep.subr.bf16.mxu1 %v8583_v30  ;;  %v8620_v29 = vld [vmem:[#allocation2 + $0xd30] sm:$0xff]  }
 0x1a9   :  { %v7598_v33 = vpop.f32.mrf.mxu0  ;;  %6118 = vmatmul.mubr.bf16.vlgmr.msra.gmra.mxu0 %v1511_v28  ;;  %v1574_v28 = vrot.slane %v1546_v22, %v8919_v35 }
 0x1aa   :  { %v7620_v38 = vpop.f32.mrf.mxu1  ;;  %7891 = vmatpush3.bf16.msra.mxu0 %v8584_v31  ;;  %6158 = vmatmul.mubr.bf16.vlgmr.msra.gmra.mxu1 %v1527_v34 }
 0x1ab   :  { %v7599_v39 = vpop.f32.mrf.mxu0  ;;  %7892 = vmatprep.subr.bf16.mxu0 %v8586_v36  ;;  %7913 = vmatpush3.bf16.msra.mxu1 %v8585_v32  ;;  %v8621_v32 = vld [vmem:[#allocation2 + $0xdb0] sm:$0xff]   ;;  %v8622_v36 = vld [vmem:[#allocation2 + $0xd68] sm:$0xff]  }
 0x1ac   :  { %v7600_v41 = vadd.f32 %v7599_v39, %v7598_v33  ;;  %v7621_v43 = vpop.f32.mrf.mxu1  ;;  %7914 = vmatprep.subr.bf16.mxu1 %v8587_v37  ;;  %6197 = vmatprep.mubr.bf16.mxu0 %v1567_v20  ;;  %v1578_v33 = vcombine.high %v1574_v28, %v1574_v28  ;;  %v8623_v39 = vld [vmem:[#allocation2 + $0xde8] sm:$0xff]  }
 0x1ad   :  { %v7601_v44 = vpop.f32.mrf.mxu0  ;;  %v7622_v47 = vadd.f32 %v7621_v43, %v7620_v38  ;;  %6237 = vmatprep.mubr.bf16.mxu1 %v1577_v25 }
 0x1ae   :  { %v5640_v46 = vadd.f32 %v7600_v41, %v9015_v5  ;;  %v7623_v49 = vpop.f32.mrf.mxu1  ;;  %7893 = vmatpush3.bf16.msra.mxu0 %v8588_v40  ;;  %v8608_v5 = vld [vmem:[#allocation2 + $0xc08] sm:$0xff]  }
 0x1af   :  { %v7602_v50 = vpop.f32.mrf.mxu0  ;;  %7894 = vmatprep.subr.bf16.mxu0 %v8590_v45  ;;  %7915 = vmatpush3.bf16.msra.mxu1 %v8589_v42  ;;  %v8624_v42 = vld [vmem:[#allocation2 + $0xd28] sm:$0xff]   ;;  %v8627_v49 = vld [vmem:[#allocation2 + $0xde0] sm:$0xff]  }
 0x1b0   :  { %v9020_v52 = vadd.f32 %v7622_v47, %v5640_v46  ;;  %v7624_v54 = vpop.f32.mrf.mxu1  ;;  %7916 = vmatprep.subr.bf16.mxu1 %v8591_v48  ;;  %v8625_v45 = vld [vmem:[#allocation2 + $0xda8] sm:$0xff]   ;;  %v8626_v47 = vld [vmem:[#allocation2 + $0xd60] sm:$0xff]  }
 0x1b1   :  { %v8628_v50 = vld [vmem:[#allocation2 + $0xd20] sm:$0xff]   ;;  %v8632_v54 = vld [vmem:[#allocation2 + $0xd18] sm:$0xff]  }
 0x1b2   :  { %7895 = vmatpush3.bf16.msra.mxu0 %v8592_v51  ;;  %v8629_v51 = vld [vmem:[#allocation2 + $0xda0] sm:$0xff]  }
 0x1b3   :  { %7896 = vmatprep.subr.bf16.mxu0 %v8594_v55  ;;  %7917 = vmatpush3.bf16.msra.mxu1 %v8593_v53  ;;  %v8631_v53 = vld [vmem:[#allocation2 + $0xdd8] sm:$0xff]  }
 0x1b4   :  { %7918 = vmatprep.subr.bf16.mxu1 %v8595_v56  ;;  %v8633_v55 = vld [vmem:[#allocation2 + $0xd98] sm:$0xff]   ;;  %v8634_v56 = vld [vmem:[#allocation2 + $0xd50] sm:$0xff]  }
 0x1b6   :  { %7897 = vmatpush3.bf16.msra.mxu0 %v8596_v57  ;;  %v8635_v57 = vld [vmem:[#allocation2 + $0xdd0] sm:$0xff]  }
 0x1b7   :  { %7898 = vmatprep.subr.bf16.mxu0 %v8598_v59  ;;  %7919 = vmatpush3.bf16.msra.mxu1 %v8597_v58  ;;  %v8636_v58 = vld [vmem:[#allocation2 + $0xd10] sm:$0xff]  }
 0x1b8   :  { %7920 = vmatprep.subr.bf16.mxu1 %v8599_v60  ;;  %v8637_v59 = vld [vmem:[#allocation2 + $0xd90] sm:$0xff]   ;;  %v8638_v60 = vld [vmem:[#allocation2 + $0xd48] sm:$0xff]  }
 0x1ba   :  { %7899 = vmatpush3.bf16.msra.mxu0 %v8600_v61  ;;  %v8639_v61 = vld [vmem:[#allocation2 + $0xdc8] sm:$0xff]  }
 0x1bb   :  { %7900 = vmatprep.subr.bf16.mxu0 %v8602_v63  ;;  %7921 = vmatpush3.bf16.msra.mxu1 %v8601_v62  ;;  %v8640_v62 = vld [vmem:[#allocation2 + $0xd08] sm:$0xff]  }
 0x1bc   :  { %7922 = vmatprep.subr.bf16.mxu1 %v8603_v0  ;;  %v8641_v63 = vld [vmem:[#allocation2 + $0xd88] sm:$0xff]   ;;  %v8642_v0 = vld [vmem:[#allocation2 + $0xd40] sm:$0xff]  }
 0x1be   :  { %7901 = vmatpush3.bf16.msra.mxu0 %v8604_v1  ;;  %v8643_v1 = vld [vmem:[#allocation2 + $0xdc0] sm:$0xff]  }
 0x1bf   :  { %7902 = vmatprep.subr.bf16.mxu0 %v8606_v3  ;;  %7923 = vmatpush3.bf16.msra.mxu1 %v8605_v2  ;;  %v8644_v2 = vld [vmem:[#allocation2 + $0xd00] sm:$0xff]  }
 0x1c0   :  { %7924 = vmatprep.subr.bf16.mxu1 %v8607_v4  ;;  %v8645_v3 = vld [vmem:[#allocation2 + $0xd80] sm:$0xff]   ;;  %v1560_v4 = vrot.slane %v9028_v18, %v8919_v35  ;;  %v8655_v18 = vld [vmem:[#allocation2 + $0xe68] sm:$0xff]  }
 0x1c2   :  { %7903 = vmatpush3.bf16.msra.mxu0 %v8608_v5  ;;  %v8647_v5 = vld [vmem:[#allocation2 + $0xe78] sm:$0xff]  }
 0x1c3   :  { %7904 = vmatprep.subr.bf16.mxu0 %v8610_v7  ;;  %7925 = vmatpush3.bf16.msra.mxu1 %v8609_v6  ;;  %v8648_v6 = vld [vmem:[#allocation2 + $0xef8] sm:$0xff]  }
 0x1c4   :  { %7926 = vmatprep.subr.bf16.mxu1 %v8611_v8  ;;  %v8649_v7 = vld [vmem:[#allocation2 + $0xe38] sm:$0xff]  }
 0x1c5   :  { %v8650_v8 = vld [vmem:[#allocation2 + $0xeb8] sm:$0xff]  }
 0x1c6   :  { %7905 = vmatpush3.bf16.msra.mxu0 %v8612_v9  ;;  %v1576_v9 = vcombine.high %v1560_v4, %v1560_v4 }
 0x1c7   :  { %7934 = vmatprep.subr.bf16.mxu0 %v8614_v14  ;;  %7927 = vmatpush3.bf16.msra.mxu1 %v8613_v11 }
 0x1c8   :  { %7956 = vmatprep.subr.bf16.mxu1 %v8615_v17 }
 0x1c9   :  { %v7642_v26 = vpop.f32.mrf.mxu0  ;;  %6198 = vmatmul.mubr.bf16.vlgmr.msra.gmra.mxu0 %v1553_v16  ;;  %v8654_v16 = vld [vmem:[#allocation2 + $0xeb0] sm:$0xff]  }
 0x1ca   :  { %v7664_v30 = vpop.f32.mrf.mxu1  ;;  %7935 = vmatpush3.bf16.msra.mxu0 %v8616_v19  ;;  %6238 = vmatmul.mubr.bf16.vlgmr.msra.gmra.mxu1 %v1575_v23 }
 0x1cb   :  { %v7643_v31 = vpop.f32.mrf.mxu0  ;;  %7936 = vmatprep.subr.bf16.mxu0 %v8618_v24  ;;  %7957 = vmatpush3.bf16.msra.mxu1 %v8617_v21  ;;  %v8656_v21 = vld [vmem:[#allocation2 + $0xee8] sm:$0xff]  }
 0x1cc   :  { %v7644_v34 = vadd.f32 %v7643_v31, %v7642_v26  ;;  %v7665_v37 = vpop.f32.mrf.mxu1  ;;  %6277 = vmatprep.mubr.bf16.mxu0 %v1574_v28  ;;  %7958 = vmatprep.subr.bf16.mxu1 %v8619_v27  ;;  %v8657_v24 = vld [vmem:[#allocation2 + $0xe28] sm:$0xff]   ;;  %v8660_v31 = vld [vmem:[#allocation2 + $0xee0] sm:$0xff]  }
 0x1cd   :  { %v7645_v38 = vpop.f32.mrf.mxu0  ;;  %v7666_v41 = vadd.f32 %v7665_v37, %v7664_v30  ;;  %6317 = vmatprep.mubr.bf16.mxu1 %v1578_v33  ;;  %v8658_v27 = vld [vmem:[#allocation2 + $0xea8] sm:$0xff]   ;;  %v8662_v33 = vld [vmem:[#allocation2 + $0xea0] sm:$0xff]   ;;  %v8665_v37 = vld [vmem:[#allocation2 + $0xe18] sm:$0xff]  }
 0x1ce   :  { %v5720_v40 = vadd.f32 %v7644_v34, %v9020_v52  ;;  %v7667_v43 = vpop.f32.mrf.mxu1  ;;  %7937 = vmatpush3.bf16.msra.mxu0 %v8620_v29  ;;  %v8630_v52 = vld [vmem:[#allocation2 + $0xd58] sm:$0xff]   ;;  %v8659_v29 = vld [vmem:[#allocation2 + $0xe60] sm:$0xff]  }
 0x1cf   :  { %v7646_v44 = vpop.f32.mrf.mxu0  ;;  %7938 = vmatprep.subr.bf16.mxu0 %v8622_v36  ;;  %7959 = vmatpush3.bf16.msra.mxu1 %v8621_v32  ;;  %v8661_v32 = vld [vmem:[#allocation2 + $0xe20] sm:$0xff]   ;;  %v8663_v34 = vld [vmem:[#allocation2 + $0xe58] sm:$0xff]   ;;  %v8671_v43 = vld [vmem:[#allocation2 + $0xe48] sm:$0xff]  }
 0x1d0   :  { %v9035_v46 = vadd.f32 %v7666_v41, %v5720_v40  ;;  %v7668_v48 = vpop.f32.mrf.mxu1  ;;  %7960 = vmatprep.subr.bf16.mxu1 %v8623_v39  ;;  %v8664_v36 = vld [vmem:[#allocation2 + $0xed8] sm:$0xff]   ;;  %v8667_v39 = vld [vmem:[#allocation2 + $0xe50] sm:$0xff]   ;;  %v8672_v44 = vld [vmem:[#allocation2 + $0xec8] sm:$0xff]  }
 0x1d1   :  { %v8666_v38 = vld [vmem:[#allocation2 + $0xe98] sm:$0xff]   ;;  %v8668_v40 = vld [vmem:[#allocation2 + $0xed0] sm:$0xff]   ;;  %v8676_v48 = vld [vmem:[#allocation2 + $0xec0] sm:$0xff]  }
 0x1d2   :  { %7939 = vmatpush3.bf16.msra.mxu0 %v8624_v42  ;;  %v8669_v41 = vld [vmem:[#allocation2 + $0xe10] sm:$0xff]  }
 0x1d3   :  { %7940 = vmatprep.subr.bf16.mxu0 %v8626_v47  ;;  %7961 = vmatpush3.bf16.msra.mxu1 %v8625_v45  ;;  %v8670_v42 = vld [vmem:[#allocation2 + $0xe90] sm:$0xff]   ;;  %v8673_v45 = vld [vmem:[#allocation2 + $0xe08] sm:$0xff]   ;;  %v8675_v47 = vld [vmem:[#allocation2 + $0xe40] sm:$0xff]  }
 0x1d4   :  { %7962 = vmatprep.subr.bf16.mxu1 %v8627_v49  ;;  %v8677_v49 = vld [vmem:[#allocation2 + $0xe00] sm:$0xff]  }
 0x1d6   :  { %7941 = vmatpush3.bf16.msra.mxu0 %v8628_v50  ;;  %v66_v50 = vld [vmem:[%s9104_s0 + $0x38] sm:$0xff] }
 0x1d7   :  { %7942 = vmatprep.subr.bf16.mxu0 %v8630_v52  ;;  %7963 = vmatpush3.bf16.msra.mxu1 %v8629_v51  ;;  %v8678_v51 = vld [vmem:[#allocation2 + $0xe80] sm:$0xff]   ;;  %v1586_v52 = vrot.slane %v66_v50, %v8919_v35 }
 0x1d8   :  { %7964 = vmatprep.subr.bf16.mxu1 %v8631_v53  ;;  %v1579_v53 = vcombine.high %v66_v50, %v66_v50  ;;  %v8716_v50 = vld [vmem:[#allocation2 + $0x1070] sm:$0xff]  }
 0x1da   :  { %7943 = vmatpush3.bf16.msra.mxu0 %v8632_v54  ;;  %v8679_v54 = vld [vmem:[#allocation2 + $0xf78] sm:$0xff]  }
 0x1db   :  { %7944 = vmatprep.subr.bf16.mxu0 %v8634_v56  ;;  %7965 = vmatpush3.bf16.msra.mxu1 %v8633_v55  ;;  %v1594_v55 = vcombine.high %v1586_v52, %v1586_v52  ;;  %v1602_v56 = vrot.slane %v1586_v52, %v8919_v35  ;;  %v8717_v52 = vld [vmem:[#allocation2 + $0x10f0] sm:$0xff]  }
 0x1dc   :  { %7966 = vmatprep.subr.bf16.mxu1 %v8635_v57  ;;  %v8680_v57 = vld [vmem:[#allocation2 + $0xff8] sm:$0xff]  }
 0x1de   :  { %7945 = vmatpush3.bf16.msra.mxu0 %v8636_v58  ;;  %v9048_v58 = vrot.slane %v1579_v53, %v8919_v35  ;;  %v8718_v53 = vld [vmem:[#allocation2 + $0x1030] sm:$0xff]  }
 0x1df   :  { %7946 = vmatprep.subr.bf16.mxu0 %v8638_v60  ;;  %7967 = vmatpush3.bf16.msra.mxu1 %v8637_v59  ;;  %v8681_v59 = vld [vmem:[#allocation2 + $0xf38] sm:$0xff]   ;;  %v1616_v60 = vrot.slane %v1594_v55, %v8919_v35 }
 0x1e0   :  { %7968 = vmatprep.subr.bf16.mxu1 %v8639_v61  ;;  %v8682_v61 = vld [vmem:[#allocation2 + $0xfb8] sm:$0xff]  }
 0x1e2   :  { %7947 = vmatpush3.bf16.msra.mxu0 %v8640_v62  ;;  %v1595_v62 = vcombine.high %v9048_v58, %v9048_v58 }
 0x1e3   :  { %7948 = vmatprep.subr.bf16.mxu0 %v8642_v0  ;;  %7969 = vmatpush3.bf16.msra.mxu1 %v8641_v63  ;;  %v1624_v63 = vcombine.high %v1602_v56, %v1602_v56  ;;  %v8683_v0 = vld [vmem:[#allocation2 + $0xf70] sm:$0xff]  }
 0x1e4   :  { %7970 = vmatprep.subr.bf16.mxu1 %v8643_v1  ;;  %v1626_v1 = vcombine.high %v1616_v60, %v1616_v60 }
 0x1e6   :  { %7949 = vmatpush3.bf16.msra.mxu0 %v8644_v2 }
 0x1e7   :  { %7978 = vmatprep.subr.bf16.mxu0 %v8647_v5  ;;  %7971 = vmatpush3.bf16.msra.mxu1 %v8645_v3  ;;  %v8684_v3 = vld [vmem:[#allocation2 + $0xff0] sm:$0xff]  }
 0x1e8   :  { %8000 = vmatprep.subr.bf16.mxu1 %v8648_v6  ;;  %v8685_v5 = vld [vmem:[#allocation2 + $0xf30] sm:$0xff]  }
 0x1e9   :  { %v7686_v11 = vpop.f32.mrf.mxu0  ;;  %6278 = vmatmul.mubr.bf16.vlgmr.msra.gmra.mxu0 %v1560_v4  ;;  %v1623_v4 = vrot.slane %v1595_v62, %v8919_v35 }
 0x1ea   :  { %v7708_v14 = vpop.f32.mrf.mxu1  ;;  %7979 = vmatpush3.bf16.msra.mxu0 %v8649_v7  ;;  %6318 = vmatmul.mubr.bf16.vlgmr.msra.gmra.mxu1 %v1576_v9 }
 0x1eb   :  { %v7687_v15 = vpop.f32.mrf.mxu0  ;;  %7980 = vmatprep.subr.bf16.mxu0 %v8651_v10  ;;  %8001 = vmatpush3.bf16.msra.mxu1 %v8650_v8  ;;  %v8686_v8 = vld [vmem:[#allocation2 + $0xfb0] sm:$0xff]   ;;  %v1627_v9 = vcombine.high %v1623_v4, %v1623_v4 }
 0x1ec   :  { %v7688_v17 = vadd.f32 %v7687_v15, %v7686_v11  ;;  %v7709_v19 = vpop.f32.mrf.mxu1  ;;  %8002 = vmatprep.subr.bf16.mxu1 %v8652_v12  ;;  %6357 = vmatprep.mubr.bf16.mxu0 %v1616_v60  ;;  %v8687_v11 = vld [vmem:[#allocation2 + $0xf68] sm:$0xff]  }
 0x1ed   :  { %v7689_v20 = vpop.f32.mrf.mxu0  ;;  %v7710_v23 = vadd.f32 %v7709_v19, %v7708_v14  ;;  %6397 = vmatprep.mubr.bf16.mxu1 %v1626_v1  ;;  %v8688_v14 = vld [vmem:[#allocation2 + $0xfe8] sm:$0xff]  }
 0x1ee   :  { %v5800_v22 = vadd.f32 %v7688_v17, %v9035_v46  ;;  %v7711_v25 = vpop.f32.mrf.mxu1  ;;  %7981 = vmatpush3.bf16.msra.mxu0 %v8653_v13  ;;  %v8674_v46 = vld [vmem:[#allocation2 + $0xe88] sm:$0xff]  }
 0x1ef   :  { %v7690_v26 = vpop.f32.mrf.mxu0  ;;  %7982 = vmatprep.subr.bf16.mxu0 %v8655_v18  ;;  %8003 = vmatpush3.bf16.msra.mxu1 %v8654_v16  ;;  %v8689_v17 = vld [vmem:[#allocation2 + $0xf28] sm:$0xff]   ;;  %v8693_v25 = vld [vmem:[#allocation2 + $0xf20] sm:$0xff]  }
 0x1f0   :  { %v9040_v28 = vadd.f32 %v7710_v23, %v5800_v22  ;;  %v7712_v30 = vpop.f32.mrf.mxu1  ;;  %8004 = vmatprep.subr.bf16.mxu1 %v8656_v21  ;;  %v8690_v20 = vld [vmem:[#allocation2 + $0xfa8] sm:$0xff]   ;;  %v8691_v22 = vld [vmem:[#allocation2 + $0xf60] sm:$0xff]  }
 0x1f1   :  { %v8694_v26 = vld [vmem:[#allocation2 + $0xfa0] sm:$0xff]   ;;  %v8698_v30 = vld [vmem:[#allocation2 + $0xf98] sm:$0xff]  }
 0x1f2   :  { %7983 = vmatpush3.bf16.msra.mxu0 %v8657_v24  ;;  %v8692_v24 = vld [vmem:[#allocation2 + $0xfe0] sm:$0xff]  }
 0x1f3   :  { %7984 = vmatprep.subr.bf16.mxu0 %v8659_v29  ;;  %8005 = vmatpush3.bf16.msra.mxu1 %v8658_v27  ;;  %v8695_v27 = vld [vmem:[#allocation2 + $0xf58] sm:$0xff]  }
 0x1f4   :  { %8006 = vmatprep.subr.bf16.mxu1 %v8660_v31  ;;  %v8697_v29 = vld [vmem:[#allocation2 + $0xf18] sm:$0xff]   ;;  %v8699_v31 = vld [vmem:[#allocation2 + $0xf50] sm:$0xff]  }
 0x1f6   :  { %7985 = vmatpush3.bf16.msra.mxu0 %v8661_v32  ;;  %v8700_v32 = vld [vmem:[#allocation2 + $0xfd0] sm:$0xff]  }
 0x1f7   :  { %7986 = vmatprep.subr.bf16.mxu0 %v8663_v34  ;;  %8007 = vmatpush3.bf16.msra.mxu1 %v8662_v33  ;;  %v8701_v33 = vld [vmem:[#allocation2 + $0xf10] sm:$0xff]  }
 0x1f8   :  { %8008 = vmatprep.subr.bf16.mxu1 %v8664_v36  ;;  %v8702_v34 = vld [vmem:[#allocation2 + $0xf90] sm:$0xff]   ;;  %v8703_v36 = vld [vmem:[#allocation2 + $0xf48] sm:$0xff]  }
 0x1fa   :  { %7987 = vmatpush3.bf16.msra.mxu0 %v8665_v37  ;;  %v8704_v37 = vld [vmem:[#allocation2 + $0xfc8] sm:$0xff]  }
 0x1fb   :  { %7988 = vmatprep.subr.bf16.mxu0 %v8667_v39  ;;  %8009 = vmatpush3.bf16.msra.mxu1 %v8666_v38  ;;  %v8705_v38 = vld [vmem:[#allocation2 + $0xf08] sm:$0xff]  }
 0x1fc   :  { %8010 = vmatprep.subr.bf16.mxu1 %v8668_v40  ;;  %v8706_v39 = vld [vmem:[#allocation2 + $0xf88] sm:$0xff]   ;;  %v8707_v40 = vld [vmem:[#allocation2 + $0xf40] sm:$0xff]  }
 0x1fe   :  { %7989 = vmatpush3.bf16.msra.mxu0 %v8669_v41  ;;  %v8708_v41 = vld [vmem:[#allocation2 + $0xfc0] sm:$0xff]  }
 0x1ff   :  { %7990 = vmatprep.subr.bf16.mxu0 %v8671_v43  ;;  %8011 = vmatpush3.bf16.msra.mxu1 %v8670_v42  ;;  %v8709_v42 = vld [vmem:[#allocation2 + $0xf00] sm:$0xff]  }
 0x200   :  { %8012 = vmatprep.subr.bf16.mxu1 %v8672_v44  ;;  %v8710_v43 = vld [vmem:[#allocation2 + $0xf80] sm:$0xff]   ;;  %v1609_v44 = vrot.slane %v9048_v58, %v8919_v35  ;;  %v8720_v58 = vld [vmem:[#allocation2 + $0x1068] sm:$0xff]  }
 0x202   :  { %7991 = vmatpush3.bf16.msra.mxu0 %v8673_v45  ;;  %v8712_v45 = vld [vmem:[#allocation2 + $0x1078] sm:$0xff]  }
 0x203   :  { %7992 = vmatprep.subr.bf16.mxu0 %v8675_v47  ;;  %8013 = vmatpush3.bf16.msra.mxu1 %v8674_v46  ;;  %v8713_v46 = vld [vmem:[#allocation2 + $0x10f8] sm:$0xff]  }
 0x204   :  { %8014 = vmatprep.subr.bf16.mxu1 %v8676_v48  ;;  %v8714_v47 = vld [vmem:[#allocation2 + $0x1038] sm:$0xff]  }
 0x205   :  { %v8715_v48 = vld [vmem:[#allocation2 + $0x10b8] sm:$0xff]  }
 0x206   :  { %7993 = vmatpush3.bf16.msra.mxu0 %v8677_v49  ;;  %v1625_v49 = vcombine.high %v1609_v44, %v1609_v44 }
 0x207   :  { %8022 = vmatprep.subr.bf16.mxu0 %v8679_v54  ;;  %8015 = vmatpush3.bf16.msra.mxu1 %v8678_v51 }
 0x208   :  { %8044 = vmatprep.subr.bf16.mxu1 %v8680_v57 }
 0x209   :  { %v7730_v2 = vpop.f32.mrf.mxu0  ;;  %6358 = vmatmul.mubr.bf16.vlgmr.msra.gmra.mxu0 %v1602_v56  ;;  %v8719_v56 = vld [vmem:[#allocation2 + $0x10b0] sm:$0xff]  }
 0x20a   :  { %v7752_v6 = vpop.f32.mrf.mxu1  ;;  %8023 = vmatpush3.bf16.msra.mxu0 %v8681_v59  ;;  %6398 = vmatmul.mubr.bf16.vlgmr.msra.gmra.mxu1 %v1624_v63 }
 0x20b   :  { %v7731_v7 = vpop.f32.mrf.mxu0  ;;  %8024 = vmatprep.subr.bf16.mxu0 %v8683_v0  ;;  %8045 = vmatpush3.bf16.msra.mxu1 %v8682_v61  ;;  %v8721_v61 = vld [vmem:[#allocation2 + $0x10e8] sm:$0xff]  }
 0x20c   :  { %v7732_v10 = vadd.f32 %v7731_v7, %v7730_v2  ;;  %v7753_v12 = vpop.f32.mrf.mxu1  ;;  %6437 = vmatprep.mubr.bf16.mxu0 %v1623_v4  ;;  %8046 = vmatprep.subr.bf16.mxu1 %v8684_v3  ;;  %v8722_v0 = vld [vmem:[#allocation2 + $0x1028] sm:$0xff]   ;;  %v8725_v7 = vld [vmem:[#allocation2 + $0x10e0] sm:$0xff]  }
 0x20d   :  { %v7733_v13 = vpop.f32.mrf.mxu0  ;;  %v7754_v16 = vadd.f32 %v7753_v12, %v7752_v6  ;;  %6477 = vmatprep.mubr.bf16.mxu1 %v1627_v9  ;;  %v8723_v3 = vld [vmem:[#allocation2 + $0x10a8] sm:$0xff]   ;;  %v8727_v9 = vld [vmem:[#allocation2 + $0x10a0] sm:$0xff]   ;;  %v8730_v12 = vld [vmem:[#allocation2 + $0x1018] sm:$0xff]  }
 0x20e   :  { %v5880_v15 = vadd.f32 %v7732_v10, %v9040_v28  ;;  %v7755_v18 = vpop.f32.mrf.mxu1  ;;  %8025 = vmatpush3.bf16.msra.mxu0 %v8685_v5  ;;  %v8696_v28 = vld [vmem:[#allocation2 + $0xfd8] sm:$0xff]   ;;  %v8724_v5 = vld [vmem:[#allocation2 + $0x1060] sm:$0xff]  }
 0x20f   :  { %v7734_v19 = vpop.f32.mrf.mxu0  ;;  %8026 = vmatprep.subr.bf16.mxu0 %v8687_v11  ;;  %8047 = vmatpush3.bf16.msra.mxu1 %v8686_v8  ;;  %v8726_v8 = vld [vmem:[#allocation2 + $0x1020] sm:$0xff]   ;;  %v8728_v10 = vld [vmem:[#allocation2 + $0x1058] sm:$0xff]   ;;  %v8736_v18 = vld [vmem:[#allocation2 + $0x1048] sm:$0xff]  }
 0x210   :  { %v9055_v21 = vadd.f32 %v7754_v16, %v5880_v15  ;;  %v7756_v23 = vpop.f32.mrf.mxu1  ;;  %8048 = vmatprep.subr.bf16.mxu1 %v8688_v14  ;;  %v8729_v11 = vld [vmem:[#allocation2 + $0x10d8] sm:$0xff]   ;;  %v8732_v14 = vld [vmem:[#allocation2 + $0x1050] sm:$0xff]   ;;  %v8737_v19 = vld [vmem:[#allocation2 + $0x10c8] sm:$0xff]  }
 0x211   :  { %v8731_v13 = vld [vmem:[#allocation2 + $0x1098] sm:$0xff]   ;;  %v8733_v15 = vld [vmem:[#allocation2 + $0x10d0] sm:$0xff]   ;;  %v8741_v23 = vld [vmem:[#allocation2 + $0x10c0] sm:$0xff]  }
 0x212   :  { %8027 = vmatpush3.bf16.msra.mxu0 %v8689_v17  ;;  %v8734_v16 = vld [vmem:[#allocation2 + $0x1010] sm:$0xff]  }
 0x213   :  { %8028 = vmatprep.subr.bf16.mxu0 %v8691_v22  ;;  %8049 = vmatpush3.bf16.msra.mxu1 %v8690_v20  ;;  %v8735_v17 = vld [vmem:[#allocation2 + $0x1090] sm:$0xff]   ;;  %v8738_v20 = vld [vmem:[#allocation2 + $0x1008] sm:$0xff]   ;;  %v8740_v22 = vld [vmem:[#allocation2 + $0x1040] sm:$0xff]  }
 0x214   :  { %8050 = vmatprep.subr.bf16.mxu1 %v8692_v24  ;;  %v8742_v24 = vld [vmem:[#allocation2 + $0x1000] sm:$0xff]  }
 0x216   :  { %8029 = vmatpush3.bf16.msra.mxu0 %v8693_v25  ;;  %v67_v25 = vld [vmem:[%s9104_s0 + $0x40] sm:$0xff] }
 0x217   :  { %8030 = vmatprep.subr.bf16.mxu0 %v8695_v27  ;;  %8051 = vmatpush3.bf16.msra.mxu1 %v8694_v26  ;;  %v1635_v26 = vrot.slane %v67_v25, %v8919_v35  ;;  %v8744_v27 = vld [vmem:[#allocation2 + $0x1178] sm:$0xff]  }
 0x218   :  { %8052 = vmatprep.subr.bf16.mxu1 %v8696_v28  ;;  %v1628_v28 = vcombine.high %v67_v25, %v67_v25 }
 0x21a   :  { %8031 = vmatpush3.bf16.msra.mxu0 %v8697_v29  ;;  %v8743_v29 = vld [vmem:[#allocation2 + $0x1080] sm:$0xff]  }
 0x21b   :  { %8032 = vmatprep.subr.bf16.mxu0 %v8699_v31  ;;  %8053 = vmatpush3.bf16.msra.mxu1 %v8698_v30  ;;  %v1643_v30 = vcombine.high %v1635_v26, %v1635_v26  ;;  %v1651_v31 = vrot.slane %v1635_v26, %v8919_v35 }
 0x21c   :  { %8054 = vmatprep.subr.bf16.mxu1 %v8700_v32  ;;  %v8745_v32 = vld [vmem:[#allocation2 + $0x11f8] sm:$0xff]  }
 0x21e   :  { %8033 = vmatpush3.bf16.msra.mxu0 %v8701_v33  ;;  %v9068_v33 = vrot.slane %v1628_v28, %v8919_v35 }
 0x21f   :  { %8034 = vmatprep.subr.bf16.mxu0 %v8703_v36  ;;  %8055 = vmatpush3.bf16.msra.mxu1 %v8702_v34  ;;  %v8746_v34 = vld [vmem:[#allocation2 + $0x1138] sm:$0xff]   ;;  %v1665_v36 = vrot.slane %v1643_v30, %v8919_v35 }
 0x220   :  { %8056 = vmatprep.subr.bf16.mxu1 %v8704_v37  ;;  %v8747_v37 = vld [vmem:[#allocation2 + $0x11b8] sm:$0xff]  }
 0x222   :  { %8035 = vmatpush3.bf16.msra.mxu0 %v8705_v38  ;;  %v1644_v38 = vcombine.high %v9068_v33, %v9068_v33 }
 0x223   :  { %8036 = vmatprep.subr.bf16.mxu0 %v8707_v40  ;;  %8057 = vmatpush3.bf16.msra.mxu1 %v8706_v39  ;;  %v1673_v39 = vcombine.high %v1651_v31, %v1651_v31  ;;  %v8748_v40 = vld [vmem:[#allocation2 + $0x1170] sm:$0xff]  }
 0x224   :  { %8058 = vmatprep.subr.bf16.mxu1 %v8708_v41  ;;  %v1675_v41 = vcombine.high %v1665_v36, %v1665_v36 }
 0x226   :  { %8037 = vmatpush3.bf16.msra.mxu0 %v8709_v42 }
 0x227   :  { %8066 = vmatprep.subr.bf16.mxu0 %v8712_v45  ;;  %8059 = vmatpush3.bf16.msra.mxu1 %v8710_v43  ;;  %v8749_v43 = vld [vmem:[#allocation2 + $0x11f0] sm:$0xff]  }
 0x228   :  { %8088 = vmatprep.subr.bf16.mxu1 %v8713_v46  ;;  %v8750_v45 = vld [vmem:[#allocation2 + $0x1130] sm:$0xff]  }
 0x229   :  { %v7774_v51 = vpop.f32.mrf.mxu0  ;;  %6438 = vmatmul.mubr.bf16.vlgmr.msra.gmra.mxu0 %v1609_v44  ;;  %v1672_v44 = vrot.slane %v1644_v38, %v8919_v35 }
 0x22a   :  { %v7796_v54 = vpop.f32.mrf.mxu1  ;;  %8067 = vmatpush3.bf16.msra.mxu0 %v8714_v47  ;;  %6478 = vmatmul.mubr.bf16.vlgmr.msra.gmra.mxu1 %v1625_v49 }
 0x22b   :  { %v7775_v55 = vpop.f32.mrf.mxu0  ;;  %8068 = vmatprep.subr.bf16.mxu0 %v8716_v50  ;;  %8089 = vmatpush3.bf16.msra.mxu1 %v8715_v48  ;;  %v8751_v48 = vld [vmem:[#allocation2 + $0x11b0] sm:$0xff]   ;;  %v1676_v49 = vcombine.high %v1672_v44, %v1672_v44 }
 0x22c   :  { %v7776_v57 = vadd.f32 %v7775_v55, %v7774_v51  ;;  %v7797_v59 = vpop.f32.mrf.mxu1  ;;  %8090 = vmatprep.subr.bf16.mxu1 %v8717_v52  ;;  %6517 = vmatprep.mubr.bf16.mxu0 %v1665_v36  ;;  %v8752_v51 = vld [vmem:[#allocation2 + $0x1168] sm:$0xff]  }
 0x22d   :  { %v7777_v60 = vpop.f32.mrf.mxu0  ;;  %v7798_v63 = vadd.f32 %v7797_v59, %v7796_v54  ;;  %6557 = vmatprep.mubr.bf16.mxu1 %v1675_v41  ;;  %v8753_v54 = vld [vmem:[#allocation2 + $0x11e8] sm:$0xff]  }
 0x22e   :  { %v5960_v62 = vadd.f32 %v7776_v57, %v9055_v21  ;;  %v7799_v1 = vpop.f32.mrf.mxu1  ;;  %8069 = vmatpush3.bf16.msra.mxu0 %v8718_v53  ;;  %v8739_v21 = vld [vmem:[#allocation2 + $0x1088] sm:$0xff]  }
 0x22f   :  { %v7778_v2 = vpop.f32.mrf.mxu0  ;;  %8070 = vmatprep.subr.bf16.mxu0 %v8720_v58  ;;  %8091 = vmatpush3.bf16.msra.mxu1 %v8719_v56  ;;  %v8754_v57 = vld [vmem:[#allocation2 + $0x1128] sm:$0xff]   ;;  %v8758_v1 = vld [vmem:[#allocation2 + $0x1120] sm:$0xff]  }
 0x230   :  { %v9060_v4 = vadd.f32 %v7798_v63, %v5960_v62  ;;  %v7800_v6 = vpop.f32.mrf.mxu1  ;;  %8092 = vmatprep.subr.bf16.mxu1 %v8721_v61  ;;  %v8755_v60 = vld [vmem:[#allocation2 + $0x11a8] sm:$0xff]   ;;  %v8756_v62 = vld [vmem:[#allocation2 + $0x1160] sm:$0xff]  }
 0x231   :  { %v8759_v2 = vld [vmem:[#allocation2 + $0x11a0] sm:$0xff]   ;;  %v8763_v6 = vld [vmem:[#allocation2 + $0x1198] sm:$0xff]  }
 0x232   :  { %8071 = vmatpush3.bf16.msra.mxu0 %v8722_v0  ;;  %v8757_v0 = vld [vmem:[#allocation2 + $0x11e0] sm:$0xff]  }
 0x233   :  { %8072 = vmatprep.subr.bf16.mxu0 %v8724_v5  ;;  %8093 = vmatpush3.bf16.msra.mxu1 %v8723_v3  ;;  %v8760_v3 = vld [vmem:[#allocation2 + $0x1158] sm:$0xff]  }
 0x234   :  { %8094 = vmatprep.subr.bf16.mxu1 %v8725_v7  ;;  %v8762_v5 = vld [vmem:[#allocation2 + $0x1118] sm:$0xff]   ;;  %v8764_v7 = vld [vmem:[#allocation2 + $0x1150] sm:$0xff]  }
 0x236   :  { %8073 = vmatpush3.bf16.msra.mxu0 %v8726_v8  ;;  %v8765_v8 = vld [vmem:[#allocation2 + $0x11d0] sm:$0xff]  }
 0x237   :  { %8074 = vmatprep.subr.bf16.mxu0 %v8728_v10  ;;  %8095 = vmatpush3.bf16.msra.mxu1 %v8727_v9  ;;  %v8766_v9 = vld [vmem:[#allocation2 + $0x1110] sm:$0xff]  }
 0x238   :  { %8096 = vmatprep.subr.bf16.mxu1 %v8729_v11  ;;  %v8767_v10 = vld [vmem:[#allocation2 + $0x1190] sm:$0xff]   ;;  %v8768_v11 = vld [vmem:[#allocation2 + $0x1148] sm:$0xff]  }
 0x23a   :  { %8075 = vmatpush3.bf16.msra.mxu0 %v8730_v12  ;;  %v8769_v12 = vld [vmem:[#allocation2 + $0x11c8] sm:$0xff]  }
 0x23b   :  { %8076 = vmatprep.subr.bf16.mxu0 %v8732_v14  ;;  %8097 = vmatpush3.bf16.msra.mxu1 %v8731_v13  ;;  %v8770_v13 = vld [vmem:[#allocation2 + $0x1108] sm:$0xff]  }
 0x23c   :  { %8098 = vmatprep.subr.bf16.mxu1 %v8733_v15  ;;  %v8771_v14 = vld [vmem:[#allocation2 + $0x1188] sm:$0xff]   ;;  %v8772_v15 = vld [vmem:[#allocation2 + $0x1140] sm:$0xff]  }
 0x23e   :  { %8077 = vmatpush3.bf16.msra.mxu0 %v8734_v16  ;;  %v8773_v16 = vld [vmem:[#allocation2 + $0x11c0] sm:$0xff]  }
 0x23f   :  { %8078 = vmatprep.subr.bf16.mxu0 %v8736_v18  ;;  %8099 = vmatpush3.bf16.msra.mxu1 %v8735_v17  ;;  %v8774_v17 = vld [vmem:[#allocation2 + $0x1100] sm:$0xff]  }
 0x240   :  { %8100 = vmatprep.subr.bf16.mxu1 %v8737_v19  ;;  %v8775_v18 = vld [vmem:[#allocation2 + $0x1180] sm:$0xff]   ;;  %v1658_v19 = vrot.slane %v9068_v33, %v8919_v35 }
 0x242   :  { %8079 = vmatpush3.bf16.msra.mxu0 %v8738_v20  ;;  %v1674_v20 = vcombine.high %v1658_v19, %v1658_v19 }
 0x243   :  { %8080 = vmatprep.subr.bf16.mxu0 %v8740_v22  ;;  %8101 = vmatpush3.bf16.msra.mxu1 %v8739_v21 }
 0x244   :  { %8102 = vmatprep.subr.bf16.mxu1 %v8741_v23 }
 0x246   :  { %8081 = vmatpush3.bf16.msra.mxu0 %v8742_v24 }
 0x247   :  { %8110 = vmatprep.subr.bf16.mxu0 %v8744_v27  ;;  %8103 = vmatpush3.bf16.msra.mxu1 %v8743_v29 }
 0x248   :  { %8132 = vmatprep.subr.bf16.mxu1 %v8745_v32 }
 0x249   :  { %v7818_v42 = vpop.f32.mrf.mxu0  ;;  %6518 = vmatmul.mubr.bf16.vlgmr.msra.gmra.mxu0 %v1651_v31 }
 0x24a   :  { %v7840_v46 = vpop.f32.mrf.mxu1  ;;  %8111 = vmatpush3.bf16.msra.mxu0 %v8746_v34  ;;  %6558 = vmatmul.mubr.bf16.vlgmr.msra.gmra.mxu1 %v1673_v39 }
 0x24b   :  { %v7819_v47 = vpop.f32.mrf.mxu0  ;;  %8112 = vmatprep.subr.bf16.mxu0 %v8748_v40  ;;  %8133 = vmatpush3.bf16.msra.mxu1 %v8747_v37 }
 0x24c   :  { %v7820_v50 = vadd.f32 %v7819_v47, %v7818_v42  ;;  %v7841_v52 = vpop.f32.mrf.mxu1  ;;  %6597 = vmatprep.mubr.bf16.mxu0 %v1672_v44  ;;  %8134 = vmatprep.subr.bf16.mxu1 %v8749_v43  ;;  %v8778_v47 = vld [vmem:[%s9107_s3 + $0x30] sm:$0xff]  }
 0x24d   :  { %v7821_v53 = vpop.f32.mrf.mxu0  ;;  %v7842_v56 = vadd.f32 %v7841_v52, %v7840_v46  ;;  %6637 = vmatprep.mubr.bf16.mxu1 %v1676_v49  ;;  %v8877_v46 = vmov 0.0   ;;  %v8780_v49 = vld [vmem:[%s9107_s3 + $0x20] sm:$0xff]  }
 0x24e   :  { %v6040_v55 = vadd.f32 %v7820_v50, %v9060_v4  ;;  %v7843_v58 = vpop.f32.mrf.mxu1  ;;  %8113 = vmatpush3.bf16.msra.mxu0 %v8750_v45  ;;  %v8761_v4 = vld [vmem:[#allocation2 + $0x11d8] sm:$0xff]  }
 0x24f   :  { %v7822_v59 = vpop.f32.mrf.mxu0  ;;  %8114 = vmatprep.subr.bf16.mxu0 %v8752_v51  ;;  %8135 = vmatpush3.bf16.msra.mxu1 %v8751_v48  ;;  %v8777_v45 = vld [vmem:[%s9107_s3 + $0x38] sm:$0xff]   ;;  %v8779_v48 = vld [vmem:[%s9107_s3 + $0x28] sm:$0xff]  }
 0x250   :  { %v6080_v61 = vadd.f32 %v7842_v56, %v6040_v55  ;;  %v7844_v63 = vpop.f32.mrf.mxu1  ;;  %8136 = vmatprep.subr.bf16.mxu1 %v8753_v54  ;;  %v8781_v50 = vld [vmem:[%s9107_s3 + $0x18] sm:$0xff]   ;;  %v8782_v55 = vld [vmem:[%s9107_s3 + $0x10] sm:$0xff]  }
 0x251   :  { %v8783_v63 = vld [vmem:[%s9107_s3 + $0x8] sm:$0xff]  }
 0x252   :  { %8115 = vmatpush3.bf16.msra.mxu0 %v8754_v57 }
 0x253   :  { %8116 = vmatprep.subr.bf16.mxu0 %v8756_v62  ;;  %8137 = vmatpush3.bf16.msra.mxu1 %v8755_v60 }
 0x254   :  { %8138 = vmatprep.subr.bf16.mxu1 %v8757_v0 }
 0x256   :  { %8117 = vmatpush3.bf16.msra.mxu0 %v8758_v1  ;;  %v8784_v1 = vld [vmem:[%s9107_s3] sm:$0xff]   ;;  %s8879_s3 = smov [#allocation8]  }
 0x257   :  { %8118 = vmatprep.subr.bf16.mxu0 %v8760_v3  ;;  %8139 = vmatpush3.bf16.msra.mxu1 %v8759_v2  ;;  %s6766_s14 = sshll.u32 %s8879_s3, 4  ;;  %s6767_s14 = int_to_ptr.vmem [resolvable:$true] %s6766_s14 }
 0x258   :  { %8140 = vmatprep.subr.bf16.mxu1 %v8761_v4  ;;  %s8845_s15 = scalar_lea.vmem %s6767_s14, 32  ;;  %p8850_p2 = scmp.lt.s32.totalorder %s6767_s14, %s6767_s14 }
 0x259   :  { %p8846_p1 = scmp.ne.s32.totalorder %s6767_s14, %s8845_s15  ;;  %p8851_p3 = scmp.lt.s32.totalorder %s8845_s15, %s8845_s15 }
 0x25a   :  { %8119 = vmatpush3.bf16.msra.mxu0 %v8762_v5 }
 0x25b   :  { %8120 = vmatprep.subr.bf16.mxu0 %v8764_v7  ;;  %8141 = vmatpush3.bf16.msra.mxu1 %v8763_v6  ;;  %p8852_p4 = por %p8851_p3, %p8850_p2 }
 0x25c   :  { %8142 = vmatprep.subr.bf16.mxu1 %v8765_v8 }
 0x25d   :  { %p8853_p5 = pnand %p8852_p4, %p8846_p1 }
 0x25e   :  { %8121 = vmatpush3.bf16.msra.mxu0 %v8766_v9 }
 0x25f   :  { %8122 = vmatprep.subr.bf16.mxu0 %v8768_v11  ;;  %8143 = vmatpush3.bf16.msra.mxu1 %v8767_v10 }
 0x260   :  { %8144 = vmatprep.subr.bf16.mxu1 %v8769_v12 }
 0x262   :  { %8123 = vmatpush3.bf16.msra.mxu0 %v8770_v13 }
 0x263   :  { %8124 = vmatprep.subr.bf16.mxu0 %v8772_v15  ;;  %8145 = vmatpush3.bf16.msra.mxu1 %v8771_v14 }
 0x264   :  { %8146 = vmatprep.subr.bf16.mxu1 %v8773_v16 }
 0x266   :  { %8125 = vmatpush3.bf16.msra.mxu0 %v8774_v17 }
 0x267   :  { %8147 = vmatpush3.bf16.msra.mxu1 %v8775_v18  ;;  %8163 = vmatprep.subr.bf16.mxu0 %v8877_v46 }
 0x269   :  { %v7862_v21 = vpop.f32.mrf.mxu0  ;;  %6598 = vmatmul.mubr.bf16.vlgmr.msra.gmra.mxu0 %v1658_v19 }
 0x26a   :  { %v7884_v22 = vpop.f32.mrf.mxu1  ;;  %6638 = vmatmul.mubr.bf16.vlgmr.msra.gmra.mxu1 %v1674_v20  ;;  %8164 = vmatpush3.bf16.msra.mxu0 %v8777_v45 }
 0x26b   :  { %v7863_v23 = vpop.f32.mrf.mxu0  ;;  %8165 = vmatprep.subr.bf16.mxu0 %v8877_v46  ;;  %8179 = vmatprep.mubr.msk.bf16.mxu0 %vm8878_vm0, %v8877_v46 }
 0x26c   :  { %v7864_v24 = vadd.f32 %v7863_v23, %v7862_v21  ;;  %v7885_v25 = vpop.f32.mrf.mxu1 }
 0x26d   :  { %v7865_v26 = vpop.f32.mrf.mxu0  ;;  %v7886_v28 = vadd.f32 %v7885_v25, %v7884_v22 }
 0x26e   :  { %v6120_v27 = vadd.f32 %v7864_v24, %v6080_v61  ;;  %v7887_v29 = vpop.f32.mrf.mxu1  ;;  %8166 = vmatpush3.bf16.msra.mxu0 %v8778_v47 }
 0x26f   :  { %v7866_v30 = vpop.f32.mrf.mxu0  ;;  %8167 = vmatprep.subr.bf16.mxu0 %v8877_v46 }
 0x270   :  { %v6160_v31 = vadd.f32 %v7886_v28, %v6120_v27  ;;  %v7888_v32 = vpop.f32.mrf.mxu1 }
 0x272   :  { %8168 = vmatpush3.bf16.msra.mxu0 %v8779_v48 }
 0x273   :  { %8169 = vmatprep.subr.bf16.mxu0 %v8877_v46 }
 0x276   :  { %8170 = vmatpush3.bf16.msra.mxu0 %v8780_v49 }
 0x277   :  { %8171 = vmatprep.subr.bf16.mxu0 %v8877_v46 }
 0x27a   :  { %8172 = vmatpush3.bf16.msra.mxu0 %v8781_v50 }
 0x27b   :  { %8173 = vmatprep.subr.bf16.mxu0 %v8877_v46 }
 0x27e   :  { %8174 = vmatpush3.bf16.msra.mxu0 %v8782_v55 }
 0x27f   :  { %8175 = vmatprep.subr.bf16.mxu0 %v8877_v46 }
 0x282   :  { %8176 = vmatpush3.bf16.msra.mxu0 %v8783_v63 }
 0x283   :  { %8177 = vmatprep.subr.bf16.mxu0 %v8877_v46 }
 0x286   :  { %8178 = vmatpush3.bf16.msra.mxu0 %v8784_v1 }
 0x289   :  { %v7906_v35 = vpop.f32.mrf.mxu0 }
 0x28a   :  { %v7928_v33 = vpop.f32.mrf.mxu1 }
 0x28b   :  { %v7907_v34 = vpop.f32.mrf.mxu0 }
 0x28c   :  { %v7908_v36 = vadd.f32 %v7907_v34, %v7906_v35  ;;  %v7929_v37 = vpop.f32.mrf.mxu1 }
 0x28d   :  { %v7909_v38 = vpop.f32.mrf.mxu0  ;;  %v7930_v40 = vadd.f32 %v7929_v37, %v7928_v33 }
 0x28e   :  { %v6200_v39 = vadd.f32 %v7908_v36, %v6160_v31  ;;  %v7931_v41 = vpop.f32.mrf.mxu1 }
 0x28f   :  { %v7910_v42 = vpop.f32.mrf.mxu0 }
 0x290   :  { %v6240_v43 = vadd.f32 %v7930_v40, %v6200_v39  ;;  %v7932_v44 = vpop.f32.mrf.mxu1 }
 0x2a9   :  { %v7950_v51 = vpop.f32.mrf.mxu0 }
 0x2aa   :  { %v7972_v52 = vpop.f32.mrf.mxu1 }
 0x2ab   :  { %v7951_v53 = vpop.f32.mrf.mxu0 }
 0x2ac   :  { %v7952_v54 = vadd.f32 %v7951_v53, %v7950_v51  ;;  %v7973_v56 = vpop.f32.mrf.mxu1 }
 0x2ad   :  { %v7953_v57 = vpop.f32.mrf.mxu0  ;;  %v7974_v59 = vadd.f32 %v7973_v56, %v7972_v52  ;;  %v7353_v52 = vld [vmem:[#allocation7] ss:$0 sm:$0xff] }
 0x2ae   :  { %v6280_v58 = vadd.f32 %v7952_v54, %v6240_v43  ;;  %v7975_v60 = vpop.f32.mrf.mxu1 }
 0x2af   :  { %v7954_v61 = vpop.f32.mrf.mxu0 }
 0x2b0   :  { %v6320_v62 = vadd.f32 %v7974_v59, %v6280_v58  ;;  %v7976_v0 = vpop.f32.mrf.mxu1 }
 0x2c9   :  { %v7994_v2 = vpop.f32.mrf.mxu0 }
 0x2ca   :  { %v8016_v3 = vpop.f32.mrf.mxu1 }
 0x2cb   :  { %v7995_v4 = vpop.f32.mrf.mxu0 }
 0x2cc   :  { %v7996_v5 = vadd.f32 %v7995_v4, %v7994_v2  ;;  %v8017_v6 = vpop.f32.mrf.mxu1 }
 0x2cd   :  { %v7997_v7 = vpop.f32.mrf.mxu0  ;;  %v8018_v9 = vadd.f32 %v8017_v6, %v8016_v3 }
 0x2ce   :  { %v6360_v8 = vadd.f32 %v7996_v5, %v6320_v62  ;;  %v8019_v10 = vpop.f32.mrf.mxu1 }
 0x2cf   :  { %v7998_v11 = vpop.f32.mrf.mxu0 }
 0x2d0   :  { %v6400_v12 = vadd.f32 %v8018_v9, %v6360_v8  ;;  %v8020_v13 = vpop.f32.mrf.mxu1 }
 0x2e9   :  { %v8038_v14 = vpop.f32.mrf.mxu0 }
 0x2ea   :  { %v8060_v15 = vpop.f32.mrf.mxu1 }
 0x2eb   :  { %v8039_v16 = vpop.f32.mrf.mxu0 }
 0x2ec   :  { %v8061_v17 = vpop.f32.mrf.mxu1  ;;  %v8040_v30 = vadd.f32 %v8039_v16, %v8038_v14 }
 0x2ed   :  { %v8041_v18 = vpop.f32.mrf.mxu0  ;;  %v8062_v32 = vadd.f32 %v8061_v17, %v8060_v15 }
 0x2ee   :  { %v8063_v19 = vpop.f32.mrf.mxu1  ;;  %v6440_v31 = vadd.f32 %v8040_v30, %v6400_v12 }
 0x2ef   :  { %v8042_v20 = vpop.f32.mrf.mxu0 }
 0x2f0   :  { %v8064_v21 = vpop.f32.mrf.mxu1  ;;  %v6480_v33 = vadd.f32 %v8062_v32, %v6440_v31 }
 0x309   :  { %v8082_v22 = vpop.f32.mrf.mxu0 }
 0x30a   :  { %v8104_v23 = vpop.f32.mrf.mxu1 }
 0x30b   :  { %v8083_v24 = vpop.f32.mrf.mxu0 }
 0x30c   :  { %v8105_v25 = vpop.f32.mrf.mxu1  ;;  %v8084_v35 = vadd.f32 %v8083_v24, %v8082_v22 }
 0x30d   :  { %v8085_v26 = vpop.f32.mrf.mxu0  ;;  %v8106_v36 = vadd.f32 %v8105_v25, %v8104_v23 }
 0x30e   :  { %v8107_v27 = vpop.f32.mrf.mxu1  ;;  %v6520_v34 = vadd.f32 %v8084_v35, %v6480_v33 }
 0x30f   :  { %v8086_v28 = vpop.f32.mrf.mxu0 }
 0x310   :  { %v8108_v29 = vpop.f32.mrf.mxu1  ;;  %v6560_v40 = vadd.f32 %v8106_v36, %v6520_v34 }
 0x329   :  { %v8126_v37 = vpop.f32.mrf.mxu0 }
 0x32a   :  { %v8148_v38 = vpop.f32.mrf.mxu1 }
 0x32b   :  { %v8127_v39 = vpop.f32.mrf.mxu0 }
 0x32c   :  { %v8128_v41 = vadd.f32 %v8127_v39, %v8126_v37  ;;  %v8149_v42 = vpop.f32.mrf.mxu1 }
 0x32d   :  { %v8129_v43 = vpop.f32.mrf.mxu0  ;;  %v8150_v45 = vadd.f32 %v8149_v42, %v8148_v38 }
 0x32e   :  { %v6600_v44 = vadd.f32 %v8128_v41, %v6560_v40  ;;  %v8151_v46 = vpop.f32.mrf.mxu1 }
 0x32f   :  { %v8130_v47 = vpop.f32.mrf.mxu0 }
 0x330   :  { %v6640_v48 = vadd.f32 %v8150_v45, %v6600_v44  ;;  %v8152_v49 = vpop.f32.mrf.mxu1 }
 0x332   :  { %v6645_v50 = vmax.f32 %v6640_v48, 0.0 }
 0x334   :  { %v6646_v51 = vpack.c.bf16 %v6645_v50, %v6645_v50 }
 0x336   :  { %8180 = vmatmul.mubr.bf16.vlgmr.msra.gmra.mxu0 %v6646_v51 }
 0x3f6   :  { %v6752_v53 = vpop.f32.mrf.mxu0 }
 0x3f7   :  { %v6753_v54 = vadd.f32 %v7353_v52, %v6752_v53 }
 0x3f8   :  { %v8181_v55 = vpop.f32.mrf.mxu0 }
 0x3f9   :  { %6759 = vst.msk [vmem:[#allocation8] sm:$0x3] %vm6758_vm1, %v6753_v54 }
 0x3fa   :  { %v6755_v56 = vpop.f32.mrf.mxu0 }
 0x3fb   :  { %8856 = shalt.err (!%p8853_p5)
}
 0x3fc   :  { %6769 = dma.vmem_to_hbm [thread:$0]  %s6767_s14, 32, %s9109_s5, [#allocation4]   ;;  %v8182_v57 = vpop.f32.mrf.mxu0 }
 0x3fd   :  { %8869 = dma.done.wait [#allocation4], 32  }
 0x3fe   :  { %8870 = vsyncadd [#allocation4], 4294967264 }
 0x3ff   :  { %6773 = vsyncpa [#allocation3], 1 }
 0x400   :  { %6774 = vsyncpa [#allocation6], 1 }
 0x401   :  { %6775 = vsyncpa [#allocation4], 1 }

</bundles_post_ra>
